<compile_context>
chip_gen: v7x
topology: tpu7x:2x2x1
jax: 0.10.0
libtpu: 0.0.40
codegen_flags: <defaults>
</compile_context>

<pallas_src>
import functools
import math

import jax
import jax.numpy as jnp
from jax.experimental import pallas as pl
from jax.experimental.pallas import tpu as pltpu


# ----------------------------------------------------------------------------
# Pass 1: grid-invariant encode.  Runs once; emits a coalesced (5B, D) slab
#   rows [0:B)  = base = user_emb + masked-sum(his_emb)
#   rows [B:2B) = s    = sum_d(mask * instance_gated)          (B, L)
#   rows [2B:3B)= inv  = 1 / mask   (exact reciprocal of {0,1})
#   rows [3B:4B)= sp   = s * pos_emb      (L == D)
#   rows [4B:5B)= sn   = s * neg_emb
# plus bpn (2B, 1) = [sum_d base*pos ; sum_d base*neg].
# ----------------------------------------------------------------------------
def _hgn_encode_kernel(his_ref, mask_ref, aux_ref, w_ref, enc_ref, bpn_ref):
    B, L, D = his_ref.shape

    his = his_ref[...]                            # (B, L, D)
    mask = mask_ref[...]                          # (B, L), 1.0 where item != pad

    # Coalesced aux slab: [user | pos | neg | b] rows.
    user = aux_ref[pl.ds(0, B), :]                # (B, D)
    pos = aux_ref[pl.ds(B, B), :]                 # (B, D)
    neg = aux_ref[pl.ds(2 * B, B), :]             # (B, D)
    b_row = aux_ref[pl.ds(3 * B, 1), :]           # (1, D)

    # Row-packed weight slab (4D, D): all slices are sublane-aligned.
    w1t = w_ref[pl.ds(0, D), :]                   # (D, D)  = W1.T
    w3t = w_ref[pl.ds(D, D), :]                   # (D, D)  = W3.T
    w2t = w_ref[pl.ds(2 * D, D), :]               # (D, D)  = W2.T
    w4t = w_ref[pl.ds(3 * D, D), :]               # (D, D)  = W4.T

    his2d = his.reshape(B * L, D)

    u_w2 = jnp.dot(user, w2t, preferred_element_type=jnp.float32)   # (B, D)
    u_w4 = jnp.dot(user, w4t, preferred_element_type=jnp.float32)   # (B, D)

    # features gating: sigmoid(W1(his) + b + W2(user)[:, None, :])
    h_w1 = jnp.dot(his2d, w1t, preferred_element_type=jnp.float32) + b_row
    gate1 = jax.nn.sigmoid(h_w1.reshape(B, L, D) + u_w2[:, None, :])
    fgated = his * gate1                          # (B, L, D)

    # instance gating: sigmoid(W3(fgated) + W4(user)[:, None, :])
    f_w3 = jnp.dot(fgated.reshape(B * L, D), w3t,
                   preferred_element_type=jnp.float32)
    gate2 = jax.nn.sigmoid(f_w3.reshape(B, L, D) + u_w4[:, None, :])
    igated = fgated * gate2                       # (B, L, D)

    mask3 = mask[:, :, None]
    s = jnp.sum(igated * mask3, axis=-1)          # (B, L)
    his_msum = jnp.sum(his * mask3, axis=1)       # (B, D)
    base = user + his_msum                        # (B, D)

    # Exact reciprocal of the {0,1} mask (mirrors the reference's divide);
    # computed once here, reused by every pass-2 grid step.
    inv = 1.0 / mask                              # (B, L)

    sp = s * pos                                  # (B, D)   (L == D)
    sn = s * neg                                  # (B, D)

    enc_ref[...] = jnp.concatenate([base, s, inv, sp, sn], axis=0)   # (5B, D)

    bp = jnp.sum(base * pos, axis=-1, keepdims=True)                 # (B, 1)
    bn = jnp.sum(base * neg, axis=-1, keepdims=True)                 # (B, 1)
    bpn_ref[...] = jnp.concatenate([bp, bn], axis=0)                 # (2B, 1)


# ----------------------------------------------------------------------------
# Pass 2: broadcast + BPR scores, parallel over the 'a' axis.
#   final_flat[a, b*D+d] = base[b,d] + s[b,d] * inv[a,d]      -> (tb, B*D)
#   scores[a, k]         = bpn[k] + sum_d inv[a,d] * spn[k,d] -> (tb, 2B)
# ----------------------------------------------------------------------------
def _hgn_broadcast_kernel(inv_ref, base_flat_ref, s_flat_ref, spn_ref, bpn_ref,
                          final_ref, scores_ref):
    B2, _ = spn_ref.shape
    B = B2 // 2

    inv = inv_ref[...]                                    # (tb, D), a-dependent
    # Lane-tile inv to (tb, B*D): tiled[a, b*D + d] = inv[a, d].  Lane concat
    # avoids the sublane->lane relayout a (tb, B, D) reshape would require.
    inv_tiled = jnp.concatenate([inv] * B, axis=1)        # (tb, B*D)

    # Dominant output, stored lane-dense (last dim = B*D, multiple of 128).
    final_ref[...] = base_flat_ref[...] + s_flat_ref[...] * inv_tiled

    # BPR scores; pure-VPU f32 reduce (MXU matmul is not worth it at this K and
    # keeps the result bit-compatible with the elementwise reference).
    part = jnp.sum(inv[:, None, :] * spn_ref[...][None, :, :], axis=-1)  # (tb, 2B)
    scores_ref[...] = part + bpn_ref[...]


def pack_hgn_weights(params):
    """Row-pack the pre-transposed linear weights into one (4D, D) slab.

    Rows [0:D)=W1.T, [D:2D)=W3.T, [2D:3D)=W2.T, [3D:4D)=W4.T.  All kernel
    slices of this slab are sublane-aligned (D is a multiple of 8).
    """
    return jnp.concatenate(
        [params["w1"].T, params["w3"].T, params["w2"].T, params["w4"].T], axis=0)


def hgn_forward(params, his_seqs, user_seqs, next_items, neg_items,
                pad_idx=0, tb=None):
    """HGN forward pass (loss_type='bpr', pool_type='avg')."""
    item_tab = params["item_emb"]
    user_tab = params["user_emb"]

    # Embedding gathers are plain-JAX glue (data-dependent gather).
    his_emb = item_tab[his_seqs]                  # (B, L, D)
    user_emb = user_tab[user_seqs]                # (B, D)
    pos_emb = item_tab[next_items]                # (B, D)
    neg_emb = item_tab[neg_items]                 # (B, D)
    mask = (his_seqs != pad_idx).astype(jnp.float32)   # (B, L)

    B, L, D = his_emb.shape
    if L != D:
        raise ValueError(
            "Reference avg-pool broadcasting only type-checks when L == d_model.")
    if tb is None:
        tb = B                                    # single grid step: best on 1-TC chips
    if B % tb != 0 or (tb != B and tb % 8 != 0):
        raise ValueError("tb must divide B and be either B or a multiple of 8 "
                         "(TPU (8,128) block-shape rule).")

    w_packed = params.get("w_packed_t")
    if w_packed is None:
        w_packed = pack_hgn_weights(params)                        # (4D, D)
    aux = jnp.concatenate([user_emb, pos_emb, neg_emb,
                           params["b"].reshape(1, D)], axis=0)     # (3B+1, D)

    # ------------------- pass 1: a-invariant encode (runs once) -------------
    flops1 = int(4 * B * L * D * D + 4 * B * D * D + 18 * B * L * D + 8 * B * D)
    transc1 = int(2 * B * L * D)
    bytes1 = int(4 * (B * L * D + B * L + (3 * B + 1) * D + 4 * D * D
                      + 5 * B * D + 2 * B))

    enc, bpn = pl.pallas_call(
        _hgn_encode_kernel,
        out_shape=(
            jax.ShapeDtypeStruct((5 * B, D), jnp.float32),
            jax.ShapeDtypeStruct((2 * B, 1), jnp.float32),
        ),
        grid=(1,),
        in_specs=[
            pl.BlockSpec((B, L, D), lambda i: (0, 0, 0)),
            pl.BlockSpec((B, L), lambda i: (0, 0)),
            pl.BlockSpec((3 * B + 1, D), lambda i: (0, 0)),
            pl.BlockSpec((4 * D, D), lambda i: (0, 0)),
        ],
        out_specs=(
            pl.BlockSpec((5 * B, D), lambda i: (0, 0)),
            pl.BlockSpec((2 * B, 1), lambda i: (0, 0)),
        ),
        compiler_params=pltpu.CompilerParams(
            dimension_semantics=("arbitrary",)),
        cost_estimate=pl.CostEstimate(
            flops=flops1, transcendentals=transc1, bytes_accessed=bytes1),
    )(his_emb, mask, aux, w_packed)

    # Tiny wrapper-side layout plumbing between the two kernels.
    base = enc[0:B]
    s = enc[B:2 * B]
    inv = enc[2 * B:3 * B]
    spn = enc[3 * B:5 * B]                        # (2B, D): [sp ; sn]
    base_flat = base.reshape(1, B * D)
    s_flat = s.reshape(1, B * D)
    bpn_row = bpn.reshape(1, 2 * B)

    # ----- pass 2: (B, B, D) broadcast + scores, "parallel" grid over 'a' ---
    flops2 = int(6 * B * B * D + 2 * B * B)
    bytes2 = int(4 * (B * L + 4 * B * D + 2 * B + B * B * D + 2 * B * B))

    final_flat, scores = pl.pallas_call(
        _hgn_broadcast_kernel,
        out_shape=(
            jax.ShapeDtypeStruct((B, B * D), jnp.float32),
            jax.ShapeDtypeStruct((B, 2 * B), jnp.float32),
        ),
        grid=(B // tb,),
        in_specs=[
            pl.BlockSpec((tb, L), lambda a: (a, 0)),          # a-dependent
            pl.BlockSpec((1, B * D), lambda a: (0, 0)),       # grid-invariant, tiny
            pl.BlockSpec((1, B * D), lambda a: (0, 0)),
            pl.BlockSpec((2 * B, D), lambda a: (0, 0)),
            pl.BlockSpec((1, 2 * B), lambda a: (0, 0)),
        ],
        out_specs=(
            pl.BlockSpec((tb, B * D), lambda a: (a, 0)),      # lane-dense store
            pl.BlockSpec((tb, 2 * B), lambda a: (a, 0)),      # coalesced scores
        ),
        compiler_params=pltpu.CompilerParams(
            dimension_semantics=("parallel",)),
        cost_estimate=pl.CostEstimate(
            flops=flops2, transcendentals=0, bytes_accessed=bytes2),
    )(inv, base_flat, s_flat, spn, bpn_row)

    final = final_flat.reshape(B, B, D)
    pos_s = scores[:, :B]
    neg_s = scores[:, B:]
    # TODO(synk): BPRLoss is not defined in the reference snippet; use the
    # standard BPR objective -mean(log sigmoid(pos_scores - neg_scores)).
    loss = -jnp.mean(jax.nn.log_sigmoid(pos_s - neg_s))
    return loss, final, pos_s, neg_s


def hgn_forward_ref(params, his_seqs, user_seqs, next_items, neg_items, pad_idx=0):
    """Pure-JAX replica of the PyTorch forward (for correctness checking)."""
    item_tab, user_tab = params["item_emb"], params["user_emb"]
    his_emb = item_tab[his_seqs]
    user_emb = user_tab[user_seqs]
    g1 = jax.nn.sigmoid(his_emb @ params["w1"].T
                        + (user_emb @ params["w2"].T)[:, None, :] + params["b"])
    fg = his_emb * g1
    g2 = jax.nn.sigmoid(fg @ params["w3"].T
                        + (user_emb @ params["w4"].T)[:, None, :])
    ig = fg * g2
    mask = (his_seqs != pad_idx)[:, :, None]                      # (B, L, 1)
    s = jnp.where(mask, ig, 0.0).sum(-1)                          # (B, L)
    cnt = mask.sum(-1)[:, None, :]                                # (B, 1, L)
    pooled = s / cnt                                              # (B, B, L)
    his_sum = jnp.where(mask, his_emb, 0.0).sum(1)                # (B, D)
    final = user_emb + pooled + his_sum                           # (B, B, D)
    pos = item_tab[next_items]
    neg = item_tab[neg_items]
    pos_s = jnp.sum(final * pos, -1)
    neg_s = jnp.sum(final * neg, -1)
    loss = -jnp.mean(jax.nn.log_sigmoid(pos_s - neg_s))
    return loss, final, pos_s, neg_s


if __name__ == "__main__":
    B, L = 16, 32
    d_model = 32            # must equal L for the reference broadcasting to work
    n_items, n_users = 50, 10
    pad_idx = 0

    keys = jax.random.split(jax.random.PRNGKey(0), 10)
    bound = 1.0 / math.sqrt(d_model)
    item_emb = jax.random.normal(keys[0], (n_items + 1, d_model), jnp.float32) * 0.1
    item_emb = item_emb.at[pad_idx].set(0.0)   # padding_idx row zeroed
    params = {
        "item_emb": item_emb,
        "user_emb": jax.random.normal(keys[1], (n_users, d_model), jnp.float32) * 0.1,
        "w1": jax.random.uniform(keys[2], (d_model, d_model), jnp.float32, -bound, bound),
        "w2": jax.random.uniform(keys[3], (d_model, d_model), jnp.float32, -bound, bound),
        "w3": jax.random.uniform(keys[4], (d_model, d_model), jnp.float32, -bound, bound),
        "w4": jax.random.uniform(keys[5], (d_model, d_model), jnp.float32, -bound, bound),
        "b": jnp.zeros((d_model,), jnp.float32),
    }
    # Hoisted: pre-transpose + row-pack the four weights once (not per step).
    params["w_packed_t"] = pack_hgn_weights(params)

    # Item ids drawn in [1, n_items] (no pad token) so the reference's
    # division-by-mask-count stays finite, exactly as in PyTorch.
    his_seqs = jax.random.randint(keys[6], (B, L), 1, n_items + 1)
    user_seqs = jax.random.randint(keys[7], (B,), 0, n_users)
    next_items = jax.random.randint(keys[8], (B,), 1, n_items + 1)
    neg_items = jax.random.randint(keys[9], (B,), 1, n_items + 1)

    # tb=8 -> grid=(2,) over the 'a' axis of the non-redundant broadcast pass
    # (parallel; shards across both TCs on v7x).  Single-TC chips can use tb=B.
    fwd = jax.jit(functools.partial(hgn_forward, pad_idx=pad_idx, tb=8))
    loss, final, pos_s, neg_s = fwd(params, his_seqs, user_seqs,
                                    next_items, neg_items)
    jax.block_until_ready((loss, final, pos_s, neg_s))

    loss_r, final_r, pos_r, neg_r = hgn_forward_ref(
        params, his_seqs, user_seqs, next_items, neg_items, pad_idx=pad_idx)
    assert jnp.allclose(final, final_r, atol=1e-3, rtol=1e-3)
    assert jnp.allclose(pos_s, pos_r, atol=1e-3, rtol=1e-3)
    assert jnp.allclose(neg_s, neg_r, atol=1e-3, rtol=1e-3)
    assert jnp.allclose(loss, loss_r, atol=1e-3, rtol=1e-3)

    print("KERNEL_OK")
</pallas_src>

<mosaic_0001>
module attributes {stable_mosaic.version = 11 : i64} {
  func.func @_hgn_encode_kernel(%arg0: i32, %arg1: memref<16x32x32xf32, #tpu.memory_space<vmem>>, %arg2: memref<16x32xf32, #tpu.memory_space<vmem>>, %arg3: memref<49x32xf32, #tpu.memory_space<vmem>>, %arg4: memref<128x32xf32, #tpu.memory_space<vmem>>, %arg5: memref<80x32xf32, #tpu.memory_space<vmem>>, %arg6: memref<32x1xf32, #tpu.memory_space<vmem>>) attributes {dimension_semantics = [#tpu.dimension_semantics<arbitrary>], iteration_bounds = array<i64: 1>, scalar_prefetch = 0 : i64, scratch_operands = 0 : i64, tpu.core_type = #tpu.core_type<tc>, window_params = [{pipeline_mode = #tpu.pipeline_mode<synchronous>, transform_indices = @transform_0, window_bounds = array<i64: 16, 32, 32>}, {pipeline_mode = #tpu.pipeline_mode<synchronous>, transform_indices = @transform_1, window_bounds = array<i64: 16, 32>}, {pipeline_mode = #tpu.pipeline_mode<synchronous>, transform_indices = @transform_2, window_bounds = array<i64: 49, 32>}, {pipeline_mode = #tpu.pipeline_mode<synchronous>, transform_indices = @transform_3, window_bounds = array<i64: 128, 32>}, {pipeline_mode = #tpu.pipeline_mode<synchronous>, transform_indices = @transform_4, window_bounds = array<i64: 80, 32>}, {pipeline_mode = #tpu.pipeline_mode<synchronous>, transform_indices = @transform_5, window_bounds = array<i64: 32, 1>}]} {
    %c0 = arith.constant 0 : index
    %c0_0 = arith.constant 0 : index
    %c0_1 = arith.constant 0 : index
    %0 = vector.load %arg1[%c0, %c0_0, %c0_1] : memref<16x32x32xf32, #tpu.memory_space<vmem>>, vector<16x32x32xf32>
    %c0_2 = arith.constant 0 : index
    %c0_3 = arith.constant 0 : index
    %1 = vector.load %arg2[%c0_2, %c0_3] : memref<16x32xf32, #tpu.memory_space<vmem>>, vector<16x32xf32>
    %c0_4 = arith.constant 0 : index
    %c0_5 = arith.constant 0 : index
    %2 = vector.load %arg3[%c0_4, %c0_5] : memref<49x32xf32, #tpu.memory_space<vmem>>, vector<16x32xf32>
    %c16 = arith.constant 16 : index
    %c0_6 = arith.constant 0 : index
    %3 = vector.load %arg3[%c16, %c0_6] : memref<49x32xf32, #tpu.memory_space<vmem>>, vector<16x32xf32>
    %c32 = arith.constant 32 : index
    %c0_7 = arith.constant 0 : index
    %4 = vector.load %arg3[%c32, %c0_7] : memref<49x32xf32, #tpu.memory_space<vmem>>, vector<16x32xf32>
    %c48 = arith.constant 48 : index
    %c0_8 = arith.constant 0 : index
    %5 = vector.load %arg3[%c48, %c0_8] : memref<49x32xf32, #tpu.memory_space<vmem>>, vector<1x32xf32>
    %c0_9 = arith.constant 0 : index
    %c0_10 = arith.constant 0 : index
    %6 = vector.load %arg4[%c0_9, %c0_10] : memref<128x32xf32, #tpu.memory_space<vmem>>, vector<32x32xf32>
    %c32_11 = arith.constant 32 : index
    %c0_12 = arith.constant 0 : index
    %7 = vector.load %arg4[%c32_11, %c0_12] : memref<128x32xf32, #tpu.memory_space<vmem>>, vector<32x32xf32>
    %c64 = arith.constant 64 : index
    %c0_13 = arith.constant 0 : index
    %8 = vector.load %arg4[%c64, %c0_13] : memref<128x32xf32, #tpu.memory_space<vmem>>, vector<32x32xf32>
    %c96 = arith.constant 96 : index
    %c0_14 = arith.constant 0 : index
    %9 = vector.load %arg4[%c96, %c0_14] : memref<128x32xf32, #tpu.memory_space<vmem>>, vector<32x32xf32>
    %10 = vector.shape_cast %0 : vector<16x32x32xf32> to vector<512x32xf32>
    %cst = arith.constant dense<0.000000e+00> : vector<16x32xf32>
    %11 = tpu.matmul %2, %8, %cst {dimension_numbers = #tpu.dot_dimension_numbers<[1], [0], [0], [1], [0, 0, 1, 1], [], []>} : vector<16x32xf32>, vector<32x32xf32>, vector<16x32xf32> -> vector<16x32xf32>
    %cst_15 = arith.constant dense<0.000000e+00> : vector<16x32xf32>
    %12 = tpu.matmul %2, %9, %cst_15 {dimension_numbers = #tpu.dot_dimension_numbers<[1], [0], [0], [1], [0, 0, 1, 1], [], []>} : vector<16x32xf32>, vector<32x32xf32>, vector<16x32xf32> -> vector<16x32xf32>
    %cst_16 = arith.constant dense<0.000000e+00> : vector<512x32xf32>
    %13 = tpu.matmul %10, %6, %cst_16 {dimension_numbers = #tpu.dot_dimension_numbers<[1], [0], [0], [1], [0, 0, 1, 1], [], []>} : vector<512x32xf32>, vector<32x32xf32>, vector<512x32xf32> -> vector<512x32xf32>
    %14 = vector.broadcast %5 : vector<1x32xf32> to vector<512x32xf32>
    %15 = arith.addf %13, %14 : vector<512x32xf32>
    %16 = vector.shape_cast %15 : vector<512x32xf32> to vector<16x32x32xf32>
    %17 = vector.shape_cast %11 : vector<16x32xf32> to vector<16x1x32xf32>
    %18 = vector.broadcast %17 : vector<16x1x32xf32> to vector<16x32x32xf32>
    %19 = arith.addf %16, %18 : vector<16x32x32xf32>
    %20 = arith.negf %19 : vector<16x32x32xf32>
    %21 = math.exp %20 : vector<16x32x32xf32>
    %cst_17 = arith.constant 1.000000e+00 : f32
    %22 = vector.broadcast %cst_17 : f32 to vector<16x32x32xf32>
    %23 = arith.addf %22, %21 : vector<16x32x32xf32>
    %24 = arith.divf %22, %23 : vector<16x32x32xf32>
    %25 = arith.mulf %0, %24 : vector<16x32x32xf32>
    %26 = vector.shape_cast %25 : vector<16x32x32xf32> to vector<512x32xf32>
    %cst_18 = arith.constant dense<0.000000e+00> : vector<512x32xf32>
    %27 = tpu.matmul %26, %7, %cst_18 {dimension_numbers = #tpu.dot_dimension_numbers<[1], [0], [0], [1], [0, 0, 1, 1], [], []>} : vector<512x32xf32>, vector<32x32xf32>, vector<512x32xf32> -> vector<512x32xf32>
    %28 = vector.shape_cast %27 : vector<512x32xf32> to vector<16x32x32xf32>
    %29 = vector.shape_cast %12 : vector<16x32xf32> to vector<16x1x32xf32>
    %30 = vector.broadcast %29 : vector<16x1x32xf32> to vector<16x32x32xf32>
    %31 = arith.addf %28, %30 : vector<16x32x32xf32>
    %32 = arith.negf %31 : vector<16x32x32xf32>
    %33 = math.exp %32 : vector<16x32x32xf32>
    %cst_19 = arith.constant 1.000000e+00 : f32
    %34 = vector.broadcast %cst_19 : f32 to vector<16x32x32xf32>
    %35 = arith.addf %34, %33 : vector<16x32x32xf32>
    %36 = arith.divf %34, %35 : vector<16x32x32xf32>
    %37 = arith.mulf %25, %36 : vector<16x32x32xf32>
    %38 = vector.shape_cast %1 : vector<16x32xf32> to vector<16x32x1xf32>
    %39 = vector.broadcast %38 : vector<16x32x1xf32> to vector<16x32x32xf32>
    %40 = arith.mulf %37, %39 : vector<16x32x32xf32>
    %cst_20 = arith.constant dense<0.000000e+00> : vector<16x32xf32>
    %41 = vector.multi_reduction <add>, %40, %cst_20 [2] : vector<16x32x32xf32> to vector<16x32xf32>
    %42 = vector.broadcast %38 : vector<16x32x1xf32> to vector<16x32x32xf32>
    %43 = arith.mulf %0, %42 : vector<16x32x32xf32>
    %cst_21 = arith.constant dense<0.000000e+00> : vector<16x32xf32>
    %44 = vector.multi_reduction <add>, %43, %cst_21 [1] : vector<16x32x32xf32> to vector<16x32xf32>
    %45 = arith.addf %2, %44 : vector<16x32xf32>
    %cst_22 = arith.constant 1.000000e+00 : f32
    %46 = vector.broadcast %cst_22 : f32 to vector<16x32xf32>
    %47 = arith.divf %46, %1 : vector<16x32xf32>
    %48 = arith.mulf %41, %3 : vector<16x32xf32>
    %49 = arith.mulf %41, %4 : vector<16x32xf32>
    %50 = tpu.concatenate %45, %41, %47, %48, %49 in 0 : vector<16x32xf32>, vector<16x32xf32>, vector<16x32xf32>, vector<16x32xf32>, vector<16x32xf32> -> vector<80x32xf32>
    %c0_23 = arith.constant 0 : index
    %c0_24 = arith.constant 0 : index
    %51 = vector.load %arg5[%c0_23, %c0_24] : memref<80x32xf32, #tpu.memory_space<vmem>>, vector<80x32xf32>
    tpu.vector_store %arg5[%c0_23, %c0_24], %50 {strides = array<i32>} : memref<80x32xf32, #tpu.memory_space<vmem>>, vector<80x32xf32>,
    %52 = arith.mulf %45, %3 : vector<16x32xf32>
    %cst_25 = arith.constant dense<0.000000e+00> : vector<16xf32>
    %53 = vector.multi_reduction <add>, %52, %cst_25 [1] : vector<16x32xf32> to vector<16xf32>
    %54 = vector.shape_cast %53 : vector<16xf32> to vector<16x1xf32>
    %55 = arith.mulf %45, %4 : vector<16x32xf32>
    %cst_26 = arith.constant dense<0.000000e+00> : vector<16xf32>
    %56 = vector.multi_reduction <add>, %55, %cst_26 [1] : vector<16x32xf32> to vector<16xf32>
    %57 = vector.shape_cast %56 : vector<16xf32> to vector<16x1xf32>
    %58 = tpu.concatenate %54, %57 in 0 : vector<16x1xf32>, vector<16x1xf32> -> vector<32x1xf32>
    %c0_27 = arith.constant 0 : index
    %c0_28 = arith.constant 0 : index
    %59 = vector.load %arg6[%c0_27, %c0_28] : memref<32x1xf32, #tpu.memory_space<vmem>>, vector<32x1xf32>
    tpu.vector_store %arg6[%c0_27, %c0_28], %58 {strides = array<i32>} : memref<32x1xf32, #tpu.memory_space<vmem>>, vector<32x1xf32>,
    return
  }
  func.func @transform_0(%arg0: i32) -> (i32, i32, i32) {
    %c0_i32 = arith.constant 0 : i32
    %c0_i32_0 = arith.constant 0 : i32
    %c0_i32_1 = arith.constant 0 : i32
    %c0_i32_2 = arith.constant 0 : i32
    return %c0_i32, %c0_i32_0, %c0_i32_1 : i32, i32, i32
  }
  func.func @transform_1(%arg0: i32) -> (i32, i32) {
    %c0_i32 = arith.constant 0 : i32
    %c0_i32_0 = arith.constant 0 : i32
    %c0_i32_1 = arith.constant 0 : i32
    return %c0_i32, %c0_i32_0 : i32, i32
  }
  func.func @transform_2(%arg0: i32) -> (i32, i32) {
    %c0_i32 = arith.constant 0 : i32
    %c0_i32_0 = arith.constant 0 : i32
    %c0_i32_1 = arith.constant 0 : i32
    return %c0_i32, %c0_i32_0 : i32, i32
  }
  func.func @transform_3(%arg0: i32) -> (i32, i32) {
    %c0_i32 = arith.constant 0 : i32
    %c0_i32_0 = arith.constant 0 : i32
    %c0_i32_1 = arith.constant 0 : i32
    return %c0_i32, %c0_i32_0 : i32, i32
  }
  func.func @transform_4(%arg0: i32) -> (i32, i32) {
    %c0_i32 = arith.constant 0 : i32
    %c0_i32_0 = arith.constant 0 : i32
    %c0_i32_1 = arith.constant 0 : i32
    return %c0_i32, %c0_i32_0 : i32, i32
  }
  func.func @transform_5(%arg0: i32) -> (i32, i32) {
    %c0_i32 = arith.constant 0 : i32
    %c0_i32_0 = arith.constant 0 : i32
    %c0_i32_1 = arith.constant 0 : i32
    return %c0_i32, %c0_i32_0 : i32, i32
  }
}

module attributes {stable_mosaic.version = 11 : i64} {
  func.func @_hgn_broadcast_kernel(%arg0: i32, %arg1: memref<8x32xf32, #tpu.memory_space<vmem>>, %arg2: memref<1x512xf32, #tpu.memory_space<vmem>>, %arg3: memref<1x512xf32, #tpu.memory_space<vmem>>, %arg4: memref<32x32xf32, #tpu.memory_space<vmem>>, %arg5: memref<1x32xf32, #tpu.memory_space<vmem>>, %arg6: memref<8x512xf32, #tpu.memory_space<vmem>>, %arg7: memref<8x32xf32, #tpu.memory_space<vmem>>) attributes {dimension_semantics = [#tpu.dimension_semantics<parallel>], iteration_bounds = array<i64: 2>, scalar_prefetch = 0 : i64, scratch_operands = 0 : i64, tpu.core_type = #tpu.core_type<tc>, window_params = [{transform_indices = @transform_0, window_bounds = array<i64: 8, 32>}, {pipeline_mode = #tpu.pipeline_mode<synchronous>, transform_indices = @transform_1, window_bounds = array<i64: 1, 512>}, {pipeline_mode = #tpu.pipeline_mode<synchronous>, transform_indices = @transform_2, window_bounds = array<i64: 1, 512>}, {pipeline_mode = #tpu.pipeline_mode<synchronous>, transform_indices = @transform_3, window_bounds = array<i64: 32, 32>}, {pipeline_mode = #tpu.pipeline_mode<synchronous>, transform_indices = @transform_4, window_bounds = array<i64: 1, 32>}, {transform_indices = @transform_5, window_bounds = array<i64: 8, 512>}, {transform_indices = @transform_6, window_bounds = array<i64: 8, 32>}]} {
    %c0 = arith.constant 0 : index
    %c0_0 = arith.constant 0 : index
    %0 = vector.load %arg1[%c0, %c0_0] : memref<8x32xf32, #tpu.memory_space<vmem>>, vector<8x32xf32>
    %1 = tpu.concatenate %0, %0, %0, %0, %0, %0, %0, %0, %0, %0, %0, %0, %0, %0, %0, %0 in 1 : vector<8x32xf32>, vector<8x32xf32>, vector<8x32xf32>, vector<8x32xf32>, vector<8x32xf32>, vector<8x32xf32>, vector<8x32xf32>, vector<8x32xf32>, vector<8x32xf32>, vector<8x32xf32>, vector<8x32xf32>, vector<8x32xf32>, vector<8x32xf32>, vector<8x32xf32>, vector<8x32xf32>, vector<8x32xf32> -> vector<8x512xf32>
    %c0_1 = arith.constant 0 : index
    %c0_2 = arith.constant 0 : index
    %2 = vector.load %arg2[%c0_1, %c0_2] : memref<1x512xf32, #tpu.memory_space<vmem>>, vector<1x512xf32>
    %c0_3 = arith.constant 0 : index
    %c0_4 = arith.constant 0 : index
    %3 = vector.load %arg3[%c0_3, %c0_4] : memref<1x512xf32, #tpu.memory_space<vmem>>, vector<1x512xf32>
    %4 = vector.broadcast %3 : vector<1x512xf32> to vector<8x512xf32>
    %5 = arith.mulf %4, %1 : vector<8x512xf32>
    %6 = vector.broadcast %2 : vector<1x512xf32> to vector<8x512xf32>
    %7 = arith.addf %6, %5 : vector<8x512xf32>
    %c0_5 = arith.constant 0 : index
    %c0_6 = arith.constant 0 : index
    %8 = vector.load %arg6[%c0_5, %c0_6] : memref<8x512xf32, #tpu.memory_space<vmem>>, vector<8x512xf32>
    tpu.vector_store %arg6[%c0_5, %c0_6], %7 {strides = array<i32>} : memref<8x512xf32, #tpu.memory_space<vmem>>, vector<8x512xf32>,
    %9 = vector.shape_cast %0 : vector<8x32xf32> to vector<8x1x32xf32>
    %c0_7 = arith.constant 0 : index
    %c0_8 = arith.constant 0 : index
    %10 = vector.load %arg4[%c0_7, %c0_8] : memref<32x32xf32, #tpu.memory_space<vmem>>, vector<32x32xf32>
    %11 = vector.shape_cast %10 : vector<32x32xf32> to vector<1x32x32xf32>
    %12 = vector.broadcast %9 : vector<8x1x32xf32> to vector<8x32x32xf32>
    %13 = vector.broadcast %11 : vector<1x32x32xf32> to vector<8x32x32xf32>
    %14 = arith.mulf %12, %13 : vector<8x32x32xf32>
    %cst = arith.constant dense<0.000000e+00> : vector<8x32xf32>
    %15 = vector.multi_reduction <add>, %14, %cst [2] : vector<8x32x32xf32> to vector<8x32xf32>
    %c0_9 = arith.constant 0 : index
    %c0_10 = arith.constant 0 : index
    %16 = vector.load %arg5[%c0_9, %c0_10] : memref<1x32xf32, #tpu.memory_space<vmem>>, vector<1x32xf32>
    %17 = vector.broadcast %16 : vector<1x32xf32> to vector<8x32xf32>
    %18 = arith.addf %15, %17 : vector<8x32xf32>
    %c0_11 = arith.constant 0 : index
    %c0_12 = arith.constant 0 : index
    %19 = vector.load %arg7[%c0_11, %c0_12] : memref<8x32xf32, #tpu.memory_space<vmem>>, vector<8x32xf32>
    tpu.vector_store %arg7[%c0_11, %c0_12], %18 {strides = array<i32>} : memref<8x32xf32, #tpu.memory_space<vmem>>, vector<8x32xf32>,
    return
  }
  func.func @transform_0(%arg0: i32) -> (i32, i32) {
    %c0_i32 = arith.constant 0 : i32
    %c0_i32_0 = arith.constant 0 : i32
    return %arg0, %c0_i32 : i32, i32
  }
  func.func @transform_1(%arg0: i32) -> (i32, i32) {
    %c0_i32 = arith.constant 0 : i32
    %c0_i32_0 = arith.constant 0 : i32
    %c0_i32_1 = arith.constant 0 : i32
    return %c0_i32, %c0_i32_0 : i32, i32
  }
  func.func @transform_2(%arg0: i32) -> (i32, i32) {
    %c0_i32 = arith.constant 0 : i32
    %c0_i32_0 = arith.constant 0 : i32
    %c0_i32_1 = arith.constant 0 : i32
    return %c0_i32, %c0_i32_0 : i32, i32
  }
  func.func @transform_3(%arg0: i32) -> (i32, i32) {
    %c0_i32 = arith.constant 0 : i32
    %c0_i32_0 = arith.constant 0 : i32
    %c0_i32_1 = arith.constant 0 : i32
    return %c0_i32, %c0_i32_0 : i32, i32
  }
  func.func @transform_4(%arg0: i32) -> (i32, i32) {
    %c0_i32 = arith.constant 0 : i32
    %c0_i32_0 = arith.constant 0 : i32
    %c0_i32_1 = arith.constant 0 : i32
    return %c0_i32, %c0_i32_0 : i32, i32
  }
  func.func @transform_5(%arg0: i32) -> (i32, i32) {
    %c0_i32 = arith.constant 0 : i32
    %c0_i32_0 = arith.constant 0 : i32
    return %arg0, %c0_i32 : i32, i32
  }
  func.func @transform_6(%arg0: i32) -> (i32, i32) {
    %c0_i32 = arith.constant 0 : i32
    %c0_i32_0 = arith.constant 0 : i32
    return %arg0, %c0_i32 : i32, i32
  }
}

</mosaic_0001>

<bundles_post_ra>
// kernel: hgn_forward.3
= control target key start
LH: loop header
LB: loop body
LE: loop exit
PB: predicated region body
PF: predicated region fallthrough
CT: control target
= control target key end

     0   :  { %s1078_s21 = smov 0   ;;  %s1355_s0 = inlined_call_operand.vmem [shape: f32[16,32], index: 0, kind: input, shape index: {}]   ;;  %s1356_s1 = inlined_call_operand.vmem [shape: f32[1,512], index: 1, kind: input, shape index: {}]   ;;  %s1357_s2 = inlined_call_operand.vmem [shape: f32[1,512], index: 2, kind: input, shape index: {}]   ;;  %s1358_s3 = inlined_call_operand.vmem [shape: f32[32,32], index: 3, kind: input, shape index: {}]   ;;  %s1359_s4 = inlined_call_operand.vmem [shape: f32[1,32], index: 4, kind: input, shape index: {}]   ;;  %s1360_s5 = inlined_call_operand.vmem [shape: f32[16,512], index: 5, kind: output, shape index: {0}]   ;;  %s1361_s6 = inlined_call_operand.vmem [shape: f32[16,32], index: 6, kind: output, shape index: {1}]  }
   0x1 LB: > { %s1001_s22 = sadd.s32 4294967295, %s1036_s21   ;;  %p1005_p0 = scmp.ge.s32.totalorder %s1036_s21, 1  ;;  %s1036_s21 = sphi %s1078_s21, %s17_s21  }
   0x2   : > { %p214_p1 = scmp.lt.s32.totalorder %s1036_s21, 3 }
   0x4   : > { %p215_p2 = pnand %p1005_p0, %p214_p1 }
   0x5   : > { %p247_p3 = scmp.lt.s32.totalorder (!%p215_p2), %s1001_s22, 1  ;;  %s1038_s27 = smov (!%p215_p2), 96   ;;  %v280_v1 = vlaneseq (!%p215_p2)  ;;  %v1041_v2 = vmov (!%p215_p2), 1966171168   ;;  %v1115_v12 = vld [vmem:[%s1358_s3 + $0x8] sm:$0xff] (!%p215_p2)  ;;  %v1120_v13 = vld [vmem:[%s1358_s3] sm:$0xff] (!%p215_p2) }
   0x6   : > { %218 = sbr.rel (%p215_p2) target bundleno = 458 (0x1ca), region = 40  ;;  %s1039_s28 = smov (!%p215_p2), 32   ;;  %v335_v3 = vunpack.c.l.s4 (!%p215_p2), %v1041_v2  ;;  %vm271_vm0 = vcmask (!%p215_p2), 261120   ;;  %v1128_v17 = vld [vmem:[%s1358_s3 + $0x10] sm:$0xff] (!%p215_p2)  ;;  %v1133_v18 = vld [vmem:[%s1358_s3 + $0x18] sm:$0xff] (!%p215_p2)  ;;  %vm273_vm1 = vcmask (!%p215_p2), 523264  }
   0x7   : > { %s1040_s29 = smov (!%p215_p2), 64   ;;  %v1100_v4 = vshrl.u32 (!%p215_p2), %v280_v1, 7  ;;  %vm275_vm2 = vcmask (!%p215_p2), 785408   ;;  %vm750_vm3 = vcmask (!%p215_p2), 130112   ;;  %vm757_vm4 = vcmask (!%p215_p2), 195712  }
   0x8   : > { %v336_v5 = vunpack.c.0.s8 (!%p215_p2), %v335_v3  ;;  %vm764_vm5 = vcmask (!%p215_p2), 261312   ;;  %vm899_vm6 = vcmask (!%p215_p2), 1041409   ;;  %vm901_vm7 = vcmask (!%p215_p2), 1042434  }
   0x9   : > { %v1108_v8 = vsub.s32 (!%p215_p2), 0, %v1100_v4  ;;  %vm903_vm8 = vcmask (!%p215_p2), 1043459   ;;  %vm905_vm9 = vcmask (!%p215_p2), 1044484   ;;  %vm907_vm10 = vcmask (!%p215_p2), 1045509  }
   0xa   : > { %v1103_v6 = vsub.s32 (!%p215_p2), %v336_v5, %v1100_v4  ;;  %vm909_vm11 = vcmask (!%p215_p2), 1046534   ;;  %vm911_vm12 = vcmask (!%p215_p2), 1047559  }
   0xd   : > { %s1363_s22 = smov (!%p247_p3, %s1001_s22), 1 }
   0xe   : > { %s1006_s23 = sshll.u32 %s1363_s22, 3  ;;  %s1013_s20 = sshll.u32 %s1363_s22, 5 }
   0xf   : > { %s250_s26 = scalar_lea.vmem %s1355_s0, %s1006_s23 }
  0x10   : > { %v1094_v0 = vld [vmem:[%s250_s26] sm:$0xff]  ;;  %s255_s26 = scalar_lea.vmem %s1360_s5, %s1013_s20 }
  0x11   : > { %268 = vrot.lane.b32.xlu1 %v1094_v0, %s1038_s27  ;;  %262 = vrot.lane.b32.xlu0 %v1094_v0, %s1039_s28  ;;  %v340_v7 = vrot.slane %v1094_v0, %v1103_v6  ;;  %v333_v37 = vcombine.high %v1094_v0, %v1094_v0 }
  0x13   : > { %v356_v9 = vrot.slane %v340_v7, %v1103_v6  ;;  %v348_v11 = vcombine.high %v340_v7, %v340_v7  ;;  %v347_v43 = vrot.slane %v333_v37, %v1103_v6 }
  0x15   : > { %265 = vrot.lane.b32.xlu0 %v1094_v0, %s1040_s29  ;;  %v389_v10 = vrot.slane %v356_v9, %v1108_v8  ;;  %v370_v15 = vrot.slane %v348_v11, %v1103_v6  ;;  %v378_v26 = vcombine.high %v356_v9, %v356_v9  ;;  %v363_v48 = vrot.slane %v347_v43, %v1103_v6  ;;  %s259_s29 = scalar_lea.vmem %s1361_s6, %s1006_s23 }
  0x16   : > { %v349_v54 = vcombine.high %v347_v43, %v347_v43  ;;  %v1042_v43 = vmov 0  }
  0x17   : > { %v427_v14 = vmul.f32 %v389_v10, %v1115_v12  ;;  %v426_v16 = vmul.f32 %v389_v10, %v1120_v13  ;;  %v428_v20 = vmul.f32 %v389_v10, %v1128_v17  ;;  %v393_v21 = vrot.slane %v370_v15, %v1108_v8  ;;  %1027 = vset.pattern.permute.xlu1 %v1042_v43 }
  0x18   : > { %v429_v23 = vmul.f32 %v389_v10, %v1133_v18  ;;  %v397_v31 = vrot.slane %v378_v26, %v1108_v8  ;;  %v380_v36 = vcombine.high %v370_v15, %v370_v15  ;;  %v405_v53 = vrot.slane %v363_v48, %v1108_v8  ;;  %1028 = vset.pattern.permute.xlu0 %v1042_v43 }
  0x19   : > { %v461_v19 = vsel %vm271_vm0, %v427_v14, 0.0  ;;  %v458_v22 = vsel %vm271_vm0, %v426_v16, 0.0  ;;  %v464_v24 = vsel %vm271_vm0, %v428_v20, 0.0  ;;  %v430_v25 = vmul.f32 %v393_v21, %v1120_v13 }
  0x1a   : > { %v467_v27 = vsel %vm271_vm0, %v429_v23, 0.0  ;;  %v431_v28 = vmul.f32 %v393_v21, %v1115_v12  ;;  %v432_v30 = vmul.f32 %v393_v21, %v1128_v17  ;;  %v433_v33 = vmul.f32 %v393_v21, %v1133_v18 }
  0x1b   : > { %v470_v29 = vsel %vm271_vm0, %v430_v25, 0.0  ;;  %v434_v35 = vmul.f32 %v397_v31, %v1120_v13  ;;  %v435_v39 = vmul.f32 %v397_v31, %v1115_v12  ;;  %v436_v41 = vmul.f32 %v397_v31, %v1128_v17 }
  0x1c   : > { %v473_v32 = vsel %vm271_vm0, %v431_v28, 0.0  ;;  %v476_v34 = vsel %vm271_vm0, %v432_v30, 0.0  ;;  %v479_v38 = vsel %vm271_vm0, %v433_v33, 0.0  ;;  %v401_v42 = vrot.slane %v380_v36, %v1108_v8 }
  0x1d   : > { %v482_v40 = vsel %vm271_vm0, %v434_v35, 0.0  ;;  %v485_v44 = vsel %vm271_vm0, %v435_v39, 0.0  ;;  %v437_v45 = vmul.f32 %v397_v31, %v1133_v18  ;;  %v488_v46 = vsel %vm271_vm0, %v436_v41, 0.0 }
  0x1e   : > { %v438_v47 = vmul.f32 %v401_v42, %v1120_v13  ;;  %v439_v50 = vmul.f32 %v401_v42, %v1115_v12  ;;  %v440_v52 = vmul.f32 %v401_v42, %v1128_v17  ;;  %v441_v56 = vmul.f32 %v401_v42, %v1133_v18 }
  0x1f   : > { %v491_v49 = vsel %vm271_vm0, %v437_v45, 0.0  ;;  %v442_v58 = vmul.f32 %v405_v53, %v1120_v13  ;;  %v377_v59 = vrot.slane %v349_v54, %v1103_v6  ;;  %v443_v61 = vmul.f32 %v405_v53, %v1115_v12 }
  0x20   : > { %v494_v51 = vsel %vm271_vm0, %v438_v47, 0.0  ;;  %v497_v55 = vsel %vm271_vm0, %v439_v50, 0.0  ;;  %v500_v57 = vsel %vm271_vm0, %v440_v52, 0.0  ;;  %v503_v60 = vsel %vm271_vm0, %v441_v56, 0.0 }
  0x21   : > { %v506_v62 = vsel %vm271_vm0, %v442_v58, 0.0  ;;  %v444_v63 = vmul.f32 %v405_v53, %v1128_v17  ;;  %v409_v2 = vrot.slane %v377_v59, %v1108_v8  ;;  %v509_v3 = vsel %vm271_vm0, %v443_v61, 0.0 }
  0x22   : > { %v445_v5 = vmul.f32 %v405_v53, %v1133_v18  ;;  %v379_v9 = vcombine.high %v363_v48, %v363_v48  ;;  %v381_v23 = vcombine.high %v377_v59, %v377_v59  ;;  %v294_v41 = vsub.s32 3, %v1100_v4 }
  0x23   : > { %v512_v6 = vsel %vm271_vm0, %v444_v63, 0.0  ;;  %v446_v7 = vmul.f32 %v409_v2, %v1120_v13  ;;  %v447_v11 = vmul.f32 %v409_v2, %v1115_v12  ;;  %v448_v15 = vmul.f32 %v409_v2, %v1128_v17 }
  0x24   : > { %v515_v10 = vsel %vm271_vm0, %v445_v5, 0.0  ;;  %v413_v16 = vrot.slane %v379_v9, %v1108_v8  ;;  %v449_v20 = vmul.f32 %v409_v2, %v1133_v18  ;;  %v417_v28 = vrot.slane %v381_v23, %v1108_v8 }
  0x25   : > { %v518_v14 = vsel %vm271_vm0, %v446_v7, 0.0  ;;  %v524_v21 = vsel %vm271_vm0, %v448_v15, 0.0 }
  0x26   : > { %v451_v25 = vmul.f32 %v413_v16, %v1115_v12  ;;  %v453_v30 = vmul.f32 %v413_v16, %v1133_v18  ;;  %v456_v36 = vmul.f32 %v417_v28, %v1128_v17 }
  0x28   : > { %v539_v33 = vsel %vm271_vm0, %v453_v30, 0.0  ;;  %v548_v39 = vsel %vm271_vm0, %v456_v36, 0.0 }
  0x34   : > { %462 = vadd.xlane.f32.xlu0 %v461_v19  ;;  %v521_v19 = vsel %vm271_vm0, %v447_v11, 0.0 }
  0x35   : > { %459 = vadd.xlane.f32.xlu1 %v458_v22  ;;  %v450_v22 = vmul.f32 %v413_v16, %v1120_v13 }
  0x37   : > { %v530_v26 = vsel %vm271_vm0, %v450_v22, 0.0 }
  0x38   : > { %465 = vadd.xlane.f32.xlu0 %v464_v24  ;;  %v527_v24 = vsel %vm271_vm0, %v449_v20, 0.0 }
  0x39   : > { %468 = vadd.xlane.f32.xlu1 %v467_v27  ;;  %v452_v27 = vmul.f32 %v413_v16, %v1128_v17  ;;  %v278_v17 = vld [vmem:[%s1357_s2] sm:$0xf] }
  0x3a   : > { %v283_v45 = vrot.slane %v278_v17, %v1108_v8  ;;  %v295_v48 = vrot.slane %v278_v17, %v294_v41 }
  0x3b   : > { %v536_v31 = vsel %vm271_vm0, %v452_v27, 0.0 }
  0x3c   : > { %471 = vadd.xlane.f32.xlu0 %v470_v29  ;;  %v533_v29 = vsel %vm271_vm0, %v451_v25, 0.0 }
  0x3d   : > { %474 = vadd.xlane.f32.xlu1 %v473_v32  ;;  %v454_v32 = vmul.f32 %v417_v28, %v1120_v13 }
  0x3f   : > { %v542_v35 = vsel %vm271_vm0, %v454_v32, 0.0 }
  0x40   : > { %477 = vadd.xlane.f32.xlu0 %v476_v34  ;;  %v455_v34 = vmul.f32 %v417_v28, %v1115_v12  ;;  %v1010_v12 = vld [vmem:[%s1359_s4] ss:$0 sm:$0xff] }
  0x41   : > { %480 = vadd.xlane.f32.xlu1 %v479_v38  ;;  %v457_v38 = vmul.f32 %v417_v28, %v1133_v18  ;;  %v290_v18 = vsub.s32 2, %v1100_v4 }
  0x42   : > { %v545_v37 = vsel %vm271_vm0, %v455_v34, 0.0 }
  0x43   : > { %v551_v13 = vsel %vm271_vm0, %v457_v38, 0.0  ;;  %v291_v47 = vrot.slane %v278_v17, %v290_v18 }
  0x44   : > { %483 = vadd.xlane.f32.xlu0 %v482_v40  ;;  %v286_v40 = vsub.s32 1, %v1100_v4 }
  0x45   : > { %486 = vadd.xlane.f32.xlu1 %v485_v44  ;;  %v277_v44 = vld [vmem:[%s1356_s1] sm:$0xf] }
  0x46   : > { %v308_v50 = vrot.slane %v277_v44, %v1108_v8  ;;  %v312_v53 = vrot.slane %v277_v44, %v286_v40  ;;  %v316_v54 = vrot.slane %v277_v44, %v290_v18 }
  0x48   : > { %489 = vadd.xlane.f32.xlu0 %v488_v46  ;;  %v287_v46 = vrot.slane %v278_v17, %v286_v40 }
  0x49   : > { %492 = vadd.xlane.f32.xlu1 %v491_v49 }
  0x4c   : > { %495 = vadd.xlane.f32.xlu0 %v494_v51 }
  0x4d   : > { %498 = vadd.xlane.f32.xlu1 %v497_v55  ;;  %v320_v55 = vrot.slane %v277_v44, %v294_v41 }
  0x50   : > { %501 = vadd.xlane.f32.xlu0 %v500_v57 }
  0x51   : > { %504 = vadd.xlane.f32.xlu1 %v503_v60 }
  0x54   : > { %507 = vadd.xlane.f32.xlu0 %v506_v62 }
  0x55   : > { %510 = vadd.xlane.f32.xlu1 %v509_v3 }
  0x58   : > { %513 = vadd.xlane.f32.xlu0 %v512_v6 }
  0x59   : > { %516 = vadd.xlane.f32.xlu1 %v515_v10 }
  0x5c   : > { %519 = vadd.xlane.f32.xlu0 %v518_v14 }
  0x5d   : > { %522 = vadd.xlane.f32.xlu1 %v521_v19 }
  0x60   : > { %525 = vadd.xlane.f32.xlu0 %v524_v21 }
  0x61   : > { %528 = vadd.xlane.f32.xlu1 %v527_v24 }
  0x64   : > { %531 = vadd.xlane.f32.xlu0 %v530_v26 }
  0x65   : > { %534 = vadd.xlane.f32.xlu1 %v533_v29 }
  0x68   : > { %537 = vadd.xlane.f32.xlu0 %v536_v31 }
  0x69   : > { %540 = vadd.xlane.f32.xlu1 %v539_v33 }
  0x6c   : > { %543 = vadd.xlane.f32.xlu0 %v542_v35 }
  0x6d   : > { %546 = vadd.xlane.f32.xlu1 %v545_v37 }
  0x70   : > { %549 = vadd.xlane.f32.xlu0 %v548_v39 }
  0x71   : > { %552 = vadd.xlane.f32.xlu1 %v551_v13 }
  0x82   : > { %565 = vbcast.lane.b32.xlu1 %v1010_v12, 264 }
  0x83   : > { %v263_v42 = vpop.permute.xlu0 %262  ;;  %v269_v52 = vpop.permute.xlu1 %268 }
  0x84   : > { %v272_v49 = vsel %vm271_vm0, %v1094_v0, %v263_v42 }
  0x86   : > { %561 = vbcast.lane.b32.xlu0 %v1010_v12, 256  ;;  %569 = vbcast.lane.b32.xlu1 %v1010_v12, 272 }
  0x87   : > { %v266_v51 = vpop.permute.xlu0 %265 }
  0x88   : > { %v274_v56 = vsel %vm273_vm1, %v272_v49, %v266_v51 }
  0x89   : > { %v276_v57 = vsel %vm275_vm2, %v274_v56, %v269_v52 }
  0x8a   : > { %v300_v58 = vmul.f32 %v283_v45, %v276_v57  ;;  %v301_v59 = vmul.f32 %v287_v46, %v276_v57  ;;  %v302_v60 = vmul.f32 %v291_v47, %v276_v57  ;;  %v303_v61 = vmul.f32 %v295_v48, %v276_v57  ;;  %573 = vbcast.lane.b32.xlu0 %v1010_v12, 280 }
  0x8c   : > { %v325_v0 = vadd.f32 %v308_v50, %v300_v58  ;;  %v326_v8 = vadd.f32 %v312_v53, %v301_v59  ;;  %v327_v62 = vadd.f32 %v316_v54, %v302_v60  ;;  %v328_v63 = vadd.f32 %v320_v55, %v303_v61 }
  0x8e   : > { %329 = vst [vmem:[%s255_s26] sm:$0xff] %v325_v0  ;;  %330 = vst [vmem:[%s255_s26 + $0x8] sm:$0xff] %v326_v8 }
  0x8f   : > { %331 = vst [vmem:[%s255_s26 + $0x10] sm:$0xff] %v327_v62  ;;  %332 = vst [vmem:[%s255_s26 + $0x18] sm:$0xff] %v328_v63 }
  0xc1   : > { %v463_v2 = vpop.xlane.xlu0 %462 }
  0xc2   : > { %v460_v3 = vpop.xlane.xlu1 %459 }
  0xc5   : > { %v466_v5 = vpop.xlane.xlu0 %465 }
  0xc6   : > { %v469_v6 = vpop.xlane.xlu1 %468 }
  0xc9   : > { %v472_v7 = vpop.xlane.xlu0 %471 }
  0xca   : > { %v475_v9 = vpop.xlane.xlu1 %474 }
  0xcd   : > { %v478_v10 = vpop.xlane.xlu0 %477 }
  0xce   : > { %v481_v11 = vpop.xlane.xlu1 %480 }
  0xd1   : > { %v484_v14 = vpop.xlane.xlu0 %483 }
  0xd2   : > { %v487_v15 = vpop.xlane.xlu1 %486 }
  0xd5   : > { %v490_v16 = vpop.xlane.xlu0 %489 }
  0xd6   : > { %v493_v19 = vpop.xlane.xlu1 %492 }
  0xd9   : > { %v496_v20 = vpop.xlane.xlu0 %495 }
  0xda   : > { %v499_v21 = vpop.xlane.xlu1 %498 }
  0xdd   : > { %v502_v22 = vpop.xlane.xlu0 %501 }
  0xde   : > { %v505_v23 = vpop.xlane.xlu1 %504 }
  0xe1   : > { %v508_v24 = vpop.xlane.xlu0 %507 }
  0xe2   : > { %v511_v25 = vpop.xlane.xlu1 %510 }
  0xe5   : > { %v514_v26 = vpop.xlane.xlu0 %513 }
  0xe6   : > { %v517_v27 = vpop.xlane.xlu1 %516 }
  0xe9   : > { %v520_v28 = vpop.xlane.xlu0 %519 }
  0xea   : > { %v523_v29 = vpop.xlane.xlu1 %522 }
  0xed   : > { %v526_v30 = vpop.xlane.xlu0 %525 }
  0xee   : > { %v1230_v31 = vpop.xlane.xlu1 %528 }
  0xf1   : > { %v532_v32 = vpop.xlane.xlu0 %531 }
  0xf2   : > { %v535_v33 = vpop.xlane.xlu1 %534 }
  0xf5   : > { %v538_v34 = vpop.xlane.xlu0 %537 }
  0xf6   : > { %v1232_v35 = vpop.xlane.xlu1 %540 }
  0xf9   : > { %v1234_v36 = vpop.xlane.xlu0 %543 }
  0xfa   : > { %v547_v37 = vpop.xlane.xlu1 %546 }
  0xfd   : > { %v550_v38 = vpop.xlane.xlu0 %549 }
  0xfe   : > { %v1236_v39 = vpop.xlane.xlu1 %552 }
 0x101   : > { %v562_v13 = vpop.permute.xlu0 %561 }
 0x102   : > { %v566_v12 = vpop.permute.xlu1 %565  ;;  %v579_v17 = vadd.f32 %v562_v13, %v460_v3  ;;  %v583_v41 = vadd.f32 %v562_v13, %v472_v7  ;;  %v587_v46 = vadd.f32 %v562_v13, %v484_v14  ;;  %v591_v54 = vadd.f32 %v562_v13, %v496_v20 }
 0x103   : > { %v580_v40 = vadd.f32 %v566_v12, %v463_v2  ;;  %v584_v47 = vadd.f32 %v566_v12, %v475_v9  ;;  %v596_v50 = vadd.f32 %v566_v12, %v511_v25  ;;  %v588_v51 = vadd.f32 %v566_v12, %v487_v15 }
 0x104   : > { %644 = vperm.xlu1 %1027, %v579_v17   ;;  %v595_v55 = vadd.f32 %v562_v13, %v508_v24  ;;  %v592_v57 = vadd.f32 %v566_v12, %v499_v21  ;;  %v600_v58 = vadd.f32 %v566_v12, %v523_v29  ;;  %v599_v61 = vadd.f32 %v562_v13, %v520_v28 }
 0x105   : > { %647 = vperm.xlu0 %1028, %v580_v40   ;;  %v574_v43 = vpop.permute.xlu0 %573  ;;  %v604_v0 = vadd.f32 %v566_v12, %v535_v33  ;;  %v603_v63 = vadd.f32 %v562_v13, %v532_v32  ;;  %v608_v2 = vadd.f32 %v566_v12, %v547_v37  ;;  %v740_v32 = vand.u32 127, %v280_v1 }
 0x106   : > { %v570_v18 = vpop.permute.xlu1 %569  ;;  %v582_v45 = vadd.f32 %v574_v43, %v469_v6  ;;  %v586_v49 = vadd.f32 %v574_v43, %v481_v11  ;;  %v590_v53 = vadd.f32 %v574_v43, %v493_v19  ;;  %v594_v59 = vadd.f32 %v574_v43, %v505_v23 }
 0x107   : > { %v581_v42 = vadd.f32 %v570_v18, %v466_v5  ;;  %v585_v44 = vadd.f32 %v570_v18, %v478_v10  ;;  %v589_v48 = vadd.f32 %v570_v18, %v490_v16  ;;  %v597_v52 = vadd.f32 %v570_v18, %v514_v26 }
 0x108   : > { %v593_v56 = vadd.f32 %v570_v18, %v502_v22  ;;  %v601_v60 = vadd.f32 %v570_v18, %v526_v30  ;;  %v598_v8 = vadd.f32 %v574_v43, %v517_v27  ;;  %v605_v62 = vadd.f32 %v570_v18, %v538_v34 }
 0x109   : > { %656 = vperm.xlu0 %1028, %v583_v41   ;;  %650 = vperm.xlu1 %1027, %v581_v42   ;;  %v602_v3 = vadd.f32 %v574_v43, %v1230_v31  ;;  %v609_v5 = vadd.f32 %v570_v18, %v550_v38  ;;  %v607_v6 = vadd.f32 %v562_v13, %v1234_v36  ;;  %v752_v38 = vadd.s32 4294967280, %v740_v32 }
 0x10a   : > { %v606_v7 = vadd.f32 %v574_v43, %v1232_v35  ;;  %v610_v9 = vadd.f32 %v574_v43, %v1236_v39  ;;  %v745_v35 = vadd.s32 4294967288, %v740_v32  ;;  %v1260_v39 = vsub.s32 %v740_v32, %v1100_v4 }
 0x10b   : > { %v1268_v40 = vsub.s32 %v752_v38, %v1100_v4  ;;  %v759_v1 = vadd.s32 4294967272, %v740_v32 }
 0x10c   : > { %v1263_v13 = vsub.s32 %v745_v35, %v1100_v4 }
 0x10d   : > { %662 = vperm.xlu0 %1028, %v585_v44   ;;  %653 = vperm.xlu1 %1027, %v582_v45  }
 0x111   : > { %668 = vperm.xlu0 %1028, %v587_v46   ;;  %659 = vperm.xlu1 %1027, %v584_v47   ;;  %v1278_v47 = vsub.s32 %v759_v1, %v1100_v4 }
 0x115   : > { %674 = vperm.xlu0 %1028, %v589_v48   ;;  %665 = vperm.xlu1 %1027, %v586_v49  }
 0x119   : > { %695 = vperm.xlu0 %1028, %v596_v50   ;;  %671 = vperm.xlu1 %1027, %v588_v51  }
 0x11d   : > { %698 = vperm.xlu0 %1028, %v597_v52   ;;  %677 = vperm.xlu1 %1027, %v590_v53  }
 0x121   : > { %680 = vperm.xlu0 %1028, %v591_v54   ;;  %692 = vperm.xlu1 %1027, %v595_v55  }
 0x125   : > { %686 = vperm.xlu0 %1028, %v593_v56   ;;  %683 = vperm.xlu1 %1027, %v592_v57  }
 0x129   : > { %707 = vperm.xlu0 %1028, %v600_v58   ;;  %689 = vperm.xlu1 %1027, %v594_v59  }
 0x12d   : > { %710 = vperm.xlu0 %1028, %v601_v60   ;;  %704 = vperm.xlu1 %1027, %v599_v61  }
 0x131   : > { %719 = vperm.xlu0 %1028, %v604_v0   ;;  %701 = vperm.xlu1 %1027, %v598_v8  }
 0x135   : > { %722 = vperm.xlu0 %1028, %v605_v62   ;;  %716 = vperm.xlu1 %1027, %v603_v63  }
 0x139   : > { %731 = vperm.xlu0 %1028, %v608_v2   ;;  %713 = vperm.xlu1 %1027, %v602_v3  }
 0x13d   : > { %734 = vperm.xlu0 %1028, %v609_v5   ;;  %728 = vperm.xlu1 %1027, %v607_v6  }
 0x141   : > { %725 = vperm.xlu1 %1027, %v606_v7  }
 0x145   : > { %737 = vperm.xlu1 %1027, %v610_v9  }
 0x183   : > { %v645_v10 = vpop.permute.xlu1 %644 }
 0x184   : > { %v648_v11 = vpop.permute.xlu0 %647  ;;  %v744_v41 = vrot.slane %v645_v10, %v1260_v39 }
 0x185   : > { %v749_v42 = vrot.slane %v648_v11, %v1263_v13 }
 0x187   : > { %v751_v52 = vsel %vm750_vm3, %v749_v42, %v744_v41 }
 0x188   : > { %v651_v14 = vpop.permute.xlu1 %650  ;;  %v657_v15 = vpop.permute.xlu0 %656 }
 0x189   : > { %v756_v45 = vrot.slane %v651_v14, %v1268_v40  ;;  %v769_v46 = vrot.slane %v657_v15, %v1260_v39 }
 0x18b   : > { %v758_v4 = vsel %vm757_vm4, %v756_v45, %v751_v52 }
 0x18c   : > { %v1242_v16 = vpop.permute.xlu1 %653  ;;  %v663_v19 = vpop.permute.xlu0 %662 }
 0x18d   : > { %v778_v53 = vrot.slane %v663_v19, %v1268_v40  ;;  %v763_v58 = vrot.slane %v1242_v16, %v1278_v47 }
 0x190   : > { %v660_v20 = vpop.permute.xlu1 %659  ;;  %v669_v21 = vpop.permute.xlu0 %668 }
 0x191   : > { %v773_v18 = vrot.slane %v660_v20, %v1263_v13  ;;  %v788_v50 = vrot.slane %v669_v21, %v1260_v39 }
 0x193   : > { %v774_v49 = vsel %vm750_vm3, %v773_v18, %v769_v46 }
 0x194   : > { %v666_v22 = vpop.permute.xlu1 %665  ;;  %v675_v23 = vpop.permute.xlu0 %674  ;;  %v779_v59 = vsel %vm757_vm4, %v778_v53, %v774_v49 }
 0x195   : > { %v783_v51 = vrot.slane %v666_v22, %v1278_v47  ;;  %v797_v60 = vrot.slane %v675_v23, %v1268_v40 }
 0x197   : > { %v784_v0 = vsel %vm764_vm5, %v783_v51, %v779_v59 }
 0x198   : > { %v672_v24 = vpop.permute.xlu1 %671  ;;  %v1244_v25 = vpop.permute.xlu0 %695 }
 0x199   : > { %v792_v48 = vrot.slane %v672_v24, %v1263_v13  ;;  %v830_v8 = vrot.slane %v1244_v25, %v1263_v13 }
 0x19b   : > { %v793_v55 = vsel %vm750_vm3, %v792_v48, %v788_v50 }
 0x19c   : > { %v1246_v26 = vpop.permute.xlu1 %677  ;;  %v1248_v27 = vpop.permute.xlu0 %698  ;;  %v798_v2 = vsel %vm757_vm4, %v797_v60, %v793_v55 }
 0x19d   : > { %v802_v3 = vrot.slane %v1246_v26, %v1278_v47  ;;  %v835_v9 = vrot.slane %v1248_v27, %v1268_v40  ;;  %v765_v26 = vsel %vm764_vm5, %v763_v58, %v758_v4 }
 0x19e   : > { %v900_v35 = vsel %vm899_vm6, %v784_v0, %v765_v26 }
 0x19f   : > { %v803_v27 = vsel %vm764_vm5, %v802_v3, %v798_v2 }
 0x1a0   : > { %v1250_v28 = vpop.permute.xlu1 %692  ;;  %v681_v29 = vpop.permute.xlu0 %680 }
 0x1a1   : > { %v826_v61 = vrot.slane %v1250_v28, %v1260_v39  ;;  %v807_v62 = vrot.slane %v681_v29, %v1260_v39 }
 0x1a3   : > { %v831_v15 = vsel %vm750_vm3, %v830_v8, %v826_v61 }
 0x1a4   : > { %v684_v30 = vpop.permute.xlu1 %683  ;;  %v1252_v31 = vpop.permute.xlu0 %686  ;;  %v836_v32 = vsel %vm757_vm4, %v835_v9, %v831_v15 }
 0x1a5   : > { %v811_v56 = vrot.slane %v684_v30, %v1263_v13  ;;  %v816_v5 = vrot.slane %v1252_v31, %v1268_v40 }
 0x1a7   : > { %v812_v10 = vsel %vm750_vm3, %v811_v56, %v807_v62 }
 0x1a8   : > { %v1255_v33 = vpop.permute.xlu1 %689  ;;  %v708_v34 = vpop.permute.xlu0 %707  ;;  %v817_v28 = vsel %vm757_vm4, %v816_v5, %v812_v10 }
 0x1a9   : > { %v821_v11 = vrot.slane %v1255_v33, %v1278_v47  ;;  %v849_v14 = vrot.slane %v708_v34, %v1263_v13 }
 0x1ab   : > { %v822_v31 = vsel %vm764_vm5, %v821_v11, %v817_v28 }
 0x1ac   : > { %v705_v36 = vpop.permute.xlu1 %704  ;;  %v1257_v37 = vpop.permute.xlu0 %710 }
 0x1ad   : > { %v845_v63 = vrot.slane %v705_v36, %v1260_v39  ;;  %v854_v16 = vrot.slane %v1257_v37, %v1268_v40 }
 0x1af   : > { %v850_v21 = vsel %vm750_vm3, %v849_v14, %v845_v63 }
 0x1b0   : > { %v1265_v12 = vpop.permute.xlu1 %701  ;;  %v720_v17 = vpop.permute.xlu0 %719  ;;  %v855_v36 = vsel %vm757_vm4, %v854_v16, %v850_v21 }
 0x1b1   : > { %v840_v19 = vrot.slane %v1265_v12, %v1278_v47  ;;  %v868_v20 = vrot.slane %v720_v17, %v1263_v13 }
 0x1b3   : > { %v841_v37 = vsel %vm764_vm5, %v840_v19, %v836_v32 }
 0x1b4   : > { %v717_v43 = vpop.permute.xlu1 %716  ;;  %v1273_v44 = vpop.permute.xlu0 %722 }
 0x1b5   : > { %v864_v6 = vrot.slane %v717_v43, %v1260_v39  ;;  %v873_v22 = vrot.slane %v1273_v44, %v1268_v40 }
 0x1b7   : > { %v869_v29 = vsel %vm750_vm3, %v868_v20, %v864_v6 }
 0x1b8   : > { %v714_v54 = vpop.permute.xlu1 %713  ;;  %v732_v57 = vpop.permute.xlu0 %731  ;;  %v874_v12 = vsel %vm757_vm4, %v873_v22, %v869_v29 }
 0x1b9   : > { %v859_v23 = vrot.slane %v714_v54, %v1278_v47  ;;  %v887_v33 = vrot.slane %v732_v57, %v1263_v13 }
 0x1bb   : > { %v860_v17 = vsel %vm764_vm5, %v859_v23, %v855_v36 }
 0x1bc   : > { %v729_v7 = vpop.permute.xlu1 %728  ;;  %v735_v25 = vpop.permute.xlu0 %734 }
 0x1bd   : > { %v883_v24 = vrot.slane %v729_v7, %v1260_v39  ;;  %v892_v38 = vrot.slane %v735_v25, %v1268_v40  ;;  %v902_v39 = vsel %vm901_vm7, %v803_v27, %v900_v35 }
 0x1be   : > { %v904_v13 = vsel %vm903_vm8, %v822_v31, %v902_v39 }
 0x1bf   : > { %v888_v1 = vsel %vm750_vm3, %v887_v33, %v883_v24  ;;  %v906_v42 = vsel %vm905_vm9, %v841_v37, %v904_v13 }
 0x1c0   : > { %v726_v30 = vpop.permute.xlu1 %725  ;;  %v908_v40 = vsel %vm907_vm10, %v860_v17, %v906_v42  ;;  %v893_v44 = vsel %vm757_vm4, %v892_v38, %v888_v1 }
 0x1c1   : > { %v878_v34 = vrot.slane %v726_v30, %v1278_v47 }
 0x1c3   : > { %v879_v18 = vsel %vm764_vm5, %v878_v34, %v874_v12 }
 0x1c4   : > { %v738_v41 = vpop.permute.xlu1 %737  ;;  %v910_v45 = vsel %vm909_vm11, %v879_v18, %v908_v40 }
 0x1c5   : > { %v897_v43 = vrot.slane %v738_v41, %v1278_v47 }
 0x1c7   : > { %v898_v46 = vsel %vm764_vm5, %v897_v43, %v893_v44 }
 0x1c8   : > { %v912_v48 = vsel %vm911_vm12, %v898_v46, %v910_v45 }
 0x1c9   : > { %914 = vst.msk [vmem:[%s259_s29] sm:$0xff] %vm271_vm0, %v912_v48 }
 0x1ca PF: > { %s17_s21 = sadd.s32 1, %s1036_s21  }
 0x1cb   : > { %p14_p4 = scmp.ge.s32.totalorder %s17_s21, 4  }
 0x1cd   :  { %16 = sbr.rel (!%p14_p4) target bundleno = 1 (0x1), region = 82 }

// kernel: hgn_forward.2
= control target key start
LH: loop header
LB: loop body
LE: loop exit
PB: predicated region body
PF: predicated region fallthrough
CT: control target
= control target key end

     0   :  { %v11008_v0 = vlaneseq  ;;  %vm108_vm0 = vcmask 261120   ;;  %vm3655_vm1 = vcmask 1041409   ;;  %vm3657_vm2 = vcmask 1042434   ;;  %s11002_s3 = inlined_call_operand.vmem [shape: f32[128,32], index: 3, kind: input, shape index: {}]   ;;  %s11003_s1 = inlined_call_operand.vmem [shape: f32[16,32], index: 1, kind: input, shape index: {}]   ;;  %s11004_s2 = inlined_call_operand.vmem [shape: f32[49,32], index: 2, kind: input, shape index: {}]   ;;  %s11005_s0 = inlined_call_operand.vmem [shape: f32[16,32,32], index: 0, kind: input, shape index: {}]   ;;  %s11006_s4 = inlined_call_operand.vmem [shape: f32[80,32], index: 4, kind: output, shape index: {0}]   ;;  %s11007_s5 = inlined_call_operand.vmem [shape: f32[32,1], index: 5, kind: output, shape index: {1}]  }
   0x1   :  { %v100_v1 = vld [vmem:[%s11002_s3 + $0x40] sm:$0xff]  ;;  %v101_v2 = vld [vmem:[%s11002_s3 + $0x48] sm:$0xff]  ;;  %v102_v3 = vld [vmem:[%s11002_s3 + $0x50] sm:$0xff]  ;;  %vm3659_vm3 = vcmask 1043459   ;;  %vm3661_vm4 = vcmask 1044484   ;;  %vm3663_vm5 = vcmask 1045509  }
   0x2   :  { %v6774_v4 = vpack.c.bf16 %v101_v2, %v100_v1  ;;  %v103_v5 = vld [vmem:[%s11002_s3 + $0x58] sm:$0xff]  ;;  %v7451_v6 = vshrl.u32 %v11008_v0, 7  ;;  %v85_v7 = vld [vmem:[%s11004_s2] sm:$0xff]  ;;  %v93_v12 = vld [vmem:[%s11002_s3 + $0x8] sm:$0xff]  ;;  %vm3665_vm6 = vcmask 1046534   ;;  %vm3667_vm7 = vcmask 1047559  }
   0x3   :  { %v6778_v8 = vpack.c.bf16 %v103_v5, %v102_v3  ;;  %v7459_v9 = vld [vmem:[%s11003_s1] sm:$0xff]  ;;  %6552 = vmatprep.mubr.msk.f32.mxu0 %vm108_vm0, %v85_v7  ;;  %6563 = vmatprep.mubr.msk.f32.mxu1 %vm108_vm0, %v85_v7  ;;  %v94_v15 = vld [vmem:[%s11002_s3 + $0x10] sm:$0xff]  ;;  %v95_v16 = vld [vmem:[%s11002_s3 + $0x18] sm:$0xff]  ;;  %vm6122_vm8 = vcmask 7168   ;;  %vm4627_vm9 = vcmask 130112   ;;  %vm4634_vm10 = vcmask 195712  }
   0x4   :  { %11150 = vst [vmem:[#allocation2_spill] sm:$0xff] %v7451_v6  ;;  %6775 = vmatprep.subr.bf16.mxu0 %v6774_v4  ;;  %v7464_v10 = vsub.s32 0, %v7451_v6  ;;  %v92_v11 = vld [vmem:[%s11002_s3] sm:$0xff]  ;;  %v7481_v17 = vsub.s32 1, %v7451_v6  ;;  %v7486_v18 = vld [vmem:[%s11004_s2 + $0x8] sm:$0xff]  ;;  %v6794_v19 = vpack.c.bf16 %v95_v16, %v94_v15  ;;  %v7500_v22 = vsub.s32 2, %v7451_v6 }
   0x5   :  { %6777 = vmatpush3.bf16.msra.mxu0 %v6774_v4  ;;  %v6790_v14 = vpack.c.bf16 %v93_v12, %v92_v11  ;;  %v7491_v20 = vld [vmem:[%s11005_s0] sm:$0xff]  ;;  %v7505_v23 = vld [vmem:[%s11005_s0 + $0x8] sm:$0xff]  ;;  %v7510_v24 = vld [vmem:[%s11005_s0 + $0x10] sm:$0xff]  ;;  %v7531_v28 = vsub.s32 3, %v7451_v6  ;;  %v7564_v34 = vsub.s32 4, %v7451_v6  ;;  %v7597_v40 = vsub.s32 5, %v7451_v6 }
   0x6   :  { %11151 = vst [vmem:[#allocation3_spill] sm:$0xff] %v7464_v10  ;;  %6779 = vmatprep.subr.bf16.mxu0 %v6778_v8  ;;  %v2810_v13 = vrot.slane %v7459_v9, %v7464_v10  ;;  %11152 = vst [vmem:[#allocation4_spill] sm:$0xff] %v7481_v17  ;;  %v2829_v21 = vrot.slane %v7459_v9, %v7481_v17  ;;  %v2848_v25 = vrot.slane %v7459_v9, %v7500_v22  ;;  %v7521_v26 = vld [vmem:[%s11005_s0 + $0x18] sm:$0xff]  ;;  %v7526_v27 = vld [vmem:[%s11005_s0 + $0x20] sm:$0xff]  ;;  %vm4641_vm11 = vcmask 261312  }
   0x7   :  { %v7538_v29 = vld [vmem:[%s11005_s0 + $0x28] sm:$0xff]  ;;  %v7543_v30 = vld [vmem:[%s11005_s0 + $0x30] sm:$0xff]  ;;  %v2867_v31 = vrot.slane %v7459_v9, %v7531_v28  ;;  %v7554_v32 = vld [vmem:[%s11005_s0 + $0x38] sm:$0xff]  ;;  %v2886_v37 = vrot.slane %v7459_v9, %v7564_v34  ;;  %v2905_v43 = vrot.slane %v7459_v9, %v7597_v40  ;;  %v7630_v46 = vsub.s32 6, %v7451_v6 }
   0x8   :  { %2820 = vbcast.lane.b32.xlu1 %v2810_v13, 272  ;;  %2812 = vbcast.lane.b32.xlu0 %v2810_v13, 256  ;;  %v7559_v33 = vld [vmem:[%s11005_s0 + $0x40] sm:$0xff]  ;;  %v7571_v35 = vld [vmem:[%s11005_s0 + $0x48] sm:$0xff]  ;;  %v7576_v36 = vld [vmem:[%s11005_s0 + $0x50] sm:$0xff]  ;;  %v7663_v52 = vsub.s32 7, %v7451_v6  ;;  %6810 = vrcp.f32 %v7459_v9 }
   0x9   :  { %6781 = vmatpush3.bf16.msra.mxu0 %v6778_v8  ;;  %v7587_v38 = vld [vmem:[%s11005_s0 + $0x58] sm:$0xff]  ;;  %v7592_v39 = vld [vmem:[%s11005_s0 + $0x60] sm:$0xff]  ;;  %v7604_v41 = vld [vmem:[%s11005_s0 + $0x68] sm:$0xff]  ;;  %v2924_v49 = vrot.slane %v7459_v9, %v7630_v46 }
   0xa   :  { %6791 = vmatprep.subr.bf16.mxu0 %v6790_v14  ;;  %v7609_v42 = vld [vmem:[%s11005_s0 + $0x70] sm:$0xff]  ;;  %v7620_v44 = vld [vmem:[%s11005_s0 + $0x78] sm:$0xff]  ;;  %v7625_v45 = vld [vmem:[%s11005_s0 + $0x80] sm:$0xff]  ;;  %v2943_v55 = vrot.slane %v7459_v9, %v7663_v52 }
   0xb   :  { %v7637_v47 = vld [vmem:[%s11005_s0 + $0x88] sm:$0xff]  ;;  %v7642_v48 = vld [vmem:[%s11005_s0 + $0x90] sm:$0xff]  ;;  %v7653_v50 = vld [vmem:[%s11005_s0 + $0x98] sm:$0xff] }
   0xc   :  { %6553 = vmatmul.mubr.msk.f32.vlgmr.msra.gmra.mrb[0].mxu0 %vm108_vm0, %v7486_v18  ;;  %2824 = vbcast.lane.b32.xlu1 %v2810_v13, 280  ;;  %v7658_v51 = vld [vmem:[%s11005_s0 + $0xa0] sm:$0xff]  ;;  %v7670_v53 = vld [vmem:[%s11005_s0 + $0xa8] sm:$0xff]  ;;  %v7675_v54 = vld [vmem:[%s11005_s0 + $0xb0] sm:$0xff] }
   0xd   :  { %2816 = vbcast.lane.b32.xlu0 %v2810_v13, 264  ;;  %6793 = vmatpush3.bf16.msra.mxu0 %v6790_v14  ;;  %v7686_v56 = vld [vmem:[%s11005_s0 + $0xb8] sm:$0xff]  ;;  %v7691_v57 = vld [vmem:[%s11005_s0 + $0xc0] sm:$0xff]  ;;  %v7700_v58 = vld [vmem:[%s11005_s0 + $0xc8] sm:$0xff] }
   0xe   :  { %6795 = vmatprep.subr.bf16.mxu0 %v6794_v19  ;;  %6574 = vmatprep.mubr.msk.f32.mxu0 %vm108_vm0, %v7491_v20  ;;  %v7705_v59 = vld [vmem:[%s11003_s1 + $0x8] sm:$0xff]  ;;  %v7710_v60 = vld [vmem:[%s11005_s0 + $0xd0] sm:$0xff]  ;;  %v7721_v62 = vld [vmem:[%s11005_s0 + $0xd8] sm:$0xff] }
   0xf   :  { %v2962_v61 = vrot.slane %v7705_v59, %v7464_v10  ;;  %v7726_v63 = vld [vmem:[%s11005_s0 + $0xe0] sm:$0xff]  ;;  %v7735_v1 = vld [vmem:[%s11005_s0 + $0xe8] sm:$0xff]  ;;  %v7740_v2 = vld [vmem:[%s11005_s0 + $0xf0] sm:$0xff]  ;;  %v2981_v3 = vrot.slane %v7705_v59, %v7481_v17  ;;  %v3000_v11 = vrot.slane %v7705_v59, %v7500_v22  ;;  %v3019_v16 = vrot.slane %v7705_v59, %v7531_v28 }
  0x10   :  { %2835 = vbcast.lane.b32.xlu1 %v2829_v21, 264  ;;  %v7751_v4 = vld [vmem:[%s11005_s0 + $0xf8] sm:$0xff]  ;;  %v7756_v5 = vld [vmem:[%s11005_s0 + $0x100] sm:$0xff]  ;;  %v7765_v7 = vld [vmem:[%s11005_s0 + $0x108] sm:$0xff]  ;;  %v3076_v6 = vrot.slane %v7705_v59, %v7630_v46  ;;  %6812 = vrcp.f32 %v7705_v59 }
  0x11   :  { %2831 = vbcast.lane.b32.xlu0 %v2829_v21, 256  ;;  %6797 = vmatpush3.bf16.msra.mxu0 %v6794_v19  ;;  %v7770_v8 = vld [vmem:[%s11005_s0 + $0x110] sm:$0xff]  ;;  %v7781_v12 = vld [vmem:[%s11005_s0 + $0x118] sm:$0xff]  ;;  %v7786_v13 = vld [vmem:[%s11005_s0 + $0x120] sm:$0xff] }
  0x12   :  { %11153 = vst [vmem:[#allocation5_spill] sm:$0xff] %v7770_v8  ;;  %11154 = vst [vmem:[#allocation6_spill] sm:$0xff] %v7781_v12  ;;  %v7795_v14 = vld [vmem:[%s11005_s0 + $0x128] sm:$0xff]  ;;  %v7800_v15 = vld [vmem:[%s11005_s0 + $0x130] sm:$0xff] }
  0x13   :  { %11155 = vst [vmem:[#allocation7_spill] sm:$0xff] %v7786_v13  ;;  %11156 = vst [vmem:[#allocation8_spill] sm:$0xff] %v7795_v14  ;;  %v7811_v19 = vld [vmem:[%s11005_s0 + $0x138] sm:$0xff]  ;;  %v7890_v0 = vld [vmem:[%s11005_s0 + $0x190] sm:$0xff] }
  0x14   :  { %2843 = vbcast.lane.b32.xlu1 %v2829_v21, 280  ;;  %6575 = vmatmul.mubr.msk.f32.vlgmr.msra.gmra.mrb[2].mxu0 %vm108_vm0, %v7505_v23  ;;  %11157 = vst [vmem:[#allocation9_spill] sm:$0xff] %v7800_v15  ;;  %11158 = vst [vmem:[#allocation10_spill] sm:$0xff] %v7811_v19 }
  0x15   :  { %2839 = vbcast.lane.b32.xlu0 %v2829_v21, 272  ;;  %6577 = vmatprep.mubr.msk.f32.mxu0 %vm108_vm0, %v7510_v24  ;;  %v7816_v21 = vld [vmem:[%s11005_s0 + $0x140] sm:$0xff]  ;;  %11169 = vst [vmem:[#allocation21_spill] sm:$0xff] %v7890_v0 }
  0x16   :  { %11159 = vst [vmem:[#allocation11_spill] sm:$0xff] %v7816_v21 }
  0x18   :  { %2854 = vbcast.lane.b32.xlu1 %v2848_v25, 264  ;;  %6578 = vmatmul.mubr.msk.f32.gmra.mrb[4].mxu0 %vm108_vm0, %v7521_v26 }
  0x19   :  { %2850 = vbcast.lane.b32.xlu0 %v2848_v25, 256  ;;  %6580 = vmatprep.mubr.msk.f32.mxu0 %vm108_vm0, %v7526_v27 }
  0x1c   :  { %2862 = vbcast.lane.b32.xlu1 %v2848_v25, 280  ;;  %6581 = vmatmul.mubr.msk.f32.gmra.mrb[6].mxu0 %vm108_vm0, %v7538_v29 }
  0x1d   :  { %2858 = vbcast.lane.b32.xlu0 %v2848_v25, 272  ;;  %6583 = vmatprep.mubr.msk.f32.mxu0 %vm108_vm0, %v7543_v30  ;;  %v7825_v25 = vld [vmem:[%s11005_s0 + $0x148] sm:$0xff] }
  0x1e   :  { %11160 = vst [vmem:[#allocation12_spill] sm:$0xff] %v7825_v25 }
  0x20   :  { %2873 = vbcast.lane.b32.xlu1 %v2867_v31, 264  ;;  %6584 = vmatmul.mubr.msk.f32.gmra.mrb[8].mxu0 %vm108_vm0, %v7554_v32 }
  0x21   :  { %2869 = vbcast.lane.b32.xlu0 %v2867_v31, 256  ;;  %6586 = vmatprep.mubr.msk.f32.mxu0 %vm108_vm0, %v7559_v33 }
  0x24   :  { %2881 = vbcast.lane.b32.xlu1 %v2867_v31, 280  ;;  %6587 = vmatmul.mubr.msk.f32.gmra.mrb[10].mxu0 %vm108_vm0, %v7571_v35 }
  0x25   :  { %2877 = vbcast.lane.b32.xlu0 %v2867_v31, 272  ;;  %6589 = vmatprep.mubr.msk.f32.mxu0 %vm108_vm0, %v7576_v36  ;;  %v7830_v31 = vld [vmem:[%s11005_s0 + $0x150] sm:$0xff] }
  0x26   :  { %11161 = vst [vmem:[#allocation13_spill] sm:$0xff] %v7830_v31 }
  0x28   :  { %2892 = vbcast.lane.b32.xlu1 %v2886_v37, 264  ;;  %6590 = vmatmul.mubr.msk.f32.gmra.mrb[12].mxu0 %vm108_vm0, %v7587_v38 }
  0x29   :  { %2888 = vbcast.lane.b32.xlu0 %v2886_v37, 256  ;;  %6592 = vmatprep.mubr.msk.f32.mxu0 %vm108_vm0, %v7592_v39 }
  0x2c   :  { %2900 = vbcast.lane.b32.xlu1 %v2886_v37, 280  ;;  %6593 = vmatmul.mubr.msk.f32.gmra.mrb[14].mxu0 %vm108_vm0, %v7604_v41 }
  0x2d   :  { %2896 = vbcast.lane.b32.xlu0 %v2886_v37, 272  ;;  %6595 = vmatprep.mubr.msk.f32.mxu0 %vm108_vm0, %v7609_v42  ;;  %v3038_v37 = vrot.slane %v7705_v59, %v7564_v34 }
  0x30   :  { %2911 = vbcast.lane.b32.xlu1 %v2905_v43, 264  ;;  %6596 = vmatmul.mubr.msk.f32.gmra.mrb[16].mxu0 %vm108_vm0, %v7620_v44 }
  0x31   :  { %2907 = vbcast.lane.b32.xlu0 %v2905_v43, 256  ;;  %6598 = vmatprep.mubr.msk.f32.mxu0 %vm108_vm0, %v7625_v45 }
  0x34   :  { %2919 = vbcast.lane.b32.xlu1 %v2905_v43, 280  ;;  %6599 = vmatmul.mubr.msk.f32.gmra.mrb[18].mxu0 %vm108_vm0, %v7637_v47 }
  0x35   :  { %2915 = vbcast.lane.b32.xlu0 %v2905_v43, 272  ;;  %6601 = vmatprep.mubr.msk.f32.mxu0 %vm108_vm0, %v7642_v48  ;;  %v7841_v43 = vld [vmem:[%s11005_s0 + $0x158] sm:$0xff] }
  0x36   :  { %11162 = vst [vmem:[#allocation14_spill] sm:$0xff] %v7841_v43 }
  0x38   :  { %2930 = vbcast.lane.b32.xlu1 %v2924_v49, 264  ;;  %6602 = vmatmul.mubr.msk.f32.gmra.mrb[20].mxu0 %vm108_vm0, %v7653_v50 }
  0x39   :  { %2926 = vbcast.lane.b32.xlu0 %v2924_v49, 256  ;;  %6604 = vmatprep.mubr.msk.f32.mxu0 %vm108_vm0, %v7658_v51 }
  0x3c   :  { %2938 = vbcast.lane.b32.xlu1 %v2924_v49, 280  ;;  %6605 = vmatmul.mubr.msk.f32.gmra.mrb[22].mxu0 %vm108_vm0, %v7670_v53 }
  0x3d   :  { %2934 = vbcast.lane.b32.xlu0 %v2924_v49, 272  ;;  %6607 = vmatprep.mubr.msk.f32.mxu0 %vm108_vm0, %v7675_v54  ;;  %v7846_v49 = vld [vmem:[%s11005_s0 + $0x160] sm:$0xff] }
  0x3e   :  { %11163 = vst [vmem:[#allocation15_spill] sm:$0xff] %v7846_v49 }
  0x40   :  { %2949 = vbcast.lane.b32.xlu1 %v2943_v55, 264  ;;  %6608 = vmatmul.mubr.msk.f32.gmra.mrb[24].mxu0 %vm108_vm0, %v7686_v56 }
  0x41   :  { %2945 = vbcast.lane.b32.xlu0 %v2943_v55, 256  ;;  %6610 = vmatprep.mubr.msk.f32.mxu0 %vm108_vm0, %v7691_v57 }
  0x44   :  { %2957 = vbcast.lane.b32.xlu1 %v2943_v55, 280  ;;  %6611 = vmatmul.mubr.msk.f32.gmra.mrb[26].mxu0 %vm108_vm0, %v7700_v58 }
  0x45   :  { %2953 = vbcast.lane.b32.xlu0 %v2943_v55, 272  ;;  %6613 = vmatprep.mubr.msk.f32.mxu0 %vm108_vm0, %v7710_v60  ;;  %v7855_v55 = vld [vmem:[%s11005_s0 + $0x168] sm:$0xff] }
  0x46   :  { %11164 = vst [vmem:[#allocation16_spill] sm:$0xff] %v7855_v55 }
  0x48   :  { %2968 = vbcast.lane.b32.xlu1 %v2962_v61, 264  ;;  %6614 = vmatmul.mubr.msk.f32.gmra.mrb[28].mxu0 %vm108_vm0, %v7721_v62 }
  0x49   :  { %2964 = vbcast.lane.b32.xlu0 %v2962_v61, 256  ;;  %6616 = vmatprep.mubr.msk.f32.mxu0 %vm108_vm0, %v7726_v63 }
  0x4c   :  { %2976 = vbcast.lane.b32.xlu1 %v2962_v61, 280  ;;  %6617 = vmatmul.mubr.msk.f32.gmra.mrb[30].mxu0 %vm108_vm0, %v7735_v1 }
  0x4d   :  { %2972 = vbcast.lane.b32.xlu0 %v2962_v61, 272  ;;  %6619 = vmatprep.mubr.msk.f32.mxu0 %vm108_vm0, %v7740_v2  ;;  %v7860_v61 = vld [vmem:[%s11005_s0 + $0x170] sm:$0xff] }
  0x4e   :  { %11165 = vst [vmem:[#allocation17_spill] sm:$0xff] %v7860_v61 }
  0x50   :  { %2987 = vbcast.lane.b32.xlu1 %v2981_v3, 264  ;;  %6620 = vmatmul.mubr.msk.f32.gmra.mrb[32].mxu0 %vm108_vm0, %v7751_v4 }
  0x51   :  { %2983 = vbcast.lane.b32.xlu0 %v2981_v3, 256  ;;  %6622 = vmatprep.mubr.msk.f32.mxu0 %vm108_vm0, %v7756_v5 }
  0x54   :  { %2995 = vbcast.lane.b32.xlu1 %v2981_v3, 280  ;;  %6623 = vmatmul.mubr.msk.f32.gmra.mrb[34].mxu0 %vm108_vm0, %v7765_v7 }
  0x55   :  { %2991 = vbcast.lane.b32.xlu0 %v2981_v3, 272  ;;  %6625 = vmatprep.mubr.msk.f32.mxu0 %vm108_vm0, %v7770_v8  ;;  %v3057_v3 = vrot.slane %v7705_v59, %v7597_v40 }
  0x58   :  { %3006 = vbcast.lane.b32.xlu1 %v3000_v11, 264  ;;  %6626 = vmatmul.mubr.msk.f32.gmra.mrb[36].mxu0 %vm108_vm0, %v7781_v12  ;;  %v80_v12 = vld [vmem:[%s11005_s0 + $0x1e8] sm:$0xff] }
  0x59   :  { %3002 = vbcast.lane.b32.xlu0 %v3000_v11, 256  ;;  %6628 = vmatprep.mubr.msk.f32.mxu0 %vm108_vm0, %v7786_v13  ;;  %v78_v13 = vld [vmem:[%s11005_s0 + $0x1d8] sm:$0xff] }
  0x5c   :  { %3014 = vbcast.lane.b32.xlu1 %v3000_v11, 280  ;;  %6629 = vmatmul.mubr.msk.f32.gmra.mrb[38].mxu0 %vm108_vm0, %v7795_v14 }
  0x5d   :  { %3010 = vbcast.lane.b32.xlu0 %v3000_v11, 272  ;;  %6631 = vmatprep.mubr.msk.f32.mxu0 %vm108_vm0, %v7800_v15  ;;  %v7871_v11 = vld [vmem:[%s11005_s0 + $0x178] sm:$0xff] }
  0x5e   :  { %11166 = vst [vmem:[#allocation18_spill] sm:$0xff] %v7871_v11 }
  0x60   :  { %3025 = vbcast.lane.b32.xlu1 %v3019_v16, 264  ;;  %6632 = vmatmul.mubr.msk.f32.gmra.mrb[40].mxu0 %vm108_vm0, %v7811_v19 }
  0x61   :  { %3021 = vbcast.lane.b32.xlu0 %v3019_v16, 256  ;;  %6634 = vmatprep.mubr.msk.f32.mxu0 %vm108_vm0, %v7816_v21  ;;  %v7958_v21 = vld [vmem:[%s11005_s0 + $0x1c8] sm:$0xff] }
  0x62   :  { %11178 = vst [vmem:[#allocation30_spill] sm:$0xff] %v7958_v21 }
  0x64   :  { %3033 = vbcast.lane.b32.xlu1 %v3019_v16, 280  ;;  %6635 = vmatmul.mubr.msk.f32.gmra.mrb[42].mxu0 %vm108_vm0, %v7825_v25 }
  0x65   :  { %3029 = vbcast.lane.b32.xlu0 %v3019_v16, 272  ;;  %6637 = vmatprep.mubr.msk.f32.mxu0 %vm108_vm0, %v7830_v31  ;;  %v7876_v16 = vld [vmem:[%s11005_s0 + $0x180] sm:$0xff] }
  0x66   :  { %11167 = vst [vmem:[#allocation19_spill] sm:$0xff] %v7876_v16 }
  0x68   :  { %3044 = vbcast.lane.b32.xlu1 %v3038_v37, 264  ;;  %6638 = vmatmul.mubr.msk.f32.gmra.mrb[44].mxu0 %vm108_vm0, %v7841_v43  ;;  %v7951_v43 = vld [vmem:[%s11004_s2 + $0x10] sm:$0xff] }
  0x69   :  { %3040 = vbcast.lane.b32.xlu0 %v3038_v37, 256  ;;  %6640 = vmatprep.mubr.msk.f32.mxu0 %vm108_vm0, %v7846_v49  ;;  %v104_v49 = vld [vmem:[%s11002_s3 + $0x60] sm:$0xff]  ;;  %v3689_v19 = vrot.slane %v7951_v43, %v7464_v10  ;;  %v3708_v14 = vrot.slane %v7951_v43, %v7481_v17  ;;  %v82_v10 = vld [vmem:[%s11005_s0 + $0x1f8] sm:$0xff] }
  0x6c   :  { %3052 = vbcast.lane.b32.xlu1 %v3038_v37, 280  ;;  %6641 = vmatmul.mubr.msk.f32.gmra.mrb[46].mxu0 %vm108_vm0, %v7855_v55  ;;  %v105_v55 = vld [vmem:[%s11002_s3 + $0x68] sm:$0xff] }
  0x6d   :  { %3048 = vbcast.lane.b32.xlu0 %v3038_v37, 272  ;;  %6643 = vmatprep.mubr.msk.f32.mxu0 %vm108_vm0, %v7860_v61  ;;  %v7885_v37 = vld [vmem:[%s11005_s0 + $0x188] sm:$0xff]  ;;  %v6782_v31 = vpack.c.bf16 %v105_v55, %v104_v49  ;;  %v106_v49 = vld [vmem:[%s11002_s3 + $0x70] sm:$0xff]  ;;  %v107_v55 = vld [vmem:[%s11002_s3 + $0x78] sm:$0xff] }
  0x6e   :  { %11168 = vst [vmem:[#allocation20_spill] sm:$0xff] %v7885_v37 }
  0x6f   :  { %6783 = vmatprep.subr.bf16.mxu1 %v6782_v31 }
  0x70   :  { %3063 = vbcast.lane.b32.xlu1 %v3057_v3, 264  ;;  %6644 = vmatmul.mubr.msk.f32.gmra.mrb[48].mxu0 %vm108_vm0, %v7871_v11  ;;  %v7906_v11 = vld [vmem:[%s11005_s0 + $0x1a0] sm:$0xff] }
  0x71   :  { %3059 = vbcast.lane.b32.xlu0 %v3057_v3, 256  ;;  %6646 = vmatprep.mubr.msk.f32.mxu0 %vm108_vm0, %v7876_v16  ;;  %v7901_v16 = vld [vmem:[%s11005_s0 + $0x198] sm:$0xff]  ;;  %11171 = vst [vmem:[#allocation23_spill] sm:$0xff] %v7906_v11 }
  0x72   :  { %11170 = vst [vmem:[#allocation22_spill] sm:$0xff] %v7901_v16  ;;  %6785 = vmatpush3.bf16.msra.mxu1 %v6782_v31  ;;  %v97_v31 = vld [vmem:[%s11002_s3 + $0x28] sm:$0xff] }
  0x74   :  { %3071 = vbcast.lane.b32.xlu1 %v3057_v3, 280  ;;  %6647 = vmatmul.mubr.msk.f32.gmra.mrb[50].mxu0 %vm108_vm0, %v7885_v37 }
  0x75   :  { %3067 = vbcast.lane.b32.xlu0 %v3057_v3, 272  ;;  %6649 = vmatprep.mubr.msk.f32.mxu0 %vm108_vm0, %v7890_v0  ;;  %v7915_v3 = vld [vmem:[%s11005_s0 + $0x1a8] sm:$0xff]  ;;  %v7920_v0 = vld [vmem:[%s11005_s0 + $0x1b0] sm:$0xff] }
  0x76   :  { %11172 = vst [vmem:[#allocation24_spill] sm:$0xff] %v7915_v3  ;;  %11173 = vst [vmem:[#allocation25_spill] sm:$0xff] %v7920_v0 }
  0x78   :  { %3082 = vbcast.lane.b32.xlu1 %v3076_v6, 264  ;;  %6650 = vmatmul.mubr.msk.f32.gmra.mrb[52].mxu0 %vm108_vm0, %v7901_v16  ;;  %v74_v16 = vld [vmem:[%s11005_s0 + $0x1b8] sm:$0xff] }
  0x79   :  { %3078 = vbcast.lane.b32.xlu0 %v3076_v6, 256  ;;  %6652 = vmatprep.mubr.msk.f32.mxu0 %vm108_vm0, %v7906_v11  ;;  %v3095_v11 = vrot.slane %v7705_v59, %v7663_v52 }
  0x7a   :  { %v7922_v37 = vpop.permute.xlu0 %2812  ;;  %v7924_v61 = vpop.permute.xlu1 %2820 }
  0x7b   :  { %11174 = vst [vmem:[#allocation26_spill] sm:$0xff] %v7922_v37  ;;  %11175 = vst [vmem:[#allocation27_spill] sm:$0xff] %v7924_v61  ;;  %v3367_v8 = vmul.f32 %v7922_v37, %v7491_v20  ;;  %v3727_v20 = vrot.slane %v7951_v43, %v7500_v22 }
  0x7c   :  { %3090 = vbcast.lane.b32.xlu1 %v3076_v6, 280  ;;  %6653 = vmatmul.mubr.msk.f32.gmra.mrb[54].mxu0 %vm108_vm0, %v7915_v3  ;;  %v75_v3 = vld [vmem:[%s11005_s0 + $0x1c0] sm:$0xff] }
  0x7d   :  { %3086 = vbcast.lane.b32.xlu0 %v3076_v6, 272  ;;  %6655 = vmatprep.mubr.msk.f32.mxu0 %vm108_vm0, %v7920_v0 }
  0x7e   :  { %v7944_v6 = vpop.permute.xlu1 %2824 }
  0x7f   :  { %11176 = vst [vmem:[#allocation28_spill] sm:$0xff] %v7944_v6  ;;  %v7946_v0 = vpop.permute.xlu0 %2816 }
  0x80   :  { %11177 = vst [vmem:[#allocation29_spill] sm:$0xff] %v7946_v0  ;;  %3101 = vbcast.lane.b32.xlu1 %v3095_v11, 264  ;;  %6656 = vmatmul.mubr.msk.f32.gmra.mrb[56].mxu0 %vm108_vm0, %v74_v16  ;;  %v77_v16 = vld [vmem:[%s11005_s0 + $0x1d0] sm:$0xff] }
  0x81   :  { %3097 = vbcast.lane.b32.xlu0 %v3095_v11, 256  ;;  %6658 = vmatprep.mubr.msk.f32.mxu0 %vm108_vm0, %v75_v3  ;;  %v6786_v3 = vpack.c.bf16 %v107_v55, %v106_v49  ;;  %v96_v49 = vld [vmem:[%s11002_s3 + $0x20] sm:$0xff] }
  0x82   :  { %v7969_v25 = vpop.permute.xlu1 %2835  ;;  %v79_v55 = vld [vmem:[%s11005_s0 + $0x1e0] sm:$0xff] }
  0x83   :  { %11179 = vst [vmem:[#allocation31_spill] sm:$0xff] %v7969_v25  ;;  %v7971_v15 = vpop.permute.xlu0 %2831  ;;  %6787 = vmatprep.subr.bf16.mxu1 %v6786_v3 }
  0x84   :  { %11180 = vst [vmem:[#allocation32_spill] sm:$0xff] %v7971_v15  ;;  %3109 = vbcast.lane.b32.xlu1 %v3095_v11, 280  ;;  %6659 = vmatmul.mubr.msk.f32.gmra.mrb[58].mxu0 %vm108_vm0, %v7958_v21 }
  0x85   :  { %3105 = vbcast.lane.b32.xlu0 %v3095_v11, 272  ;;  %6661 = vmatprep.mubr.msk.f32.mxu0 %vm108_vm0, %v77_v16  ;;  %v6798_v11 = vpack.c.bf16 %v97_v31, %v96_v49  ;;  %v98_v49 = vld [vmem:[%s11002_s3 + $0x30] sm:$0xff] }
  0x86   :  { %v7990_v21 = vpop.permute.xlu1 %2843  ;;  %6789 = vmatpush3.bf16.msra.mxu1 %v6786_v3  ;;  %v99_v3 = vld [vmem:[%s11002_s3 + $0x38] sm:$0xff] }
  0x87   :  { %11181 = vst [vmem:[#allocation33_spill] sm:$0xff] %v7990_v21  ;;  %v7992_v16 = vpop.permute.xlu0 %2839  ;;  %6799 = vmatprep.subr.bf16.mxu1 %v6798_v11 }
  0x88   :  { %11182 = vst [vmem:[#allocation34_spill] sm:$0xff] %v7992_v16  ;;  %3691 = vbcast.lane.b32.xlu1 %v3689_v19, 256  ;;  %6662 = vmatmul.mubr.msk.f32.gmra.mrb[60].mxu0 %vm108_vm0, %v78_v13  ;;  %v81_v13 = vld [vmem:[%s11005_s0 + $0x1f0] sm:$0xff] }
  0x89   :  { %3695 = vbcast.lane.b32.xlu0 %v3689_v19, 264  ;;  %6664 = vmatprep.mubr.msk.f32.mxu0 %vm108_vm0, %v79_v55  ;;  %v6802_v55 = vpack.c.bf16 %v99_v3, %v98_v49  ;;  %v3371_v49 = vmul.f32 %v7971_v15, %v7526_v27  ;;  %v3373_v15 = vmul.f32 %v7992_v16, %v7543_v30 }
  0x8a   :  { %v8010_v31 = vpop.permute.xlu1 %2854  ;;  %6564 = vmatmul.mubr.msk.f32.vlgmr.msra.gmra.mrb[0].mxu1 %vm108_vm0, %v7486_v18  ;;  %v3368_v18 = vmul.f32 %v7946_v0, %v7505_v23  ;;  %v3431_v23 = vsel %vm108_vm0, %v3367_v8, 0.0 }
  0x8b   :  { %11183 = vst [vmem:[#allocation35_spill] sm:$0xff] %v8010_v31  ;;  %v8014_v17 = vpop.permute.xlu0 %2850  ;;  %6801 = vmatpush3.bf16.msra.mxu1 %v6798_v11  ;;  %v3372_v11 = vmul.f32 %v7969_v25, %v7538_v29 }
  0x8c   :  { %11184 = vst [vmem:[#allocation36_spill] sm:$0xff] %v8014_v17  ;;  %3699 = vbcast.lane.b32.xlu1 %v3689_v19, 272  ;;  %6665 = vmatmul.mubr.msk.f32.gmra.mrb[62].mxu0 %vm108_vm0, %v80_v12  ;;  %v3432_v27 = vsel %vm108_vm0, %v3368_v18, 0.0  ;;  %v3375_v29 = vmul.f32 %v8014_v17, %v7559_v33 }
  0x8d   :  { %3710 = vbcast.lane.b32.xlu0 %v3708_v14, 256  ;;  %6667 = vmatprep.mubr.msk.f32.mxu0 %vm108_vm0, %v81_v13  ;;  %v3376_v13 = vmul.f32 %v8010_v31, %v7571_v35  ;;  %v3433_v18 = vadd.f32 %v3432_v27, %v3431_v23  ;;  %v3370_v23 = vmul.f32 %v7944_v6, %v7521_v26  ;;  %v3447_v27 = vsel %vm108_vm0, %v3373_v15, 0.0 }
  0x8e   :  { %v8029_v12 = vpop.permute.xlu1 %2862  ;;  %6803 = vmatprep.subr.bf16.mxu1 %v6802_v55 }
  0x8f   :  { %11185 = vst [vmem:[#allocation37_spill] sm:$0xff] %v8029_v12  ;;  %v8031_v3 = vpop.permute.xlu0 %2858  ;;  %6805 = vmatpush3.bf16.msra.mxu1 %v6802_v55  ;;  %v3369_v55 = vmul.f32 %v7924_v61, %v7510_v24 }
  0x90   :  { %11186 = vst [vmem:[#allocation38_spill] sm:$0xff] %v8031_v3  ;;  %3703 = vbcast.lane.b32.xlu1 %v3689_v19, 280  ;;  %6668 = vmatmul.mubr.msk.f32.gmra.mrb[64].mxu0 %vm108_vm0, %v82_v10  ;;  %v3444_v19 = vsel %vm108_vm0, %v3371_v49, 0.0  ;;  %v3445_v10 = vsel %vm108_vm0, %v3372_v11, 0.0  ;;  %v3457_v49 = vsel %vm108_vm0, %v3375_v29, 0.0  ;;  %v3458_v11 = vsel %vm108_vm0, %v3376_v13, 0.0 }
  0x91   :  { %3718 = vbcast.lane.b32.xlu0 %v3708_v14, 272  ;;  %v3446_v24 = vadd.f32 %v3445_v10, %v3444_v19  ;;  %v3377_v30 = vmul.f32 %v8031_v3, %v7576_v36  ;;  %v3434_v17 = vsel %vm108_vm0, %v3369_v55, 0.0  ;;  %v8070_v29 = vrot.slane %v7951_v43, %v7531_v28 }
  0x92   :  { %v8048_v25 = vpop.permute.xlu1 %2873  ;;  %v3459_v36 = vadd.f32 %v3458_v11, %v3457_v49  ;;  %v3435_v15 = vadd.f32 %v3434_v17, %v3433_v18 }
  0x93   :  { %11187 = vst [vmem:[#allocation39_spill] sm:$0xff] %v8048_v25  ;;  %v8050_v8 = vpop.permute.xlu0 %2869  ;;  %v3380_v35 = vmul.f32 %v8048_v25, %v7604_v41  ;;  %v3460_v10 = vsel %vm108_vm0, %v3377_v30, 0.0  ;;  %v3436_v25 = vsel %vm108_vm0, %v3370_v23, 0.0 }
  0x94   :  { %11188 = vst [vmem:[#allocation40_spill] sm:$0xff] %v8050_v8  ;;  %3714 = vbcast.lane.b32.xlu1 %v3708_v14, 264  ;;  %v3379_v33 = vmul.f32 %v8050_v8, %v7592_v39  ;;  %v3374_v39 = vmul.f32 %v7990_v21, %v7554_v32  ;;  %v3448_v32 = vadd.f32 %v3447_v27, %v3446_v24 }
  0x95   :  { %3729 = vbcast.lane.b32.xlu0 %v3727_v20, 256  ;;  %v3471_v19 = vsel %vm108_vm0, %v3380_v35, 0.0  ;;  %v3378_v8 = vmul.f32 %v8029_v12, %v7587_v38  ;;  %v3461_v17 = vadd.f32 %v3460_v10, %v3459_v36  ;;  %v3437_v24 = vadd.f32 %v3436_v25, %v3435_v15 }
  0x96   :  { %v8066_v41 = vpop.permute.xlu1 %2881  ;;  %v3470_v55 = vsel %vm108_vm0, %v3379_v33, 0.0 }
  0x97   :  { %11189 = vst [vmem:[#allocation41_spill] sm:$0xff] %v8066_v41  ;;  %v8072_v13 = vpop.permute.xlu0 %2877  ;;  %v3472_v33 = vadd.f32 %v3471_v19, %v3470_v55  ;;  %v3382_v35 = vmul.f32 %v8066_v41, %v7620_v44  ;;  %v3462_v23 = vsel %vm108_vm0, %v3378_v8, 0.0 }
  0x98   :  { %11190 = vst [vmem:[#allocation42_spill] sm:$0xff] %v8072_v13  ;;  %3722 = vbcast.lane.b32.xlu1 %v3708_v14, 280  ;;  %v3381_v26 = vmul.f32 %v8072_v13, %v7609_v42  ;;  %v3449_v14 = vsel %vm108_vm0, %v3374_v39, 0.0 }
  0x99   :  { %3737 = vbcast.lane.b32.xlu0 %v3727_v20, 272  ;;  %v3450_v30 = vadd.f32 %v3449_v14, %v3448_v32  ;;  %v3475_v25 = vsel %vm108_vm0, %v3382_v35, 0.0  ;;  %v3765_v32 = vrot.slane %v7951_v43, %v7564_v34 }
  0x9a   :  { %v8083_v49 = vpop.permute.xlu1 %2892  ;;  %v3473_v18 = vsel %vm108_vm0, %v3381_v26, 0.0  ;;  %v3438_v26 = vrot.slane %v3437_v24, 4 }
  0x9b   :  { %11191 = vst [vmem:[#allocation43_spill] sm:$0xff] %v8083_v49  ;;  %v8085_v11 = vpop.permute.xlu0 %2888  ;;  %v3384_v42 = vmul.f32 %v8083_v49, %v7637_v47  ;;  %v3474_v36 = vadd.f32 %v3473_v18, %v3472_v33  ;;  %v3451_v15 = vrot.slane %v3450_v30, 4 }
  0x9c   :  { %11192 = vst [vmem:[#allocation44_spill] sm:$0xff] %v8085_v11  ;;  %3733 = vbcast.lane.b32.xlu1 %v3727_v20, 264  ;;  %v3383_v38 = vmul.f32 %v8085_v11, %v7625_v45  ;;  %v3463_v45 = vadd.f32 %v3462_v23, %v3461_v17  ;;  %v3439_v17 = vadd.f32 %v3438_v26, %v3437_v24 }
  0x9d   :  { %3748 = vbcast.lane.b32.xlu0 %v8070_v29, 256  ;;  %v3484_v27 = vsel %vm108_vm0, %v3384_v42, 0.0  ;;  %v3476_v9 = vadd.f32 %v3475_v25, %v3474_v36  ;;  %v3452_v18 = vadd.f32 %v3451_v15, %v3450_v30  ;;  %v8136_v25 = vrot.slane %v7951_v43, %v7597_v40 }
  0x9e   :  { %v3483_v47 = vsel %vm108_vm0, %v3383_v38, 0.0  ;;  %v8098_v39 = vpop.permute.xlu1 %2900  ;;  %v3464_v59 = vrot.slane %v3463_v45, 4  ;;  %v3440_v30 = vrot.slane %v3439_v17, 2 }
  0x9f   :  { %11193 = vst [vmem:[#allocation45_spill] sm:$0xff] %v8098_v39  ;;  %v3485_v55 = vadd.f32 %v3484_v27, %v3483_v47  ;;  %v8100_v19 = vpop.permute.xlu0 %2896  ;;  %v3386_v44 = vmul.f32 %v8098_v39, %v7653_v50  ;;  %v3477_v47 = vrot.slane %v3476_v9, 4 }
  0xa0   :  { %11194 = vst [vmem:[#allocation46_spill] sm:$0xff] %v8100_v19  ;;  %3741 = vbcast.lane.b32.xlu1 %v3727_v20, 280  ;;  %v3385_v8 = vmul.f32 %v8100_v19, %v7642_v48 }
  0xa1   :  { %3756 = vbcast.lane.b32.xlu0 %v8070_v29, 272  ;;  %v3488_v14 = vsel %vm108_vm0, %v3386_v44, 0.0  ;;  %v3453_v44 = vrot.slane %v3452_v18, 2 }
  0xa2   :  { %v3486_v50 = vsel %vm108_vm0, %v3385_v8, 0.0  ;;  %v8113_v10 = vpop.permute.xlu1 %2911  ;;  %v6811_v8 = vpop.eup %6810 }
  0xa3   :  { %11195 = vst [vmem:[#allocation47_spill] sm:$0xff] %v8113_v10  ;;  %v3487_v20 = vadd.f32 %v3486_v50, %v3485_v55  ;;  %v8116_v33 = vpop.permute.xlu0 %2907  ;;  %v3388_v48 = vmul.f32 %v8113_v10, %v7670_v53  ;;  %6100 = vst.msk [vmem:[%s11006_s4 + $0x20] sm:$0xff] %vm108_vm0, %v6811_v8 }
  0xa4   :  { %11196 = vst [vmem:[#allocation48_spill] sm:$0xff] %v8116_v33  ;;  %3752 = vbcast.lane.b32.xlu1 %v8070_v29, 264  ;;  %v3387_v42 = vmul.f32 %v8116_v33, %v7658_v51  ;;  %v3465_v51 = vadd.f32 %v3464_v59, %v3463_v45  ;;  %v3478_v45 = vadd.f32 %v3477_v47, %v3476_v9 }
  0xa5   :  { %3767 = vbcast.lane.b32.xlu0 %v3765_v32, 256  ;;  %v3497_v35 = vsel %vm108_vm0, %v3388_v48, 0.0  ;;  %v3489_v38 = vadd.f32 %v3488_v14, %v3487_v20 }
  0xa6   :  { %v3496_v23 = vsel %vm108_vm0, %v3387_v42, 0.0  ;;  %v8125_v27 = vpop.permute.xlu1 %2919  ;;  %v3466_v48 = vrot.slane %v3465_v51, 2  ;;  %v3441_v42 = vadd.f32 %v3440_v30, %v3439_v17 }
  0xa7   :  { %11197 = vst [vmem:[#allocation49_spill] sm:$0xff] %v8125_v27  ;;  %v3498_v36 = vadd.f32 %v3497_v35, %v3496_v23  ;;  %v8127_v55 = vpop.permute.xlu0 %2915  ;;  %v3390_v53 = vmul.f32 %v8125_v27, %v7686_v56  ;;  %v3490_v26 = vrot.slane %v3489_v38, 4  ;;  %v3454_v35 = vadd.f32 %v3453_v44, %v3452_v18 }
  0xa8   :  { %11198 = vst [vmem:[#allocation50_spill] sm:$0xff] %v8127_v55  ;;  %3760 = vbcast.lane.b32.xlu1 %v8070_v29, 280  ;;  %v3389_v24 = vmul.f32 %v8127_v55, %v7675_v54  ;;  %v6813_v29 = vpop.eup %6812  ;;  %v3442_v44 = vrot.slane %v3441_v42, 1 }
  0xa9   :  { %3775 = vbcast.lane.b32.xlu0 %v3765_v32, 272  ;;  %v3501_v50 = vsel %vm108_vm0, %v3390_v53, 0.0  ;;  %6101 = vst.msk [vmem:[%s11006_s4 + $0x28] sm:$0xff] %vm108_vm0, %v6813_v29  ;;  %v3455_v8 = vrot.slane %v3454_v35, 1 }
  0xaa   :  { %v3499_v15 = vsel %vm108_vm0, %v3389_v24, 0.0  ;;  %v8140_v56 = vpop.permute.xlu1 %2930  ;;  %v3491_v24 = vadd.f32 %v3490_v26, %v3489_v38  ;;  %v3803_v26 = vrot.slane %v7951_v43, %v7630_v46 }
  0xab   :  { %11199 = vst [vmem:[#allocation51_spill] sm:$0xff] %v8140_v56  ;;  %v3500_v20 = vadd.f32 %v3499_v15, %v3498_v36  ;;  %v8142_v14 = vpop.permute.xlu0 %2926  ;;  %v3392_v54 = vmul.f32 %v8140_v56, %v7700_v58  ;;  %v3467_v36 = vadd.f32 %v3466_v48, %v3465_v51 }
  0xac   :  { %11200 = vst [vmem:[#allocation52_spill] sm:$0xff] %v8142_v14  ;;  %3771 = vbcast.lane.b32.xlu1 %v3765_v32, 264  ;;  %v3391_v59 = vmul.f32 %v8142_v14, %v7691_v57  ;;  %v3479_v57 = vrot.slane %v3478_v45, 2  ;;  %v3492_v15 = vrot.slane %v3491_v24, 2 }
  0xad   :  { %3786 = vbcast.lane.b32.xlu0 %v8136_v25, 256  ;;  %v3502_v23 = vadd.f32 %v3501_v50, %v3500_v20  ;;  %v3510_v53 = vsel %vm108_vm0, %v3392_v54, 0.0  ;;  %v3468_v48 = vrot.slane %v3467_v36, 1 }
  0xae   :  { %v3509_v9 = vsel %vm108_vm0, %v3391_v59, 0.0  ;;  %v8151_v47 = vpop.permute.xlu1 %2938 }
  0xaf   :  { %11201 = vst [vmem:[#allocation53_spill] sm:$0xff] %v8151_v47  ;;  %v3503_v58 = vrot.slane %v3502_v23, 4  ;;  %v3511_v17 = vadd.f32 %v3510_v53, %v3509_v9  ;;  %v8161_v18 = vpop.permute.xlu0 %2934  ;;  %v3394_v38 = vmul.f32 %v8151_v47, %v7721_v62  ;;  %v3480_v62 = vadd.f32 %v3479_v57, %v3478_v45 }
  0xb0   :  { %11202 = vst [vmem:[#allocation54_spill] sm:$0xff] %v8161_v18  ;;  %3779 = vbcast.lane.b32.xlu1 %v3765_v32, 280  ;;  %v3393_v30 = vmul.f32 %v8161_v18, %v7710_v60  ;;  %v3456_v53 = vadd.f32 %v3455_v8, %v3454_v35  ;;  %v3493_v45 = vadd.f32 %v3492_v15, %v3491_v24 }
  0xb1   :  { %3794 = vbcast.lane.b32.xlu0 %v8136_v25, 272  ;;  %v3504_v50 = vadd.f32 %v3503_v58, %v3502_v23  ;;  %v3514_v20 = vsel %vm108_vm0, %v3394_v38, 0.0  ;;  %v3443_v23 = vadd.f32 %v3442_v44, %v3441_v42  ;;  %v3469_v42 = vadd.f32 %v3468_v48, %v3467_v36 }
  0xb2   :  { %v3512_v29 = vsel %vm108_vm0, %v3393_v30, 0.0  ;;  %v8172_v54 = vpop.permute.xlu1 %2949  ;;  %v3822_v44 = vrot.slane %v7951_v43, %v7663_v52  ;;  %v3494_v15 = vrot.slane %v3493_v45, 1 }
  0xb3   :  { %11203 = vst [vmem:[#allocation55_spill] sm:$0xff] %v8172_v54  ;;  %v3513_v32 = vadd.f32 %v3512_v29, %v3511_v17  ;;  %v8174_v51 = vpop.permute.xlu0 %2945  ;;  %v3396_v60 = vmul.f32 %v8172_v54, %v7735_v1  ;;  %v3505_v57 = vrot.slane %v3504_v50, 2  ;;  %v3481_v1 = vrot.slane %v3480_v62, 1 }
  0xb4   :  { %11204 = vst [vmem:[#allocation56_spill] sm:$0xff] %v8174_v51  ;;  %3790 = vbcast.lane.b32.xlu1 %v8136_v25, 264  ;;  %v3395_v59 = vmul.f32 %v8174_v51, %v7726_v63  ;;  %v3656_v24 = vsel %vm3655_vm1, %v3456_v53, %v3443_v23 }
  0xb5   :  { %3805 = vbcast.lane.b32.xlu0 %v3803_v26, 256  ;;  %v3515_v9 = vadd.f32 %v3514_v20, %v3513_v32  ;;  %v3523_v58 = vsel %vm108_vm0, %v3396_v60, 0.0  ;;  %v3506_v20 = vadd.f32 %v3505_v57, %v3504_v50  ;;  %v3658_v23 = vsel %vm3657_vm2, %v3469_v42, %v3656_v24  ;;  %v11212_v42 = vld [vmem:[#allocation3_spill] sm:$0xff] }
  0xb6   :  { %v3522_v17 = vsel %vm108_vm0, %v3395_v59, 0.0  ;;  %v8183_v38 = vpop.permute.xlu1 %2957 }
  0xb7   :  { %11205 = vst [vmem:[#allocation57_spill] sm:$0xff] %v8183_v38  ;;  %v3516_v30 = vrot.slane %v3515_v9, 4  ;;  %v3524_v29 = vadd.f32 %v3523_v58, %v3522_v17  ;;  %v8185_v54 = vpop.permute.xlu0 %2953  ;;  %v3398_v63 = vmul.f32 %v8183_v38, %v7751_v4  ;;  %v3507_v58 = vrot.slane %v3506_v20, 1 }
  0xb8   :  { %11206 = vst [vmem:[#allocation58_spill] sm:$0xff] %v8185_v54  ;;  %3798 = vbcast.lane.b32.xlu1 %v8136_v25, 280  ;;  %v3397_v35 = vmul.f32 %v8185_v54, %v7740_v2  ;;  %v3482_v25 = vadd.f32 %v3481_v1, %v3480_v62  ;;  %v8209_v62 = vld [vmem:[%s11004_s2 + $0x18] sm:$0xff]  ;;  %v11246_v54 = vld [vmem:[#allocation20_spill] sm:$0xff] }
  0xb9   :  { %3813 = vbcast.lane.b32.xlu0 %v3803_v26, 272  ;;  %v3517_v8 = vadd.f32 %v3516_v30, %v3515_v9  ;;  %v3527_v4 = vsel %vm108_vm0, %v3398_v63, 0.0  ;;  %v3495_v9 = vadd.f32 %v3494_v15, %v3493_v45  ;;  %v3841_v45 = vrot.slane %v8209_v62, %v11212_v42 }
  0xba   :  { %v3525_v32 = vsel %vm108_vm0, %v3397_v35, 0.0  ;;  %v8197_v36 = vpop.permute.xlu1 %2968 }
  0xbb   :  { %11207 = vst [vmem:[#allocation59_spill] sm:$0xff] %v8197_v36  ;;  %v3518_v60 = vrot.slane %v3517_v8, 2  ;;  %v3526_v48 = vadd.f32 %v3525_v32, %v3524_v29  ;;  %v8199_v2 = vpop.permute.xlu0 %2964  ;;  %v3400_v59 = vmul.f32 %v8197_v36, %v7765_v7  ;;  %v3660_v7 = vsel %vm3659_vm3, %v3482_v25, %v3658_v23  ;;  %v11211_v29 = vld [vmem:[#allocation5_spill] sm:$0xff]  ;;  %v11216_v23 = vld [vmem:[#allocation8_spill] sm:$0xff] }
  0xbc   :  { %11208 = vst [vmem:[#allocation60_spill] sm:$0xff] %v8199_v2  ;;  %3809 = vbcast.lane.b32.xlu1 %v3803_v26, 264  ;;  %v3399_v43 = vmul.f32 %v8199_v2, %v7756_v5  ;;  %v11245_v2 = vld [vmem:[#allocation19_spill] sm:$0xff] }
  0xbd   :  { %3824 = vbcast.lane.b32.xlu0 %v3822_v44, 256  ;;  %v3519_v50 = vadd.f32 %v3518_v60, %v3517_v8  ;;  %v3528_v53 = vadd.f32 %v3527_v4, %v3526_v48  ;;  %v3536_v5 = vsel %vm108_vm0, %v3400_v59, 0.0  ;;  %v3508_v8 = vadd.f32 %v3507_v58, %v3506_v20 }
  0xbe   :  { %v8211_v57 = vpop.permute.xlu1 %2976  ;;  %v3535_v1 = vsel %vm108_vm0, %v3399_v43, 0.0  ;;  %v3662_v4 = vsel %vm3661_vm4, %v3495_v9, %v3660_v7 }
  0xbf   :  { %11209 = vst [vmem:[#allocation61_spill] sm:$0xff] %v8211_v57  ;;  %v3529_v17 = vrot.slane %v3528_v53, 4  ;;  %v8216_v30 = vpop.permute.xlu0 %2972  ;;  %v3520_v35 = vrot.slane %v3519_v50, 1  ;;  %v3537_v15 = vadd.f32 %v3536_v5, %v3535_v1 }
  0xc0   :  { %11210 = vst [vmem:[#allocation62_spill] sm:$0xff] %v8216_v30  ;;  %3817 = vbcast.lane.b32.xlu1 %v3803_v26, 280  ;;  %v3401_v63 = vmul.f32 %v8216_v30, %v11211_v29  ;;  %v11214_v26 = vld [vmem:[#allocation6_spill] sm:$0xff]  ;;  %v3664_v29 = vsel %vm3663_vm5, %v3508_v8, %v3662_v4 }
  0xc1   :  { %3832 = vbcast.lane.b32.xlu0 %v3822_v44, 272  ;;  %v3530_v24 = vadd.f32 %v3529_v17, %v3528_v53  ;;  %v3402_v48 = vmul.f32 %v8211_v57, %v11214_v26  ;;  %v11217_v53 = vld [vmem:[#allocation7_spill] sm:$0xff]  ;;  %v3521_v58 = vadd.f32 %v3520_v35, %v3519_v50  ;;  %v11221_v35 = vld [vmem:[#allocation9_spill] sm:$0xff] }
  0xc2   :  { %v8222_v32 = vpop.permute.xlu1 %2987  ;;  %v3538_v60 = vsel %vm108_vm0, %v3401_v63, 0.0 }
  0xc3   :  { %11213 = vst [vmem:[#allocation5_spill] sm:$0xff] %v8222_v32  ;;  %v3531_v25 = vrot.slane %v3530_v24, 2  ;;  %v8228_v59 = vpop.permute.xlu0 %2983  ;;  %v3404_v43 = vmul.f32 %v8222_v32, %v11216_v23  ;;  %v3539_v7 = vadd.f32 %v3538_v60, %v3537_v15  ;;  %v3540_v26 = vsel %vm108_vm0, %v3402_v48, 0.0  ;;  %v11222_v15 = vld [vmem:[#allocation4_spill] sm:$0xff] }
  0xc4   :  { %11215 = vst [vmem:[#allocation3_spill] sm:$0xff] %v8228_v59  ;;  %3828 = vbcast.lane.b32.xlu1 %v3822_v44, 264  ;;  %v3403_v20 = vmul.f32 %v8228_v59, %v11217_v53  ;;  %v11220_v53 = vld [vmem:[#allocation10_spill] sm:$0xff]  ;;  %v3666_v8 = vsel %vm3665_vm6, %v3521_v58, %v3664_v29 }
  0xc5   :  { %3843 = vbcast.lane.b32.xlu0 %v3841_v45, 256  ;;  %v3532_v17 = vadd.f32 %v3531_v25, %v3530_v24  ;;  %v3549_v9 = vsel %vm108_vm0, %v3404_v43, 0.0  ;;  %v3860_v25 = vrot.slane %v8209_v62, %v11222_v15  ;;  %v3541_v4 = vadd.f32 %v3540_v26, %v3539_v7 }
  0xc6   :  { %v3548_v1 = vsel %vm108_vm0, %v3403_v20, 0.0  ;;  %v8236_v5 = vpop.permute.xlu1 %2995 }
  0xc7   :  { %11218 = vst [vmem:[#allocation6_spill] sm:$0xff] %v8236_v5  ;;  %v3533_v63 = vrot.slane %v3532_v17, 1  ;;  %v3550_v23 = vadd.f32 %v3549_v9, %v3548_v1  ;;  %v8240_v32 = vpop.permute.xlu0 %2991  ;;  %v3406_v50 = vmul.f32 %v8236_v5, %v11220_v53  ;;  %v11225_v1 = vld [vmem:[#allocation12_spill] sm:$0xff] }
  0xc8   :  { %11219 = vst [vmem:[#allocation8_spill] sm:$0xff] %v8240_v32  ;;  %3836 = vbcast.lane.b32.xlu1 %v3822_v44, 280  ;;  %v3405_v24 = vmul.f32 %v8240_v32, %v11221_v35  ;;  %v11226_v35 = vld [vmem:[#allocation11_spill] sm:$0xff] }
  0xc9   :  { %3851 = vbcast.lane.b32.xlu0 %v3841_v45, 272  ;;  %v3534_v60 = vadd.f32 %v3533_v63, %v3532_v17  ;;  %v3553_v43 = vsel %vm108_vm0, %v3406_v50, 0.0  ;;  %v7326_v63 = vld [vmem:[%s11004_s2] sm:$0xff] }
  0xca   :  { %v3551_v48 = vsel %vm108_vm0, %v3405_v24, 0.0  ;;  %v8251_v20 = vpop.permute.xlu1 %3006 }
  0xcb   :  { %11223 = vst [vmem:[#allocation7_spill] sm:$0xff] %v8251_v20  ;;  %v3552_v9 = vadd.f32 %v3551_v48, %v3550_v23  ;;  %v8253_v44 = vpop.permute.xlu0 %3002  ;;  %v3408_v53 = vmul.f32 %v8251_v20, %v11225_v1  ;;  %v3668_v58 = vsel %vm3667_vm7, %v3534_v60, %v3666_v8  ;;  %v3542_v23 = vrot.slane %v3541_v4, 4  ;;  %v11230_v60 = vld [vmem:[#allocation14_spill] sm:$0xff]  ;;  %v11234_v20 = vld [vmem:[#allocation16_spill] sm:$0xff] }
  0xcc   :  { %11224 = vst [vmem:[#allocation10_spill] sm:$0xff] %v8253_v44  ;;  %3847 = vbcast.lane.b32.xlu1 %v3841_v45, 264  ;;  %v3407_v17 = vmul.f32 %v8253_v44, %v11226_v35  ;;  %v8264_v26 = vadd.f32 %v7326_v63, %v3668_v58  ;;  %v11235_v44 = vld [vmem:[#allocation15_spill] sm:$0xff] }
  0xcd   :  { %3862 = vbcast.lane.b32.xlu0 %v3860_v25, 256  ;;  %v3554_v7 = vadd.f32 %v3553_v43, %v3552_v9  ;;  %v3562_v29 = vsel %vm108_vm0, %v3408_v53, 0.0  ;;  %v11231_v43 = vld [vmem:[#allocation13_spill] sm:$0xff]  ;;  %v3879_v53 = vrot.slane %v8209_v62, %v7500_v22 }
  0xce   :  { %11227 = vst [vmem:[#allocation9_spill] sm:$0xff] %v8264_v26  ;;  %v3561_v50 = vsel %vm108_vm0, %v3407_v17, 0.0  ;;  %v8267_v24 = vpop.permute.xlu1 %3014  ;;  %6096 = vst.msk [vmem:[%s11006_s4] sm:$0xff] %vm108_vm0, %v8264_v26  ;;  %v3543_v17 = vadd.f32 %v3542_v23, %v3541_v4 }
  0xcf   :  { %11228 = vst [vmem:[#allocation4_spill] sm:$0xff] %v8267_v24  ;;  %v3555_v48 = vrot.slane %v3554_v7, 4  ;;  %v3563_v1 = vadd.f32 %v3562_v29, %v3561_v50  ;;  %v8269_v35 = vpop.permute.xlu0 %3010  ;;  %v3410_v8 = vmul.f32 %v8267_v24, %v11230_v60 }
  0xd0   :  { %11229 = vst [vmem:[#allocation12_spill] sm:$0xff] %v8269_v35  ;;  %3855 = vbcast.lane.b32.xlu1 %v3841_v45, 280  ;;  %v3409_v9 = vmul.f32 %v8269_v35, %v11231_v43  ;;  %v7406_v43 = vmov 1966171168   ;;  %v3544_v23 = vrot.slane %v3543_v17, 2 }
  0xd1   :  { %3870 = vbcast.lane.b32.xlu0 %v3860_v25, 272  ;;  %v3556_v58 = vadd.f32 %v3555_v48, %v3554_v7  ;;  %v3566_v63 = vsel %vm108_vm0, %v3410_v8, 0.0  ;;  %v850_v35 = vunpack.c.l.s4 %v7406_v43  ;;  %v11238_v43 = vld [vmem:[#allocation17_spill] sm:$0xff] }
  0xd2   :  { %v3564_v29 = vsel %vm108_vm0, %v3409_v9, 0.0  ;;  %v8284_v50 = vpop.permute.xlu1 %3025 }
  0xd3   :  { %11232 = vst [vmem:[#allocation11_spill] sm:$0xff] %v8284_v50  ;;  %v3565_v60 = vadd.f32 %v3564_v29, %v3563_v1  ;;  %v8286_v24 = vpop.permute.xlu0 %3021  ;;  %v3412_v45 = vmul.f32 %v8284_v50, %v11234_v20  ;;  %v3557_v48 = vrot.slane %v3556_v58, 2  ;;  %v851_v20 = vunpack.c.0.s8 %v850_v35 }
  0xd4   :  { %11233 = vst [vmem:[#allocation14_spill] sm:$0xff] %v8286_v24  ;;  %3866 = vbcast.lane.b32.xlu1 %v3860_v25, 264  ;;  %v3411_v32 = vmul.f32 %v8286_v24, %v11235_v44  ;;  %v8302_v44 = vrot.slane %v8209_v62, %v7531_v28 }
  0xd5   :  { %3881 = vbcast.lane.b32.xlu0 %v3879_v53, 256  ;;  %v3567_v4 = vadd.f32 %v3566_v63, %v3565_v60  ;;  %v3575_v7 = vsel %vm108_vm0, %v3412_v45, 0.0  ;;  %v11239_v60 = vld [vmem:[#allocation18_spill] sm:$0xff]  ;;  %v3545_v45 = vadd.f32 %v3544_v23, %v3543_v17  ;;  %v3558_v24 = vadd.f32 %v3557_v48, %v3556_v58 }
  0xd6   :  { %v3574_v8 = vsel %vm108_vm0, %v3411_v32, 0.0  ;;  %v8294_v1 = vpop.permute.xlu1 %3033 }
  0xd7   :  { %11236 = vst [vmem:[#allocation13_spill] sm:$0xff] %v8294_v1  ;;  %v3568_v9 = vrot.slane %v3567_v4, 4  ;;  %v8296_v29 = vpop.permute.xlu0 %3029  ;;  %v3576_v50 = vadd.f32 %v3575_v7, %v3574_v8  ;;  %v3414_v32 = vmul.f32 %v8294_v1, %v11239_v60  ;;  %v11242_v7 = vld [vmem:[#allocation2_spill] sm:$0xff]  ;;  %v3546_v23 = vrot.slane %v3545_v45, 1 }
  0xd8   :  { %11237 = vst [vmem:[#allocation16_spill] sm:$0xff] %v8296_v29  ;;  %3874 = vbcast.lane.b32.xlu1 %v3860_v25, 280  ;;  %v3413_v5 = vmul.f32 %v8296_v29, %v11238_v43  ;;  %v8312_v8 = vsub.s32 %v851_v20, %v11242_v7  ;;  %v3559_v48 = vrot.slane %v3558_v24, 1  ;;  %v8337_v60 = vrot.slane %v8209_v62, %v7663_v52 }
  0xd9   :  { %3889 = vbcast.lane.b32.xlu0 %v3879_v53, 272  ;;  %v3569_v63 = vadd.f32 %v3568_v9, %v3567_v4  ;;  %v8317_v4 = vrot.slane %v8209_v62, %v7564_v34  ;;  %v3579_v58 = vsel %vm108_vm0, %v3414_v32, 0.0  ;;  %v8325_v9 = vrot.slane %v8209_v62, %v7597_v40 }
  0xda   :  { %v3577_v59 = vsel %vm108_vm0, %v3413_v5, 0.0  ;;  %v8307_v30 = vpop.permute.xlu1 %3044  ;;  %v89_v5 = vld [vmem:[%s11004_s2 + $0x20] sm:$0xff]  ;;  %v3547_v14 = vadd.f32 %v3546_v23, %v3545_v45  ;;  %v3560_v27 = vadd.f32 %v3559_v48, %v3558_v24 }
  0xdb   :  { %11240 = vst [vmem:[#allocation15_spill] sm:$0xff] %v8307_v30  ;;  %v3570_v25 = vrot.slane %v3569_v63, 2  ;;  %v8309_v35 = vpop.permute.xlu0 %3040  ;;  %v3578_v43 = vadd.f32 %v3577_v59, %v3576_v50  ;;  %v8329_v59 = vrot.slane %v8209_v62, %v7630_v46  ;;  %v8340_v32 = vrot.slane %v89_v5, %v11212_v42 }
  0xdc   :  { %11241 = vst [vmem:[#allocation17_spill] sm:$0xff] %v8309_v35  ;;  %3885 = vbcast.lane.b32.xlu1 %v3879_v53, 264  ;;  %v8346_v7 = vrot.slane %v89_v5, %v7500_v22  ;;  %v3415_v36 = vmul.f32 %v8309_v35, %v11245_v2  ;;  %v3416_v62 = vmul.f32 %v8307_v30, %v11246_v54  ;;  %v11249_v35 = vld [vmem:[#allocation21_spill] sm:$0xff] }
  0xdd   :  { %3900 = vbcast.lane.b32.xlu0 %v8302_v44, 256  ;;  %v3571_v17 = vadd.f32 %v3570_v25, %v3569_v63  ;;  %v8343_v25 = vrot.slane %v89_v5, %v11222_v15  ;;  %v3580_v57 = vadd.f32 %v3579_v58, %v3578_v43  ;;  %v8362_v54 = vrot.slane %v89_v5, %v7531_v28 }
  0xde   :  { %v8331_v50 = vpop.permute.xlu1 %3052  ;;  %v8365_v58 = vrot.slane %v89_v5, %v7564_v34 }
  0xdf   :  { %11243 = vst [vmem:[#allocation18_spill] sm:$0xff] %v8331_v50  ;;  %v6554_v20 = vpop.f32.mrb[0].mxu0  ;;  %v8333_v63 = vpop.permute.xlu0 %3048  ;;  %v3572_v18 = vrot.slane %v3571_v17, 1  ;;  %v3581_v24 = vrot.slane %v3580_v57, 4 }
  0xe0   :  { %11244 = vst [vmem:[#allocation63_spill] sm:$0xff] %v8333_v63  ;;  %v904_v29 = vrot.slane %v6554_v20, %v8312_v8  ;;  %v181_v1 = vpop.f32.mrb[1].mxu0  ;;  %3893 = vbcast.lane.b32.xlu1 %v3879_v53, 280  ;;  %v897_v38 = vcombine.high %v6554_v20, %v6554_v20  ;;  %v3417_v30 = vmul.f32 %v8333_v63, %v11249_v35 }
  0xe1   :  { %v848_v51 = vcombine.high %v181_v1, %v181_v1  ;;  %v855_v47 = vrot.slane %v181_v1, %v8312_v8  ;;  %3908 = vbcast.lane.b32.xlu0 %v8302_v44, 272  ;;  %v8368_v1 = vrot.slane %v89_v5, %v7597_v40  ;;  %v3573_v20 = vadd.f32 %v3572_v18, %v3571_v17 }
  0xe2   :  { %v912_v56 = vcombine.high %v904_v29, %v904_v29  ;;  %v920_v55 = vrot.slane %v904_v29, %v8312_v8  ;;  %v8356_v53 = vpop.permute.xlu1 %3063  ;;  %v3587_v29 = vsel %vm108_vm0, %v3415_v36, 0.0  ;;  %v8375_v23 = vrot.slane %v897_v38, %v8312_v8 }
  0xe3   :  { %11247 = vst [vmem:[#allocation19_spill] sm:$0xff] %v8356_v53  ;;  %v862_v43 = vrot.slane %v848_v51, %v8312_v8  ;;  %v8359_v2 = vpop.permute.xlu0 %3059  ;;  %v3588_v51 = vsel %vm108_vm0, %v3416_v62, 0.0  ;;  %v863_v48 = vcombine.high %v855_v47, %v855_v47  ;;  %v3669_v36 = vsel %vm3655_vm1, %v3560_v27, %v3547_v14  ;;  %v8403_v27 = vld [vmem:[%s11004_s2 + $0x30] ss:$0 sm:$0xff] }
  0xe4   :  { %11248 = vst [vmem:[#allocation20_spill] sm:$0xff] %v8359_v2  ;;  %v934_v45 = vrot.slane %v912_v56, %v8312_v8  ;;  %3904 = vbcast.lane.b32.xlu1 %v8302_v44, 264  ;;  %v90_v56 = vld [vmem:[%s11004_s2 + $0x28] sm:$0xff]  ;;  %v942_v33 = vcombine.high %v920_v55, %v920_v55  ;;  %v8387_v38 = vrot.slane %v89_v5, %v7630_v46 }
  0xe5   :  { %3919 = vbcast.lane.b32.xlu0 %v8317_v4, 256  ;;  %v864_v10 = vcombine.high %v862_v43, %v862_v43  ;;  %v8390_v62 = vrot.slane %v855_v47, %v8312_v8  ;;  %v3589_v17 = vadd.f32 %v3588_v51, %v3587_v29  ;;  %v8395_v35 = vrot.slane %v89_v5, %v7663_v52  ;;  %v11252_v51 = vld [vmem:[#allocation22_spill] sm:$0xff] }
  0xe6   :  { %v8384_v19 = vpop.permute.xlu1 %3071  ;;  %v8398_v63 = vrot.slane %v90_v56, %v11212_v42  ;;  %v944_v14 = vcombine.high %v934_v45, %v934_v45  ;;  %v8406_v11 = vrot.slane %v862_v43, %v8312_v8  ;;  %v3582_v29 = vadd.f32 %v3581_v24, %v3580_v57 }
  0xe7   :  { %11250 = vst [vmem:[#allocation21_spill] sm:$0xff] %v8384_v19  ;;  %v6576_v18 = vpop.f32.mrb[2].mxu0  ;;  %v8392_v39 = vpop.permute.xlu0 %3067  ;;  %v3418_v5 = vmul.f32 %v8331_v50, %v11252_v51  ;;  %v8414_v49 = vrot.slane %v863_v48, %v8312_v8  ;;  %v8418_v13 = vsel %vm3657_vm2, %v3573_v20, %v3669_v36  ;;  %v3590_v43 = vsel %vm108_vm0, %v3417_v30, 0.0 }
  0xe8   :  { %11251 = vst [vmem:[#allocation64_spill] sm:$0xff] %v8392_v39  ;;  %3912 = vbcast.lane.b32.xlu1 %v8302_v44, 280  ;;  %v527_v47 = vpop.f32.mrb[3].mxu0  ;;  %v8422_v44 = vrot.slane %v920_v55, %v11212_v42  ;;  %v8425_v57 = vrot.slane %v934_v45, %v11212_v42  ;;  %v8428_v24 = vrot.slane %v942_v33, %v11212_v42  ;;  %v3583_v3 = vrot.slane %v3582_v29, 2 }
  0xe9   :  { %3927 = vbcast.lane.b32.xlu0 %v8317_v4, 272  ;;  %v8431_v51 = vrot.slane %v864_v10, %v8312_v8  ;;  %v893_v20 = vcombine.high %v8390_v62, %v8390_v62  ;;  %v949_v30 = vrot.slane %v8390_v62, %v11212_v42  ;;  %v533_v55 = vadd.f32 %v6576_v18, %v8403_v27 }
  0xea   :  { %v8433_v48 = vpop.permute.xlu1 %3082  ;;  %v528_v36 = vadd.f32 %v8403_v27, %v527_v47  ;;  %v8444_v33 = vrot.slane %v944_v14, %v11212_v42  ;;  %v895_v62 = vcombine.high %v8414_v49, %v8414_v49  ;;  %v3591_v10 = vadd.f32 %v3590_v43, %v3589_v17  ;;  %v11257_v17 = vld [vmem:[#allocation23_spill] sm:$0xff] }
  0xeb   :  { %11253 = vst [vmem:[#allocation22_spill] sm:$0xff] %v8433_v48  ;;  %v6579_v45 = vpop.f32.mrb[4].mxu0  ;;  %v8441_v56 = vpop.permute.xlu0 %3078  ;;  %v1027_v18 = vadd.f32 %v949_v30, %v533_v55  ;;  %v3584_v0 = vadd.f32 %v3583_v3, %v3582_v29  ;;  %v11258_v3 = vld [vmem:[#allocation24_spill] sm:$0xff] }
  0xec   :  { %11254 = vst [vmem:[#allocation65_spill] sm:$0xff] %v8441_v56  ;;  %v543_v50 = vadd.f32 %v6579_v45, %v8403_v27  ;;  %3923 = vbcast.lane.b32.xlu1 %v8317_v4, 264  ;;  %v537_v41 = vpop.f32.mrb[5].mxu0  ;;  %v1026_v47 = vadd.f32 %v949_v30, %v528_v36  ;;  %v3592_v45 = vsel %vm108_vm0, %v3418_v5, 0.0  ;;  %v953_v36 = vrot.slane %v8414_v49, %v11212_v42 }
  0xed   :  { %3938 = vbcast.lane.b32.xlu0 %v8325_v9, 256  ;;  %v538_v12 = vadd.f32 %v8403_v27, %v537_v41  ;;  %v6205_v21 = vmul.f32 -1.442695, %v1027_v18  ;;  %v3419_v5 = vmul.f32 %v8359_v2, %v11257_v17  ;;  %v3420_v29 = vmul.f32 %v8356_v53, %v11258_v3  ;;  %v11261_v17 = vld [vmem:[#allocation25_spill] sm:$0xff] }
  0xee   :  { %v1029_v31 = vadd.f32 %v949_v30, %v543_v50  ;;  %v8457_v16 = vpop.permute.xlu1 %3090  ;;  %v6204_v61 = vmul.f32 -1.442695, %v1026_v47  ;;  %v8472_v49 = vrot.slane %v893_v20, %v11212_v42 }
  0xef   :  { %11255 = vst [vmem:[#allocation66_spill] sm:$0xff] %v8457_v16  ;;  %v1028_v6 = vadd.f32 %v949_v30, %v538_v12  ;;  %v6582_v37 = vpop.f32.mrb[6].mxu0  ;;  %v8459_v55 = vpop.permute.xlu0 %3086  ;;  %6814 = vpow2.f32 %v6205_v21  ;;  %v8478_v30 = vrot.slane %v8406_v11, %v11212_v42 }
  0xf0   :  { %11256 = vst [vmem:[#allocation67_spill] sm:$0xff] %v8459_v55  ;;  %v6207_v41 = vmul.f32 -1.442695, %v1029_v31  ;;  %v553_v26 = vadd.f32 %v6582_v37, %v8403_v27  ;;  %3931 = vbcast.lane.b32.xlu1 %v8317_v4, 280  ;;  %v547_v50 = vpop.f32.mrb[7].mxu0  ;;  %6816 = vpow2.f32 %v6204_v61  ;;  %v3593_v31 = vadd.f32 %v3592_v45, %v3591_v10 }
  0xf1   :  { %v6206_v43 = vmul.f32 -1.442695, %v1028_v6  ;;  %3946 = vbcast.lane.b32.xlu0 %v8325_v9, 272  ;;  %v548_v12 = vadd.f32 %v8403_v27, %v547_v50  ;;  %v3585_v6 = vrot.slane %v3584_v0, 1 }
  0xf2   :  { %v1031_v37 = vadd.f32 %v953_v36, %v553_v26  ;;  %v8474_v4 = vpop.permute.xlu1 %3101  ;;  %6818 = vpow2.f32 %v6207_v41  ;;  %v3600_v26 = vsel %vm108_vm0, %v3419_v5, 0.0  ;;  %v3601_v41 = vsel %vm108_vm0, %v3420_v29, 0.0 }
  0xf3   :  { %11259 = vst [vmem:[#allocation23_spill] sm:$0xff] %v8474_v4  ;;  %v1030_v21 = vadd.f32 %v953_v36, %v548_v12  ;;  %v6585_v18 = vpop.f32.mrb[8].mxu0  ;;  %v8480_v47 = vpop.permute.xlu0 %3097  ;;  %6820 = vpow2.f32 %v6206_v43  ;;  %v3421_v12 = vmul.f32 %v8392_v39, %v11261_v17  ;;  %v8492_v43 = vrot.slane %v8431_v51, %v11212_v42 }
  0xf4   :  { %11260 = vst [vmem:[#allocation24_spill] sm:$0xff] %v8480_v47  ;;  %v6209_v50 = vmul.f32 -1.442695, %v1031_v37  ;;  %v563_v20 = vadd.f32 %v6585_v18, %v8403_v27  ;;  %3942 = vbcast.lane.b32.xlu1 %v8325_v9, 264  ;;  %v557_v61 = vpop.f32.mrb[9].mxu0  ;;  %v3594_v37 = vrot.slane %v3593_v31, 4  ;;  %v8497_v5 = vrot.slane %v895_v62, %v11212_v42 }
  0xf5   :  { %v6208_v10 = vmul.f32 -1.442695, %v1030_v21  ;;  %3957 = vbcast.lane.b32.xlu0 %v8329_v59, 256  ;;  %v558_v45 = vadd.f32 %v8403_v27, %v557_v61  ;;  %v3586_v21 = vadd.f32 %v3585_v6, %v3584_v0  ;;  %v11264_v6 = vld [vmem:[#allocation30_spill] sm:$0xff] }
  0xf6   :  { %6822 = vpow2.f32 %v6209_v50  ;;  %v1033_v3 = vadd.f32 %v953_v36, %v563_v20  ;;  %v8494_v18 = vpop.permute.xlu1 %3109  ;;  %v3602_v50 = vadd.f32 %v3601_v41, %v3600_v26  ;;  %v7327_v20 = vld [vmem:[%s11005_s0 + $0x1c0] sm:$0xff] }
  0xf7   :  { %11262 = vst [vmem:[#allocation25_spill] sm:$0xff] %v8494_v18  ;;  %6824 = vpow2.f32 %v6208_v10  ;;  %v1032_v61 = vadd.f32 %v953_v36, %v558_v45  ;;  %v6588_v14 = vpop.f32.mrb[10].mxu0  ;;  %v8499_v29 = vpop.permute.xlu0 %3105  ;;  %v3423_v62 = vmul.f32 %v7327_v20, %v8441_v56  ;;  %v3603_v36 = vsel %vm108_vm0, %v3421_v12, 0.0 }
  0xf8   :  { %11263 = vst [vmem:[#allocation68_spill] sm:$0xff] %v8499_v29  ;;  %v6211_v2 = vmul.f32 -1.442695, %v1033_v3  ;;  %v573_v17 = vadd.f32 %v6588_v14, %v8403_v27  ;;  %3950 = vbcast.lane.b32.xlu1 %v8325_v9, 280  ;;  %v567_v39 = vpop.f32.mrb[11].mxu0  ;;  %v3424_v14 = vmul.f32 %v8433_v48, %v11264_v6  ;;  %v11265_v9 = vcombine.high %v8406_v11, %v8406_v11  ;;  %v7328_v11 = vld [vmem:[%s11005_s0 + $0x1b8] sm:$0xff] }
  0xf9   :  { %v6210_v53 = vmul.f32 -1.442695, %v1032_v61  ;;  %3965 = vbcast.lane.b32.xlu0 %v8329_v59, 272  ;;  %v568_v0 = vadd.f32 %v8403_v27, %v567_v39  ;;  %v8519_v45 = vadd.f32 %v3594_v37, %v3593_v31  ;;  %v6815_v3 = vpop.eup %6814  ;;  %v8525_v39 = vsel %vm3659_vm3, %v3586_v21, %v8418_v13 }
  0xfa   :  { %v8516_v26 = vrot.slane %v11265_v9, %v11212_v42  ;;  %6826 = vpow2.f32 %v6211_v2  ;;  %v1035_v10 = vadd.f32 %v8472_v49, %v573_v17  ;;  %v8521_v41 = vpop.permute.xlu1 %3691  ;;  %v3422_v2 = vmul.f32 %v7328_v11, %v8384_v19  ;;  %v6817_v31 = vpop.eup %6816 }
  0xfb   :  { %11266 = vst [vmem:[#allocation30_spill] sm:$0xff] %v8521_v41  ;;  %6828 = vpow2.f32 %v6210_v53  ;;  %v1034_v12 = vadd.f32 %v8472_v49, %v568_v0  ;;  %v6591_v61 = vpop.f32.mrb[12].mxu0  ;;  %v8532_v17 = vpop.permute.xlu0 %3695  ;;  %v1283_v37 = vadd.f32 1.0, %v6815_v3  ;;  %v3604_v21 = vadd.f32 %v3603_v36, %v3602_v50  ;;  %v7329_v50 = vld [vmem:[%s11005_s0 + $0x1d0] sm:$0xff] }
  0xfc   :  { %11267 = vst [vmem:[#allocation69_spill] sm:$0xff] %v8532_v17  ;;  %v583_v20 = vadd.f32 %v6591_v61, %v8403_v27  ;;  %3961 = vbcast.lane.b32.xlu1 %v8329_v59, 264  ;;  %v577_v13 = vpop.f32.mrb[13].mxu0  ;;  %v3613_v53 = vsel %vm108_vm0, %v3423_v62, 0.0  ;;  %v6819_v0 = vpop.eup %6818  ;;  %v1282_v6 = vadd.f32 1.0, %v6817_v31  ;;  %v3614_v11 = vsel %vm108_vm0, %v3424_v14, 0.0 }
  0xfd   :  { %v6213_v9 = vmul.f32 -1.442695, %v1035_v10  ;;  %3976 = vbcast.lane.b32.xlu0 %v8337_v60, 256  ;;  %v578_v41 = vadd.f32 %v8403_v27, %v577_v13  ;;  %v6821_v17 = vpop.eup %6820  ;;  %6830 = vrcp.f32 %v1283_v37  ;;  %v1285_v3 = vadd.f32 1.0, %v6819_v0 }
  0xfe   :  { %v1037_v61 = vadd.f32 %v8472_v49, %v583_v20  ;;  %v3425_v62 = vmul.f32 %v7329_v50, %v8459_v55  ;;  %v8545_v36 = vpop.permute.xlu1 %3699  ;;  %6832 = vrcp.f32 %v1282_v6  ;;  %v1284_v10 = vadd.f32 1.0, %v6821_v17 }
  0xff   :  { %11268 = vst [vmem:[#allocation70_spill] sm:$0xff] %v8545_v36  ;;  %v1036_v31 = vadd.f32 %v8472_v49, %v578_v41  ;;  %v6594_v13 = vpop.f32.mrb[14].mxu0  ;;  %v3605_v14 = vsel %vm108_vm0, %v3422_v2, 0.0  ;;  %v8549_v56 = vpop.permute.xlu0 %3710  ;;  %6834 = vrcp.f32 %v1285_v3  ;;  %v6212_v20 = vmul.f32 -1.442695, %v1034_v12 }
 0x100   :  { %11269 = vst [vmem:[#allocation71_spill] sm:$0xff] %v8549_v56  ;;  %v6823_v37 = vpop.eup %6822  ;;  %v593_v0 = vadd.f32 %v6594_v13, %v8403_v27  ;;  %3969 = vbcast.lane.b32.xlu1 %v8329_v59, 280  ;;  %v587_v48 = vpop.f32.mrb[15].mxu0  ;;  %v3615_v50 = vadd.f32 %v3614_v11, %v3613_v53  ;;  %6836 = vrcp.f32 %v1284_v10  ;;  %v3616_v41 = vsel %vm108_vm0, %v3425_v62, 0.0  ;;  %v7330_v10 = vld [vmem:[%s11005_s0 + $0x1d8] sm:$0xff] }
 0x101   :  { %v6825_v55 = vpop.eup %6824  ;;  %v1287_v6 = vadd.f32 1.0, %v6823_v37  ;;  %3984 = vbcast.lane.b32.xlu0 %v8337_v60, 272  ;;  %v588_v49 = vadd.f32 %v8403_v27, %v587_v48  ;;  %6838 = vpow2.f32 %v6213_v9  ;;  %v6215_v17 = vmul.f32 -1.442695, %v1037_v61 }
 0x102   :  { %v1286_v2 = vadd.f32 1.0, %v6825_v55  ;;  %v1039_v12 = vadd.f32 %v8497_v5, %v593_v0  ;;  %v8557_v3 = vpop.permute.xlu1 %3703  ;;  %v3596_v59 = vrot.slane %v8519_v45, 2  ;;  %v3426_v48 = vmul.f32 %v7330_v10, %v8457_v16 }
 0x103   :  { %11270 = vst [vmem:[#allocation72_spill] sm:$0xff] %v8557_v3  ;;  %6840 = vrcp.f32 %v1287_v6  ;;  %v1038_v53 = vadd.f32 %v8497_v5, %v588_v49  ;;  %v6597_v11 = vpop.f32.mrb[16].mxu0  ;;  %v8565_v62 = vpop.permute.xlu0 %3718  ;;  %v8567_v9 = vadd.f32 %v3605_v14, %v3604_v21  ;;  %v3617_v37 = vadd.f32 %v3616_v41, %v3615_v50 }
 0x104   :  { %11271 = vst [vmem:[#allocation73_spill] sm:$0xff] %v8565_v62  ;;  %v6827_v55 = vpop.eup %6826  ;;  %6842 = vrcp.f32 %v1286_v2  ;;  %v603_v61 = vadd.f32 %v6597_v11, %v8403_v27  ;;  %3980 = vbcast.lane.b32.xlu1 %v8337_v60, 264  ;;  %v597_v13 = vpop.f32.mrb[17].mxu0  ;;  %v6214_v49 = vmul.f32 -1.442695, %v1036_v31  ;;  %v3618_v41 = vsel %vm108_vm0, %v3426_v48, 0.0 }
 0x105   :  { %v6829_v0 = vpop.eup %6828  ;;  %v1289_v6 = vadd.f32 1.0, %v6827_v55  ;;  %6844 = vpow2.f32 %v6212_v20  ;;  %4125 = vbcast.lane.b32.xlu0 %v8340_v32, 256  ;;  %v598_v10 = vadd.f32 %v8403_v27, %v597_v13  ;;  %v6217_v62 = vmul.f32 -1.442695, %v1039_v12 }
 0x106   :  { %v1288_v56 = vadd.f32 1.0, %v6829_v0  ;;  %6846 = vpow2.f32 %v6215_v17  ;;  %v1041_v21 = vadd.f32 %v8497_v5, %v603_v61  ;;  %v8574_v14 = vpop.permute.xlu1 %3714  ;;  %v6216_v2 = vmul.f32 -1.442695, %v1038_v53 }
 0x107   :  { %11272 = vst [vmem:[#allocation74_spill] sm:$0xff] %v8574_v14  ;;  %6848 = vrcp.f32 %v1289_v6  ;;  %v1040_v11 = vadd.f32 %v8497_v5, %v598_v10  ;;  %v6600_v50 = vpop.f32.mrb[18].mxu0  ;;  %v8578_v20 = vpop.permute.xlu0 %3729  ;;  %v3619_v12 = vadd.f32 %v3618_v41, %v3617_v37  ;;  %v8583_v0 = vadd.f32 %v3596_v59, %v8519_v45 }
 0x108   :  { %11273 = vst [vmem:[#allocation75_spill] sm:$0xff] %v8578_v20  ;;  %v6831_v31 = vpop.eup %6830  ;;  %6850 = vrcp.f32 %v1288_v56  ;;  %v6219_v55 = vmul.f32 -1.442695, %v1041_v21  ;;  %v613_v13 = vadd.f32 %v6600_v50, %v8403_v27  ;;  %3988 = vbcast.lane.b32.xlu1 %v8337_v60, 280  ;;  %v607_v17 = vpop.f32.mrb[19].mxu0  ;;  %v3607_v56 = vrot.slane %v8567_v9, 4 }
 0x109   :  { %v6833_v61 = vpop.eup %6832  ;;  %6852 = vpow2.f32 %v6214_v49  ;;  %v6218_v5 = vmul.f32 -1.442695, %v1040_v11  ;;  %4133 = vbcast.lane.b32.xlu0 %v8340_v32, 272  ;;  %v608_v53 = vadd.f32 %v8403_v27, %v607_v17  ;;  %v7331_v60 = vld [vmem:[%s11005_s0] sm:$0xff]  ;;  %v3620_v17 = vrot.slane %v3619_v12, 4 }
 0x10a   :  { %v6835_v48 = vpop.eup %6834  ;;  %6854 = vpow2.f32 %v6217_v62  ;;  %v1043_v6 = vadd.f32 %v8478_v30, %v613_v13  ;;  %v8592_v37 = vmul.f32 %v7331_v60, %v6833_v61  ;;  %v8594_v45 = vpop.permute.xlu1 %3722  ;;  %v7332_v62 = vld [vmem:[%s11005_s0 + $0x8] sm:$0xff]  ;;  %v7333_v11 = vld [vmem:[%s11005_s0 + $0x1e0] sm:$0xff] }
 0x10b   :  { %11274 = vst [vmem:[#allocation76_spill] sm:$0xff] %v8594_v45  ;;  %v6837_v59 = vpop.eup %6836  ;;  %6856 = vpow2.f32 %v6216_v2  ;;  %v1042_v49 = vadd.f32 %v8478_v30, %v608_v53  ;;  %v8600_v10 = vmul.f32 %v7332_v62, %v6831_v31  ;;  %v6603_v21 = vpop.f32.mrb[20].mxu0  ;;  %v3427_v50 = vmul.f32 %v7333_v11, %v8480_v47 }
 0x10c   :  { %v8606_v41 = vpop.permute.xlu0 %3737  ;;  %v6839_v13 = vpop.eup %6838  ;;  %6858 = vpow2.f32 %v6219_v55  ;;  %v6221_v2 = vmul.f32 -1.442695, %v1043_v6  ;;  %6678 = vmatprep.mubr.msk.f32.mxu1 %vm108_vm0, %v8592_v37  ;;  %v623_v61 = vadd.f32 %v6603_v21, %v8403_v27  ;;  %4129 = vbcast.lane.b32.xlu1 %v8340_v32, 264  ;;  %v8619_v11 = vadd.f32 %v3607_v56, %v8567_v9  ;;  %v7335_v9 = vld [vmem:[%s11005_s0 + $0x18] sm:$0xff] }
 0x10d   :  { %11275 = vst [vmem:[#allocation77_spill] sm:$0xff] %v8606_v41  ;;  %v617_v31 = vpop.f32.mrb[21].mxu0  ;;  %v8612_v53 = vpop.eup %6840  ;;  %v1291_v60 = vadd.f32 1.0, %v6839_v13  ;;  %6860 = vpow2.f32 %v6218_v5  ;;  %v6220_v62 = vmul.f32 -1.442695, %v1042_v49  ;;  %6679 = vmatmul.mubr.msk.f32.vlgmr.msra.gmra.mrb[2].mxu1 %vm108_vm0, %v8600_v10  ;;  %4144 = vbcast.lane.b32.xlu0 %v8343_v25, 256  ;;  %v8634_v56 = vmul.f32 %v7335_v9, %v6835_v48 }
 0x10e   :  { %v618_v55 = vadd.f32 %v8403_v27, %v617_v31  ;;  %v6843_v6 = vpop.eup %6842  ;;  %6862 = vpow2.f32 %v6221_v2  ;;  %v1045_v21 = vadd.f32 %v8478_v30, %v623_v61  ;;  %v7334_v13 = vld [vmem:[%s11005_s0 + $0x10] sm:$0xff]  ;;  %v8627_v49 = vpop.permute.xlu1 %3733  ;;  %v3626_v31 = vsel %vm108_vm0, %v3427_v50, 0.0  ;;  %v7336_v2 = vld [vmem:[%s11005_s0 + $0x1e8] sm:$0xff] }
 0x10f   :  { %v8625_v5 = vmul.f32 %v7334_v13, %v6837_v59  ;;  %11276 = vst [vmem:[#allocation78_spill] sm:$0xff] %v8627_v49  ;;  %v6845_v41 = vpop.eup %6844  ;;  %v3428_v59 = vmul.f32 %v7336_v2, %v8474_v4  ;;  %v6606_v61 = vpop.f32.mrb[22].mxu0  ;;  %6864 = vpow2.f32 %v6220_v62 }
 0x110   :  { %v1044_v20 = vadd.f32 %v8478_v30, %v618_v55  ;;  %v8640_v13 = vpop.permute.xlu0 %3748  ;;  %v6847_v49 = vpop.eup %6846  ;;  %v1290_v45 = vadd.f32 1.0, %v6845_v41  ;;  %v8642_v30 = vadd.f32 %v3620_v17, %v3619_v12  ;;  %v6223_v50 = vmul.f32 -1.442695, %v1045_v21  ;;  %4137 = vbcast.lane.b32.xlu1 %v8340_v32, 280  ;;  %v7337_v32 = vld [vmem:[%s11005_s0 + $0x1f0] sm:$0xff] }
 0x111   :  { %11277 = vst [vmem:[#allocation79_spill] sm:$0xff] %v8640_v13  ;;  %6681 = vmatprep.mubr.msk.f32.mxu1 %vm108_vm0, %v8625_v5  ;;  %v627_v48 = vpop.f32.mrb[23].mxu0  ;;  %v8647_v55 = vpop.eup %6848  ;;  %6866 = vrcp.f32 %v1291_v60  ;;  %v1293_v9 = vadd.f32 1.0, %v6847_v49  ;;  %v633_v41 = vadd.f32 %v6606_v61, %v8403_v27  ;;  %4152 = vbcast.lane.b32.xlu0 %v8343_v25, 272  ;;  %v3627_v17 = vsel %vm108_vm0, %v3428_v59, 0.0 }
 0x112   :  { %v6222_v2 = vmul.f32 -1.442695, %v1044_v20  ;;  %6682 = vmatmul.mubr.msk.f32.gmra.mrb[4].mxu1 %vm108_vm0, %v8634_v56  ;;  %v6851_v12 = vpop.eup %6850  ;;  %6868 = vrcp.f32 %v1290_v45  ;;  %v628_v62 = vadd.f32 %v8403_v27, %v627_v48  ;;  %v3429_v60 = vmul.f32 %v7337_v32, %v8499_v29  ;;  %v8659_v20 = vpop.permute.xlu1 %3741  ;;  %v7338_v45 = vld [vmem:[%s11005_s0 + $0x20] sm:$0xff] }
 0x113   :  { %11278 = vst [vmem:[#allocation80_spill] sm:$0xff] %v8659_v20  ;;  %v6853_v21 = vpop.eup %6852  ;;  %6870 = vrcp.f32 %v1293_v9  ;;  %v1047_v61 = vadd.f32 %v8492_v43, %v633_v41  ;;  %v8666_v59 = vmul.f32 %v7338_v45, %v6843_v6  ;;  %v6609_v48 = vpop.f32.mrb[24].mxu0  ;;  %v3628_v6 = vadd.f32 %v3627_v17, %v3626_v31 }
 0x114   :  { %v8668_v13 = vpop.permute.xlu0 %3756  ;;  %v6855_v14 = vpop.eup %6854  ;;  %v1292_v3 = vadd.f32 1.0, %v6853_v21  ;;  %6872 = vpow2.f32 %v6223_v50  ;;  %v1046_v20 = vadd.f32 %v8492_v43, %v628_v62  ;;  %4148 = vbcast.lane.b32.xlu1 %v8343_v25, 264  ;;  %v3629_v50 = vsel %vm108_vm0, %v3429_v60, 0.0  ;;  %v7339_v62 = vld [vmem:[%s11005_s0 + $0x28] sm:$0xff] }
 0x115   :  { %11279 = vst [vmem:[#allocation81_spill] sm:$0xff] %v8668_v13  ;;  %v637_v9 = vpop.f32.mrb[25].mxu0  ;;  %v6857_v41 = vpop.eup %6856  ;;  %v1295_v49 = vadd.f32 1.0, %v6855_v14  ;;  %6874 = vpow2.f32 %v6222_v2  ;;  %6684 = vmatprep.mubr.msk.f32.mxu1 %vm108_vm0, %v8666_v59  ;;  %4163 = vbcast.lane.b32.xlu0 %v8346_v7, 256  ;;  %v8682_v14 = vmul.f32 %v7339_v62, %v8612_v53  ;;  %v6225_v17 = vmul.f32 -1.442695, %v1047_v61 }
 0x116   :  { %v6859_v21 = vpop.eup %6858  ;;  %6876 = vrcp.f32 %v1292_v3  ;;  %v1294_v45 = vadd.f32 1.0, %v6857_v41  ;;  %v8684_v36 = vpop.permute.xlu1 %3752  ;;  %v643_v32 = vadd.f32 %v6609_v48, %v8403_v27  ;;  %v638_v53 = vadd.f32 %v8403_v27, %v637_v9  ;;  %v7340_v62 = vld [vmem:[%s11005_s0 + $0x30] sm:$0xff] }
 0x117   :  { %11280 = vst [vmem:[#allocation82_spill] sm:$0xff] %v8684_v36  ;;  %v6861_v31 = vpop.eup %6860  ;;  %6878 = vrcp.f32 %v1295_v49  ;;  %v1297_v2 = vadd.f32 1.0, %v6859_v21  ;;  %v6612_v13 = vpop.f32.mrb[26].mxu0  ;;  %6685 = vmatmul.mubr.msk.f32.gmra.mrb[6].mxu1 %vm108_vm0, %v8682_v14  ;;  %v8695_v49 = vmul.f32 %v7340_v62, %v6851_v12  ;;  %v7341_v21 = vld [vmem:[%s11005_s0 + $0x1f8] sm:$0xff]  ;;  %v3630_v36 = vadd.f32 %v3629_v50, %v3628_v6 }
 0x118   :  { %v8687_v3 = vpop.permute.xlu0 %3767  ;;  %v6863_v41 = vpop.eup %6862  ;;  %6880 = vrcp.f32 %v1294_v45  ;;  %v1296_v60 = vadd.f32 1.0, %v6861_v31  ;;  %4156 = vbcast.lane.b32.xlu1 %v8343_v25, 280  ;;  %v3430_v45 = vmul.f32 %v7341_v21, %v8494_v18  ;;  %v1049_v31 = vadd.f32 %v8492_v43, %v643_v32  ;;  %v7342_v25 = vld [vmem:[%s11005_s0 + $0x38] sm:$0xff] }
 0x119   :  { %11281 = vst [vmem:[#allocation83_spill] sm:$0xff] %v8687_v3  ;;  %v647_v61 = vpop.f32.mrb[27].mxu0  ;;  %6882 = vrcp.f32 %v1297_v2  ;;  %v1299_v48 = vadd.f32 1.0, %v6863_v41  ;;  %4171 = vbcast.lane.b32.xlu0 %v8346_v7, 272  ;;  %v6865_v9 = vpop.eup %6864  ;;  %v6224_v3 = vmul.f32 -1.442695, %v1046_v20  ;;  %v1048_v12 = vadd.f32 %v8492_v43, %v638_v53  ;;  %6687 = vmatprep.mubr.msk.f32.mxu1 %vm108_vm0, %v8695_v49 }
 0x11a   :  { %6884 = vrcp.f32 %v1296_v60  ;;  %v8711_v2 = vmul.f32 %v7342_v25, %v8647_v55  ;;  %v8713_v41 = vpop.permute.xlu1 %3760  ;;  %v1298_v62 = vadd.f32 1.0, %v6865_v9  ;;  %v6227_v21 = vmul.f32 -1.442695, %v1049_v31  ;;  %v7344_v9 = vld [vmem:[%s11005_s0 + $0x48] sm:$0xff] }
 0x11b   :  { %11282 = vst [vmem:[#allocation84_spill] sm:$0xff] %v8713_v41  ;;  %v6867_v32 = vpop.eup %6866  ;;  %6886 = vrcp.f32 %v1299_v48  ;;  %v653_v20 = vadd.f32 %v6612_v13, %v8403_v27  ;;  %v6615_v60 = vpop.f32.mrb[28].mxu0  ;;  %v6226_v29 = vmul.f32 -1.442695, %v1048_v12  ;;  %v648_v55 = vadd.f32 %v8403_v27, %v647_v61 }
 0x11c   :  { %v8716_v43 = vpop.permute.xlu0 %3775  ;;  %v6869_v53 = vpop.eup %6868  ;;  %6888 = vpow2.f32 %v6225_v17  ;;  %6688 = vmatmul.mubr.msk.f32.gmra.mrb[8].mxu1 %vm108_vm0, %v8711_v2  ;;  %4167 = vbcast.lane.b32.xlu1 %v8346_v7, 264  ;;  %v3631_v31 = vsel %vm108_vm0, %v3430_v45, 0.0  ;;  %v7343_v17 = vld [vmem:[%s11005_s0 + $0x40] sm:$0xff]  ;;  %v8734_v12 = vmul.f32 %v7344_v9, %v6867_v32  ;;  %v663_v45 = vadd.f32 %v6615_v60, %v8403_v27 }
 0x11d   :  { %11283 = vst [vmem:[#allocation85_spill] sm:$0xff] %v8716_v43  ;;  %v657_v25 = vpop.f32.mrb[29].mxu0  ;;  %v6871_v48 = vpop.eup %6870  ;;  %6890 = vrcp.f32 %v1298_v62  ;;  %v1051_v13 = vadd.f32 %v8516_v26, %v653_v20  ;;  %v8727_v6 = vmul.f32 %v7343_v17, %v6869_v53  ;;  %4182 = vbcast.lane.b32.xlu0 %v8362_v54, 256  ;;  %v1050_v61 = vadd.f32 %v8516_v26, %v648_v55 }
 0x11e   :  { %v6873_v50 = vpop.eup %6872  ;;  %6892 = vpow2.f32 %v6224_v3  ;;  %v8737_v62 = vpop.permute.xlu1 %3771  ;;  %v658_v3 = vadd.f32 %v8403_v27, %v657_v25  ;;  %v3632_v32 = vadd.f32 %v3631_v31, %v3630_v36  ;;  %v11286_v36 = vrot.slane %v8619_v11, 2 }
 0x11f   :  { %11284 = vst [vmem:[#allocation86_spill] sm:$0xff] %v8737_v62  ;;  %v6875_v20 = vpop.eup %6874  ;;  %v1301_v43 = vadd.f32 1.0, %v6873_v50  ;;  %6894 = vpow2.f32 %v6227_v21  ;;  %v6229_v53 = vmul.f32 -1.442695, %v1051_v13  ;;  %6690 = vmatprep.mubr.msk.f32.mxu1 %vm108_vm0, %v8727_v6  ;;  %v6618_v55 = vpop.f32.mrb[30].mxu0  ;;  %v1053_v13 = vadd.f32 %v8516_v26, %v663_v45  ;;  %v7345_v50 = vld [vmem:[%s11005_s0 + $0x50] sm:$0xff] }
 0x120   :  { %v8742_v17 = vpop.permute.xlu0 %3786  ;;  %v6877_v41 = vpop.eup %6876  ;;  %v1300_v18 = vadd.f32 1.0, %v6875_v20  ;;  %6896 = vpow2.f32 %v6226_v29  ;;  %v6228_v9 = vmul.f32 -1.442695, %v1050_v61  ;;  %6691 = vmatmul.mubr.msk.f32.gmra.mrb[10].mxu1 %vm108_vm0, %v8734_v12  ;;  %4175 = vbcast.lane.b32.xlu1 %v8346_v7, 280  ;;  %v1052_v25 = vadd.f32 %v8516_v26, %v658_v3 }
 0x121   :  { %11285 = vst [vmem:[#allocation87_spill] sm:$0xff] %v8742_v17  ;;  %v667_v21 = vpop.f32.mrb[31].mxu0  ;;  %v6879_v60 = vpop.eup %6878  ;;  %6898 = vrcp.f32 %v1301_v43  ;;  %v8752_v20 = vmul.f32 %v7345_v50, %v6877_v41  ;;  %4190 = vbcast.lane.b32.xlu0 %v8362_v54, 272  ;;  %v8758_v7 = vadd.f32 %v11286_v36, %v8619_v11  ;;  %v7346_v43 = vld [vmem:[%s11005_s0 + $0x58] sm:$0xff]  ;;  %v673_v31 = vadd.f32 %v6618_v55, %v8403_v27  ;;  %v7347_v55 = vld [vmem:[%s11005_s0 + $0x60] sm:$0xff] }
 0x122   :  { %v6881_v29 = vpop.eup %6880  ;;  %6900 = vrcp.f32 %v1300_v18  ;;  %v8763_v26 = vmul.f32 %v7346_v43, %v6871_v48  ;;  %v8766_v61 = vpop.permute.xlu1 %3779  ;;  %v6231_v45 = vmul.f32 -1.442695, %v1053_v13  ;;  %v6230_v3 = vmul.f32 -1.442695, %v1052_v25 }
 0x123   :  { %11287 = vst [vmem:[#allocation88_spill] sm:$0xff] %v8766_v61  ;;  %v6883_v41 = vpop.eup %6882  ;;  %6902 = vpow2.f32 %v6229_v53  ;;  %6693 = vmatprep.mubr.msk.f32.mxu1 %vm108_vm0, %v8752_v20  ;;  %v11288_v18 = vcombine.high %v8431_v51, %v8431_v51  ;;  %v6621_v50 = vpop.f32.mrb[32].mxu0  ;;  %v3633_v43 = vrot.slane %v3632_v32, 4  ;;  %v668_v53 = vadd.f32 %v8403_v27, %v667_v21 }
 0x124   :  { %v8774_v36 = vpop.permute.xlu0 %3794  ;;  %v6885_v48 = vpop.eup %6884  ;;  %6904 = vpow2.f32 %v6228_v9  ;;  %6694 = vmatmul.mubr.msk.f32.gmra.mrb[12].mxu1 %vm108_vm0, %v8763_v26  ;;  %v8782_v13 = vmul.f32 %v7347_v55, %v6881_v29  ;;  %4186 = vbcast.lane.b32.xlu1 %v8362_v54, 264  ;;  %v683_v21 = vadd.f32 %v6621_v50, %v8403_v27  ;;  %v7348_v55 = vld [vmem:[%s11005_s0 + $0x68] sm:$0xff] }
 0x125   :  { %v977_v11 = vrot.slane %v11288_v18, %v11212_v42  ;;  %11289 = vst [vmem:[#allocation89_spill] sm:$0xff] %v8774_v36  ;;  %v677_v51 = vpop.f32.mrb[33].mxu0  ;;  %v8785_v25 = vpop.eup %6886  ;;  %v11291_v18 = vrot.slane %v8642_v30, 2  ;;  %6906 = vpow2.f32 %v6231_v45  ;;  %4201 = vbcast.lane.b32.xlu0 %v8365_v58, 256  ;;  %v8799_v61 = vmul.f32 %v7348_v55, %v6879_v60 }
 0x126   :  { %11290 = vst [vmem:[#allocation90_spill] sm:$0xff] %v8782_v13  ;;  %v6889_v17 = vpop.eup %6888  ;;  %6908 = vpow2.f32 %v6230_v3  ;;  %6696 = vmatprep.mubr.msk.f32.mxu1 %vm108_vm0, %v8782_v13  ;;  %v8802_v45 = vpop.permute.xlu1 %3790  ;;  %v7349_v3 = vld [vmem:[%s11005_s0 + $0x70] sm:$0xff]  ;;  %v8811_v60 = vadd.f32 %v3633_v43, %v3632_v32  ;;  %v7350_v32 = vld [vmem:[%s11005_s0 + $0x78] sm:$0xff] }
 0x127   :  { %v8790_v9 = vadd.f32 %v11291_v18, %v8642_v30  ;;  %v1055_v36 = vadd.f32 %v977_v11, %v673_v31  ;;  %v1054_v29 = vadd.f32 %v977_v11, %v668_v53  ;;  %v678_v30 = vadd.f32 %v8403_v27, %v677_v51  ;;  %11292 = vst [vmem:[#allocation91_spill] sm:$0xff] %v8802_v45  ;;  %v6891_v31 = vpop.eup %6890  ;;  %v6624_v47 = vpop.f32.mrb[34].mxu0 }
 0x128   :  { %v1303_v50 = vadd.f32 1.0, %v6889_v17  ;;  %v1057_v62 = vadd.f32 %v977_v11, %v683_v21  ;;  %v8807_v53 = vmul.f32 %v7349_v3, %v6885_v48  ;;  %v8809_v4 = vpop.permute.xlu0 %3805  ;;  %v6893_v16 = vpop.eup %6892  ;;  %6697 = vmatmul.mubr.msk.f32.gmra.mrb[14].mxu1 %vm108_vm0, %v8799_v61  ;;  %v693_v17 = vadd.f32 %v6624_v47, %v8403_v27  ;;  %4194 = vbcast.lane.b32.xlu1 %v8362_v54, 280 }
 0x129   :  { %v6233_v18 = vmul.f32 -1.442695, %v1055_v36  ;;  %11294 = vst [vmem:[#allocation93_spill] sm:$0xff] %v8809_v4  ;;  %v6232_v55 = vmul.f32 -1.442695, %v1054_v29  ;;  %v1056_v51 = vadd.f32 %v977_v11, %v678_v30  ;;  %v687_v36 = vpop.f32.mrb[35].mxu0  ;;  %v6895_v21 = vpop.eup %6894  ;;  %v8822_v43 = vmul.f32 %v7350_v32, %v6883_v41 }
 0x12a   :  { %11293 = vst [vmem:[#allocation92_spill] sm:$0xff] %v8807_v53  ;;  %6910 = vrcp.f32 %v1303_v50  ;;  %v1302_v48 = vadd.f32 1.0, %v6893_v16  ;;  %6699 = vmatprep.mubr.msk.f32.mxu1 %vm108_vm0, %v8807_v53  ;;  %4209 = vbcast.lane.b32.xlu0 %v8365_v58, 272  ;;  %v688_v11 = vadd.f32 %v8403_v27, %v687_v36  ;;  %v6897_v47 = vpop.eup %6896  ;;  %v1305_v29 = vadd.f32 1.0, %v6895_v21  ;;  %v8827_v16 = vpop.permute.xlu1 %3798  ;;  %v7351_v41 = vld [vmem:[%s11005_s0 + $0x80] sm:$0xff] }
 0x12b   :  { %11295 = vst [vmem:[#allocation94_spill] sm:$0xff] %v8822_v43  ;;  %6912 = vpow2.f32 %v6233_v18  ;;  %v6235_v54 = vmul.f32 -1.442695, %v1057_v62  ;;  %v1059_v30 = vadd.f32 %v8422_v44, %v693_v17  ;;  %11296 = vst [vmem:[#allocation95_spill] sm:$0xff] %v8827_v16  ;;  %v6899_v50 = vpop.eup %6898  ;;  %v1304_v3 = vadd.f32 1.0, %v6897_v47  ;;  %v6627_v36 = vpop.f32.mrb[36].mxu0 }
 0x12c   :  { %6914 = vrcp.f32 %v1302_v48  ;;  %v1058_v4 = vadd.f32 %v8422_v44, %v688_v11  ;;  %v8833_v32 = vmul.f32 %v7351_v41, %v6891_v31  ;;  %v8835_v45 = vpop.permute.xlu0 %3813  ;;  %v6901_v18 = vpop.eup %6900  ;;  %v11299_v62 = vrot.slane %v8583_v0, 1  ;;  %6700 = vmatmul.mubr.msk.f32.gmra.mrb[16].mxu1 %vm108_vm0, %v8822_v43  ;;  %4205 = vbcast.lane.b32.xlu1 %v8365_v58, 264 }
 0x12d   :  { %11298 = vst [vmem:[#allocation97_spill] sm:$0xff] %v8835_v45  ;;  %v3611_v21 = vrot.slane %v8758_v7, 1  ;;  %6916 = vrcp.f32 %v1305_v29  ;;  %v703_v48 = vadd.f32 %v6627_v36, %v8403_v27  ;;  %v697_v31 = vpop.f32.mrb[37].mxu0  ;;  %v6903_v11 = vpop.eup %6902  ;;  %v3624_v47 = vrot.slane %v8790_v9, 1  ;;  %v7352_v29 = vld [vmem:[%s11005_s0 + $0x90] sm:$0xff] }
 0x12e   :  { %11297 = vst [vmem:[#allocation96_spill] sm:$0xff] %v8833_v32  ;;  %v8840_v17 = vadd.f32 %v11299_v62, %v8583_v0  ;;  %6918 = vrcp.f32 %v1304_v3  ;;  %6702 = vmatprep.mubr.msk.f32.mxu1 %vm108_vm0, %v8833_v32  ;;  %4220 = vbcast.lane.b32.xlu0 %v8368_v1, 256  ;;  %v698_v0 = vadd.f32 %v8403_v27, %v697_v31  ;;  %v6905_v36 = vpop.eup %6904  ;;  %v1307_v62 = vadd.f32 1.0, %v6903_v11  ;;  %v7353_v3 = vld [vmem:[%s11005_s0 + $0x88] sm:$0xff]  ;;  %v8864_v19 = vpop.permute.xlu1 %3809 }
 0x12f   :  { %v8855_v41 = vmul.f32 %v7352_v29, %v6901_v18  ;;  %6920 = vpow2.f32 %v6232_v55  ;;  %v8861_v45 = vmul.f32 %v7353_v3, %v8785_v25  ;;  %v1061_v16 = vadd.f32 %v8422_v44, %v703_v48  ;;  %11300 = vst [vmem:[#allocation98_spill] sm:$0xff] %v8864_v19  ;;  %v6907_v31 = vpop.eup %6906  ;;  %v6630_v11 = vpop.f32.mrb[38].mxu0 }
 0x130   :  { %v3635_v32 = vrot.slane %v8811_v60, 2  ;;  %v1306_v53 = vadd.f32 1.0, %v6905_v36  ;;  %6922 = vpow2.f32 %v6235_v54  ;;  %v1060_v18 = vadd.f32 %v8422_v44, %v698_v0  ;;  %v8868_v55 = vpop.permute.xlu0 %3824  ;;  %v6909_v29 = vpop.eup %6908  ;;  %4213 = vbcast.lane.b32.xlu1 %v8365_v58, 280  ;;  %v7354_v0 = vld [vmem:[%s11005_s0 + $0x98] sm:$0xff] }
 0x131   :  { %11301 = vst [vmem:[#allocation99_spill] sm:$0xff] %v8868_v55  ;;  %6924 = vrcp.f32 %v1307_v62  ;;  %v1309_v43 = vadd.f32 1.0, %v6907_v31  ;;  %v6234_v13 = vmul.f32 -1.442695, %v1056_v51  ;;  %6703 = vmatmul.mubr.msk.f32.gmra.mrb[18].mxu1 %vm108_vm0, %v8861_v45  ;;  %v713_v25 = vadd.f32 %v6630_v11, %v8403_v27  ;;  %v707_v48 = vpop.f32.mrb[39].mxu0 }
 0x132   :  { %6926 = vrcp.f32 %v1306_v53  ;;  %v1308_v36 = vadd.f32 1.0, %v6909_v29  ;;  %v6237_v54 = vmul.f32 -1.442695, %v1059_v30  ;;  %6705 = vmatprep.mubr.msk.f32.mxu1 %vm108_vm0, %v8855_v41  ;;  %4228 = vbcast.lane.b32.xlu0 %v8368_v1, 272  ;;  %v708_v44 = vadd.f32 %v8403_v27, %v707_v48  ;;  %v8884_v53 = vpop.permute.xlu1 %3817 }
 0x133   :  { %6928 = vrcp.f32 %v1309_v43  ;;  %v6236_v51 = vmul.f32 -1.442695, %v1058_v4  ;;  %v8881_v62 = vmul.f32 %v7354_v0, %v6899_v50  ;;  %v1063_v58 = vadd.f32 %v8425_v57, %v713_v25  ;;  %11302 = vst [vmem:[#allocation100_spill] sm:$0xff] %v8884_v53  ;;  %v6633_v43 = vpop.f32.mrb[40].mxu0 }
 0x134   :  { %v6911_v30 = vpop.eup %6910  ;;  %v8887_v3 = vadd.f32 %v3611_v21, %v8758_v7  ;;  %v8890_v31 = vadd.f32 %v3635_v32, %v8811_v60  ;;  %6930 = vrcp.f32 %v1308_v36  ;;  %v1062_v4 = vadd.f32 %v8425_v57, %v708_v44  ;;  %v8893_v11 = vpop.permute.xlu0 %3832  ;;  %4224 = vbcast.lane.b32.xlu1 %v8368_v1, 264 }
 0x135   :  { %11303 = vst [vmem:[#allocation101_spill] sm:$0xff] %v8893_v11  ;;  %v6913_v29 = vpop.eup %6912  ;;  %v8896_v50 = vadd.f32 %v3624_v47, %v8790_v9  ;;  %6932 = vpow2.f32 %v6234_v13  ;;  %v6239_v25 = vmul.f32 -1.442695, %v1061_v16  ;;  %6706 = vmatmul.mubr.msk.f32.gmra.mrb[20].mxu1 %vm108_vm0, %v8881_v62  ;;  %v723_v7 = vadd.f32 %v6633_v43, %v8403_v27  ;;  %v717_v60 = vpop.f32.mrb[41].mxu0  ;;  %v7355_v16 = vld [vmem:[%s11005_s0 + $0xa0] sm:$0xff] }
 0x136   :  { %v6915_v32 = vpop.eup %6914  ;;  %v1311_v21 = vadd.f32 1.0, %v6913_v29  ;;  %6934 = vpow2.f32 %v6237_v54  ;;  %v6238_v48 = vmul.f32 -1.442695, %v1060_v18  ;;  %4239 = vbcast.lane.b32.xlu0 %v8387_v38, 256  ;;  %v718_v36 = vadd.f32 %v8403_v27, %v717_v60  ;;  %v8910_v0 = vpop.permute.xlu1 %3828  ;;  %v7356_v27 = vld [vmem:[%s11005_s0 + $0xa8] sm:$0xff] }
 0x137   :  { %v6917_v9 = vpop.eup %6916  ;;  %6936 = vpow2.f32 %v6236_v51  ;;  %v6241_v13 = vmul.f32 -1.442695, %v1063_v58  ;;  %v8907_v47 = vmul.f32 %v7355_v16, %v6915_v32  ;;  %v1065_v44 = vadd.f32 %v8425_v57, %v723_v7  ;;  %11304 = vst [vmem:[#allocation102_spill] sm:$0xff] %v8910_v0  ;;  %v6636_v58 = vpop.f32.mrb[42].mxu0  ;;  %v7357_v32 = vld [vmem:[%s11005_s0 + $0xb0] sm:$0xff]  ;;  %v7359_v16 = vld [vmem:[%s11005_s0 + $0xb8] sm:$0xff] }
 0x138   :  { %v6919_v43 = vpop.eup %6918  ;;  %v3637_v18 = vrot.slane %v8890_v31, 1  ;;  %6938 = vrcp.f32 %v1311_v21  ;;  %v8916_v54 = vmul.f32 %v7356_v27, %v6911_v30  ;;  %v1064_v51 = vadd.f32 %v8425_v57, %v718_v36  ;;  %v8919_v29 = vpop.permute.xlu0 %3843  ;;  %v8931_v30 = vld [vmem:[%s11004_s2 + $0x30] ss:$0 sm:$0xff]  ;;  %4232 = vbcast.lane.b32.xlu1 %v8368_v1, 280 }
 0x139   :  { %11305 = vst [vmem:[#allocation103_spill] sm:$0xff] %v8919_v29  ;;  %v6921_v60 = vpop.eup %6920  ;;  %6940 = vpow2.f32 %v6239_v25  ;;  %v6240_v7 = vmul.f32 -1.442695, %v1062_v4  ;;  %6708 = vmatprep.mubr.msk.f32.mxu1 %vm108_vm0, %v8907_v47  ;;  %v8926_v21 = vmul.f32 %v7357_v32, %v6919_v43  ;;  %v733_v57 = vadd.f32 %v8931_v30, %v6636_v58  ;;  %v727_v25 = vpop.f32.mrb[43].mxu0 }
 0x13a   :  { %v6923_v4 = vpop.eup %6922  ;;  %v1310_v36 = vadd.f32 1.0, %v6921_v60  ;;  %6942 = vpow2.f32 %v6238_v48  ;;  %6709 = vmatmul.mubr.msk.f32.gmra.mrb[22].mxu1 %vm108_vm0, %v8916_v54  ;;  %v8940_v43 = vmul.f32 %v7359_v16, %v6917_v9  ;;  %4247 = vbcast.lane.b32.xlu0 %v8387_v38, 272  ;;  %v728_v27 = vadd.f32 %v8931_v30, %v727_v25  ;;  %v8947_v60 = vpop.permute.xlu1 %3836 }
 0x13b   :  { %v6925_v58 = vpop.eup %6924  ;;  %v1313_v32 = vadd.f32 1.0, %v6923_v4  ;;  %6944 = vpow2.f32 %v6241_v13  ;;  %v6243_v1 = vmul.f32 -1.442695, %v1065_v44  ;;  %6711 = vmatprep.mubr.msk.f32.mxu1 %vm108_vm0, %v8926_v21  ;;  %v1067_v48 = vadd.f32 %v8428_v24, %v733_v57  ;;  %11306 = vst [vmem:[#allocation104_spill] sm:$0xff] %v8947_v60  ;;  %v6639_v16 = vpop.f32.mrb[44].mxu0  ;;  %v7360_v57 = vld [vmem:[%s11005_s0 + $0xc0] sm:$0xff] }
 0x13c   :  { %v6927_v29 = vpop.eup %6926  ;;  %6946 = vrcp.f32 %v1310_v36  ;;  %v6242_v11 = vmul.f32 -1.442695, %v1064_v51  ;;  %v1066_v9 = vadd.f32 %v8428_v24, %v728_v27  ;;  %v8950_v55 = vpop.permute.xlu0 %3851  ;;  %v3672_v13 = vsel %vm3661_vm4, %v8840_v17, %v8525_v39  ;;  %4243 = vbcast.lane.b32.xlu1 %v8387_v38, 264  ;;  %v7361_v39 = vld [vmem:[%s11005_s0 + $0xc8] sm:$0xff] }
 0x13d   :  { %11307 = vst [vmem:[#allocation105_spill] sm:$0xff] %v8950_v55  ;;  %v6929_v44 = vpop.eup %6928  ;;  %6948 = vrcp.f32 %v1313_v32  ;;  %v6245_v25 = vmul.f32 -1.442695, %v1067_v48  ;;  %v8958_v4 = vmul.f32 %v7360_v57, %v6927_v29  ;;  %v743_v51 = vadd.f32 %v8931_v30, %v6639_v16  ;;  %v737_v36 = vpop.f32.mrb[45].mxu0 }
 0x13e   :  { %v6931_v27 = vpop.eup %6930  ;;  %v3638_v55 = vadd.f32 %v3637_v18, %v8890_v31  ;;  %6950 = vpow2.f32 %v6240_v7  ;;  %6712 = vmatmul.mubr.msk.f32.gmra.mrb[24].mxu1 %vm108_vm0, %v8940_v43  ;;  %v8968_v17 = vmul.f32 %v7361_v39, %v6925_v58  ;;  %4258 = vbcast.lane.b32.xlu0 %v8395_v35, 256  ;;  %v738_v29 = vadd.f32 %v8931_v30, %v737_v36  ;;  %v7362_v18 = vld [vmem:[%s11005_s0 + $0xd0] sm:$0xff]  ;;  %v8980_v48 = vpop.permute.xlu1 %3847 }
 0x13f   :  { %v6933_v32 = vpop.eup %6932  ;;  %6952 = vpow2.f32 %v6243_v1  ;;  %6714 = vmatprep.mubr.msk.f32.mxu1 %vm108_vm0, %v8958_v4  ;;  %v1069_v31 = vadd.f32 %v8428_v24, %v743_v51  ;;  %v8978_v7 = vmul.f32 %v7362_v18, %v6931_v27  ;;  %11308 = vst [vmem:[#allocation106_spill] sm:$0xff] %v8980_v48  ;;  %v3673_v58 = vsel %vm3663_vm5, %v8887_v3, %v3672_v13  ;;  %v6642_v36 = vpop.f32.mrb[46].mxu0 }
 0x140   :  { %v6935_v16 = vpop.eup %6934  ;;  %v1312_v57 = vadd.f32 1.0, %v6933_v32  ;;  %6954 = vpow2.f32 %v6242_v11  ;;  %v1068_v1 = vadd.f32 %v8428_v24, %v738_v29  ;;  %v8985_v39 = vpop.permute.xlu0 %3862  ;;  %v3674_v51 = vsel %vm3665_vm6, %v8896_v50, %v3673_v58  ;;  %4251 = vbcast.lane.b32.xlu1 %v8387_v38, 280  ;;  %v7363_v38 = vld [vmem:[%s11005_s0 + $0xd8] sm:$0xff] }
 0x141   :  { %11309 = vst [vmem:[#allocation107_spill] sm:$0xff] %v8985_v39  ;;  %v6937_v60 = vpop.eup %6936  ;;  %v1315_v0 = vadd.f32 1.0, %v6935_v16  ;;  %6956 = vpow2.f32 %v6245_v25  ;;  %v6244_v27 = vmul.f32 -1.442695, %v1066_v9  ;;  %v753_v18 = vadd.f32 %v8931_v30, %v6642_v36  ;;  %v747_v3 = vpop.f32.mrb[47].mxu0 }
 0x142   :  { %v6939_v13 = vpop.eup %6938  ;;  %v8993_v11 = vrot.slane %v8375_v23, %v8312_v8  ;;  %6958 = vrcp.f32 %v1312_v57  ;;  %v1314_v24 = vadd.f32 1.0, %v6937_v60  ;;  %6715 = vmatmul.mubr.msk.f32.gmra.mrb[26].mxu1 %vm108_vm0, %v8968_v17  ;;  %4266 = vbcast.lane.b32.xlu0 %v8395_v35, 272  ;;  %v748_v50 = vadd.f32 %v8931_v30, %v747_v3  ;;  %v9007_v29 = vpop.permute.xlu1 %3855  ;;  %v7364_v3 = vld [vmem:[%s11004_s2 + $0x8] sm:$0xff] }
 0x143   :  { %v6941_v9 = vpop.eup %6940  ;;  %6960 = vrcp.f32 %v1315_v0  ;;  %6717 = vmatprep.mubr.msk.f32.mxu1 %vm108_vm0, %v8978_v7  ;;  %v9004_v25 = vmul.f32 %v7363_v38, %v6929_v44  ;;  %v1071_v60 = vadd.f32 %v8444_v33, %v753_v18  ;;  %11310 = vst [vmem:[#allocation108_spill] sm:$0xff] %v9007_v29  ;;  %v3675_v32 = vsel %vm3667_vm7, %v3638_v55, %v3674_v51  ;;  %v6645_v57 = vpop.f32.mrb[48].mxu0 }
 0x144   :  { %v6943_v58 = vpop.eup %6942  ;;  %6962 = vrcp.f32 %v1314_v24  ;;  %v1317_v16 = vadd.f32 1.0, %v6941_v9  ;;  %v1070_v0 = vadd.f32 %v8444_v33, %v748_v50  ;;  %v9011_v36 = vpop.permute.xlu0 %3870  ;;  %v9016_v44 = vadd.f32 %v7364_v3, %v3675_v32  ;;  %4262 = vbcast.lane.b32.xlu1 %v8395_v35, 264 }
 0x145   :  { %11311 = vst [vmem:[#allocation109_spill] sm:$0xff] %v9011_v36  ;;  %v6945_v38 = vpop.eup %6944  ;;  %v1316_v18 = vadd.f32 1.0, %v6943_v58  ;;  %6964 = vpow2.f32 %v6244_v27  ;;  %v6247_v39 = vmul.f32 -1.442695, %v1069_v31  ;;  %v763_v55 = vadd.f32 %v8931_v30, %v6645_v57  ;;  %v757_v51 = vpop.f32.mrb[49].mxu0  ;;  %v7365_v27 = vld [vmem:[%s11005_s0 + $0xe0] sm:$0xff] }
 0x146   :  { %11312 = vst [vmem:[#allocation110_spill] sm:$0xff] %v9016_v44  ;;  %v6947_v24 = vpop.eup %6946  ;;  %6966 = vrcp.f32 %v1317_v16  ;;  %v1319_v50 = vadd.f32 1.0, %v6945_v38  ;;  %v6246_v9 = vmul.f32 -1.442695, %v1068_v1  ;;  %6718 = vmatmul.mubr.msk.f32.gmra.mrb[28].mxu1 %vm108_vm0, %v9004_v25  ;;  %4277 = vbcast.lane.b32.xlu0 %v8398_v63, 256  ;;  %v758_v32 = vadd.f32 %v8931_v30, %v757_v51  ;;  %6097 = vst.msk [vmem:[%s11006_s4 + $0x8] sm:$0xff] %vm108_vm0, %v9016_v44  ;;  %v9035_v16 = vpop.permute.xlu1 %3866 }
 0x147   :  { %v6949_v31 = vpop.eup %6948  ;;  %6968 = vrcp.f32 %v1316_v18  ;;  %v9032_v1 = vmul.f32 %v7365_v27, %v6947_v24  ;;  %v1073_v58 = vadd.f32 %v8444_v33, %v763_v55  ;;  %11314 = vst [vmem:[#allocation112_spill] sm:$0xff] %v9035_v16  ;;  %v11315_v3 = vcombine.high %v8375_v23, %v8375_v23  ;;  %v7366_v18 = vld [vmem:[%s11005_s0 + $0xe8] sm:$0xff]  ;;  %v6648_v27 = vpop.f32.mrb[50].mxu0 }
 0x148   :  { %v6951_v57 = vpop.eup %6950  ;;  %6970 = vrcp.f32 %v1319_v50  ;;  %v9046_v51 = vmul.f32 %v7366_v18, %v6939_v13  ;;  %v1072_v24 = vadd.f32 %v8444_v33, %v758_v32  ;;  %v9049_v55 = vpop.permute.xlu0 %3881  ;;  %v997_v16 = vrot.slane %v8993_v11, %v11212_v42  ;;  %4270 = vbcast.lane.b32.xlu1 %v8395_v35, 280 }
 0x149   :  { %11313 = vst [vmem:[#allocation111_spill] sm:$0xff] %v9032_v1  ;;  %v9041_v38 = vrot.slane %v11315_v3, %v8312_v8  ;;  %11317 = vst [vmem:[#allocation114_spill] sm:$0xff] %v9049_v55  ;;  %v6953_v36 = vpop.eup %6952  ;;  %v1318_v29 = vadd.f32 1.0, %v6951_v57  ;;  %6972 = vpow2.f32 %v6247_v39  ;;  %6720 = vmatprep.mubr.msk.f32.mxu1 %vm108_vm0, %v9032_v1  ;;  %v773_v23 = vadd.f32 %v8931_v30, %v6648_v27  ;;  %v767_v13 = vpop.f32.mrb[51].mxu0  ;;  %v9064_v39 = vld [vmem:[%s11004_s2 + $0x28] sm:$0xff] }
 0x14a   :  { %11316 = vst [vmem:[#allocation113_spill] sm:$0xff] %v9046_v51  ;;  %v6955_v50 = vpop.eup %6954  ;;  %v1321_v3 = vadd.f32 1.0, %v6953_v36  ;;  %6974 = vpow2.f32 %v6246_v9  ;;  %6721 = vmatmul.mubr.msk.f32.gmra.mrb[30].mxu1 %vm108_vm0, %v9046_v51  ;;  %4285 = vbcast.lane.b32.xlu0 %v8398_v63, 272  ;;  %v768_v33 = vadd.f32 %v8931_v30, %v767_v13  ;;  %v9068_v32 = vrot.slane %v9064_v39, %v11222_v15  ;;  %v9070_v18 = vpop.permute.xlu1 %3874  ;;  %v7368_v15 = vld [vmem:[%s11005_s0 + $0xf0] sm:$0xff] }
 0x14b   :  { %v6957_v35 = vpop.eup %6956  ;;  %6976 = vrcp.f32 %v1318_v29  ;;  %v1320_v36 = vadd.f32 1.0, %v6955_v50  ;;  %v6249_v9 = vmul.f32 -1.442695, %v1071_v60  ;;  %v1075_v57 = vadd.f32 %v997_v16, %v773_v23  ;;  %11318 = vst [vmem:[#allocation115_spill] sm:$0xff] %v9070_v18  ;;  %v6651_v53 = vpop.f32.mrb[52].mxu0 }
 0x14c   :  { %v6959_v27 = vpop.eup %6958  ;;  %6978 = vrcp.f32 %v1321_v3  ;;  %v1323_v55 = vadd.f32 1.0, %v6957_v35  ;;  %v6248_v13 = vmul.f32 -1.442695, %v1070_v0  ;;  %v1074_v48 = vadd.f32 %v997_v16, %v768_v33  ;;  %v9072_v19 = vpop.permute.xlu0 %3889  ;;  %4281 = vbcast.lane.b32.xlu1 %v8398_v63, 264 }
 0x14d   :  { %11319 = vst [vmem:[#allocation116_spill] sm:$0xff] %v9072_v19  ;;  %v6961_v1 = vpop.eup %6960  ;;  %6980 = vrcp.f32 %v1320_v36  ;;  %v6251_v51 = vmul.f32 -1.442695, %v1073_v58  ;;  %v9077_v29 = vmul.f32 %v7368_v15, %v6959_v27  ;;  %v783_v60 = vadd.f32 %v8931_v30, %v6651_v53  ;;  %v777_v23 = vpop.f32.mrb[53].mxu0  ;;  %v7369_v58 = vld [vmem:[%s11005_s0 + $0xf8] sm:$0xff] }
 0x14e   :  { %v6963_v50 = vpop.eup %6962  ;;  %v9083_v0 = vrot.slane %v9041_v38, %v11212_v42  ;;  %6982 = vrcp.f32 %v1323_v55  ;;  %v9088_v3 = vmul.f32 %v7369_v58, %v6949_v31  ;;  %4296 = vbcast.lane.b32.xlu0 %v9068_v32, 256  ;;  %v778_v33 = vadd.f32 %v8931_v30, %v777_v23  ;;  %v7370_v55 = vld [vmem:[%s11005_s0 + $0x100] sm:$0xff]  ;;  %v9099_v15 = vpop.permute.xlu1 %3885 }
 0x14f   :  { %11320 = vst [vmem:[#allocation117_spill] sm:$0xff] %v9077_v29  ;;  %v6965_v53 = vpop.eup %6964  ;;  %6984 = vpow2.f32 %v6249_v9  ;;  %v6250_v35 = vmul.f32 -1.442695, %v1072_v24  ;;  %6723 = vmatprep.mubr.msk.f32.mxu1 %vm108_vm0, %v9077_v29  ;;  %v9097_v36 = vmul.f32 %v7370_v55, %v6963_v50  ;;  %v1077_v27 = vadd.f32 %v997_v16, %v783_v60  ;;  %11322 = vst [vmem:[#allocation119_spill] sm:$0xff] %v9099_v15  ;;  %v6654_v23 = vpop.f32.mrb[54].mxu0 }
 0x150   :  { %v6967_v31 = vpop.eup %6966  ;;  %v1322_v58 = vadd.f32 1.0, %v6965_v53  ;;  %6986 = vpow2.f32 %v6248_v13  ;;  %6724 = vmatmul.mubr.msk.f32.gmra.mrb[32].mxu1 %vm108_vm0, %v9088_v3  ;;  %v6253_v9 = vmul.f32 -1.442695, %v1075_v57  ;;  %v1076_v24 = vadd.f32 %v997_v16, %v778_v33  ;;  %v9103_v19 = vpop.permute.xlu0 %3900  ;;  %4289 = vbcast.lane.b32.xlu1 %v8398_v63, 280  ;;  %v7371_v16 = vld [vmem:[%s11005_s0 + $0x108] sm:$0xff] }
 0x151   :  { %11321 = vst [vmem:[#allocation118_spill] sm:$0xff] %v9097_v36  ;;  %11323 = vst [vmem:[#allocation120_spill] sm:$0xff] %v9103_v19  ;;  %v6969_v18 = vpop.eup %6968  ;;  %6988 = vpow2.f32 %v6251_v51  ;;  %v6252_v29 = vmul.f32 -1.442695, %v1074_v48  ;;  %6726 = vmatprep.mubr.msk.f32.mxu1 %vm108_vm0, %v9097_v36  ;;  %v793_v60 = vadd.f32 %v8931_v30, %v6654_v23  ;;  %v787_v50 = vpop.f32.mrb[55].mxu0  ;;  %v9111_v13 = vrot.slane %v9064_v39, %v7500_v22  ;;  %v7372_v51 = vld [vmem:[%s11005_s0 + $0x110] sm:$0xff] }
 0x152   :  { %v9113_v57 = vpop.eup %6970  ;;  %6990 = vrcp.f32 %v1322_v58  ;;  %v9118_v48 = vmul.f32 %v7371_v16, %v6961_v1  ;;  %v9123_v33 = vmul.f32 %v7372_v51, %v6969_v18  ;;  %4304 = vbcast.lane.b32.xlu0 %v9068_v32, 272  ;;  %v788_v22 = vadd.f32 %v8931_v30, %v787_v50  ;;  %v9130_v1 = vpop.permute.xlu1 %3893  ;;  %v7373_v18 = vld [vmem:[%s11005_s0 + $0x118] sm:$0xff] }
 0x153   :  { %v6973_v63 = vpop.eup %6972  ;;  %v943_v53 = vcombine.high %v8993_v11, %v8993_v11  ;;  %6992 = vpow2.f32 %v6250_v35  ;;  %v6255_v55 = vmul.f32 -1.442695, %v1077_v27  ;;  %v1079_v58 = vadd.f32 %v9083_v0, %v793_v60  ;;  %11325 = vst [vmem:[#allocation122_spill] sm:$0xff] %v9130_v1  ;;  %v6657_v35 = vpop.f32.mrb[56].mxu0 }
 0x154   :  { %11324 = vst [vmem:[#allocation121_spill] sm:$0xff] %v9123_v33  ;;  %v6975_v23 = vpop.eup %6974  ;;  %v1325_v16 = vadd.f32 1.0, %v6973_v63  ;;  %6994 = vpow2.f32 %v6253_v9  ;;  %6727 = vmatmul.mubr.msk.f32.gmra.mrb[34].mxu1 %vm108_vm0, %v9118_v48  ;;  %v9137_v50 = vmul.f32 %v7373_v18, %v6967_v31  ;;  %v1078_v11 = vadd.f32 %v9083_v0, %v788_v22  ;;  %v9140_v27 = vpop.permute.xlu0 %3908  ;;  %4300 = vbcast.lane.b32.xlu1 %v9068_v32, 264  ;;  %v7374_v22 = vld [vmem:[%s11005_s0 + $0x120] sm:$0xff] }
 0x155   :  { %11327 = vst [vmem:[#allocation124_spill] sm:$0xff] %v9140_v27  ;;  %v6977_v60 = vpop.eup %6976  ;;  %v1324_v51 = vadd.f32 1.0, %v6975_v23  ;;  %6996 = vpow2.f32 %v6252_v29  ;;  %v6254_v19 = vmul.f32 -1.442695, %v1076_v24  ;;  %6729 = vmatprep.mubr.msk.f32.mxu1 %vm108_vm0, %v9123_v33  ;;  %v803_v9 = vadd.f32 %v8931_v30, %v6657_v35  ;;  %v797_v63 = vpop.f32.mrb[57].mxu0 }
 0x156   :  { %11326 = vst [vmem:[#allocation123_spill] sm:$0xff] %v9137_v50  ;;  %v6979_v1 = vpop.eup %6978  ;;  %6998 = vrcp.f32 %v1325_v16  ;;  %v6257_v31 = vmul.f32 -1.442695, %v1079_v58  ;;  %v9149_v18 = vmul.f32 %v7374_v22, %v6977_v60  ;;  %4315 = vbcast.lane.b32.xlu0 %v9111_v13, 256  ;;  %v798_v29 = vadd.f32 %v8931_v30, %v797_v63  ;;  %v9154_v27 = vpop.permute.xlu1 %3904 }
 0x157   :  { %v6981_v24 = vpop.eup %6980  ;;  %7000 = vrcp.f32 %v1324_v51  ;;  %v6256_v23 = vmul.f32 -1.442695, %v1078_v11  ;;  %v1081_v35 = vadd.f32 %v9083_v0, %v803_v9  ;;  %11329 = vst [vmem:[#allocation126_spill] sm:$0xff] %v9154_v27  ;;  %v945_v58 = vcombine.high %v9041_v38, %v9041_v38  ;;  %v6660_v63 = vpop.f32.mrb[58].mxu0  ;;  %v7375_v38 = vld [vmem:[%s11005_s0 + $0x130] sm:$0xff] }
 0x158   :  { %11328 = vst [vmem:[#allocation125_spill] sm:$0xff] %v9149_v18  ;;  %v9156_v15 = vpop.eup %6982  ;;  %v1005_v16 = vrot.slane %v943_v53, %v11212_v42  ;;  %7002 = vpow2.f32 %v6255_v55  ;;  %6730 = vmatmul.mubr.msk.f32.gmra.mrb[36].mxu1 %vm108_vm0, %v9137_v50  ;;  %v1080_v60 = vadd.f32 %v9083_v0, %v798_v29  ;;  %v9164_v51 = vpop.permute.xlu0 %3919  ;;  %v9171_v9 = vmul.f32 %v7375_v38, %v6981_v24  ;;  %v7376_v29 = vld [vmem:[%s11005_s0 + $0x128] sm:$0xff] }
 0x159   :  { %11330 = vst [vmem:[#allocation127_spill] sm:$0xff] %v9164_v51  ;;  %v6985_v11 = vpop.eup %6984  ;;  %7004 = vpow2.f32 %v6254_v19  ;;  %6732 = vmatprep.mubr.msk.f32.mxu1 %vm108_vm0, %v9149_v18  ;;  %v813_v53 = vadd.f32 %v8931_v30, %v6660_v63  ;;  %4308 = vbcast.lane.b32.xlu1 %v9068_v32, 280  ;;  %v807_v55 = vpop.f32.mrb[59].mxu0  ;;  %v9177_v0 = vrot.slane %v9064_v39, %v7531_v28  ;;  %v6259_v38 = vmul.f32 -1.442695, %v1081_v35 }
 0x15a   :  { %11331 = vst [vmem:[#allocation128_spill] sm:$0xff] %v9171_v9  ;;  %v6987_v22 = vpop.eup %6986  ;;  %v1327_v19 = vadd.f32 1.0, %v6985_v11  ;;  %7006 = vpow2.f32 %v6257_v31  ;;  %v9183_v51 = vmul.f32 %v7376_v29, %v9113_v57  ;;  %4323 = vbcast.lane.b32.xlu0 %v9111_v13, 272  ;;  %v808_v24 = vadd.f32 %v8931_v30, %v807_v55  ;;  %v9187_v27 = vpop.permute.xlu1 %3912 }
 0x15b   :  { %v6989_v32 = vpop.eup %6988  ;;  %v1326_v63 = vadd.f32 1.0, %v6987_v22  ;;  %7008 = vpow2.f32 %v6256_v23  ;;  %v1083_v28 = vadd.f32 %v1005_v16, %v813_v53  ;;  %11333 = vst [vmem:[#allocation130_spill] sm:$0xff] %v9187_v27  ;;  %v6663_v57 = vpop.f32.mrb[60].mxu0  ;;  %v7377_v23 = vld [vmem:[%s11005_s0 + $0x140] sm:$0xff] }
 0x15c   :  { %11332 = vst [vmem:[#allocation129_spill] sm:$0xff] %v9183_v51  ;;  %v6991_v11 = vpop.eup %6990  ;;  %7010 = vrcp.f32 %v1327_v19  ;;  %6733 = vmatmul.mubr.msk.f32.gmra.mrb[38].mxu1 %vm108_vm0, %v9183_v51  ;;  %v9191_v31 = vadd.f32 %v1005_v16, %v808_v24  ;;  %v9193_v29 = vpop.permute.xlu0 %3927  ;;  %v1329_v55 = vadd.f32 1.0, %v6989_v32  ;;  %v823_v53 = vadd.f32 %v8931_v30, %v6663_v57  ;;  %v7378_v32 = vld [vmem:[%s11005_s0 + $0x138] sm:$0xff] }
 0x15d   :  { %11334 = vst [vmem:[#allocation131_spill] sm:$0xff] %v9193_v29  ;;  %v6993_v18 = vpop.eup %6992  ;;  %7012 = vrcp.f32 %v1326_v63  ;;  %6735 = vmatprep.mubr.msk.f32.mxu1 %vm108_vm0, %v9171_v9  ;;  %v9200_v35 = vmul.f32 %v7377_v23, %v6991_v11  ;;  %4319 = vbcast.lane.b32.xlu1 %v9111_v13, 264  ;;  %v817_v22 = vpop.f32.mrb[61].mxu0  ;;  %v9207_v63 = vmul.f32 %v7378_v32, %v6979_v1  ;;  %v6258_v57 = vmul.f32 -1.442695, %v1080_v60 }
 0x15e   :  { %v6995_v19 = vpop.eup %6994  ;;  %v1328_v24 = vadd.f32 1.0, %v6993_v18  ;;  %4334 = vbcast.lane.b32.xlu0 %v9177_v0, 256  ;;  %v818_v29 = vadd.f32 %v8931_v30, %v817_v22  ;;  %v9211_v27 = vpop.f32.mrb[0].mxu1  ;;  %7014 = vpow2.f32 %v6259_v38  ;;  %v1085_v23 = vadd.f32 %v1005_v16, %v823_v53 }
 0x15f   :  { %v6997_v11 = vpop.eup %6996  ;;  %v9214_v9 = vrot.slane %v945_v58, %v11212_v42  ;;  %v9216_v18 = vpop.permute.xlu1 %3923  ;;  %v6261_v22 = vmul.f32 -1.442695, %v1083_v28  ;;  %v1331_v38 = vadd.f32 1.0, %v6995_v19 }
 0x160   :  { %11335 = vst [vmem:[#allocation132_spill] sm:$0xff] %v9216_v18  ;;  %v9218_v51 = vpop.f32.mrb[1].mxu1  ;;  %v6999_v33 = vpop.eup %6998  ;;  %7016 = vrcp.f32 %v1328_v24  ;;  %v1330_v1 = vadd.f32 1.0, %v6997_v11  ;;  %6736 = vmatmul.mubr.msk.f32.gmra.mrb[40].mxu1 %vm108_vm0, %v9207_v63  ;;  %v1084_v32 = vadd.f32 %v1005_v16, %v818_v29  ;;  %v9230_v24 = vrot.slane %v9064_v39, %v7564_v34  ;;  %v7379_v16 = vld [vmem:[%s11005_s0 + $0x148] sm:$0xff] }
 0x161   :  { %v6666_v50 = vpop.f32.mrb[62].mxu0  ;;  %v9222_v36 = vpop.permute.xlu0 %3938  ;;  %7018 = vrcp.f32 %v1329_v55  ;;  %6738 = vmatprep.mubr.msk.f32.mxu1 %vm108_vm0, %v9200_v35  ;;  %4327 = vbcast.lane.b32.xlu1 %v9111_v13, 280  ;;  %v9236_v29 = vmul.f32 %v7379_v16, %v9156_v15 }
 0x162   :  { %11336 = vst [vmem:[#allocation133_spill] sm:$0xff] %v9222_v36  ;;  %v7001_v60 = vpop.eup %7000  ;;  %v833_v58 = vadd.f32 %v8931_v30, %v6666_v50  ;;  %v827_v53 = vpop.f32.mrb[63].mxu0  ;;  %7020 = vrcp.f32 %v1330_v1  ;;  %v7380_v50 = vld [vmem:[%s11005_s0 + $0x150] sm:$0xff]  ;;  %4342 = vbcast.lane.b32.xlu0 %v9177_v0, 272 }
 0x163   :  { %v7003_v28 = vpop.eup %7002  ;;  %v9241_v55 = vmul.f32 %v7380_v50, %v7001_v60  ;;  %v828_v34 = vadd.f32 %v8931_v30, %v827_v53  ;;  %7022 = vpow2.f32 %v6258_v57  ;;  %v9246_v1 = vpop.permute.xlu1 %3931  ;;  %v6260_v53 = vmul.f32 -1.442695, %v9191_v31 }
 0x164   :  { %v7005_v13 = vpop.eup %7004  ;;  %v1333_v19 = vadd.f32 1.0, %v7003_v28  ;;  %v1087_v11 = vadd.f32 %v9214_v9, %v833_v58  ;;  %11338 = vst [vmem:[#allocation135_spill] sm:$0xff] %v9246_v1  ;;  %7024 = vpow2.f32 %v6261_v22  ;;  %6739 = vmatmul.mubr.msk.f32.gmra.mrb[42].mxu1 %vm108_vm0, %v9236_v29  ;;  %v6669_v16 = vpop.f32.mrb[64].mxu0  ;;  %v6263_v57 = vmul.f32 -1.442695, %v1085_v23 }
 0x165   :  { %11337 = vst [vmem:[#allocation134_spill] sm:$0xff] %v9241_v55  ;;  %v7007_v36 = vpop.eup %7006  ;;  %v1332_v15 = vadd.f32 1.0, %v7005_v13  ;;  %v1086_v60 = vadd.f32 %v9214_v9, %v828_v34  ;;  %v9251_v50 = vpop.permute.xlu0 %3946  ;;  %7026 = vrcp.f32 %v1331_v38  ;;  %6741 = vmatprep.mubr.msk.f32.mxu1 %vm108_vm0, %v9241_v55  ;;  %v843_v58 = vadd.f32 %v8931_v30, %v6669_v16  ;;  %4338 = vbcast.lane.b32.xlu1 %v9177_v0, 264  ;;  %v7381_v34 = vld [vmem:[%s11005_s0 + $0x158] sm:$0xff] }
 0x166   :  { %11339 = vst [vmem:[#allocation136_spill] sm:$0xff] %v9251_v50  ;;  %v7009_v18 = vpop.eup %7008  ;;  %v837_v22 = vpop.f32.mrb[65].mxu0  ;;  %v9261_v50 = vmul.f32 %v7381_v34, %v6999_v33  ;;  %4353 = vbcast.lane.b32.xlu0 %v9230_v24, 256  ;;  %v6262_v38 = vmul.f32 -1.442695, %v1084_v32  ;;  %v1335_v55 = vadd.f32 1.0, %v7007_v36 }
 0x167   :  { %v7011_v28 = vpop.eup %7010  ;;  %7028 = vrcp.f32 %v1332_v15  ;;  %v1334_v13 = vadd.f32 1.0, %v7009_v18  ;;  %v838_v31 = vadd.f32 %v8931_v30, %v837_v22  ;;  %v1089_v16 = vadd.f32 %v9214_v9, %v843_v58  ;;  %v9266_v1 = vpop.permute.xlu1 %3942  ;;  %v7382_v33 = vld [vmem:[%s11005_s0 + $0x160] sm:$0xff]  ;;  %v7383_v22 = vld [vmem:[%s11005_s0 + $0x168] sm:$0xff] }
 0x168   :  { %v7013_v23 = vpop.eup %7012  ;;  %7030 = vrcp.f32 %v1333_v19  ;;  %11340 = vst [vmem:[#allocation137_spill] sm:$0xff] %v9266_v1  ;;  %6742 = vmatmul.mubr.msk.f32.gmra.mrb[44].mxu1 %vm108_vm0, %v9261_v50  ;;  %v6265_v19 = vmul.f32 -1.442695, %v1087_v11  ;;  %v6264_v58 = vmul.f32 -1.442695, %v1086_v60  ;;  %v7384_v60 = vld [vmem:[%s11005_s0 + $0x170] sm:$0xff] }
 0x169   :  { %7032 = vrcp.f32 %v1334_v13  ;;  %v9273_v18 = vmul.f32 %v7382_v33, %v7013_v23  ;;  %v1088_v30 = vadd.f32 %v9214_v9, %v838_v31  ;;  %v9276_v15 = vpop.permute.xlu0 %3957  ;;  %v7015_v32 = vpop.eup %7014  ;;  %4346 = vbcast.lane.b32.xlu1 %v9177_v0, 280  ;;  %v9284_v13 = vmul.f32 %v7383_v22, %v7011_v28  ;;  %v7385_v23 = vld [vmem:[%s11005_s0 + $0x180] sm:$0xff] }
 0x16a   :  { %11341 = vst [vmem:[#allocation138_spill] sm:$0xff] %v9276_v15  ;;  %7034 = vpow2.f32 %v6260_v53  ;;  %v7017_v36 = vpop.eup %7016  ;;  %4361 = vbcast.lane.b32.xlu0 %v9230_v24, 272  ;;  %v9289_v9 = vrot.slane %v9064_v39, %v7597_v40  ;;  %v6267_v0 = vmul.f32 -1.442695, %v1089_v16  ;;  %v1337_v31 = vadd.f32 1.0, %v7015_v32  ;;  %v7386_v32 = vld [vmem:[%s11005_s0 + $0x178] sm:$0xff] }
 0x16b   :  { %7036 = vpow2.f32 %v6263_v57  ;;  %6744 = vmatprep.mubr.msk.f32.mxu1 %vm108_vm0, %v9273_v18  ;;  %v7019_v11 = vpop.eup %7018  ;;  %v9294_v53 = vmul.f32 %v7384_v60, %v7017_v36  ;;  %v9296_v57 = vpop.permute.xlu1 %3950  ;;  %v6266_v33 = vmul.f32 -1.442695, %v1088_v30 }
 0x16c   :  { %7038 = vpow2.f32 %v6262_v38  ;;  %11343 = vst [vmem:[#allocation140_spill] sm:$0xff] %v9296_v57  ;;  %v7021_v34 = vpop.eup %7020  ;;  %6745 = vmatmul.mubr.msk.f32.gmra.mrb[46].mxu1 %vm108_vm0, %v9284_v13 }
 0x16d   :  { %11342 = vst [vmem:[#allocation139_spill] sm:$0xff] %v9294_v53  ;;  %7040 = vrcp.f32 %v1335_v55  ;;  %v9300_v28 = vpop.permute.xlu0 %3965  ;;  %v7023_v40 = vpop.eup %7022  ;;  %6747 = vmatprep.mubr.msk.f32.mxu1 %vm108_vm0, %v9294_v53  ;;  %v9307_v38 = vmul.f32 %v7385_v23, %v7021_v34  ;;  %4357 = vbcast.lane.b32.xlu1 %v9230_v24, 264  ;;  %v7388_v23 = vld [vmem:[%s11005_s0 + $0x188] sm:$0xff] }
 0x16e   :  { %11344 = vst [vmem:[#allocation141_spill] sm:$0xff] %v9300_v28  ;;  %7042 = vpow2.f32 %v6265_v19  ;;  %v7025_v55 = vpop.eup %7024  ;;  %v1336_v16 = vadd.f32 1.0, %v7023_v40  ;;  %v9313_v19 = vmul.f32 %v7386_v32, %v7019_v11  ;;  %4372 = vbcast.lane.b32.xlu0 %v9289_v9, 256  ;;  %v7387_v11 = vld [vmem:[%s11005_s0 + $0x190] sm:$0xff] }
 0x16f   :  { %11345 = vst [vmem:[#allocation142_spill] sm:$0xff] %v9307_v38  ;;  %7044 = vpow2.f32 %v6264_v58  ;;  %v7027_v36 = vpop.eup %7026  ;;  %v9316_v22 = vpop.permute.xlu1 %3961  ;;  %v1339_v58 = vadd.f32 1.0, %v7025_v55 }
 0x170   :  { %7046 = vpow2.f32 %v6267_v0  ;;  %11346 = vst [vmem:[#allocation143_spill] sm:$0xff] %v9316_v22  ;;  %6748 = vmatmul.mubr.msk.f32.gmra.mrb[48].mxu1 %vm108_vm0, %v9313_v19 }
 0x171   :  { %v7029_v60 = vpop.eup %7028  ;;  %7048 = vrcp.f32 %v1336_v16  ;;  %v9320_v34 = vpop.permute.xlu0 %3976  ;;  %6750 = vmatprep.mubr.msk.f32.mxu1 %vm108_vm0, %v9307_v38  ;;  %4365 = vbcast.lane.b32.xlu1 %v9230_v24, 280  ;;  %v9333_v16 = vmul.f32 %v7388_v23, %v7027_v36  ;;  %v11417_v38 = vld [vmem:[#allocation26_spill] sm:$0xff] }
 0x172   :  { %11347 = vst [vmem:[#allocation144_spill] sm:$0xff] %v9320_v34  ;;  %v7031_v30 = vpop.eup %7030  ;;  %7050 = vrcp.f32 %v1337_v31  ;;  %v9327_v0 = vmul.f32 %v7387_v11, %v7029_v60  ;;  %4380 = vbcast.lane.b32.xlu0 %v9289_v9, 272  ;;  %v4389_v31 = vrot.slane %v9064_v39, %v7630_v46  ;;  %v7389_v46 = vld [vmem:[%s11005_s0 + $0x1a0] sm:$0xff] }
 0x173   :  { %v7033_v40 = vpop.eup %7032  ;;  %7052 = vpow2.f32 %v6266_v33  ;;  %11349 = vst [vmem:[#allocation146_spill] sm:$0xff] %v9333_v16  ;;  %v9338_v32 = vpop.permute.xlu1 %3969 }
 0x174   :  { %11348 = vst [vmem:[#allocation145_spill] sm:$0xff] %v9327_v0  ;;  %v7035_v55 = vpop.eup %7034  ;;  %11350 = vst [vmem:[#allocation147_spill] sm:$0xff] %v9338_v32  ;;  %6751 = vmatmul.mubr.msk.f32.gmra.mrb[50].mxu1 %vm108_vm0, %v9333_v16  ;;  %7054 = vrcp.f32 %v1339_v58  ;;  %v9349_v36 = vmul.f32 %v7389_v46, %v7033_v40 }
 0x175   :  { %v7037_v60 = vpop.eup %7036  ;;  %v1338_v11 = vadd.f32 1.0, %v7035_v55  ;;  %v9342_v24 = vpop.permute.xlu0 %3984  ;;  %6753 = vmatprep.mubr.msk.f32.mxu1 %vm108_vm0, %v9327_v0  ;;  %4376 = vbcast.lane.b32.xlu1 %v9289_v9, 264 }
 0x176   :  { %11351 = vst [vmem:[#allocation148_spill] sm:$0xff] %v9342_v24  ;;  %v7039_v33 = vpop.eup %7038  ;;  %v1341_v34 = vadd.f32 1.0, %v7037_v60  ;;  %11352 = vst [vmem:[#allocation149_spill] sm:$0xff] %v9349_v36  ;;  %v7390_v24 = vld [vmem:[%s11005_s0 + $0x198] sm:$0xff]  ;;  %4391 = vbcast.lane.b32.xlu0 %v4389_v31, 256 }
 0x177   :  { %v7041_v23 = vpop.eup %7040  ;;  %7056 = vrcp.f32 %v1338_v11  ;;  %v1340_v55 = vadd.f32 1.0, %v7039_v33  ;;  %v9355_v58 = vmul.f32 %v7390_v24, %v7031_v30  ;;  %v9357_v28 = vpop.permute.xlu1 %3980  ;;  %v7391_v24 = vld [vmem:[%s11005_s0 + $0x1a8] sm:$0xff] }
 0x178   :  { %v7043_v60 = vpop.eup %7042  ;;  %11354 = vst [vmem:[#allocation151_spill] sm:$0xff] %v9357_v28  ;;  %v4408_v28 = vrot.slane %v9064_v39, %v7663_v52  ;;  %v7393_v52 = vld [vmem:[%s11005_s0 + $0x1b8] sm:$0xff] }
 0x179   :  { %11353 = vst [vmem:[#allocation150_spill] sm:$0xff] %v9355_v58  ;;  %v7045_v15 = vpop.eup %7044  ;;  %7058 = vrcp.f32 %v1340_v55  ;;  %6754 = vmatmul.mubr.msk.f32.gmra.mrb[52].mxu1 %vm108_vm0, %v9355_v58  ;;  %v9361_v40 = vpop.permute.xlu0 %4125  ;;  %v1343_v11 = vadd.f32 1.0, %v7043_v60  ;;  %4384 = vbcast.lane.b32.xlu1 %v9289_v9, 280  ;;  %v9369_v55 = vmul.f32 %v7391_v24, %v7041_v23 }
 0x17a   :  { %11355 = vst [vmem:[#allocation152_spill] sm:$0xff] %v9361_v40  ;;  %v7047_v46 = vpop.eup %7046  ;;  %7060 = vrcp.f32 %v1341_v34  ;;  %v1342_v33 = vadd.f32 1.0, %v7045_v15  ;;  %6756 = vmatprep.mubr.msk.f32.mxu1 %vm108_vm0, %v9349_v36  ;;  %4399 = vbcast.lane.b32.xlu0 %v4389_v31, 272  ;;  %v7392_v15 = vld [vmem:[%s11005_s0 + $0x1b0] sm:$0xff] }
 0x17b   :  { %v7049_v30 = vpop.eup %7048  ;;  %11356 = vst [vmem:[#allocation153_spill] sm:$0xff] %v9369_v55  ;;  %v9378_v9 = vpop.permute.xlu1 %3988  ;;  %v1345_v24 = vadd.f32 1.0, %v7047_v46 }
 0x17c   :  { %v7051_v32 = vpop.eup %7050  ;;  %7062 = vrcp.f32 %v1342_v33  ;;  %v9376_v34 = vmul.f32 %v7392_v15, %v7049_v30  ;;  %11358 = vst [vmem:[#allocation155_spill] sm:$0xff] %v9378_v9 }
 0x17d   :  { %v7053_v60 = vpop.eup %7052  ;;  %6757 = vmatmul.mubr.msk.f32.gmra.mrb[54].mxu1 %vm108_vm0, %v9369_v55  ;;  %v9382_v23 = vpop.permute.xlu0 %4133  ;;  %7064 = vrcp.f32 %v1343_v11  ;;  %4395 = vbcast.lane.b32.xlu1 %v4389_v31, 264  ;;  %v9389_v39 = vmul.f32 %v7393_v52, %v7051_v32  ;;  %v7394_v11 = vld [vmem:[%s11005_s0 + $0x1c0] sm:$0xff] }
 0x17e   :  { %11357 = vst [vmem:[#allocation154_spill] sm:$0xff] %v9376_v34  ;;  %11359 = vst [vmem:[#allocation156_spill] sm:$0xff] %v9382_v23  ;;  %v1344_v22 = vadd.f32 1.0, %v7053_v60  ;;  %6759 = vmatprep.mubr.msk.f32.mxu1 %vm108_vm0, %v9376_v34  ;;  %4410 = vbcast.lane.b32.xlu0 %v4408_v28, 256  ;;  %v7055_v33 = vpop.eup %7054  ;;  %v11381_v23 = vld [vmem:[#allocation9_spill] sm:$0xff] }
 0x17f   :  { %11360 = vst [vmem:[#allocation157_spill] sm:$0xff] %v9389_v39  ;;  %v9391_v30 = vpop.permute.xlu1 %4129 }
 0x180   :  { %7066 = vrcp.f32 %v1344_v22  ;;  %11361 = vst [vmem:[#allocation158_spill] sm:$0xff] %v9391_v30  ;;  %v7395_v22 = vld [vmem:[%s11005_s0 + $0x1c8] sm:$0xff] }
 0x181   :  { %v7057_v15 = vpop.eup %7056  ;;  %6760 = vmatmul.mubr.msk.f32.gmra.mrb[56].mxu1 %vm108_vm0, %v9389_v39  ;;  %v9395_v46 = vpop.permute.xlu0 %4144  ;;  %7068 = vrcp.f32 %v1345_v24  ;;  %4403 = vbcast.lane.b32.xlu1 %v4389_v31, 280  ;;  %v9405_v52 = vmul.f32 %v7395_v22, %v7055_v33  ;;  %v7396_v24 = vld [vmem:[%s11005_s0 + $0x1d0] sm:$0xff] }
 0x182   :  { %11362 = vst [vmem:[#allocation159_spill] sm:$0xff] %v9395_v46  ;;  %v9400_v60 = vmul.f32 %v7394_v11, %v7057_v15  ;;  %4418 = vbcast.lane.b32.xlu0 %v4408_v28, 272  ;;  %v7397_v11 = vld [vmem:[%s11005_s0 + $0x1d8] sm:$0xff] }
 0x183   :  { %v7059_v32 = vpop.eup %7058  ;;  %11364 = vst [vmem:[#allocation161_spill] sm:$0xff] %v9405_v52  ;;  %v9414_v15 = vpop.permute.xlu1 %4137 }
 0x184   :  { %11363 = vst [vmem:[#allocation160_spill] sm:$0xff] %v9400_v60  ;;  %v7061_v30 = vpop.eup %7060  ;;  %6762 = vmatprep.mubr.msk.f32.mxu1 %vm108_vm0, %v9400_v60  ;;  %v9412_v9 = vmul.f32 %v7396_v24, %v7059_v32  ;;  %11366 = vst [vmem:[#allocation163_spill] sm:$0xff] %v9414_v15  ;;  %v7398_v32 = vld [vmem:[%s11005_s0 + $0x1e0] sm:$0xff] }
 0x185   :  { %6763 = vmatmul.mubr.msk.f32.gmra.mrb[58].mxu1 %vm108_vm0, %v9405_v52  ;;  %v9418_v31 = vpop.permute.xlu0 %4152  ;;  %4414 = vbcast.lane.b32.xlu1 %v4408_v28, 264  ;;  %v9425_v22 = vmul.f32 %v7397_v11, %v7061_v30  ;;  %v7399_v30 = vld [vmem:[%s11005_s0 + $0x1e8] sm:$0xff] }
 0x186   :  { %11365 = vst [vmem:[#allocation162_spill] sm:$0xff] %v9412_v9  ;;  %11367 = vst [vmem:[#allocation164_spill] sm:$0xff] %v9418_v31  ;;  %v7063_v33 = vpop.eup %7062  ;;  %6765 = vmatprep.mubr.msk.f32.mxu1 %vm108_vm0, %v9412_v9 }
 0x187   :  { %11368 = vst [vmem:[#allocation165_spill] sm:$0xff] %v9425_v22  ;;  %v9430_v24 = vmul.f32 %v7398_v32, %v7063_v33  ;;  %v7065_v15 = vpop.eup %7064  ;;  %v9432_v57 = vpop.permute.xlu1 %4148  ;;  %v7400_v33 = vld [vmem:[%s11005_s0 + $0x1f0] sm:$0xff] }
 0x188   :  { %11370 = vst [vmem:[#allocation167_spill] sm:$0xff] %v9432_v57  ;;  %v9443_v11 = vmul.f32 %v7399_v30, %v7065_v15 }
 0x189   :  { %11369 = vst [vmem:[#allocation166_spill] sm:$0xff] %v9430_v24  ;;  %6766 = vmatmul.mubr.msk.f32.gmra.mrb[60].mxu1 %vm108_vm0, %v9425_v22  ;;  %v9436_v1 = vpop.permute.xlu0 %4163  ;;  %4422 = vbcast.lane.b32.xlu1 %v4408_v28, 280  ;;  %v7401_v28 = vld [vmem:[%s11005_s0 + $0x1f8] sm:$0xff] }
 0x18a   :  { %11371 = vst [vmem:[#allocation168_spill] sm:$0xff] %v9436_v1  ;;  %v7067_v31 = vpop.eup %7066  ;;  %6768 = vmatprep.mubr.msk.f32.mxu1 %vm108_vm0, %v9430_v24  ;;  %11372 = vst [vmem:[#allocation169_spill] sm:$0xff] %v9443_v11 }
 0x18b   :  { %v9448_v32 = vmul.f32 %v7400_v33, %v7067_v31  ;;  %v7069_v57 = vpop.eup %7068  ;;  %v9450_v46 = vpop.permute.xlu1 %4156 }
 0x18c   :  { %11374 = vst [vmem:[#allocation171_spill] sm:$0xff] %v9450_v46  ;;  %v9461_v15 = vmul.f32 %v7401_v28, %v7069_v57 }
 0x18d   :  { %11373 = vst [vmem:[#allocation170_spill] sm:$0xff] %v9448_v32  ;;  %6769 = vmatmul.mubr.msk.f32.gmra.mrb[62].mxu1 %vm108_vm0, %v9443_v11  ;;  %v9454_v1 = vpop.permute.xlu0 %4171 }
 0x18e   :  { %11375 = vst [vmem:[#allocation172_spill] sm:$0xff] %v9454_v1  ;;  %6771 = vmatprep.mubr.msk.f32.mxu1 %vm108_vm0, %v9448_v32  ;;  %11376 = vst [vmem:[#allocation173_spill] sm:$0xff] %v9461_v15  ;;  %v7402_v1 = vld [vmem:[%s11004_s2 + $0x10] sm:$0xff] }
 0x18f   :  { %v9465_v31 = vpop.permute.xlu1 %4167  ;;  %v6106_v40 = vmul.f32 %v7402_v1, %v11381_v23 }
 0x190   :  { %11377 = vst [vmem:[#allocation174_spill] sm:$0xff] %v9465_v31 }
 0x191   :  { %6772 = vmatmul.mubr.msk.f32.gmra.mrb[64].mxu1 %vm108_vm0, %v9461_v15  ;;  %v9467_v30 = vpop.permute.xlu0 %4182  ;;  %v6108_v28 = vsel %vm108_vm0, %v6106_v40, 0.0 }
 0x192   :  { %11378 = vst [vmem:[#allocation175_spill] sm:$0xff] %v9467_v30 }
 0x193   :  { %v9469_v33 = vpop.permute.xlu1 %4175 }
 0x194   :  { %11379 = vst [vmem:[#allocation176_spill] sm:$0xff] %v9469_v33  ;;  %v7403_v33 = vld [vmem:[%s11004_s2 + $0x18] sm:$0xff] }
 0x195   :  { %v9471_v46 = vpop.permute.xlu0 %4190 }
 0x196   :  { %11380 = vst [vmem:[#allocation177_spill] sm:$0xff] %v9471_v46  ;;  %v6107_v46 = vmul.f32 %v7403_v33, %v9016_v44 }
 0x197   :  { %v9477_v32 = vpop.permute.xlu1 %4186 }
 0x198   :  { %11382 = vst [vmem:[#allocation178_spill] sm:$0xff] %v9477_v32  ;;  %v6111_v32 = vsel %vm108_vm0, %v6107_v46, 0.0 }
 0x199   :  { %v9479_v57 = vpop.permute.xlu0 %4201 }
 0x19a   :  { %11383 = vst [vmem:[#allocation179_spill] sm:$0xff] %v9479_v57 }
 0x19b   :  { %v9482_v31 = vpop.permute.xlu1 %4194 }
 0x19c   :  { %11384 = vst [vmem:[#allocation180_spill] sm:$0xff] %v9482_v31 }
 0x19d   :  { %v9484_v30 = vpop.permute.xlu0 %4209 }
 0x19e   :  { %11385 = vst [vmem:[#allocation181_spill] sm:$0xff] %v9484_v30 }
 0x19f   :  { %v9490_v15 = vpop.permute.xlu1 %4205 }
 0x1a0   :  { %11386 = vst [vmem:[#allocation182_spill] sm:$0xff] %v9490_v15 }
 0x1a1   :  { %6109 = vadd.xlane.f32.xlu0 %v6108_v28  ;;  %v9492_v1 = vpop.permute.xlu0 %4220 }
 0x1a2   :  { %11387 = vst [vmem:[#allocation183_spill] sm:$0xff] %v9492_v1 }
 0x1a3   :  { %v9495_v57 = vpop.permute.xlu1 %4213 }
 0x1a4   :  { %11388 = vst [vmem:[#allocation184_spill] sm:$0xff] %v9495_v57 }
 0x1a5   :  { %v9497_v40 = vpop.permute.xlu0 %4228 }
 0x1a6   :  { %11389 = vst [vmem:[#allocation185_spill] sm:$0xff] %v9497_v40 }
 0x1a7   :  { %v9499_v28 = vpop.permute.xlu1 %4224 }
 0x1a8   :  { %11390 = vst [vmem:[#allocation186_spill] sm:$0xff] %v9499_v28 }
 0x1a9   :  { %v9501_v31 = vpop.permute.xlu0 %4239 }
 0x1aa   :  { %11391 = vst [vmem:[#allocation187_spill] sm:$0xff] %v9501_v31 }
 0x1ab   :  { %v9503_v30 = vpop.permute.xlu1 %4232 }
 0x1ac   :  { %11392 = vst [vmem:[#allocation188_spill] sm:$0xff] %v9503_v30  ;;  %v2124_v30 = vrot.slane %v9218_v51, %v8312_v8 }
 0x1ad   :  { %6112 = vadd.xlane.f32.xlu1 %v6111_v32  ;;  %v9505_v23 = vpop.permute.xlu0 %4247 }
 0x1ae   :  { %11393 = vst [vmem:[#allocation189_spill] sm:$0xff] %v9505_v23  ;;  %v2132_v44 = vcombine.high %v2124_v30, %v2124_v30 }
 0x1af   :  { %v9507_v33 = vpop.permute.xlu1 %4243 }
 0x1b0   :  { %11394 = vst [vmem:[#allocation190_spill] sm:$0xff] %v9507_v33  ;;  %v2140_v33 = vrot.slane %v2124_v30, %v8312_v8  ;;  %v9540_v52 = vrot.slane %v2132_v44, %v8312_v8 }
 0x1b1   :  { %v9509_v15 = vpop.permute.xlu0 %4258 }
 0x1b2   :  { %11395 = vst [vmem:[#allocation191_spill] sm:$0xff] %v9509_v15 }
 0x1b3   :  { %v9511_v1 = vpop.permute.xlu1 %4251 }
 0x1b4   :  { %11396 = vst [vmem:[#allocation192_spill] sm:$0xff] %v9511_v1  ;;  %v2218_v1 = vrot.slane %v2140_v33, %v11212_v42 }
 0x1b5   :  { %v9513_v46 = vpop.permute.xlu0 %4266 }
 0x1b6   :  { %11397 = vst [vmem:[#allocation193_spill] sm:$0xff] %v9513_v46 }
 0x1b7   :  { %v9515_v32 = vpop.permute.xlu1 %4262 }
 0x1b8   :  { %11398 = vst [vmem:[#allocation194_spill] sm:$0xff] %v9515_v32 }
 0x1b9   :  { %v9517_v57 = vpop.permute.xlu0 %4277 }
 0x1ba   :  { %11399 = vst [vmem:[#allocation195_spill] sm:$0xff] %v9517_v57 }
 0x1bb   :  { %v9519_v40 = vpop.permute.xlu1 %4270 }
 0x1bc   :  { %11400 = vst [vmem:[#allocation196_spill] sm:$0xff] %v9519_v40 }
 0x1bd   :  { %v9521_v28 = vpop.permute.xlu0 %4285 }
 0x1be   :  { %11401 = vst [vmem:[#allocation197_spill] sm:$0xff] %v9521_v28 }
 0x1bf   :  { %v9525_v23 = vpop.permute.xlu1 %4281 }
 0x1c0   :  { %11402 = vst [vmem:[#allocation198_spill] sm:$0xff] %v9525_v23 }
 0x1c1   :  { %v9528_v15 = vpop.permute.xlu0 %4296 }
 0x1c2   :  { %11403 = vst [vmem:[#allocation199_spill] sm:$0xff] %v9528_v15 }
 0x1c3   :  { %v9531_v46 = vpop.permute.xlu1 %4289 }
 0x1c4   :  { %11404 = vst [vmem:[#allocation200_spill] sm:$0xff] %v9531_v46 }
 0x1c5   :  { %v9533_v32 = vpop.permute.xlu0 %4304 }
 0x1c6   :  { %11405 = vst [vmem:[#allocation201_spill] sm:$0xff] %v9533_v32 }
 0x1c7   :  { %v9535_v22 = vpop.permute.xlu1 %4300 }
 0x1c8   :  { %11406 = vst [vmem:[#allocation202_spill] sm:$0xff] %v9535_v22 }
 0x1c9   :  { %v9537_v15 = vpop.permute.xlu0 %4315 }
 0x1ca   :  { %11407 = vst [vmem:[#allocation203_spill] sm:$0xff] %v9537_v15  ;;  %v2162_v15 = vcombine.high %v2140_v33, %v2140_v33  ;;  %v2117_v33 = vcombine.high %v9218_v51, %v9218_v51 }
 0x1cb   :  { %v9544_v30 = vpop.permute.xlu1 %4308 }
 0x1cc   :  { %11408 = vst [vmem:[#allocation204_spill] sm:$0xff] %v9544_v30 }
 0x1cf   :  { %v9550_v30 = vpop.permute.xlu1 %4319 }
 0x1d0   :  { %11410 = vst [vmem:[#allocation206_spill] sm:$0xff] %v9550_v30 }
 0x1e0   :  { %v6680_v57 = vpop.f32.mrb[2].mxu1 }
 0x1e1   :  { %v2296_v31 = vadd.f32 %v6680_v57, %v2218_v1  ;;  %v1796_v40 = vpop.f32.mrb[3].mxu1 }
 0x1e2   :  { %v2295_v28 = vadd.f32 %v2218_v1, %v1796_v40 }
 0x1e3   :  { %v6333_v24 = vmul.f32 -1.442695, %v2296_v31  ;;  %v2222_v31 = vrot.slane %v9540_v52, %v11212_v42 }
 0x1e4   :  { %v6332_v11 = vmul.f32 -1.442695, %v2295_v28 }
 0x1e5   :  { %v6683_v9 = vpop.f32.mrb[4].mxu1  ;;  %7070 = vpow2.f32 %v6333_v24  ;;  %v9546_v24 = vpop.permute.xlu0 %4323 }
 0x1e6   :  { %v2298_v23 = vadd.f32 %v6683_v9, %v2218_v1  ;;  %v1806_v60 = vpop.f32.mrb[5].mxu1  ;;  %7072 = vpow2.f32 %v6332_v11  ;;  %11409 = vst [vmem:[#allocation205_spill] sm:$0xff] %v9546_v24 }
 0x1e7   :  { %v2297_v46 = vadd.f32 %v2218_v1, %v1806_v60  ;;  %v2166_v1 = vcombine.high %v9211_v27, %v9211_v27 }
 0x1e8   :  { %v6335_v32 = vmul.f32 -1.442695, %v2298_v23 }
 0x1e9   :  { %v6334_v57 = vmul.f32 -1.442695, %v2297_v46  ;;  %v9552_v24 = vpop.permute.xlu0 %4334 }
 0x1ea   :  { %7074 = vpow2.f32 %v6335_v32  ;;  %v6686_v40 = vpop.f32.mrb[6].mxu1  ;;  %11411 = vst [vmem:[#allocation207_spill] sm:$0xff] %v9552_v24 }
 0x1eb   :  { %7076 = vpow2.f32 %v6334_v57  ;;  %v2300_v9 = vadd.f32 %v6686_v40, %v2222_v31  ;;  %v1816_v28 = vpop.f32.mrb[7].mxu1 }
 0x1ec   :  { %v2299_v22 = vadd.f32 %v2222_v31, %v1816_v28 }
 0x1ed   :  { %v6337_v44 = vmul.f32 -1.442695, %v2300_v9 }
 0x1ee   :  { %v6336_v11 = vmul.f32 -1.442695, %v2299_v22  ;;  %v2226_v22 = vrot.slane %v2162_v15, %v11212_v42  ;;  %v9561_v15 = vrot.slane %v2117_v33, %v8312_v8 }
 0x1ef   :  { %v7071_v34 = vpop.eup %7070  ;;  %v6689_v60 = vpop.f32.mrb[8].mxu1  ;;  %7078 = vpow2.f32 %v6337_v44 }
 0x1f0   :  { %v7073_v23 = vpop.eup %7072  ;;  %v2552_v46 = vadd.f32 1.0, %v7071_v34  ;;  %v2302_v32 = vadd.f32 %v6689_v60, %v2222_v31  ;;  %v1826_v57 = vpop.f32.mrb[9].mxu1  ;;  %7080 = vpow2.f32 %v6336_v11  ;;  %v2173_v34 = vrot.slane %v9211_v27, %v8312_v8 }
 0x1f1   :  { %v2551_v39 = vadd.f32 1.0, %v7073_v23  ;;  %v2301_v40 = vadd.f32 %v2222_v31, %v1826_v57  ;;  %v2180_v11 = vrot.slane %v2166_v1, %v8312_v8 }
 0x1f2   :  { %7082 = vrcp.f32 %v2552_v46  ;;  %v6339_v9 = vmul.f32 -1.442695, %v2302_v32  ;;  %v2164_v46 = vcombine.high %v9540_v52, %v9540_v52  ;;  %v2181_v32 = vcombine.high %v2173_v34, %v2173_v34 }
 0x1f3   :  { %7084 = vrcp.f32 %v2551_v39  ;;  %v6338_v44 = vmul.f32 -1.442695, %v2301_v40  ;;  %v6692_v60 = vpop.f32.mrb[10].mxu1  ;;  %v9565_v39 = vpop.permute.xlu1 %4327  ;;  %v9574_v52 = vrot.slane %v9561_v15, %v8312_v8 }
 0x1f4   :  { %v7075_v28 = vpop.eup %7074  ;;  %7086 = vpow2.f32 %v6339_v9  ;;  %v2304_v23 = vadd.f32 %v6692_v60, %v2226_v22  ;;  %v1836_v57 = vpop.f32.mrb[11].mxu1  ;;  %11412 = vst [vmem:[#allocation208_spill] sm:$0xff] %v9565_v39 }
 0x1f5   :  { %v7077_v30 = vpop.eup %7076  ;;  %v2554_v31 = vadd.f32 1.0, %v7075_v28  ;;  %7088 = vpow2.f32 %v6338_v44  ;;  %v2303_v51 = vadd.f32 %v2226_v22, %v1836_v57  ;;  %v9567_v9 = vpop.permute.xlu0 %4342  ;;  %v2182_v28 = vcombine.high %v2180_v11, %v2180_v11 }
 0x1f6   :  { %v2553_v24 = vadd.f32 1.0, %v7077_v30  ;;  %v6341_v27 = vmul.f32 -1.442695, %v2304_v23  ;;  %11413 = vst [vmem:[#allocation209_spill] sm:$0xff] %v9567_v9  ;;  %v9570_v57 = vrot.slane %v2173_v34, %v8312_v8 }
 0x1f7   :  { %7090 = vrcp.f32 %v2554_v31  ;;  %v6340_v1 = vmul.f32 -1.442695, %v2303_v51  ;;  %v6695_v40 = vpop.f32.mrb[12].mxu1  ;;  %v9578_v51 = vrot.slane %v2180_v11, %v8312_v8  ;;  %v9584_v34 = vrot.slane %v2182_v28, %v8312_v8  ;;  %v9586_v36 = vpop.permute.xlu1 %4338 }
 0x1f8   :  { %7092 = vrcp.f32 %v2553_v24  ;;  %v2306_v30 = vadd.f32 %v6695_v40, %v2226_v22  ;;  %v1846_v44 = vpop.f32.mrb[13].mxu1  ;;  %v2230_v24 = vrot.slane %v2164_v46, %v11212_v42  ;;  %11414 = vst [vmem:[#allocation210_spill] sm:$0xff] %v9586_v36  ;;  %v2133_v11 = vcombine.high %v9561_v15, %v9561_v15 }
 0x1f9   :  { %7094 = vpow2.f32 %v6341_v27  ;;  %v2305_v33 = vadd.f32 %v2226_v22, %v1846_v44  ;;  %v7079_v60 = vpop.eup %7078  ;;  %v9581_v27 = vrot.slane %v2181_v32, %v8312_v8  ;;  %v9595_v28 = vrot.slane %v9574_v52, %v11212_v42 }
 0x1fa   :  { %7096 = vpow2.f32 %v6340_v1  ;;  %v6343_v31 = vmul.f32 -1.442695, %v2306_v30  ;;  %v7081_v23 = vpop.eup %7080  ;;  %v2556_v1 = vadd.f32 1.0, %v7079_v60 }
 0x1fb   :  { %v6342_v22 = vmul.f32 -1.442695, %v2305_v33  ;;  %v6698_v40 = vpop.f32.mrb[14].mxu1  ;;  %v2555_v39 = vadd.f32 1.0, %v7081_v23  ;;  %v9591_v33 = vpop.permute.xlu0 %4353 }
 0x1fc   :  { %v7083_v44 = vpop.eup %7082  ;;  %7098 = vpow2.f32 %v6343_v31  ;;  %v2308_v9 = vadd.f32 %v6698_v40, %v2230_v24  ;;  %v1856_v30 = vpop.f32.mrb[15].mxu1  ;;  %11415 = vst [vmem:[#allocation211_spill] sm:$0xff] %v9591_v33 }
 0x1fd   :  { %v7085_v46 = vpop.eup %7084  ;;  %7100 = vrcp.f32 %v2556_v1  ;;  %v2307_v32 = vadd.f32 %v2230_v24, %v1856_v30  ;;  %v2744_v60 = vmul.f32 %v7083_v44, %v8600_v10  ;;  %v11416_v1 = vld [vmem:[#allocation29_spill] sm:$0xff] }
 0x1fe   :  { %v7087_v55 = vpop.eup %7086  ;;  %7102 = vrcp.f32 %v2555_v39  ;;  %v6345_v31 = vmul.f32 -1.442695, %v2308_v9  ;;  %v2743_v23 = vmul.f32 %v7085_v46, %v8592_v37 }
 0x1ff   :  { %v7089_v40 = vpop.eup %7088  ;;  %v2558_v36 = vadd.f32 1.0, %v7087_v55  ;;  %7104 = vpow2.f32 %v6342_v22  ;;  %v6344_v0 = vmul.f32 -1.442695, %v2307_v32  ;;  %v6701_v15 = vpop.f32.mrb[16].mxu1  ;;  %v3112_v30 = vmul.f32 %v11416_v1, %v2744_v60 }
 0x200   :  { %v2557_v10 = vadd.f32 1.0, %v7089_v40  ;;  %7106 = vpow2.f32 %v6345_v31  ;;  %v2310_v44 = vadd.f32 %v6701_v15, %v2230_v24  ;;  %v1866_v33 = vpop.f32.mrb[17].mxu1  ;;  %v3111_v16 = vmul.f32 %v11417_v38, %v2743_v23  ;;  %v9604_v60 = vpop.permute.xlu1 %4346  ;;  %v11421_v15 = vld [vmem:[#allocation27_spill] sm:$0xff] }
 0x201   :  { %v7091_v58 = vpop.eup %7090  ;;  %7108 = vrcp.f32 %v2558_v36  ;;  %v2309_v39 = vadd.f32 %v2230_v24, %v1866_v33  ;;  %v3178_v9 = vsel %vm108_vm0, %v3112_v30, 0.0  ;;  %11418 = vst [vmem:[#allocation29_spill] sm:$0xff] %v9604_v60  ;;  %v11419_v24 = vld [vmem:[#allocation28_spill] sm:$0xff]  ;;  %v9607_v23 = vpop.permute.xlu0 %4361 }
 0x202   :  { %v7093_v53 = vpop.eup %7092  ;;  %v2746_v37 = vmul.f32 %v7091_v58, %v8634_v56  ;;  %7110 = vrcp.f32 %v2557_v10  ;;  %v6347_v22 = vmul.f32 -1.442695, %v2310_v44  ;;  %3179 = vadd.xlane.f32.xlu1 %v3178_v9  ;;  %v3175_v46 = vsel %vm108_vm0, %v3111_v16, 0.0  ;;  %11420 = vst [vmem:[#allocation26_spill] sm:$0xff] %v9607_v23  ;;  %v11600_v23 = vld [vmem:[#allocation191_spill] sm:$0xff] }
 0x203   :  { %v7095_v55 = vpop.eup %7094  ;;  %v2745_v32 = vmul.f32 %v7093_v53, %v8625_v5  ;;  %7112 = vpow2.f32 %v6344_v0  ;;  %v6346_v38 = vmul.f32 -1.442695, %v2309_v39  ;;  %3176 = vadd.xlane.f32.xlu0 %v3175_v46  ;;  %v9610_v56 = vrot.slane %v2133_v11, %v8312_v8 }
 0x204   :  { %v7097_v31 = vpop.eup %7096  ;;  %v2560_v40 = vadd.f32 1.0, %v7095_v55  ;;  %v6704_v36 = vpop.f32.mrb[18].mxu1  ;;  %v3114_v33 = vmul.f32 %v11419_v24, %v2746_v37  ;;  %7114 = vpow2.f32 %v6347_v22  ;;  %v2211_v10 = vcombine.high %v9570_v57, %v9570_v57 }
 0x205   :  { %v2559_v58 = vadd.f32 1.0, %v7097_v31  ;;  %v2312_v16 = vadd.f32 %v6704_v36, %v9595_v28  ;;  %v1876_v5 = vpop.f32.mrb[19].mxu1  ;;  %v3113_v1 = vmul.f32 %v11421_v15, %v2745_v32  ;;  %v2212_v8 = vcombine.high %v9578_v51, %v9578_v51  ;;  %v9626_v36 = vpop.permute.xlu1 %4357 }
 0x206   :  { %7116 = vrcp.f32 %v2560_v40  ;;  %v2311_v53 = vadd.f32 %v9595_v28, %v1876_v5  ;;  %v3184_v0 = vsel %vm108_vm0, %v3114_v33, 0.0  ;;  %v7099_v30 = vpop.eup %7098  ;;  %v2163_v39 = vcombine.high %v9574_v52, %v9574_v52  ;;  %11422 = vst [vmem:[#allocation28_spill] sm:$0xff] %v9626_v36 }
 0x207   :  { %7118 = vrcp.f32 %v2559_v58  ;;  %v6349_v11 = vmul.f32 -1.442695, %v2312_v16  ;;  %v7101_v44 = vpop.eup %7100  ;;  %v2562_v9 = vadd.f32 1.0, %v7099_v30  ;;  %3185 = vadd.xlane.f32.xlu0 %v3184_v0  ;;  %v2165_v46 = vcombine.high %v9610_v56, %v9610_v56  ;;  %v9631_v58 = vpop.permute.xlu0 %4372  ;;  %v11424_v0 = vld [vmem:[#allocation31_spill] sm:$0xff] }
 0x208   :  { %7120 = vpow2.f32 %v6346_v38  ;;  %v6348_v37 = vmul.f32 -1.442695, %v2311_v53  ;;  %v6707_v55 = vpop.f32.mrb[20].mxu1  ;;  %v7103_v22 = vpop.eup %7102  ;;  %v2748_v40 = vmul.f32 %v7101_v44, %v8682_v14  ;;  %v3181_v38 = vsel %vm108_vm0, %v3113_v1, 0.0  ;;  %11423 = vst [vmem:[#allocation27_spill] sm:$0xff] %v9631_v58 }
 0x209   :  { %7122 = vpow2.f32 %v6349_v11  ;;  %v2314_v32 = vadd.f32 %v6707_v55, %v9595_v28  ;;  %v1886_v31 = vpop.f32.mrb[21].mxu1  ;;  %v7105_v24 = vpop.eup %7104  ;;  %v2747_v33 = vmul.f32 %v7103_v22, %v8666_v59  ;;  %v2238_v44 = vrot.slane %v9610_v56, %v11212_v42 }
 0x20a   :  { %7124 = vrcp.f32 %v2562_v9  ;;  %v2313_v52 = vadd.f32 %v9595_v28, %v1886_v31  ;;  %v7107_v16 = vpop.eup %7106  ;;  %v2561_v5 = vadd.f32 1.0, %v7105_v24  ;;  %v3116_v15 = vmul.f32 %v11424_v0, %v2748_v40  ;;  %v11425_v28 = vld [vmem:[#allocation32_spill] sm:$0xff] }
 0x20b   :  { %7126 = vpow2.f32 %v6348_v37  ;;  %v6351_v53 = vmul.f32 -1.442695, %v2314_v32  ;;  %v7109_v30 = vpop.eup %7108  ;;  %v2564_v14 = vadd.f32 1.0, %v7107_v16  ;;  %3182 = vadd.xlane.f32.xlu0 %v3181_v38  ;;  %v3115_v9 = vmul.f32 %v11425_v28, %v2747_v33 }
 0x20c   :  { %v6350_v11 = vmul.f32 -1.442695, %v2313_v52  ;;  %v7111_v1 = vpop.eup %7110  ;;  %7128 = vrcp.f32 %v2561_v5  ;;  %v3190_v55 = vsel %vm108_vm0, %v3116_v15, 0.0  ;;  %v9639_v22 = vrot.slane %v2163_v39, %v11212_v42  ;;  %v11426_v5 = vld [vmem:[#allocation33_spill] sm:$0xff]  ;;  %v9645_v15 = vpop.permute.xlu1 %4365 }
 0x20d   :  { %v6710_v59 = vpop.f32.mrb[22].mxu1  ;;  %v2750_v37 = vmul.f32 %v7109_v30, %v8711_v2  ;;  %v7113_v32 = vpop.eup %7112  ;;  %7130 = vrcp.f32 %v2564_v14  ;;  %v3187_v24 = vsel %vm108_vm0, %v3115_v9, 0.0  ;;  %v2749_v52 = vmul.f32 %v7111_v1, %v8695_v49  ;;  %11427 = vst [vmem:[#allocation31_spill] sm:$0xff] %v9645_v15  ;;  %v11428_v30 = vld [vmem:[#allocation34_spill] sm:$0xff] }
 0x20e   :  { %v2316_v31 = vadd.f32 %v6710_v59, %v2238_v44  ;;  %v1896_v40 = vpop.f32.mrb[23].mxu1  ;;  %v7115_v38 = vpop.eup %7114  ;;  %v2563_v33 = vadd.f32 1.0, %v7113_v32  ;;  %7132 = vpow2.f32 %v6351_v53  ;;  %3188 = vadd.xlane.f32.xlu1 %v3187_v24 }
 0x20f   :  { %v2315_v16 = vadd.f32 %v2238_v44, %v1896_v40  ;;  %v3118_v0 = vmul.f32 %v11426_v5, %v2750_v37  ;;  %v2566_v28 = vadd.f32 1.0, %v7115_v38  ;;  %7134 = vpow2.f32 %v6350_v11  ;;  %3191 = vadd.xlane.f32.xlu0 %v3190_v55  ;;  %v9648_v59 = vpop.permute.xlu0 %4380 }
 0x210   :  { %v7117_v39 = vpop.eup %7116  ;;  %v6353_v2 = vmul.f32 -1.442695, %v2316_v31  ;;  %v3117_v14 = vmul.f32 %v11428_v30, %v2749_v52  ;;  %11429 = vst [vmem:[#allocation32_spill] sm:$0xff] %v9648_v59  ;;  %7136 = vrcp.f32 %v2563_v33  ;;  %v11430_v33 = vld [vmem:[#allocation35_spill] sm:$0xff] }
 0x211   :  { %v7119_v9 = vpop.eup %7118  ;;  %v6352_v49 = vmul.f32 -1.442695, %v2315_v16  ;;  %v6713_v1 = vpop.f32.mrb[24].mxu1  ;;  %v3196_v53 = vsel %vm108_vm0, %v3118_v0, 0.0  ;;  %v2752_v32 = vmul.f32 %v7117_v39, %v8734_v12  ;;  %7138 = vrcp.f32 %v2566_v28  ;;  %v11431_v12 = vld [vmem:[#allocation36_spill] sm:$0xff] }
 0x212   :  { %v7121_v37 = vpop.eup %7120  ;;  %v2318_v40 = vadd.f32 %v6713_v1, %v2238_v44  ;;  %v1906_v24 = vpop.f32.mrb[25].mxu1  ;;  %v3193_v11 = vsel %vm108_vm0, %v3117_v14, 0.0  ;;  %v2751_v55 = vmul.f32 %v7119_v9, %v8727_v6  ;;  %7140 = vpow2.f32 %v6353_v2 }
 0x213   :  { %v7123_v31 = vpop.eup %7122  ;;  %v2565_v52 = vadd.f32 1.0, %v7121_v37  ;;  %v2317_v38 = vadd.f32 %v2238_v44, %v1906_v24  ;;  %3194 = vadd.xlane.f32.xlu1 %v3193_v11  ;;  %v3120_v16 = vmul.f32 %v11430_v33, %v2752_v32  ;;  %7142 = vpow2.f32 %v6352_v49  ;;  %3197 = vadd.xlane.f32.xlu0 %v3196_v53  ;;  %v9659_v44 = vpop.permute.xlu1 %4376 }
 0x214   :  { %v7125_v5 = vpop.eup %7124  ;;  %v2568_v30 = vadd.f32 1.0, %v7123_v31  ;;  %v6355_v0 = vmul.f32 -1.442695, %v2318_v40  ;;  %v3119_v39 = vmul.f32 %v11431_v12, %v2751_v55  ;;  %v2213_v14 = vcombine.high %v9581_v27, %v9581_v27  ;;  %11432 = vst [vmem:[#allocation33_spill] sm:$0xff] %v9659_v44  ;;  %v9663_v37 = vpop.permute.xlu0 %4391  ;;  %v11434_v55 = vld [vmem:[#allocation37_spill] sm:$0xff] }
 0x215   :  { %v7127_v28 = vpop.eup %7126  ;;  %7144 = vrcp.f32 %v2565_v52  ;;  %v6354_v6 = vmul.f32 -1.442695, %v2317_v38  ;;  %v6716_v9 = vpop.f32.mrb[26].mxu1  ;;  %v2754_v2 = vmul.f32 %v7125_v5, %v8763_v26  ;;  %11433 = vst [vmem:[#allocation34_spill] sm:$0xff] %v9663_v37  ;;  %v3202_v11 = vsel %vm108_vm0, %v3120_v16, 0.0 }
 0x216   :  { %7146 = vrcp.f32 %v2568_v30  ;;  %v2567_v1 = vadd.f32 1.0, %v7127_v28  ;;  %v2320_v32 = vadd.f32 %v6716_v9, %v9639_v22  ;;  %v1916_v49 = vpop.f32.mrb[27].mxu1  ;;  %v3199_v53 = vsel %vm108_vm0, %v3119_v39, 0.0  ;;  %v7129_v40 = vpop.eup %7128 }
 0x217   :  { %7148 = vpow2.f32 %v6355_v0  ;;  %v2319_v24 = vadd.f32 %v9639_v22, %v1916_v49  ;;  %3200 = vadd.xlane.f32.xlu1 %v3199_v53  ;;  %v3122_v26 = vmul.f32 %v11434_v55, %v2754_v2  ;;  %v7131_v31 = vpop.eup %7130  ;;  %3203 = vadd.xlane.f32.xlu0 %v3202_v11  ;;  %v2753_v38 = vmul.f32 %v7129_v40, %v8752_v20  ;;  %v11435_v2 = vld [vmem:[#allocation38_spill] sm:$0xff]  ;;  %v9681_v53 = vpop.permute.xlu1 %4384 }
 0x218   :  { %7150 = vrcp.f32 %v2567_v1  ;;  %v6357_v52 = vmul.f32 -1.442695, %v2320_v32  ;;  %v9673_v33 = vrot.slane %v2165_v46, %v11212_v42  ;;  %v7133_v5 = vpop.eup %7132  ;;  %v2756_v12 = vmul.f32 %v7131_v31, %v8799_v61  ;;  %11437 = vst [vmem:[#allocation35_spill] sm:$0xff] %v9681_v53  ;;  %v11438_v11 = vld [vmem:[#allocation90_spill] sm:$0xff] }
 0x219   :  { %7152 = vpow2.f32 %v6354_v6  ;;  %v6356_v30 = vmul.f32 -1.442695, %v2319_v24  ;;  %v6719_v0 = vpop.f32.mrb[28].mxu1  ;;  %v3208_v16 = vsel %vm108_vm0, %v3122_v26, 0.0  ;;  %v7135_v39 = vpop.eup %7134  ;;  %v2570_v28 = vadd.f32 1.0, %v7133_v5  ;;  %v11436_v6 = vld [vmem:[#allocation39_spill] sm:$0xff] }
 0x21a   :  { %7154 = vpow2.f32 %v6357_v52  ;;  %v2322_v9 = vadd.f32 %v6719_v0, %v9639_v22  ;;  %v1926_v20 = vpop.f32.mrb[29].mxu1  ;;  %v3121_v1 = vmul.f32 %v11435_v2, %v2753_v38  ;;  %v7137_v32 = vpop.eup %7136  ;;  %v2569_v56 = vadd.f32 1.0, %v7135_v39  ;;  %v11440_v5 = vld [vmem:[#allocation94_spill] sm:$0xff] }
 0x21b   :  { %7156 = vpow2.f32 %v6356_v30  ;;  %v2321_v46 = vadd.f32 %v9639_v22, %v1926_v20  ;;  %v3124_v49 = vmul.f32 %v11436_v6, %v2756_v12  ;;  %v7139_v40 = vpop.eup %7138  ;;  %3209 = vadd.xlane.f32.xlu0 %v3208_v16  ;;  %v2755_v55 = vmul.f32 %v7137_v32, %v11438_v11  ;;  %v9685_v26 = vpop.permute.xlu0 %4399  ;;  %v11441_v16 = vld [vmem:[#allocation40_spill] sm:$0xff]  ;;  %v11442_v32 = vld [vmem:[#allocation41_spill] sm:$0xff] }
 0x21c   :  { %7158 = vrcp.f32 %v2570_v28  ;;  %v6359_v61 = vmul.f32 -1.442695, %v2322_v9  ;;  %v3205_v24 = vsel %vm108_vm0, %v3121_v1, 0.0  ;;  %11439 = vst [vmem:[#allocation36_spill] sm:$0xff] %v9685_v26  ;;  %v7141_v31 = vpop.eup %7140  ;;  %v2758_v30 = vmul.f32 %v7139_v40, %v11440_v5  ;;  %v11443_v40 = vld [vmem:[#allocation92_spill] sm:$0xff] }
 0x21d   :  { %7160 = vrcp.f32 %v2569_v56  ;;  %v6358_v52 = vmul.f32 -1.442695, %v2321_v46  ;;  %3206 = vadd.xlane.f32.xlu1 %v3205_v24  ;;  %v6722_v38 = vpop.f32.mrb[30].mxu1  ;;  %v3214_v22 = vsel %vm108_vm0, %v3124_v49, 0.0  ;;  %v7143_v0 = vpop.eup %7142  ;;  %v2572_v12 = vadd.f32 1.0, %v7141_v31 }
 0x21e   :  { %7162 = vpow2.f32 %v6359_v61  ;;  %v2324_v39 = vadd.f32 %v6722_v38, %v9673_v33  ;;  %v1936_v28 = vpop.f32.mrb[31].mxu1  ;;  %v3123_v9 = vmul.f32 %v11441_v16, %v2755_v55  ;;  %v2571_v2 = vadd.f32 1.0, %v7143_v0 }
 0x21f   :  { %v7145_v20 = vpop.eup %7144  ;;  %7164 = vpow2.f32 %v6358_v52  ;;  %v2323_v1 = vadd.f32 %v9673_v33, %v1936_v28  ;;  %v3126_v56 = vmul.f32 %v11442_v32, %v2758_v30  ;;  %3215 = vadd.xlane.f32.xlu0 %v3214_v22  ;;  %v9697_v11 = vrot.slane %v9570_v57, %v11212_v42  ;;  %v9700_v52 = vpop.permute.xlu1 %4395  ;;  %v11445_v30 = vld [vmem:[#allocation42_spill] sm:$0xff] }
 0x220   :  { %v7147_v46 = vpop.eup %7146  ;;  %7166 = vrcp.f32 %v2572_v12  ;;  %v6361_v6 = vmul.f32 -1.442695, %v2324_v39  ;;  %v3211_v49 = vsel %vm108_vm0, %v3123_v9, 0.0  ;;  %v2757_v61 = vmul.f32 %v7145_v20, %v11443_v40  ;;  %11444 = vst [vmem:[#allocation37_spill] sm:$0xff] %v9700_v52  ;;  %v9707_v12 = vpop.permute.xlu0 %4410  ;;  %v11447_v9 = vld [vmem:[#allocation96_spill] sm:$0xff]  ;;  %v11448_v20 = vld [vmem:[#allocation43_spill] sm:$0xff] }
 0x221   :  { %v7149_v24 = vpop.eup %7148  ;;  %7168 = vrcp.f32 %v2571_v2  ;;  %v6360_v55 = vmul.f32 -1.442695, %v2323_v1  ;;  %3212 = vadd.xlane.f32.xlu1 %v3211_v49  ;;  %v2760_v31 = vmul.f32 %v7147_v46, %v8861_v45  ;;  %v9704_v5 = vrot.slane %v9581_v27, %v11212_v42  ;;  %11446 = vst [vmem:[#allocation38_spill] sm:$0xff] %v9707_v12 }
 0x222   :  { %v7151_v38 = vpop.eup %7150  ;;  %v2574_v22 = vadd.f32 1.0, %v7149_v24  ;;  %7170 = vpow2.f32 %v6361_v6  ;;  %v3125_v0 = vmul.f32 %v11445_v30, %v2757_v61  ;;  %v3220_v16 = vsel %vm108_vm0, %v3126_v56, 0.0 }
 0x223   :  { %v7153_v39 = vpop.eup %7152  ;;  %7172 = vpow2.f32 %v6360_v55  ;;  %v6725_v28 = vpop.f32.mrb[32].mxu1  ;;  %v2759_v45 = vmul.f32 %v7151_v38, %v11447_v9  ;;  %v3128_v2 = vmul.f32 %v11448_v20, %v2760_v31  ;;  %3221 = vadd.xlane.f32.xlu0 %v3220_v16  ;;  %v11449_v55 = vld [vmem:[#allocation44_spill] sm:$0xff]  ;;  %v9796_v27 = vrot.slane %v9578_v51, %v11212_v42 }
 0x224   :  { %v7155_v1 = vpop.eup %7154  ;;  %7174 = vrcp.f32 %v2574_v22  ;;  %v2573_v32 = vadd.f32 1.0, %v7153_v39  ;;  %v2326_v46 = vadd.f32 %v6725_v28, %v9673_v33  ;;  %v1946_v49 = vpop.f32.mrb[33].mxu1  ;;  %v3217_v6 = vsel %vm108_vm0, %v3125_v0, 0.0 }
 0x225   :  { %v7157_v40 = vpop.eup %7156  ;;  %v2576_v61 = vadd.f32 1.0, %v7155_v1  ;;  %v2325_v24 = vadd.f32 %v9673_v33, %v1946_v49  ;;  %3218 = vadd.xlane.f32.xlu1 %v3217_v6  ;;  %v3127_v56 = vmul.f32 %v11449_v55, %v2759_v45  ;;  %v3226_v38 = vsel %vm108_vm0, %v3128_v2, 0.0  ;;  %v9719_v20 = vpop.permute.xlu1 %4403 }
 0x226   :  { %v7159_v30 = vpop.eup %7158  ;;  %7176 = vrcp.f32 %v2573_v32  ;;  %v2575_v31 = vadd.f32 1.0, %v7157_v40  ;;  %v6363_v22 = vmul.f32 -1.442695, %v2326_v46  ;;  %11450 = vst [vmem:[#allocation39_spill] sm:$0xff] %v9719_v20  ;;  %v7407_v33 = vmov 0   ;;  %v9723_v46 = vpop.permute.xlu0 %4418  ;;  %v11452_v40 = vld [vmem:[#allocation45_spill] sm:$0xff] }
 0x227   :  { %v7161_v39 = vpop.eup %7160  ;;  %7178 = vrcp.f32 %v2576_v61  ;;  %v6362_v28 = vmul.f32 -1.442695, %v2325_v24  ;;  %v6728_v9 = vpop.f32.mrb[34].mxu1  ;;  %v3223_v0 = vsel %vm108_vm0, %v3127_v56, 0.0  ;;  %v2762_v16 = vmul.f32 %v7159_v30, %v8881_v62  ;;  %6808 = vset.pattern.permute.xlu1 %v7407_v33  ;;  %6809 = vset.pattern.permute.xlu0 %v7407_v33  ;;  %11451 = vst [vmem:[#allocation90_spill] sm:$0xff] %v9723_v46  ;;  %v11453_v30 = vld [vmem:[#allocation46_spill] sm:$0xff] }
 0x228   :  { %v7163_v45 = vpop.eup %7162  ;;  %7180 = vrcp.f32 %v2575_v31  ;;  %v2328_v2 = vadd.f32 %v6728_v9, %v9697_v11  ;;  %v1956_v1 = vpop.f32.mrb[35].mxu1  ;;  %3227 = vadd.xlane.f32.xlu0 %v3226_v38  ;;  %v2761_v32 = vmul.f32 %v7161_v39, %v8855_v41 }
 0x229   :  { %v7165_v49 = vpop.eup %7164  ;;  %v2578_v6 = vadd.f32 1.0, %v7163_v45  ;;  %7182 = vpow2.f32 %v6363_v22  ;;  %v2327_v62 = vadd.f32 %v9697_v11, %v1956_v1  ;;  %3224 = vadd.xlane.f32.xlu1 %v3223_v0  ;;  %v3130_v61 = vmul.f32 %v11452_v40, %v2762_v16 }
 0x22a   :  { %v7167_v24 = vpop.eup %7166  ;;  %v2577_v55 = vadd.f32 1.0, %v7165_v49  ;;  %7184 = vpow2.f32 %v6362_v28  ;;  %v6365_v56 = vmul.f32 -1.442695, %v2328_v2  ;;  %v3129_v31 = vmul.f32 %v11453_v30, %v2761_v32  ;;  %v11454_v49 = vld [vmem:[#allocation47_spill] sm:$0xff]  ;;  %v9736_v30 = vpop.permute.xlu1 %4414 }
 0x22b   :  { %v7169_v38 = vpop.eup %7168  ;;  %7186 = vrcp.f32 %v2578_v6  ;;  %v6364_v41 = vmul.f32 -1.442695, %v2327_v62  ;;  %v6731_v39 = vpop.f32.mrb[36].mxu1  ;;  %v3232_v9 = vsel %vm108_vm0, %v3130_v61, 0.0  ;;  %v2764_v33 = vmul.f32 %v7167_v24, %v8916_v54  ;;  %v11455_v61 = vld [vmem:[#allocation48_spill] sm:$0xff]  ;;  %11456 = vst [vmem:[#allocation94_spill] sm:$0xff] %v9736_v30 }
 0x22c   :  { %v7171_v22 = vpop.eup %7170  ;;  %7188 = vrcp.f32 %v2577_v55  ;;  %v2330_v0 = vadd.f32 %v6731_v39, %v9697_v11  ;;  %v1966_v45 = vpop.f32.mrb[37].mxu1  ;;  %v3229_v16 = vsel %vm108_vm0, %v3129_v31, 0.0  ;;  %3233 = vadd.xlane.f32.xlu0 %v3232_v9  ;;  %v2763_v28 = vmul.f32 %v7169_v38, %v8907_v47 }
 0x22d   :  { %v7173_v2 = vpop.eup %7172  ;;  %v2580_v1 = vadd.f32 1.0, %v7171_v22  ;;  %7190 = vpow2.f32 %v6365_v56  ;;  %v2329_v32 = vadd.f32 %v9697_v11, %v1966_v45  ;;  %3230 = vadd.xlane.f32.xlu1 %v3229_v16  ;;  %v3132_v6 = vmul.f32 %v11454_v49, %v2764_v33  ;;  %v11457_v16 = vld [vmem:[#allocation49_spill] sm:$0xff] }
 0x22e   :  { %v7175_v62 = vpop.eup %7174  ;;  %v2579_v54 = vadd.f32 1.0, %v7173_v2  ;;  %7192 = vpow2.f32 %v6364_v41  ;;  %v6367_v40 = vmul.f32 -1.442695, %v2330_v0  ;;  %v3131_v24 = vmul.f32 %v11455_v61, %v2763_v28  ;;  %v6110_v55 = vpop.xlane.xlu0 %6109 }
 0x22f   :  { %7194 = vrcp.f32 %v2580_v1  ;;  %v6366_v31 = vmul.f32 -1.442695, %v2329_v32  ;;  %v6734_v47 = vpop.f32.mrb[38].mxu1  ;;  %6123 = vst.msk [vmem:[%s11007_s5] sm:$0xff] %vm6122_vm8, %v6110_v55  ;;  %v3238_v11 = vsel %vm108_vm0, %v3132_v6, 0.0  ;;  %v2766_v56 = vmul.f32 %v7175_v62, %v8940_v43 }
 0x230   :  { %v7177_v38 = vpop.eup %7176  ;;  %v2214_v41 = vcombine.high %v9584_v34, %v9584_v34  ;;  %7196 = vrcp.f32 %v2579_v54  ;;  %v2332_v39 = vadd.f32 %v6734_v47, %v9704_v5  ;;  %v1976_v9 = vpop.f32.mrb[39].mxu1  ;;  %v3235_v33 = vsel %vm108_vm0, %v3131_v24, 0.0  ;;  %3239 = vadd.xlane.f32.xlu0 %v3238_v11  ;;  %v11458_v54 = vld [vmem:[#allocation50_spill] sm:$0xff] }
 0x231   :  { %v7179_v22 = vpop.eup %7178  ;;  %7198 = vpow2.f32 %v6367_v40  ;;  %v2331_v0 = vadd.f32 %v9704_v5, %v1976_v9  ;;  %3236 = vadd.xlane.f32.xlu1 %v3235_v33  ;;  %v2765_v45 = vmul.f32 %v7177_v38, %v8926_v21  ;;  %v3134_v43 = vmul.f32 %v11457_v16, %v2766_v56  ;;  %v9763_v11 = vpop.permute.xlu1 %4422  ;;  %v11461_v33 = vld [vmem:[#allocation52_spill] sm:$0xff] }
 0x232   :  { %v7181_v28 = vpop.eup %7180  ;;  %v9755_v2 = vrot.slane %v2211_v10, %v11212_v42  ;;  %7200 = vpow2.f32 %v6366_v31  ;;  %v6369_v1 = vmul.f32 -1.442695, %v2332_v39  ;;  %v2768_v32 = vmul.f32 %v7179_v22, %v8968_v17  ;;  %v11459_v31 = vld [vmem:[#allocation51_spill] sm:$0xff]  ;;  %11460 = vst [vmem:[#allocation40_spill] sm:$0xff] %v9763_v11 }
 0x233   :  { %v7183_v49 = vpop.eup %7182  ;;  %v6368_v6 = vmul.f32 -1.442695, %v2331_v0  ;;  %v6737_v62 = vpop.f32.mrb[40].mxu1  ;;  %v3133_v40 = vmul.f32 %v11458_v54, %v2765_v45  ;;  %v3244_v21 = vsel %vm108_vm0, %v3134_v43, 0.0  ;;  %v2767_v61 = vmul.f32 %v7181_v28, %v8958_v4 }
 0x234   :  { %v7185_v24 = vpop.eup %7184  ;;  %v2582_v55 = vadd.f32 1.0, %v7183_v49  ;;  %7202 = vpow2.f32 %v6369_v1  ;;  %v2334_v57 = vadd.f32 %v6737_v62, %v9704_v5  ;;  %v1986_v10 = vpop.f32.mrb[41].mxu1  ;;  %3245 = vadd.xlane.f32.xlu0 %v3244_v21  ;;  %v3136_v47 = vmul.f32 %v11459_v31, %v2768_v32  ;;  %v11464_v31 = vld [vmem:[#allocation113_spill] sm:$0xff] }
 0x235   :  { %v7187_v17 = vpop.eup %7186  ;;  %v2581_v56 = vadd.f32 1.0, %v7185_v24  ;;  %7204 = vpow2.f32 %v6368_v6  ;;  %v2333_v38 = vadd.f32 %v9704_v5, %v1986_v10  ;;  %v3241_v39 = vsel %vm108_vm0, %v3133_v40, 0.0 }
 0x236   :  { %v7189_v9 = vpop.eup %7188  ;;  %7206 = vrcp.f32 %v2582_v55  ;;  %v6371_v4 = vmul.f32 -1.442695, %v2334_v57  ;;  %3242 = vadd.xlane.f32.xlu1 %v3241_v39  ;;  %v3135_v22 = vmul.f32 %v11461_v33, %v2767_v61  ;;  %v3250_v0 = vsel %vm108_vm0, %v3136_v47, 0.0  ;;  %v11462_v61 = vld [vmem:[#allocation54_spill] sm:$0xff] }
 0x237   :  { %v7191_v45 = vpop.eup %7190  ;;  %7208 = vrcp.f32 %v2581_v56  ;;  %v6370_v16 = vmul.f32 -1.442695, %v2333_v38  ;;  %v6740_v43 = vpop.f32.mrb[42].mxu1  ;;  %v2769_v28 = vmul.f32 %v7189_v9, %v8978_v7  ;;  %v2770_v1 = vmul.f32 %v7187_v17, %v9004_v25  ;;  %v11463_v25 = vld [vmem:[#allocation53_spill] sm:$0xff]  ;;  %v11465_v9 = vld [vmem:[#allocation111_spill] sm:$0xff] }
 0x238   :  { %v7193_v32 = vpop.eup %7192  ;;  %v2584_v5 = vadd.f32 1.0, %v7191_v45  ;;  %7210 = vpow2.f32 %v6371_v4  ;;  %v2336_v49 = vadd.f32 %v6740_v43, %v9755_v2  ;;  %v1996_v6 = vpop.f32.mrb[43].mxu1  ;;  %v3247_v62 = vsel %vm108_vm0, %v3135_v22, 0.0  ;;  %3251 = vadd.xlane.f32.xlu0 %v3250_v0 }
 0x239   :  { %v7195_v54 = vpop.eup %7194  ;;  %v2583_v40 = vadd.f32 1.0, %v7193_v32  ;;  %7212 = vpow2.f32 %v6370_v16  ;;  %v2335_v21 = vadd.f32 %v9755_v2, %v1996_v6  ;;  %v3137_v24 = vmul.f32 %v11462_v61, %v2769_v28 }
 0x23a   :  { %v7197_v55 = vpop.eup %7196  ;;  %7214 = vrcp.f32 %v2584_v5  ;;  %v6373_v7 = vmul.f32 -1.442695, %v2336_v49  ;;  %3248 = vadd.xlane.f32.xlu1 %v3247_v62  ;;  %v3138_v57 = vmul.f32 %v11463_v25, %v2770_v1  ;;  %v6113_v10 = vpop.xlane.xlu1 %6112  ;;  %v2772_v47 = vmul.f32 %v7195_v54, %v11464_v31  ;;  %v11466_v1 = vld [vmem:[#allocation56_spill] sm:$0xff]  ;;  %v11467_v62 = vld [vmem:[#allocation55_spill] sm:$0xff] }
 0x23b   :  { %v7199_v17 = vpop.eup %7198  ;;  %7216 = vrcp.f32 %v2583_v40  ;;  %v6372_v56 = vmul.f32 -1.442695, %v2335_v21  ;;  %v6743_v38 = vpop.f32.mrb[44].mxu1  ;;  %v3253_v39 = vsel %vm108_vm0, %v3137_v24, 0.0  ;;  %v2771_v4 = vmul.f32 %v7197_v55, %v11465_v9  ;;  %6124 = vst.msk [vmem:[%s11007_s5 + $0x8] sm:$0xff] %vm6122_vm8, %v6113_v10 }
 0x23c   :  { %v7201_v33 = vpop.eup %7200  ;;  %v2586_v22 = vadd.f32 1.0, %v7199_v17  ;;  %7218 = vpow2.f32 %v6373_v7  ;;  %v2338_v0 = vadd.f32 %v6743_v38, %v9755_v2  ;;  %v2006_v45 = vpop.f32.mrb[45].mxu1  ;;  %v3256_v16 = vsel %vm108_vm0, %v3138_v57, 0.0  ;;  %v11468_v38 = vld [vmem:[#allocation117_spill] sm:$0xff] }
 0x23d   :  { %v2585_v43 = vadd.f32 1.0, %v7201_v33  ;;  %7220 = vpow2.f32 %v6372_v56  ;;  %v2337_v28 = vadd.f32 %v9755_v2, %v2006_v45  ;;  %3257 = vadd.xlane.f32.xlu0 %v3256_v16  ;;  %v3139_v32 = vmul.f32 %v11466_v1, %v2771_v4  ;;  %v11469_v45 = vld [vmem:[#allocation57_spill] sm:$0xff] }
 0x23e   :  { %v7203_v5 = vpop.eup %7202  ;;  %7222 = vrcp.f32 %v2586_v22  ;;  %v6375_v49 = vmul.f32 -1.442695, %v2338_v0  ;;  %3254 = vadd.xlane.f32.xlu1 %v3253_v39  ;;  %v2262_v6 = vrot.slane %v2213_v14, %v11212_v42  ;;  %v3140_v54 = vmul.f32 %v11467_v62, %v2772_v47 }
 0x23f   :  { %v7205_v40 = vpop.eup %7204  ;;  %7224 = vrcp.f32 %v2585_v43  ;;  %v2588_v21 = vadd.f32 1.0, %v7203_v5  ;;  %v6374_v61 = vmul.f32 -1.442695, %v2337_v28  ;;  %v6746_v24 = vpop.f32.mrb[46].mxu1  ;;  %v3259_v2 = vsel %vm108_vm0, %v3139_v32, 0.0  ;;  %v11470_v32 = vld [vmem:[#allocation58_spill] sm:$0xff] }
 0x240   :  { %v7207_v55 = vpop.eup %7206  ;;  %v2587_v7 = vadd.f32 1.0, %v7205_v40  ;;  %7226 = vpow2.f32 %v6375_v49  ;;  %v2340_v25 = vadd.f32 %v6746_v24, %v2262_v6  ;;  %v2016_v57 = vpop.f32.mrb[47].mxu1  ;;  %v3262_v10 = vsel %vm108_vm0, %v3140_v54, 0.0 }
 0x241   :  { %v7209_v31 = vpop.eup %7208  ;;  %7228 = vrcp.f32 %v2588_v21  ;;  %v2339_v14 = vadd.f32 %v2262_v6, %v2016_v57  ;;  %3263 = vadd.xlane.f32.xlu0 %v3262_v10  ;;  %v2774_v47 = vmul.f32 %v7207_v55, %v9088_v3  ;;  %v9802_v9 = vrot.slane %v9584_v34, %v11212_v42  ;;  %v11490_v34 = vld [vmem:[#allocation11_spill] sm:$0xff] }
 0x242   :  { %v7211_v17 = vpop.eup %7210  ;;  %7230 = vrcp.f32 %v2587_v7  ;;  %v6377_v56 = vmul.f32 -1.442695, %v2340_v25  ;;  %3260 = vadd.xlane.f32.xlu1 %v3259_v2  ;;  %v2773_v39 = vmul.f32 %v7209_v31, %v11468_v38  ;;  %v11471_v2 = vld [vmem:[#allocation118_spill] sm:$0xff]  ;;  %v11472_v31 = vld [vmem:[#allocation59_spill] sm:$0xff] }
 0x243   :  { %v7213_v4 = vpop.eup %7212  ;;  %v2590_v33 = vadd.f32 1.0, %v7211_v17  ;;  %7232 = vpow2.f32 %v6374_v61  ;;  %v6376_v22 = vmul.f32 -1.442695, %v2339_v14  ;;  %v6749_v0 = vpop.f32.mrb[48].mxu1  ;;  %v3142_v16 = vmul.f32 %v11469_v45, %v2774_v47 }
 0x244   :  { %v7215_v43 = vpop.eup %7214  ;;  %v2589_v28 = vadd.f32 1.0, %v7213_v4  ;;  %7234 = vpow2.f32 %v6377_v56  ;;  %v2342_v3 = vadd.f32 %v6749_v0, %v2262_v6  ;;  %v2026_v1 = vpop.f32.mrb[49].mxu1  ;;  %v3141_v5 = vmul.f32 %v11470_v32, %v2773_v39  ;;  %v11473_v56 = vld [vmem:[#allocation60_spill] sm:$0xff] }
 0x245   :  { %v7217_v49 = vpop.eup %7216  ;;  %7236 = vrcp.f32 %v2590_v33  ;;  %v2341_v62 = vadd.f32 %v2262_v6, %v2026_v1  ;;  %v3268_v54 = vsel %vm108_vm0, %v3142_v16, 0.0  ;;  %v2776_v40 = vmul.f32 %v7215_v43, %v9118_v48 }
 0x246   :  { %v7219_v21 = vpop.eup %7218  ;;  %7238 = vrcp.f32 %v2589_v28  ;;  %v6379_v61 = vmul.f32 -1.442695, %v2342_v3  ;;  %v3265_v24 = vsel %vm108_vm0, %v3141_v5, 0.0  ;;  %3269 = vadd.xlane.f32.xlu0 %v3268_v54  ;;  %v2775_v55 = vmul.f32 %v7217_v49, %v11471_v2  ;;  %v11475_v28 = vld [vmem:[#allocation121_spill] sm:$0xff] }
 0x247   :  { %v7221_v7 = vpop.eup %7220  ;;  %v2592_v25 = vadd.f32 1.0, %v7219_v21  ;;  %7240 = vpow2.f32 %v6376_v22  ;;  %v6378_v57 = vmul.f32 -1.442695, %v2341_v62  ;;  %3266 = vadd.xlane.f32.xlu1 %v3265_v24  ;;  %v6752_v10 = vpop.f32.mrb[50].mxu1  ;;  %v3144_v6 = vmul.f32 %v11472_v31, %v2776_v40  ;;  %v11474_v22 = vld [vmem:[#allocation123_spill] sm:$0xff]  ;;  %v11476_v62 = vld [vmem:[#allocation61_spill] sm:$0xff] }
 0x248   :  { %v7223_v14 = vpop.eup %7222  ;;  %v2591_v47 = vadd.f32 1.0, %v7221_v7  ;;  %7242 = vpow2.f32 %v6379_v61  ;;  %v2344_v48 = vadd.f32 %v6752_v10, %v9796_v27  ;;  %v2036_v17 = vpop.f32.mrb[51].mxu1  ;;  %v3143_v38 = vmul.f32 %v11473_v56, %v2775_v55  ;;  %v11477_v24 = vld [vmem:[#allocation62_spill] sm:$0xff]  ;;  %v11478_v55 = vld [vmem:[#allocation129_spill] sm:$0xff] }
 0x249   :  { %v7225_v39 = vpop.eup %7224  ;;  %7244 = vrcp.f32 %v2592_v25  ;;  %v2343_v4 = vadd.f32 %v9796_v27, %v2036_v17  ;;  %v3274_v33 = vsel %vm108_vm0, %v3144_v6, 0.0  ;;  %v2778_v0 = vmul.f32 %v7223_v14, %v11474_v22  ;;  %v11479_v31 = vld [vmem:[#allocation125_spill] sm:$0xff] }
 0x24a   :  { %v7227_v45 = vpop.eup %7226  ;;  %7246 = vrcp.f32 %v2591_v47  ;;  %v6381_v16 = vmul.f32 -1.442695, %v2344_v48  ;;  %v3271_v43 = vsel %vm108_vm0, %v3143_v38, 0.0  ;;  %3275 = vadd.xlane.f32.xlu0 %v3274_v33  ;;  %v2777_v3 = vmul.f32 %v7225_v39, %v11475_v28  ;;  %v11480_v33 = vld [vmem:[#allocation3_spill] sm:$0xff] }
 0x24b   :  { %v7229_v1 = vpop.eup %7228  ;;  %v2594_v32 = vadd.f32 1.0, %v7227_v45  ;;  %7248 = vpow2.f32 %v6378_v57  ;;  %v6380_v5 = vmul.f32 -1.442695, %v2343_v4  ;;  %3272 = vadd.xlane.f32.xlu1 %v3271_v43  ;;  %v3146_v54 = vmul.f32 %v11476_v62, %v2778_v0  ;;  %v11481_v0 = vld [vmem:[#allocation5_spill] sm:$0xff] }
 0x24c   :  { %v6755_v49 = vpop.f32.mrb[52].mxu1  ;;  %v7231_v40 = vpop.eup %7230  ;;  %7250 = vpow2.f32 %v6381_v16  ;;  %v3145_v2 = vmul.f32 %v11477_v24, %v2777_v3  ;;  %v2780_v7 = vmul.f32 %v7229_v1, %v11478_v55  ;;  %v9833_v28 = vrot.slane %v2212_v8, %v11212_v42 }
 0x24d   :  { %v2346_v21 = vadd.f32 %v6755_v49, %v9796_v27  ;;  %v2046_v61 = vpop.f32.mrb[53].mxu1  ;;  %v7233_v25 = vpop.eup %7232  ;;  %7252 = vrcp.f32 %v2594_v32  ;;  %v3280_v57 = vsel %vm108_vm0, %v3146_v54, 0.0  ;;  %v2779_v6 = vmul.f32 %v7231_v40, %v11479_v31 }
 0x24e   :  { %v2345_v10 = vadd.f32 %v9796_v27, %v2046_v61  ;;  %v7235_v14 = vpop.eup %7234  ;;  %v2593_v47 = vadd.f32 1.0, %v7233_v25  ;;  %7254 = vpow2.f32 %v6380_v5  ;;  %v3277_v17 = vsel %vm108_vm0, %v3145_v2, 0.0  ;;  %3281 = vadd.xlane.f32.xlu0 %v3280_v57  ;;  %v11483_v2 = vld [vmem:[#allocation6_spill] sm:$0xff]  ;;  %v11484_v57 = vld [vmem:[#allocation8_spill] sm:$0xff] }
 0x24f   :  { %v6383_v48 = vmul.f32 -1.442695, %v2346_v21  ;;  %v7237_v56 = vpop.eup %7236  ;;  %v2596_v38 = vadd.f32 1.0, %v7235_v14  ;;  %3278 = vadd.xlane.f32.xlu1 %v3277_v17  ;;  %v3147_v22 = vmul.f32 %v11480_v33, %v2779_v6  ;;  %v3148_v27 = vmul.f32 %v11481_v0, %v2780_v7  ;;  %v11482_v21 = vld [vmem:[#allocation128_spill] sm:$0xff] }
 0x250   :  { %v6382_v39 = vmul.f32 -1.442695, %v2345_v10  ;;  %v6758_v4 = vpop.f32.mrb[54].mxu1  ;;  %v7239_v45 = vpop.eup %7238  ;;  %7256 = vrcp.f32 %v2593_v47  ;;  %v2782_v3 = vmul.f32 %v7237_v56, %v9207_v63 }
 0x251   :  { %v2348_v16 = vadd.f32 %v6758_v4, %v9802_v9  ;;  %v2056_v43 = vpop.f32.mrb[55].mxu1  ;;  %v7241_v1 = vpop.eup %7240  ;;  %7258 = vrcp.f32 %v2596_v38  ;;  %v3283_v5 = vsel %vm108_vm0, %v3147_v22, 0.0  ;;  %v3286_v49 = vsel %vm108_vm0, %v3148_v27, 0.0  ;;  %v11485_v27 = vld [vmem:[#allocation10_spill] sm:$0xff] }
 0x252   :  { %v2347_v32 = vadd.f32 %v9802_v9, %v2056_v43  ;;  %v7243_v62 = vpop.eup %7242  ;;  %v2595_v54 = vadd.f32 1.0, %v7241_v1  ;;  %7260 = vpow2.f32 %v6383_v48  ;;  %3287 = vadd.xlane.f32.xlu0 %v3286_v49  ;;  %v2781_v61 = vmul.f32 %v7239_v45, %v11482_v21  ;;  %v11486_v43 = vld [vmem:[#allocation7_spill] sm:$0xff]  ;;  %v11487_v21 = vld [vmem:[#allocation4_spill] sm:$0xff] }
 0x253   :  { %v6385_v40 = vmul.f32 -1.442695, %v2348_v16  ;;  %v7245_v51 = vpop.eup %7244  ;;  %v2598_v8 = vadd.f32 1.0, %v7243_v62  ;;  %7262 = vpow2.f32 %v6382_v39  ;;  %3284 = vadd.xlane.f32.xlu1 %v3283_v5  ;;  %v3150_v55 = vmul.f32 %v11483_v2, %v2782_v3 }
 0x254   :  { %v6384_v24 = vmul.f32 -1.442695, %v2347_v32  ;;  %v6761_v63 = vpop.f32.mrb[56].mxu1  ;;  %v7247_v7 = vpop.eup %7246  ;;  %7264 = vrcp.f32 %v2595_v54  ;;  %v3149_v31 = vmul.f32 %v11484_v57, %v2781_v61  ;;  %v2784_v6 = vmul.f32 %v7245_v51, %v9236_v29 }
 0x255   :  { %v2350_v25 = vadd.f32 %v6761_v63, %v9802_v9  ;;  %v2066_v10 = vpop.f32.mrb[57].mxu1  ;;  %v7249_v14 = vpop.eup %7248  ;;  %7266 = vrcp.f32 %v2598_v8  ;;  %v3292_v48 = vsel %vm108_vm0, %v3150_v55, 0.0  ;;  %v2783_v17 = vmul.f32 %v7247_v7, %v9200_v35 }
 0x256   :  { %v2349_v47 = vadd.f32 %v9802_v9, %v2066_v10  ;;  %v7251_v56 = vpop.eup %7250  ;;  %v2597_v38 = vadd.f32 1.0, %v7249_v14  ;;  %7268 = vpow2.f32 %v6385_v40  ;;  %v3289_v4 = vsel %vm108_vm0, %v3149_v31, 0.0  ;;  %3293 = vadd.xlane.f32.xlu0 %v3292_v48 }
 0x257   :  { %v6387_v39 = vmul.f32 -1.442695, %v2350_v25  ;;  %v7253_v33 = vpop.eup %7252  ;;  %v2600_v22 = vadd.f32 1.0, %v7251_v56  ;;  %7270 = vpow2.f32 %v6384_v24  ;;  %3290 = vadd.xlane.f32.xlu1 %v3289_v4  ;;  %v3151_v45 = vmul.f32 %v11485_v27, %v2783_v17 }
 0x258   :  { %v6386_v0 = vmul.f32 -1.442695, %v2349_v47  ;;  %v6764_v29 = vpop.f32.mrb[58].mxu1  ;;  %v7255_v9 = vpop.eup %7254  ;;  %7272 = vrcp.f32 %v2597_v38  ;;  %v3152_v3 = vmul.f32 %v11486_v43, %v2784_v6  ;;  %v2786_v1 = vmul.f32 %v7253_v33, %v9261_v50  ;;  %v11488_v50 = vld [vmem:[#allocation134_spill] sm:$0xff]  ;;  %v11489_v47 = vld [vmem:[#allocation12_spill] sm:$0xff] }
 0x259   :  { %v2352_v16 = vadd.f32 %v6764_v29, %v9833_v28  ;;  %v2076_v35 = vpop.f32.mrb[59].mxu1  ;;  %7274 = vrcp.f32 %v2600_v22  ;;  %v2599_v32 = vadd.f32 1.0, %v7255_v9  ;;  %v3295_v49 = vsel %vm108_vm0, %v3151_v45, 0.0 }
 0x25a   :  { %v2351_v5 = vadd.f32 %v9833_v28, %v2076_v35  ;;  %v7257_v62 = vpop.eup %7256  ;;  %7276 = vpow2.f32 %v6387_v39  ;;  %v3298_v40 = vsel %vm108_vm0, %v3152_v3, 0.0  ;;  %v3154_v61 = vmul.f32 %v11487_v21, %v2786_v1  ;;  %v11491_v35 = vld [vmem:[#allocation14_spill] sm:$0xff] }
 0x25b   :  { %v6389_v54 = vmul.f32 -1.442695, %v2352_v16  ;;  %v7259_v51 = vpop.eup %7258  ;;  %7278 = vrcp.f32 %v2599_v32  ;;  %3296 = vadd.xlane.f32.xlu1 %v3295_v49  ;;  %3299 = vadd.xlane.f32.xlu0 %v3298_v40  ;;  %v2785_v63 = vmul.f32 %v7257_v62, %v11488_v50  ;;  %v2278_v2 = vrot.slane %v2214_v41, %v11212_v42  ;;  %v11494_v50 = vld [vmem:[#allocation146_spill] sm:$0xff] }
 0x25c   :  { %v6388_v8 = vmul.f32 -1.442695, %v2351_v5  ;;  %v6767_v24 = vpop.f32.mrb[60].mxu1  ;;  %v7261_v55 = vpop.eup %7260  ;;  %7280 = vpow2.f32 %v6386_v0  ;;  %v3304_v10 = vsel %vm108_vm0, %v3154_v61, 0.0  ;;  %v2788_v57 = vmul.f32 %v7259_v51, %v9284_v13 }
 0x25d   :  { %v2354_v7 = vadd.f32 %v6767_v24, %v9833_v28  ;;  %v2086_v25 = vpop.f32.mrb[61].mxu1  ;;  %v7263_v31 = vpop.eup %7262  ;;  %v2602_v6 = vadd.f32 1.0, %v7261_v55  ;;  %7282 = vpow2.f32 %v6389_v54  ;;  %v3153_v48 = vmul.f32 %v11489_v47, %v2785_v63 }
 0x25e   :  { %v2353_v14 = vadd.f32 %v9833_v28, %v2086_v25  ;;  %v7265_v17 = vpop.eup %7264  ;;  %v2601_v56 = vadd.f32 1.0, %v7263_v31  ;;  %7284 = vpow2.f32 %v6388_v8  ;;  %v3156_v41 = vmul.f32 %v11490_v34, %v2788_v57 }
 0x25f   :  { %v6391_v42 = vmul.f32 -1.442695, %v2354_v7  ;;  %v7267_v38 = vpop.eup %7266  ;;  %7286 = vrcp.f32 %v2602_v6  ;;  %v3301_v4 = vsel %vm108_vm0, %v3153_v48, 0.0  ;;  %3305 = vadd.xlane.f32.xlu0 %v3304_v10  ;;  %v2787_v13 = vmul.f32 %v7265_v17, %v9273_v18  ;;  %v11492_v18 = vld [vmem:[#allocation13_spill] sm:$0xff]  ;;  %v11495_v10 = vld [vmem:[#allocation16_spill] sm:$0xff]  ;;  %v11497_v48 = vld [vmem:[#allocation15_spill] sm:$0xff] }
 0x260   :  { %v6390_v39 = vmul.f32 -1.442695, %v2353_v14  ;;  %v6770_v33 = vpop.f32.mrb[62].mxu1  ;;  %v7269_v22 = vpop.eup %7268  ;;  %7288 = vrcp.f32 %v2601_v56  ;;  %3302 = vadd.xlane.f32.xlu1 %v3301_v4  ;;  %v3310_v29 = vsel %vm108_vm0, %v3156_v41, 0.0  ;;  %v2790_v27 = vmul.f32 %v7267_v38, %v9313_v19  ;;  %v11493_v19 = vld [vmem:[#allocation139_spill] sm:$0xff]  ;;  %v11496_v14 = vld [vmem:[#allocation142_spill] sm:$0xff] }
 0x261   :  { %v2356_v28 = vadd.f32 %v6770_v33, %v2278_v2  ;;  %v2096_v0 = vpop.f32.mrb[63].mxu1  ;;  %v7271_v45 = vpop.eup %7270  ;;  %v2604_v9 = vadd.f32 1.0, %v7269_v22  ;;  %7290 = vpow2.f32 %v6391_v42  ;;  %v3155_v43 = vmul.f32 %v11491_v35, %v2787_v13 }
 0x262   :  { %v2355_v16 = vadd.f32 %v2278_v2, %v2096_v0  ;;  %v7273_v3 = vpop.eup %7272  ;;  %v2603_v1 = vadd.f32 1.0, %v7271_v45  ;;  %7292 = vpow2.f32 %v6390_v39  ;;  %v3158_v5 = vmul.f32 %v11492_v18, %v2790_v27 }
 0x263   :  { %v6393_v32 = vmul.f32 -1.442695, %v2356_v28  ;;  %v7275_v49 = vpop.eup %7274  ;;  %7294 = vrcp.f32 %v2604_v9  ;;  %v3307_v54 = vsel %vm108_vm0, %v3155_v43, 0.0  ;;  %3311 = vadd.xlane.f32.xlu0 %v3310_v29  ;;  %v2789_v21 = vmul.f32 %v7273_v3, %v11493_v19  ;;  %v11499_v29 = vld [vmem:[#allocation150_spill] sm:$0xff]  ;;  %v11500_v9 = vld [vmem:[#allocation145_spill] sm:$0xff] }
 0x264   :  { %v6392_v62 = vmul.f32 -1.442695, %v2355_v16  ;;  %v6773_v40 = vpop.f32.mrb[64].mxu1  ;;  %v7277_v61 = vpop.eup %7276  ;;  %7296 = vrcp.f32 %v2603_v1  ;;  %3308 = vadd.xlane.f32.xlu1 %v3307_v54  ;;  %v3316_v24 = vsel %vm108_vm0, %v3158_v5, 0.0  ;;  %v2792_v63 = vmul.f32 %v7275_v49, %v11494_v50  ;;  %v11501_v3 = vld [vmem:[#allocation18_spill] sm:$0xff]  ;;  %v11502_v5 = vld [vmem:[#allocation63_spill] sm:$0xff] }
 0x265   :  { %v2358_v51 = vadd.f32 %v6773_v40, %v2278_v2  ;;  %v2106_v8 = vpop.f32.mrb[65].mxu1  ;;  %v7279_v55 = vpop.eup %7278  ;;  %v2606_v7 = vadd.f32 1.0, %v7277_v61  ;;  %7298 = vpow2.f32 %v6393_v32  ;;  %v3157_v57 = vmul.f32 %v11495_v10, %v2789_v21  ;;  %v11503_v40 = vld [vmem:[#allocation153_spill] sm:$0xff]  ;;  %v11506_v10 = vld [vmem:[#allocation20_spill] sm:$0xff] }
 0x266   :  { %v2357_v25 = vadd.f32 %v2278_v2, %v2106_v8  ;;  %v7281_v31 = vpop.eup %7280  ;;  %7300 = vpow2.f32 %v6392_v62  ;;  %v2791_v47 = vmul.f32 %v7279_v55, %v11496_v14  ;;  %v3160_v17 = vmul.f32 %v11497_v48, %v2792_v63  ;;  %v11498_v2 = vld [vmem:[#allocation17_spill] sm:$0xff]  ;;  %v11505_v63 = vld [vmem:[#allocation19_spill] sm:$0xff] }
 0x267   :  { %v6395_v6 = vmul.f32 -1.442695, %v2358_v51  ;;  %v7283_v56 = vpop.eup %7282  ;;  %7302 = vrcp.f32 %v2606_v7  ;;  %v2605_v42 = vadd.f32 1.0, %v7281_v31  ;;  %v3313_v34 = vsel %vm108_vm0, %v3157_v57, 0.0  ;;  %3317 = vadd.xlane.f32.xlu0 %v3316_v24  ;;  %v11504_v51 = vld [vmem:[#allocation149_spill] sm:$0xff] }
 0x268   :  { %v7285_v41 = vpop.eup %7284  ;;  %v2608_v38 = vadd.f32 1.0, %v7283_v56  ;;  %v6394_v39 = vmul.f32 -1.442695, %v2357_v25  ;;  %3314 = vadd.xlane.f32.xlu1 %v3313_v34  ;;  %v3159_v4 = vmul.f32 %v11498_v2, %v2791_v47  ;;  %v3322_v0 = vsel %vm108_vm0, %v3160_v17, 0.0  ;;  %v11507_v14 = vld [vmem:[#allocation157_spill] sm:$0xff]  ;;  %v11508_v34 = vld [vmem:[#allocation154_spill] sm:$0xff] }
 0x269   :  { %7304 = vpow2.f32 %v6395_v6  ;;  %v7287_v33 = vpop.eup %7286  ;;  %v2607_v13 = vadd.f32 1.0, %v7285_v41 }
 0x26a   :  { %7306 = vrcp.f32 %v2605_v42  ;;  %v7289_v22 = vpop.eup %7288  ;;  %v3319_v28 = vsel %vm108_vm0, %v3159_v4, 0.0  ;;  %v2794_v27 = vmul.f32 %v7287_v33, %v11499_v29  ;;  %v11510_v4 = vld [vmem:[#allocation161_spill] sm:$0xff]  ;;  %v11512_v29 = vld [vmem:[#allocation160_spill] sm:$0xff] }
 0x26b   :  { %7308 = vrcp.f32 %v2608_v38  ;;  %v7291_v45 = vpop.eup %7290  ;;  %3323 = vadd.xlane.f32.xlu0 %v3322_v0  ;;  %v2793_v16 = vmul.f32 %v7289_v22, %v11500_v9  ;;  %v11509_v38 = vld [vmem:[#allocation21_spill] sm:$0xff]  ;;  %v11511_v22 = vld [vmem:[#allocation64_spill] sm:$0xff]  ;;  %v11513_v9 = vld [vmem:[#allocation22_spill] sm:$0xff] }
 0x26c   :  { %7310 = vrcp.f32 %v2607_v13  ;;  %v7293_v35 = vpop.eup %7292  ;;  %v2610_v43 = vadd.f32 1.0, %v7291_v45  ;;  %3320 = vadd.xlane.f32.xlu1 %v3319_v28  ;;  %v3162_v1 = vmul.f32 %v11501_v3, %v2794_v27  ;;  %v11514_v3 = vld [vmem:[#allocation65_spill] sm:$0xff] }
 0x26d   :  { %7312 = vpow2.f32 %v6394_v39  ;;  %v7295_v32 = vpop.eup %7294  ;;  %v2609_v18 = vadd.f32 1.0, %v7293_v35  ;;  %v3161_v49 = vmul.f32 %v11502_v5, %v2793_v16 }
 0x26e   :  { %v7297_v62 = vpop.eup %7296  ;;  %7314 = vrcp.f32 %v2610_v43  ;;  %v3328_v54 = vsel %vm108_vm0, %v3162_v1, 0.0  ;;  %v2796_v19 = vmul.f32 %v7295_v32, %v11503_v40 }
 0x26f   :  { %v7299_v21 = vpop.eup %7298  ;;  %7316 = vrcp.f32 %v2609_v18  ;;  %v3325_v61 = vsel %vm108_vm0, %v3161_v49, 0.0  ;;  %3329 = vadd.xlane.f32.xlu0 %v3328_v54  ;;  %v2795_v8 = vmul.f32 %v7297_v62, %v11504_v51  ;;  %v11515_v18 = vld [vmem:[#allocation165_spill] sm:$0xff]  ;;  %v11516_v54 = vld [vmem:[#allocation162_spill] sm:$0xff]  ;;  %v11518_v51 = vld [vmem:[#allocation67_spill] sm:$0xff] }
 0x270   :  { %v7301_v24 = vpop.eup %7300  ;;  %v2612_v50 = vadd.f32 1.0, %v7299_v21  ;;  %3326 = vadd.xlane.f32.xlu1 %v3325_v61  ;;  %v3164_v55 = vmul.f32 %v11505_v63, %v2796_v19  ;;  %v11517_v19 = vld [vmem:[#allocation66_spill] sm:$0xff] }
 0x271   :  { %v7303_v7 = vpop.eup %7302  ;;  %v2611_v25 = vadd.f32 1.0, %v7301_v24  ;;  %v3163_v57 = vmul.f32 %v11506_v10, %v2795_v8 }
 0x272   :  { %7318 = vrcp.f32 %v2612_v50  ;;  %v3334_v6 = vsel %vm108_vm0, %v3164_v55, 0.0  ;;  %v2798_v47 = vmul.f32 %v7303_v7, %v11507_v14  ;;  %v11519_v50 = vld [vmem:[#allocation169_spill] sm:$0xff]  ;;  %v11522_v14 = vld [vmem:[#allocation24_spill] sm:$0xff] }
 0x273   :  { %v7305_v31 = vpop.eup %7304  ;;  %7320 = vrcp.f32 %v2611_v25  ;;  %v3331_v56 = vsel %vm108_vm0, %v3163_v57, 0.0  ;;  %3335 = vadd.xlane.f32.xlu0 %v3334_v6  ;;  %v11520_v25 = vld [vmem:[#allocation166_spill] sm:$0xff] }
 0x274   :  { %v7307_v48 = vpop.eup %7306  ;;  %v2614_v17 = vadd.f32 1.0, %v7305_v31  ;;  %3332 = vadd.xlane.f32.xlu1 %v3331_v56  ;;  %v3166_v39 = vmul.f32 %v11509_v38, %v2798_v47  ;;  %v11521_v31 = vld [vmem:[#allocation23_spill] sm:$0xff] }
 0x275   :  { %v7309_v42 = vpop.eup %7308  ;;  %v2797_v41 = vmul.f32 %v7307_v48, %v11508_v34  ;;  %v11523_v48 = vld [vmem:[#allocation173_spill] sm:$0xff] }
 0x276   :  { %v7311_v2 = vpop.eup %7310  ;;  %7322 = vrcp.f32 %v2614_v17  ;;  %v2800_v33 = vmul.f32 %v7309_v42, %v11510_v4  ;;  %v3340_v0 = vsel %vm108_vm0, %v3166_v39, 0.0  ;;  %v11524_v34 = vld [vmem:[#allocation25_spill] sm:$0xff]  ;;  %v11525_v39 = vld [vmem:[#allocation170_spill] sm:$0xff]  ;;  %v11526_v4 = vld [vmem:[#allocation68_spill] sm:$0xff] }
 0x277   :  { %v7313_v13 = vpop.eup %7312  ;;  %v3165_v28 = vmul.f32 %v11511_v22, %v2797_v41  ;;  %v2799_v27 = vmul.f32 %v7311_v2, %v11512_v29  ;;  %3341 = vadd.xlane.f32.xlu0 %v3340_v0  ;;  %v7404_v22 = vld [vmem:[%s11004_s2 + $0x20] sm:$0xff] }
 0x278   :  { %v2613_v45 = vadd.f32 1.0, %v7313_v13  ;;  %v3168_v16 = vmul.f32 %v11513_v9, %v2800_v33  ;;  %v7315_v35 = vpop.eup %7314  ;;  %v11528_v9 = vld [vmem:[#allocation110_spill] sm:$0xff] }
 0x279   :  { %v3337_v43 = vsel %vm108_vm0, %v3165_v28, 0.0  ;;  %v3167_v1 = vmul.f32 %v11514_v3, %v2799_v27  ;;  %v7317_v32 = vpop.eup %7316  ;;  %v2802_v5 = vmul.f32 %v7315_v35, %v11515_v18  ;;  %v11527_v28 = vld [vmem:[#allocation9_spill] sm:$0xff] }
 0x27a   :  { %7324 = vrcp.f32 %v2613_v45  ;;  %3338 = vadd.xlane.f32.xlu1 %v3337_v43  ;;  %v3346_v62 = vsel %vm108_vm0, %v3168_v16, 0.0  ;;  %v2801_v40 = vmul.f32 %v7317_v32, %v11516_v54  ;;  %v6114_v0 = vmul.f32 %v7404_v22, %v11527_v28  ;;  %v7405_v45 = vld [vmem:[%s11004_s2 + $0x28] sm:$0xff]  ;;  %v11529_v32 = vld [vmem:[#allocation69_spill] sm:$0xff]  ;;  %v11541_v28 = vld [vmem:[#allocation164_spill] sm:$0xff] }
 0x27b   :  { %v3343_v49 = vsel %vm108_vm0, %v3167_v1, 0.0  ;;  %3347 = vadd.xlane.f32.xlu0 %v3346_v62  ;;  %v3170_v21 = vmul.f32 %v11517_v19, %v2802_v5  ;;  %v6115_v16 = vmul.f32 %v7405_v45, %v11528_v9  ;;  %v11531_v19 = vld [vmem:[#allocation70_spill] sm:$0xff] }
 0x27c   :  { %v7319_v61 = vpop.eup %7318  ;;  %v3169_v8 = vmul.f32 %v11518_v51, %v2801_v40  ;;  %v6116_v27 = vsel %vm108_vm0, %v6114_v0, 0.0 }
 0x27d   :  { %v7321_v24 = vpop.eup %7320  ;;  %v2804_v63 = vmul.f32 %v7319_v61, %v11519_v50  ;;  %v3352_v7 = vsel %vm108_vm0, %v3170_v21, 0.0  ;;  %v6119_v35 = vsel %vm108_vm0, %v6115_v16, 0.0  ;;  %v11533_v50 = vld [vmem:[#allocation156_spill] sm:$0xff] }
 0x27e   :  { %3344 = vadd.xlane.f32.xlu1 %v3343_v49  ;;  %v3349_v55 = vsel %vm108_vm0, %v3169_v8, 0.0  ;;  %v2803_v10 = vmul.f32 %v7321_v24, %v11520_v25  ;;  %v11530_v49 = vld [vmem:[#allocation152_spill] sm:$0xff]  ;;  %v11532_v8 = vld [vmem:[#allocation30_spill] sm:$0xff] }
 0x27f   :  { %3353 = vadd.xlane.f32.xlu0 %v3352_v7  ;;  %v3172_v6 = vmul.f32 %v11521_v31, %v2804_v63  ;;  %v11534_v25 = vld [vmem:[#allocation72_spill] sm:$0xff] }
 0x280   :  { %v7323_v57 = vpop.eup %7322  ;;  %v3171_v47 = vmul.f32 %v11522_v14, %v2803_v10  ;;  %v11543_v16 = vld [vmem:[#allocation80_spill] sm:$0xff] }
 0x281   :  { %v2806_v17 = vmul.f32 %v7323_v57, %v11523_v48  ;;  %v3358_v42 = vsel %vm108_vm0, %v3172_v6, 0.0  ;;  %v11535_v57 = vld [vmem:[#allocation71_spill] sm:$0xff] }
 0x282   :  { %3350 = vadd.xlane.f32.xlu1 %v3349_v55  ;;  %v3355_v56 = vsel %vm108_vm0, %v3171_v47, 0.0  ;;  %v11536_v47 = vld [vmem:[#allocation74_spill] sm:$0xff] }
 0x283   :  { %v3174_v41 = vmul.f32 %v11524_v34, %v2806_v17  ;;  %3359 = vadd.xlane.f32.xlu0 %v3358_v42  ;;  %v11537_v17 = vld [vmem:[#allocation159_spill] sm:$0xff] }
 0x284   :  { %v7325_v38 = vpop.eup %7324 }
 0x285   :  { %v2805_v2 = vmul.f32 %v7325_v38, %v11525_v39  ;;  %v3364_v13 = vsel %vm108_vm0, %v3174_v41, 0.0  ;;  %v11538_v41 = vld [vmem:[#allocation76_spill] sm:$0xff]  ;;  %v11539_v39 = vld [vmem:[#allocation73_spill] sm:$0xff] }
 0x286   :  { %3356 = vadd.xlane.f32.xlu1 %v3355_v56 }
 0x287   :  { %v3173_v33 = vmul.f32 %v11526_v4, %v2805_v2  ;;  %3365 = vadd.xlane.f32.xlu0 %v3364_v13  ;;  %v11540_v13 = vld [vmem:[#allocation78_spill] sm:$0xff] }
 0x289   :  { %v3361_v29 = vsel %vm108_vm0, %v3173_v33, 0.0 }
 0x28a   :  { %3362 = vadd.xlane.f32.xlu1 %v3361_v29  ;;  %v11542_v29 = vlaneseq }
 0x28b   :  { %6117 = vadd.xlane.f32.xlu0 %v6116_v27 }
 0x28c   :  { %v4617_v27 = vand.u32 127, %v11542_v29  ;;  %v11551_v29 = vld [vmem:[#allocation86_spill] sm:$0xff] }
 0x28f   :  { %6120 = vadd.xlane.f32.xlu0 %v6119_v35  ;;  %v9938_v3 = vpop.xlane.xlu1 %3179 }
 0x290   :  { %v9936_v43 = vpop.xlane.xlu0 %3176  ;;  %v4055_v18 = vmul.f32 %v11529_v32, %v9938_v3  ;;  %v11544_v32 = vld [vmem:[#allocation75_spill] sm:$0xff] }
 0x291   :  { %v4488_v62 = vmul.f32 %v11530_v49, %v9936_v43  ;;  %v4054_v24 = vmul.f32 %v11532_v8, %v9936_v43  ;;  %v4622_v49 = vadd.s32 4294967288, %v4617_v27  ;;  %v11545_v8 = vld [vmem:[#allocation82_spill] sm:$0xff] }
 0x294   :  { %v9940_v1 = vpop.xlane.xlu0 %3185 }
 0x295   :  { %v4057_v10 = vmul.f32 %v11534_v25, %v9940_v1  ;;  %v11547_v25 = vld [vmem:[#allocation2_spill] sm:$0xff] }
 0x298   :  { %v9944_v5 = vpop.xlane.xlu0 %3182 }
 0x299   :  { %v4056_v21 = vmul.f32 %v11531_v19, %v9944_v5  ;;  %v4490_v63 = vmul.f32 %v11533_v50, %v9944_v5  ;;  %v4629_v19 = vadd.s32 4294967280, %v4617_v27  ;;  %v11546_v50 = vld [vmem:[#allocation168_spill] sm:$0xff] }
 0x29b   :  { %5012 = vperm.xlu1 %6808, %v4055_v18   ;;  %v9948_v54 = vpop.xlane.xlu1 %3188 }
 0x29c   :  { %v9950_v40 = vpop.xlane.xlu0 %3191  ;;  %v4058_v31 = vmul.f32 %v11535_v57, %v9948_v54  ;;  %v4492_v56 = vmul.f32 %v11537_v17, %v9948_v54  ;;  %v10015_v57 = vsub.s32 %v4617_v27, %v11547_v25  ;;  %v11549_v17 = vld [vmem:[#allocation84_spill] sm:$0xff] }
 0x29d   :  { %v4059_v48 = vmul.f32 %v11536_v47, %v9950_v40  ;;  %v10020_v47 = vsub.s32 %v4629_v19, %v11547_v25 }
 0x29f   :  { %5585 = vperm.xlu1 %6808, %v4488_v62  }
 0x2a0   :  { %v9954_v61 = vpop.xlane.xlu1 %3194  ;;  %v9956_v51 = vpop.xlane.xlu0 %3197 }
 0x2a1   :  { %v4061_v38 = vmul.f32 %v11538_v41, %v9956_v51  ;;  %v4060_v2 = vmul.f32 %v11539_v39, %v9954_v61  ;;  %v4494_v0 = vmul.f32 %v11541_v28, %v9954_v61  ;;  %v4636_v41 = vadd.s32 4294967272, %v4617_v27 }
 0x2a2   :  { %v4633_v28 = vrot.slane %v9944_v5, %v10020_v47 }
 0x2a3   :  { %5015 = vperm.xlu1 %6808, %v4056_v21  }
 0x2a4   :  { %v9962_v55 = vpop.xlane.xlu1 %3200  ;;  %v9964_v7 = vpop.xlane.xlu0 %3203 }
 0x2a5   :  { %5009 = vperm.xlu0 %6809, %v4054_v24   ;;  %v4063_v22 = vmul.f32 %v11540_v13, %v9964_v7  ;;  %v4062_v18 = vmul.f32 %v11544_v32, %v9962_v55  ;;  %v4621_v13 = vrot.slane %v9936_v43, %v10015_v57  ;;  %v11552_v32 = vld [vmem:[#allocation172_spill] sm:$0xff] }
 0x2a7   :  { %5591 = vperm.xlu1 %6808, %v4490_v63   ;;  %v4496_v63 = vmul.f32 %v11546_v50, %v9962_v55  ;;  %v4665_v50 = vrot.slane %v9962_v55, %v10015_v57 }
 0x2a8   :  { %v9970_v6 = vpop.xlane.xlu0 %3209 }
 0x2a9   :  { %5018 = vperm.xlu0 %6809, %v4057_v10   ;;  %v4065_v35 = vmul.f32 %v11543_v16, %v9970_v6  ;;  %v10012_v10 = vsub.s32 %v4622_v49, %v11547_v25  ;;  %v4646_v49 = vrot.slane %v9948_v54, %v10015_v57 }
 0x2aa   :  { %v9972_v14 = vpop.xlane.xlu1 %3206 }
 0x2ab   :  { %5021 = vperm.xlu1 %6808, %v4058_v31   ;;  %11548 = vst [vmem:[#allocation41_spill] sm:$0xff] %v10012_v10  ;;  %v4669_v43 = vrot.slane %v9964_v7, %v10012_v10  ;;  %v4674_v54 = vrot.slane %v9972_v14, %v10020_v47 }
 0x2ac   :  { %v9978_v42 = vpop.xlane.xlu0 %3215 }
 0x2ad   :  { %5024 = vperm.xlu0 %6809, %v4059_v48   ;;  %v4067_v24 = vmul.f32 %v11545_v8, %v9978_v42 }
 0x2ae   :  { %v9980_v34 = vpop.xlane.xlu1 %3212 }
 0x2af   :  { %5597 = vperm.xlu1 %6808, %v4492_v56  }
 0x2b0   :  { %v9986_v4 = vpop.xlane.xlu0 %3221 }
 0x2b1   :  { %5030 = vperm.xlu0 %6809, %v4061_v38   ;;  %v4069_v56 = vmul.f32 %v11549_v17, %v9986_v4  ;;  %v11550_v38 = vld [vmem:[#allocation77_spill] sm:$0xff]  ;;  %v11553_v17 = vld [vmem:[#allocation88_spill] sm:$0xff] }
 0x2b2   :  { %v9988_v33 = vpop.xlane.xlu1 %3218  ;;  %v4064_v39 = vmul.f32 %v11550_v38, %v9972_v14  ;;  %v4670_v38 = vsel %vm4627_vm9, %v4669_v43, %v4665_v50 }
 0x2b3   :  { %5027 = vperm.xlu1 %6808, %v4060_v2   ;;  %v4626_v2 = vrot.slane %v9938_v3, %v10012_v10  ;;  %v4675_v43 = vsel %vm4634_vm10, %v4674_v54, %v4670_v38 }
 0x2b5   :  { %5036 = vperm.xlu0 %6809, %v4063_v22   ;;  %v9995_v45 = vpop.xlane.xlu0 %3227  ;;  %v4628_v5 = vsel %vm4627_vm9, %v4626_v2, %v4621_v13  ;;  %v4688_v13 = vrot.slane %v9978_v42, %v10012_v10 }
 0x2b6   :  { %v9997_v9 = vpop.xlane.xlu1 %3224  ;;  %v4071_v27 = vmul.f32 %v11551_v29, %v9995_v45  ;;  %v4635_v8 = vsel %vm4634_vm10, %v4633_v28, %v4628_v5 }
 0x2b7   :  { %5603 = vperm.xlu1 %6808, %v4494_v0   ;;  %v4650_v0 = vrot.slane %v9950_v40, %v10012_v10 }
 0x2b9   :  { %5042 = vperm.xlu0 %6809, %v4065_v35   ;;  %v10003_v62 = vpop.xlane.xlu0 %3233  ;;  %v10043_v35 = vsub.s32 %v4636_v41, %v11547_v25 }
 0x2ba   :  { %v10005_v21 = vpop.xlane.xlu1 %3230 }
 0x2bb   :  { %5033 = vperm.xlu1 %6808, %v4062_v18   ;;  %v4498_v18 = vmul.f32 %v11552_v32, %v9972_v14  ;;  %v4660_v25 = vrot.slane %v9956_v51, %v10043_v35  ;;  %v4679_v55 = vrot.slane %v9970_v6, %v10043_v35  ;;  %v4684_v32 = vrot.slane %v9980_v34, %v10015_v57 }
 0x2bd   :  { %5048 = vperm.xlu0 %6809, %v4067_v24   ;;  %v10017_v31 = vpop.xlane.xlu0 %3239  ;;  %v4655_v24 = vrot.slane %v9954_v61, %v10020_v47  ;;  %v4640_v61 = vrot.slane %v9940_v1, %v10043_v35  ;;  %v4689_v54 = vsel %vm4627_vm9, %v4688_v13, %v4684_v32  ;;  %v11558_v32 = vld [vmem:[#allocation95_spill] sm:$0xff] }
 0x2be   :  { %v10022_v48 = vpop.xlane.xlu1 %3236 }
 0x2bf   :  { %5609 = vperm.xlu1 %6808, %v4496_v63   ;;  %v4651_v63 = vsel %vm4627_vm9, %v4650_v0, %v4646_v49  ;;  %v4642_v14 = vsel %vm4641_vm11, %v4640_v61, %v4635_v8  ;;  %v4707_v0 = vrot.slane %v9995_v45, %v10012_v10  ;;  %v4680_v8 = vsel %vm4641_vm11, %v4679_v55, %v4675_v43 }
 0x2c0   :  { %v4656_v28 = vsel %vm4634_vm10, %v4655_v24, %v4651_v63  ;;  %v11556_v24 = vld [vmem:[#allocation175_spill] sm:$0xff]  ;;  %v4703_v63 = vrot.slane %v9997_v9, %v10015_v57 }
 0x2c1   :  { %5054 = vperm.xlu0 %6809, %v4069_v56   ;;  %v10032_v22 = vpop.xlane.xlu0 %3245  ;;  %v4073_v56 = vmul.f32 %v11553_v17, %v10003_v62  ;;  %v4500_v50 = vmul.f32 %v11556_v24, %v9980_v34  ;;  %v4693_v17 = vrot.slane %v9988_v33, %v10020_v47 }
 0x2c2   :  { %v4708_v55 = vsel %vm4627_vm9, %v4707_v0, %v4703_v63 }
 0x2c3   :  { %5039 = vperm.xlu1 %6808, %v4064_v39   ;;  %v10040_v16 = vpop.xlane.xlu1 %3242  ;;  %v11554_v39 = vld [vmem:[#allocation79_spill] sm:$0xff] }
 0x2c4   :  { %v4066_v2 = vmul.f32 %v11554_v39, %v9980_v34  ;;  %v11557_v34 = vld [vmem:[#allocation81_spill] sm:$0xff]  ;;  %v4712_v39 = vrot.slane %v10005_v21, %v10020_v47  ;;  %v4731_v43 = vrot.slane %v10040_v16, %v10020_v47 }
 0x2c5   :  { %5060 = vperm.xlu0 %6809, %v4071_v27   ;;  %v10052_v19 = vpop.xlane.xlu0 %3251  ;;  %v4661_v27 = vsel %vm4641_vm11, %v4660_v25, %v4656_v28  ;;  %v4726_v25 = vrot.slane %v10017_v31, %v10012_v10  ;;  %v4068_v38 = vmul.f32 %v11557_v34, %v9988_v33  ;;  %v4717_v28 = vrot.slane %v10003_v62, %v10043_v35 }
 0x2c6   :  { %v4745_v61 = vrot.slane %v10052_v19, %v10012_v10  ;;  %v4928_v11 = vsel %vm3655_vm1, %v4661_v27, %v4642_v14  ;;  %v4713_v30 = vsel %vm4634_vm10, %v4712_v39, %v4708_v55  ;;  %v11559_v14 = vld [vmem:[#allocation177_spill] sm:$0xff] }
 0x2c7   :  { %5615 = vperm.xlu1 %6808, %v4498_v18   ;;  %v10066_v41 = vpop.xlane.xlu1 %3248  ;;  %v11555_v18 = vld [vmem:[#allocation91_spill] sm:$0xff]  ;;  %v4502_v27 = vmul.f32 %v11559_v14, %v9988_v33  ;;  %v11565_v14 = vld [vmem:[#allocation102_spill] sm:$0xff] }
 0x2c8   :  { %v4075_v5 = vmul.f32 %v11555_v18, %v10017_v31  ;;  %v4077_v18 = vmul.f32 %v11558_v32, %v10032_v22  ;;  %v4741_v0 = vrot.slane %v10066_v41, %v10015_v57  ;;  %v4694_v32 = vsel %vm4634_vm10, %v4693_v17, %v4689_v54 }
 0x2c9   :  { %5066 = vperm.xlu0 %6809, %v4073_v56   ;;  %v4698_v56 = vrot.slane %v9986_v4, %v10043_v35  ;;  %v4718_v54 = vsel %vm4641_vm11, %v4717_v28, %v4713_v30 }
 0x2ca   :  { %v10081_v29 = vpop.xlane.xlu0 %3257  ;;  %v4746_v46 = vsel %vm4627_vm9, %v4745_v61, %v4741_v0  ;;  %v11560_v61 = vld [vmem:[#allocation98_spill] sm:$0xff] }
 0x2cb   :  { %5045 = vperm.xlu1 %6808, %v4066_v2   ;;  %v10089_v49 = vpop.xlane.xlu1 %3254  ;;  %v4722_v2 = vrot.slane %v10022_v48, %v10015_v57  ;;  %v4755_v20 = vrot.slane %v10081_v29, %v10043_v35 }
 0x2cc   :  { %v4750_v63 = vrot.slane %v10089_v49, %v10020_v47 }
 0x2cd   :  { %5072 = vperm.xlu0 %6809, %v4075_v5   ;;  %v4727_v24 = vsel %vm4627_vm9, %v4726_v25, %v4722_v2  ;;  %v4929_v25 = vsel %vm3657_vm2, %v4680_v8, %v4928_v11  ;;  %v4699_v2 = vsel %vm4641_vm11, %v4698_v56, %v4694_v32 }
 0x2ce   :  { %v10112_v13 = vpop.xlane.xlu0 %3263  ;;  %v4732_v17 = vsel %vm4634_vm10, %v4731_v43, %v4727_v24  ;;  %v4751_v8 = vsel %vm4634_vm10, %v4750_v63, %v4746_v46  ;;  %v4930_v30 = vsel %vm3659_vm3, %v4699_v2, %v4929_v25  ;;  %v11564_v63 = vld [vmem:[#allocation83_spill] sm:$0xff] }
 0x2cf   :  { %5621 = vperm.xlu1 %6808, %v4500_v50   ;;  %v10122_v5 = vpop.xlane.xlu1 %3260  ;;  %v4736_v50 = vrot.slane %v10032_v22, %v10043_v35  ;;  %v4764_v34 = vrot.slane %v10112_v13, %v10012_v10  ;;  %v4931_v28 = vsel %vm3661_vm4, %v4718_v54, %v4930_v30 }
 0x2d0   :  { %v4760_v26 = vrot.slane %v10122_v5, %v10015_v57 }
 0x2d1   :  { %5078 = vperm.xlu0 %6809, %v4077_v18   ;;  %v4079_v18 = vmul.f32 %v11560_v61, %v10052_v19  ;;  %v4737_v11 = vsel %vm4641_vm11, %v4736_v50, %v4732_v17  ;;  %v11567_v17 = vld [vmem:[#allocation179_spill] sm:$0xff] }
 0x2d2   :  { %v4765_v56 = vsel %vm4627_vm9, %v4764_v34, %v4760_v26  ;;  %v4932_v46 = vsel %vm3663_vm5, %v4737_v11, %v4931_v28  ;;  %v11562_v26 = vld [vmem:[#allocation100_spill] sm:$0xff]  ;;  %v4070_v34 = vmul.f32 %v11564_v63, %v9997_v9  ;;  %v4504_v61 = vmul.f32 %v11567_v17, %v9997_v9 }
 0x2d3   :  { %5051 = vperm.xlu1 %6808, %v4068_v38   ;;  %v10147_v0 = vpop.xlane.xlu0 %3269  ;;  %v4756_v38 = vsel %vm4641_vm11, %v4755_v20, %v4751_v8  ;;  %v4081_v43 = vmul.f32 %v11562_v26, %v10081_v29  ;;  %v11568_v11 = vld [vmem:[#allocation104_spill] sm:$0xff] }
 0x2d4   :  { %11561 = vst [vmem:[#allocation92_spill] sm:$0xff] %v10147_v0  ;;  %v10152_v55 = vpop.xlane.xlu1 %3266  ;;  %v4774_v33 = vrot.slane %v10147_v0, %v10043_v35  ;;  %v4933_v20 = vsel %vm3665_vm6, %v4756_v38, %v4932_v46  ;;  %v4085_v8 = vmul.f32 %v11568_v11, %v10147_v0  ;;  %v11573_v46 = vld [vmem:[#allocation181_spill] sm:$0xff] }
 0x2d5   :  { %v4769_v39 = vrot.slane %v10152_v55, %v10020_v47  ;;  %5084 = vperm.xlu0 %6809, %v4079_v18   ;;  %v4506_v26 = vmul.f32 %v11573_v46, %v10005_v21 }
 0x2d7   :  { %5627 = vperm.xlu1 %6808, %v4502_v27   ;;  %v4770_v24 = vsel %vm4634_vm10, %v4769_v39, %v4765_v56  ;;  %v10165_v50 = vpop.xlane.xlu0 %3275  ;;  %v4083_v27 = vmul.f32 %v11565_v14, %v10112_v13  ;;  %v11571_v39 = vld [vmem:[#allocation106_spill] sm:$0xff]  ;;  %v11577_v14 = vld [vmem:[#allocation112_spill] sm:$0xff] }
 0x2d8   :  { %11563 = vst [vmem:[#allocation42_spill] sm:$0xff] %v10165_v50  ;;  %v4775_v32 = vsel %vm4641_vm11, %v4774_v33, %v4770_v24  ;;  %v10171_v25 = vpop.xlane.xlu1 %3272  ;;  %v11570_v33 = vld [vmem:[#allocation85_spill] sm:$0xff]  ;;  %v4087_v28 = vmul.f32 %v11571_v39, %v10165_v50  ;;  %v11574_v24 = vld [vmem:[#allocation108_spill] sm:$0xff] }
 0x2d9   :  { %v4934_v2 = vsel %vm3667_vm7, %v4775_v32, %v4933_v20  ;;  %5090 = vperm.xlu0 %6809, %v4081_v43   ;;  %v4072_v30 = vmul.f32 %v11570_v33, %v10005_v21  ;;  %v11578_v21 = vld [vmem:[#allocation183_spill] sm:$0xff] }
 0x2da   :  { %6098 = vst.msk [vmem:[%s11006_s4 + $0x10] sm:$0xff] %vm108_vm0, %v4934_v2  ;;  %v4508_v17 = vmul.f32 %v11578_v21, %v10022_v48  ;;  %v11587_v21 = vld [vmem:[#allocation93_spill] sm:$0xff] }
 0x2db   :  { %5057 = vperm.xlu1 %6808, %v4070_v34   ;;  %v10180_v54 = vpop.xlane.xlu0 %3281  ;;  %v11575_v34 = vld [vmem:[#allocation87_spill] sm:$0xff] }
 0x2dc   :  { %11566 = vst [vmem:[#allocation96_spill] sm:$0xff] %v10180_v54  ;;  %v10184_v18 = vpop.xlane.xlu1 %3278  ;;  %v4089_v63 = vmul.f32 %v11574_v24, %v10180_v54  ;;  %v4074_v20 = vmul.f32 %v11575_v34, %v10022_v48  ;;  %v11583_v48 = vld [vmem:[#allocation119_spill] sm:$0xff]  ;;  %v11584_v24 = vld [vmem:[#allocation185_spill] sm:$0xff]  ;;  %v4793_v59 = vrot.slane %v10180_v54, %v10043_v35 }
 0x2dd   :  { %5096 = vperm.xlu0 %6809, %v4083_v27  }
 0x2df   :  { %5633 = vperm.xlu1 %6808, %v4504_v61   ;;  %v10188_v56 = vpop.xlane.xlu0 %3287 }
 0x2e0   :  { %11569 = vst [vmem:[#allocation43_spill] sm:$0xff] %v10188_v56  ;;  %v10192_v38 = vpop.xlane.xlu1 %3284  ;;  %v4091_v27 = vmul.f32 %v11577_v14, %v10188_v56  ;;  %v11586_v14 = vld [vmem:[#allocation122_spill] sm:$0xff] }
 0x2e1   :  { %5102 = vperm.xlu0 %6809, %v4085_v8   ;;  %v11580_v8 = vld [vmem:[#allocation115_spill] sm:$0xff]  ;;  %v4798_v53 = vrot.slane %v10192_v38, %v10015_v57 }
 0x2e3   :  { %5063 = vperm.xlu1 %6808, %v4072_v30   ;;  %v10196_v9 = vpop.xlane.xlu0 %3293  ;;  %v11581_v30 = vld [vmem:[#allocation89_spill] sm:$0xff] }
 0x2e4   :  { %11572 = vst [vmem:[#allocation44_spill] sm:$0xff] %v10196_v9  ;;  %v10200_v43 = vpop.xlane.xlu1 %3290  ;;  %v4093_v33 = vmul.f32 %v11580_v8, %v10196_v9  ;;  %v4076_v39 = vmul.f32 %v11581_v30, %v10040_v16  ;;  %v4812_v58 = vrot.slane %v10196_v9, %v10043_v35 }
 0x2e5   :  { %5108 = vperm.xlu0 %6809, %v4087_v28  }
 0x2e7   :  { %5639 = vperm.xlu1 %6808, %v4506_v26  }
 0x2e8   :  { %v10206_v32 = vpop.xlane.xlu1 %3296  ;;  %v10208_v2 = vpop.xlane.xlu0 %3299 }
 0x2e9   :  { %11576 = vst [vmem:[#allocation45_spill] sm:$0xff] %v10208_v2  ;;  %5114 = vperm.xlu0 %6809, %v4089_v63   ;;  %v4095_v26 = vmul.f32 %v11583_v48, %v10208_v2  ;;  %v4510_v63 = vmul.f32 %v11584_v24, %v10040_v16  ;;  %v11589_v16 = vld [vmem:[#allocation126_spill] sm:$0xff]  ;;  %v4817_v44 = vrot.slane %v10206_v32, %v10015_v57 }
 0x2eb   :  { %5069 = vperm.xlu1 %6808, %v4074_v20  }
 0x2ec   :  { %v10214_v61 = vpop.xlane.xlu0 %3305 }
 0x2ed   :  { %11579 = vst [vmem:[#allocation46_spill] sm:$0xff] %v10214_v61  ;;  %v10216_v11 = vpop.xlane.xlu1 %3302  ;;  %5120 = vperm.xlu0 %6809, %v4091_v27   ;;  %v4097_v27 = vmul.f32 %v11586_v14, %v10214_v61 }
 0x2ef   :  { %5645 = vperm.xlu1 %6808, %v4508_v17   ;;  %v4078_v17 = vmul.f32 %v11587_v21, %v10066_v41  ;;  %v11593_v21 = vld [vmem:[#allocation97_spill] sm:$0xff] }
 0x2f0   :  { %v10222_v28 = vpop.xlane.xlu0 %3311  ;;  %v4080_v12 = vmul.f32 %v11593_v21, %v10089_v49  ;;  %v4821_v21 = vrot.slane %v10208_v2, %v10012_v10  ;;  %v4516_v2 = vmul.f32 %v11600_v23, %v10122_v5 }
 0x2f1   :  { %11582 = vst [vmem:[#allocation47_spill] sm:$0xff] %v10222_v28  ;;  %v10224_v46 = vpop.xlane.xlu1 %3308  ;;  %5126 = vperm.xlu0 %6809, %v4093_v33   ;;  %v4099_v30 = vmul.f32 %v11589_v16, %v10222_v28 }
 0x2f2   :  { %v4822_v60 = vsel %vm4627_vm9, %v4821_v21, %v4817_v44  ;;  %v4840_v21 = vrot.slane %v10222_v28, %v10012_v10 }
 0x2f3   :  { %5075 = vperm.xlu1 %6808, %v4076_v39   ;;  %v11590_v39 = vld [vmem:[#allocation187_spill] sm:$0xff] }
 0x2f4   :  { %v10230_v34 = vpop.xlane.xlu0 %3317  ;;  %v4512_v48 = vmul.f32 %v11590_v39, %v10066_v41  ;;  %v11595_v41 = vld [vmem:[#allocation132_spill] sm:$0xff]  ;;  %v11596_v39 = vld [vmem:[#allocation189_spill] sm:$0xff] }
 0x2f5   :  { %11585 = vst [vmem:[#allocation48_spill] sm:$0xff] %v10230_v34  ;;  %v10232_v20 = vpop.xlane.xlu1 %3314  ;;  %5132 = vperm.xlu0 %6809, %v4095_v26   ;;  %v4514_v37 = vmul.f32 %v11596_v39, %v10089_v49  ;;  %v11598_v49 = vld [vmem:[#allocation135_spill] sm:$0xff] }
 0x2f6   :  { %v11599_v39 = vld [vmem:[#allocation99_spill] sm:$0xff] }
 0x2f7   :  { %5651 = vperm.xlu1 %6808, %v4510_v63   ;;  %v11592_v63 = vld [vmem:[#allocation130_spill] sm:$0xff]  ;;  %v4082_v52 = vmul.f32 %v11599_v39, %v10122_v5  ;;  %v4826_v39 = vrot.slane %v10216_v11, %v10020_v47 }
 0x2f8   :  { %v10238_v8 = vpop.xlane.xlu0 %3323  ;;  %v4101_v14 = vmul.f32 %v11592_v63, %v10230_v34  ;;  %v4802_v63 = vrot.slane %v10188_v56, %v10012_v10  ;;  %v11601_v56 = vld [vmem:[#allocation137_spill] sm:$0xff] }
 0x2f9   :  { %11588 = vst [vmem:[#allocation49_spill] sm:$0xff] %v10238_v8  ;;  %v10240_v33 = vpop.xlane.xlu1 %3320  ;;  %5138 = vperm.xlu0 %6809, %v4097_v27   ;;  %v4103_v16 = vmul.f32 %v11595_v41, %v10238_v8  ;;  %v4827_v5 = vsel %vm4634_vm10, %v4826_v39, %v4822_v60  ;;  %v4845_v60 = vrot.slane %v10232_v20, %v10020_v47 }
 0x2fa   :  { %v4803_v36 = vsel %vm4627_vm9, %v4802_v63, %v4798_v53  ;;  %v11603_v63 = vld [vmem:[#allocation103_spill] sm:$0xff]  ;;  %v4850_v39 = vrot.slane %v10230_v34, %v10043_v35 }
 0x2fb   :  { %5081 = vperm.xlu1 %6808, %v4078_v17   ;;  %v4086_v9 = vmul.f32 %v11603_v63, %v10171_v25 }
 0x2fc   :  { %v10246_v26 = vpop.xlane.xlu0 %3329 }
 0x2fd   :  { %11591 = vst [vmem:[#allocation50_spill] sm:$0xff] %v10246_v26  ;;  %v10248_v24 = vpop.xlane.xlu1 %3326  ;;  %5144 = vperm.xlu0 %6809, %v4099_v30   ;;  %v4105_v41 = vmul.f32 %v11598_v49, %v10246_v26  ;;  %v4807_v49 = vrot.slane %v10200_v43, %v10020_v47 }
 0x2ff   :  { %5657 = vperm.xlu1 %6808, %v4512_v48   ;;  %v4783_v48 = vrot.slane %v10165_v50, %v10012_v10  ;;  %v4808_v23 = vsel %vm4634_vm10, %v4807_v49, %v4803_v36  ;;  %v4855_v36 = vrot.slane %v10240_v33, %v10015_v57 }
 0x300   :  { %v10254_v27 = vpop.xlane.xlu0 %3335 }
 0x301   :  { %11594 = vst [vmem:[#allocation51_spill] sm:$0xff] %v10254_v27  ;;  %v10256_v17 = vpop.xlane.xlu1 %3332  ;;  %5150 = vperm.xlu0 %6809, %v4101_v14   ;;  %v4107_v54 = vmul.f32 %v11601_v56, %v10254_v27  ;;  %v4859_v56 = vrot.slane %v10238_v8, %v10012_v10 }
 0x303   :  { %5087 = vperm.xlu1 %6808, %v4080_v12   ;;  %v4779_v12 = vrot.slane %v10171_v25, %v10015_v57 }
 0x304   :  { %v10262_v30 = vpop.xlane.xlu0 %3341 }
 0x305   :  { %11597 = vst [vmem:[#allocation52_spill] sm:$0xff] %v10262_v30  ;;  %5156 = vperm.xlu0 %6809, %v4103_v16   ;;  %v4788_v16 = vrot.slane %v10184_v18, %v10020_v47 }
 0x307   :  { %v10270_v14 = vpop.xlane.xlu1 %3338  ;;  %5663 = vperm.xlu1 %6808, %v4514_v37   ;;  %v4784_v37 = vsel %vm4627_vm9, %v4783_v48, %v4779_v12  ;;  %v4831_v48 = vrot.slane %v10214_v61, %v10043_v35 }
 0x308   :  { %v10284_v15 = vpop.xlane.xlu0 %3347  ;;  %v4789_v44 = vsel %vm4634_vm10, %v4788_v16, %v4784_v37  ;;  %v4836_v16 = vrot.slane %v10224_v46, %v10015_v57  ;;  %v4878_v37 = vrot.slane %v10254_v27, %v10012_v10  ;;  %v4888_v27 = vrot.slane %v10262_v30, %v10043_v35 }
 0x309   :  { %5162 = vperm.xlu0 %6809, %v4105_v41   ;;  %v11602_v41 = vld [vmem:[#allocation101_spill] sm:$0xff]  ;;  %v4832_v63 = vsel %vm4641_vm11, %v4831_v48, %v4827_v5  ;;  %v4874_v48 = vrot.slane %v10256_v17, %v10015_v57  ;;  %v4869_v5 = vrot.slane %v10246_v26, %v10043_v35  ;;  %v11605_v26 = vld [vmem:[#allocation143_spill] sm:$0xff] }
 0x30a   :  { %v4084_v53 = vmul.f32 %v11602_v41, %v10152_v55  ;;  %v4813_v41 = vsel %vm4641_vm11, %v4812_v58, %v4808_v23  ;;  %v4841_v49 = vsel %vm4627_vm9, %v4840_v21, %v4836_v16  ;;  %v4860_v23 = vsel %vm4627_vm9, %v4859_v56, %v4855_v36 }
 0x30b   :  { %v10299_v12 = vpop.xlane.xlu1 %3344  ;;  %5093 = vperm.xlu1 %6808, %v4082_v52   ;;  %v4794_v52 = vsel %vm4641_vm11, %v4793_v59, %v4789_v44  ;;  %v11604_v59 = vld [vmem:[#allocation140_spill] sm:$0xff]  ;;  %v4879_v16 = vsel %vm4627_vm9, %v4878_v37, %v4874_v48  ;;  %v4846_v36 = vsel %vm4634_vm10, %v4845_v60, %v4841_v49  ;;  %v4111_v50 = vmul.f32 %v11605_v26, %v10284_v15 }
 0x30c   :  { %v10312_v61 = vpop.xlane.xlu0 %3353  ;;  %v4109_v58 = vmul.f32 %v11604_v59, %v10262_v30  ;;  %v4883_v59 = vrot.slane %v10270_v14, %v10020_v47  ;;  %v4893_v21 = vrot.slane %v10299_v12, %v10015_v57  ;;  %v4935_v48 = vsel %vm3655_vm1, %v4813_v41, %v4794_v52 }
 0x30d   :  { %5168 = vperm.xlu0 %6809, %v4107_v54   ;;  %v4897_v54 = vrot.slane %v10284_v15, %v10012_v10  ;;  %v4907_v37 = vrot.slane %v10312_v61, %v10043_v35  ;;  %v4851_v30 = vsel %vm4641_vm11, %v4850_v39, %v4846_v36  ;;  %v4936_v60 = vsel %vm3657_vm2, %v4832_v63, %v4935_v48  ;;  %v11606_v63 = vld [vmem:[#allocation147_spill] sm:$0xff] }
 0x30f   :  { %v10325_v28 = vpop.xlane.xlu1 %3350  ;;  %5669 = vperm.xlu1 %6808, %v4516_v2   ;;  %v4864_v2 = vrot.slane %v10248_v24, %v10020_v47 }
 0x310   :  { %v10342_v44 = vpop.xlane.xlu0 %3359  ;;  %v4902_v8 = vrot.slane %v10325_v28, %v10020_v47 }
 0x311   :  { %5174 = vperm.xlu0 %6809, %v4109_v58   ;;  %v4916_v56 = vrot.slane %v10342_v44, %v10012_v10  ;;  %v4898_v58 = vsel %vm4627_vm9, %v4897_v54, %v4893_v21  ;;  %v4865_v0 = vsel %vm4634_vm10, %v4864_v2, %v4860_v23  ;;  %v4884_v54 = vsel %vm4634_vm10, %v4883_v59, %v4879_v16 }
 0x312   :  { %v4870_v26 = vsel %vm4641_vm11, %v4869_v5, %v4865_v0  ;;  %v4889_v49 = vsel %vm4641_vm11, %v4888_v27, %v4884_v54  ;;  %v4903_v52 = vsel %vm4634_vm10, %v4902_v8, %v4898_v58  ;;  %v4937_v23 = vsel %vm3659_vm3, %v4851_v30, %v4936_v60  ;;  %v11607_v8 = vld [vmem:[#allocation105_spill] sm:$0xff]  ;;  %v11608_v58 = vld [vmem:[#allocation151_spill] sm:$0xff] }
 0x313   :  { %v10356_v34 = vpop.xlane.xlu1 %3356  ;;  %5099 = vperm.xlu1 %6808, %v4084_v53   ;;  %v4113_v0 = vmul.f32 %v11606_v63, %v10312_v61  ;;  %v4908_v5 = vsel %vm4641_vm11, %v4907_v37, %v4903_v52  ;;  %v4088_v27 = vmul.f32 %v11607_v8, %v10184_v18  ;;  %v4938_v59 = vsel %vm3661_vm4, %v4870_v26, %v4937_v23  ;;  %v11613_v63 = vld [vmem:[#allocation158_spill] sm:$0xff] }
 0x314   :  { %v4912_v53 = vrot.slane %v10356_v34, %v10015_v57  ;;  %v10371_v10 = vpop.xlane.xlu0 %3365  ;;  %v4115_v37 = vmul.f32 %v11608_v58, %v10342_v44 }
 0x315   :  { %5180 = vperm.xlu0 %6809, %v4111_v50   ;;  %v4926_v2 = vrot.slane %v10371_v10, %v10043_v35 }
 0x316   :  { %v4917_v41 = vsel %vm4627_vm9, %v4916_v56, %v4912_v53  ;;  %v11609_v53 = vld [vmem:[#allocation107_spill] sm:$0xff] }
 0x317   :  { %v10379_v39 = vpop.xlane.xlu1 %3362  ;;  %5105 = vperm.xlu1 %6808, %v4086_v9   ;;  %v4939_v9 = vsel %vm3663_vm5, %v4889_v49, %v4938_v59  ;;  %v4090_v60 = vmul.f32 %v11609_v53, %v10192_v38  ;;  %v11611_v49 = vld [vmem:[#allocation155_spill] sm:$0xff] }
 0x318   :  { %v4921_v50 = vrot.slane %v10379_v39, %v10020_v47  ;;  %v6118_v21 = vpop.xlane.xlu0 %6117  ;;  %v4940_v30 = vsel %vm3665_vm6, %v4908_v5, %v4939_v9  ;;  %v4117_v52 = vmul.f32 %v11611_v49, %v10371_v10  ;;  %v11614_v5 = vld [vmem:[#allocation114_spill] sm:$0xff]  ;;  %v11616_v59 = vld [vmem:[#allocation163_spill] sm:$0xff]  ;;  %v11617_v9 = vld [vmem:[#allocation116_spill] sm:$0xff] }
 0x319   :  { %6125 = vst.msk [vmem:[%s11007_s5 + $0x10] sm:$0xff] %vm6122_vm8, %v6118_v21  ;;  %5186 = vperm.xlu0 %6809, %v4113_v0   ;;  %v4489_v0 = vmul.f32 %v11613_v63, %v9938_v3  ;;  %v4491_v21 = vmul.f32 %v11616_v59, %v9940_v1  ;;  %v11618_v3 = vld [vmem:[#allocation167_spill] sm:$0xff]  ;;  %v11622_v49 = vld [vmem:[#allocation124_spill] sm:$0xff] }
 0x31a   :  { %v4922_v16 = vsel %vm4634_vm10, %v4921_v50, %v4917_v41  ;;  %v11612_v41 = vld [vmem:[#allocation109_spill] sm:$0xff]  ;;  %v4094_v50 = vmul.f32 %v11614_v5, %v10206_v32  ;;  %v4493_v58 = vmul.f32 %v11618_v3, %v9950_v40  ;;  %v11621_v1 = vld [vmem:[#allocation171_spill] sm:$0xff]  ;;  %v11623_v40 = vld [vmem:[#allocation174_spill] sm:$0xff] }
 0x31b   :  { %v4927_v56 = vsel %vm4641_vm11, %v4926_v2, %v4922_v16  ;;  %v10400_v36 = vpop.permute.xlu1 %5012  ;;  %5111 = vperm.xlu1 %6808, %v4088_v27   ;;  %v4092_v2 = vmul.f32 %v11612_v41, %v10200_v43  ;;  %v4096_v16 = vmul.f32 %v11617_v9, %v10216_v11  ;;  %v4497_v63 = vmul.f32 %v11623_v40, %v9964_v7  ;;  %v11627_v9 = vld [vmem:[#allocation131_spill] sm:$0xff]  ;;  %v11628_v7 = vld [vmem:[#allocation178_spill] sm:$0xff]  ;;  %v11632_v40 = vld [vmem:[#allocation136_spill] sm:$0xff] }
 0x31c   :  { %v4941_v48 = vsel %vm3667_vm7, %v4927_v56, %v4940_v30  ;;  %v6121_v26 = vpop.xlane.xlu0 %6120 }
 0x31d   :  { %6099 = vst.msk [vmem:[%s11006_s4 + $0x18] sm:$0xff] %vm108_vm0, %v4941_v48  ;;  %5192 = vperm.xlu0 %6809, %v4115_v37   ;;  %v11619_v37 = vld [vmem:[#allocation120_spill] sm:$0xff] }
 0x31e   :  { %6126 = vst.msk [vmem:[%s11007_s5 + $0x18] sm:$0xff] %vm6122_vm8, %v6121_v26  ;;  %v4098_v48 = vmul.f32 %v11619_v37, %v10224_v46  ;;  %v4495_v26 = vmul.f32 %v11621_v1, %v9956_v51  ;;  %v11626_v51 = vld [vmem:[#allocation176_spill] sm:$0xff]  ;;  %v4501_v37 = vmul.f32 %v11628_v7, %v9978_v42  ;;  %v11633_v42 = vld [vmem:[#allocation182_spill] sm:$0xff] }
 0x31f   :  { %v10415_v54 = vpop.permute.xlu1 %5585  ;;  %5117 = vperm.xlu1 %6808, %v4090_v60  }
 0x320   :  { %11610 = vst [vmem:[#allocation54_spill] sm:$0xff] %v10415_v54 }
 0x321   :  { %5198 = vperm.xlu0 %6809, %v4117_v52   ;;  %v4100_v52 = vmul.f32 %v11622_v49, %v10232_v20 }
 0x323   :  { %v10421_v23 = vpop.permute.xlu1 %5015  ;;  %5123 = vperm.xlu1 %6808, %v4092_v2  }
 0x324   :  { %v10427_v8 = vpop.permute.xlu0 %5009 }
 0x325   :  { %5588 = vperm.xlu0 %6809, %v4489_v0   ;;  %v11624_v0 = vld [vmem:[#allocation127_spill] sm:$0xff] }
 0x326   :  { %v4102_v5 = vmul.f32 %v11624_v0, %v10240_v33 }
 0x327   :  { %v10429_v27 = vpop.permute.xlu1 %5591  ;;  %5129 = vperm.xlu1 %6808, %v4094_v50  }
 0x328   :  { %11615 = vst [vmem:[#allocation53_spill] sm:$0xff] %v10429_v27  ;;  %v10435_v30 = vpop.permute.xlu0 %5018 }
 0x329   :  { %5594 = vperm.xlu0 %6809, %v4491_v21   ;;  %v4499_v21 = vmul.f32 %v11626_v51, %v9970_v6  ;;  %v11631_v6 = vld [vmem:[#allocation180_spill] sm:$0xff]  ;;  %v4505_v51 = vmul.f32 %v11633_v42, %v9995_v45  ;;  %v11638_v45 = vld [vmem:[#allocation186_spill] sm:$0xff] }
 0x32b   :  { %v10437_v56 = vpop.permute.xlu1 %5021  ;;  %5135 = vperm.xlu1 %6808, %v4096_v16   ;;  %v4104_v16 = vmul.f32 %v11627_v9, %v10248_v24 }
 0x32c   :  { %v10443_v53 = vpop.permute.xlu0 %5024 }
 0x32d   :  { %5600 = vperm.xlu0 %6809, %v4493_v58  }
 0x32f   :  { %v10445_v60 = vpop.permute.xlu1 %5597  ;;  %5141 = vperm.xlu1 %6808, %v4098_v48   ;;  %v11629_v48 = vld [vmem:[#allocation133_spill] sm:$0xff] }
 0x330   :  { %11620 = vst [vmem:[#allocation113_spill] sm:$0xff] %v10445_v60  ;;  %v10451_v41 = vpop.permute.xlu0 %5030  ;;  %v4106_v1 = vmul.f32 %v11629_v48, %v10256_v17  ;;  %v11637_v48 = vld [vmem:[#allocation141_spill] sm:$0xff] }
 0x331   :  { %5606 = vperm.xlu0 %6809, %v4495_v26  }
 0x333   :  { %v10453_v2 = vpop.permute.xlu1 %5027  ;;  %5147 = vperm.xlu1 %6808, %v4100_v52   ;;  %v4503_v52 = vmul.f32 %v11631_v6, %v9986_v4  ;;  %v11636_v4 = vld [vmem:[#allocation184_spill] sm:$0xff] }
 0x334   :  { %v10459_v50 = vpop.permute.xlu0 %5036 }
 0x335   :  { %5612 = vperm.xlu0 %6809, %v4497_v63   ;;  %v4108_v63 = vmul.f32 %v11632_v40, %v10270_v14  ;;  %v4509_v40 = vmul.f32 %v11638_v45, %v10017_v31  ;;  %v11643_v31 = vld [vmem:[#allocation190_spill] sm:$0xff] }
 0x336   :  { %v4513_v45 = vmul.f32 %v11643_v31, %v10052_v19  ;;  %v11648_v19 = vld [vmem:[#allocation194_spill] sm:$0xff]  ;;  %v11649_v31 = vld [vmem:[#allocation197_spill] sm:$0xff] }
 0x337   :  { %v10461_v59 = vpop.permute.xlu1 %5603  ;;  %5153 = vperm.xlu1 %6808, %v4102_v5  }
 0x338   :  { %11625 = vst [vmem:[#allocation111_spill] sm:$0xff] %v10461_v59  ;;  %v10467_v3 = vpop.permute.xlu0 %5042 }
 0x339   :  { %5618 = vperm.xlu0 %6809, %v4499_v21   ;;  %v11634_v21 = vld [vmem:[#allocation138_spill] sm:$0xff] }
 0x33a   :  { %v4110_v9 = vmul.f32 %v11634_v21, %v10299_v12 }
 0x33b   :  { %v10469_v58 = vpop.permute.xlu1 %5033  ;;  %5159 = vperm.xlu1 %6808, %v4104_v16  }
 0x33c   :  { %v10475_v26 = vpop.permute.xlu0 %5048 }
 0x33d   :  { %5624 = vperm.xlu0 %6809, %v4501_v37   ;;  %v4507_v37 = vmul.f32 %v11636_v4, %v10003_v62  ;;  %v11641_v62 = vld [vmem:[#allocation188_spill] sm:$0xff] }
 0x33e   :  { %v11642_v4 = vld [vmem:[#allocation148_spill] sm:$0xff] }
 0x33f   :  { %v10477_v49 = vpop.permute.xlu1 %5609  ;;  %5165 = vperm.xlu1 %6808, %v4106_v1   ;;  %v4112_v1 = vmul.f32 %v11637_v48, %v10325_v28 }
 0x340   :  { %11630 = vst [vmem:[#allocation56_spill] sm:$0xff] %v10477_v49  ;;  %v10483_v0 = vpop.permute.xlu0 %5054 }
 0x341   :  { %5630 = vperm.xlu0 %6809, %v4503_v52  }
 0x343   :  { %v10485_v5 = vpop.permute.xlu1 %5039  ;;  %5171 = vperm.xlu1 %6808, %v4108_v63   ;;  %v11639_v63 = vld [vmem:[#allocation144_spill] sm:$0xff] }
 0x344   :  { %v10491_v16 = vpop.permute.xlu0 %5060  ;;  %v4114_v42 = vmul.f32 %v11639_v63, %v10356_v34 }
 0x345   :  { %5636 = vperm.xlu0 %6809, %v4505_v51  }
 0x347   :  { %v10493_v7 = vpop.permute.xlu1 %5615  ;;  %5177 = vperm.xlu1 %6808, %v4110_v9   ;;  %v4511_v9 = vmul.f32 %v11641_v62, %v10032_v22  ;;  %v11646_v22 = vld [vmem:[#allocation192_spill] sm:$0xff] }
 0x348   :  { %11635 = vst [vmem:[#allocation55_spill] sm:$0xff] %v10493_v7  ;;  %v10499_v6 = vpop.permute.xlu0 %5066  ;;  %v4515_v62 = vmul.f32 %v11646_v22, %v10081_v29  ;;  %v11651_v29 = vld [vmem:[#allocation92_spill] sm:$0xff] }
 0x349   :  { %5642 = vperm.xlu0 %6809, %v4507_v37   ;;  %v4116_v37 = vmul.f32 %v11642_v4, %v10379_v39 }
 0x34b   :  { %v10501_v52 = vpop.permute.xlu1 %5045  ;;  %5183 = vperm.xlu1 %6808, %v4112_v1  }
 0x34c   :  { %v10507_v51 = vpop.permute.xlu0 %5072 }
 0x34d   :  { %5648 = vperm.xlu0 %6809, %v4509_v40   ;;  %v11644_v40 = vld [vmem:[#allocation193_spill] sm:$0xff] }
 0x34e   :  { %v4518_v63 = vmul.f32 %v11644_v40, %v10152_v55  ;;  %v4517_v55 = vmul.f32 %v11648_v19, %v10112_v13  ;;  %v11654_v13 = vld [vmem:[#allocation42_spill] sm:$0xff] }
 0x34f   :  { %v10509_v21 = vpop.permute.xlu1 %5621  ;;  %5189 = vperm.xlu1 %6808, %v4114_v42  }
 0x350   :  { %11640 = vst [vmem:[#allocation117_spill] sm:$0xff] %v10509_v21  ;;  %v10515_v48 = vpop.permute.xlu0 %5078 }
 0x351   :  { %5654 = vperm.xlu0 %6809, %v4511_v9   ;;  %v11647_v9 = vld [vmem:[#allocation195_spill] sm:$0xff] }
 0x352   :  { %v4520_v4 = vmul.f32 %v11647_v9, %v10171_v25  ;;  %v11652_v25 = vld [vmem:[#allocation196_spill] sm:$0xff] }
 0x353   :  { %v10517_v1 = vpop.permute.xlu1 %5051  ;;  %5195 = vperm.xlu1 %6808, %v4116_v37   ;;  %v4519_v22 = vmul.f32 %v11652_v25, %v11651_v29  ;;  %v11658_v29 = vld [vmem:[#allocation96_spill] sm:$0xff] }
 0x354   :  { %v10523_v21 = vpop.permute.xlu0 %5084 }
 0x355   :  { %5660 = vperm.xlu0 %6809, %v4513_v45   ;;  %v4522_v45 = vmul.f32 %v11649_v31, %v10184_v18  ;;  %v11655_v18 = vld [vmem:[#allocation198_spill] sm:$0xff] }
 0x356   :  { %v4521_v19 = vmul.f32 %v11655_v18, %v11654_v13  ;;  %v11661_v13 = vld [vmem:[#allocation43_spill] sm:$0xff] }
 0x357   :  { %v10525_v42 = vpop.permute.xlu1 %5627  ;;  %5675 = vperm.xlu1 %6808, %v4518_v63  }
 0x358   :  { %11645 = vst [vmem:[#allocation57_spill] sm:$0xff] %v10525_v42  ;;  %v10531_v7 = vpop.permute.xlu0 %5090 }
 0x359   :  { %5666 = vperm.xlu0 %6809, %v4515_v62   ;;  %v11653_v62 = vld [vmem:[#allocation199_spill] sm:$0xff] }
 0x35a   :  { %v4524_v9 = vmul.f32 %v11653_v62, %v10192_v38  ;;  %v11659_v38 = vld [vmem:[#allocation200_spill] sm:$0xff] }
 0x35b   :  { %v10533_v37 = vpop.permute.xlu1 %5057  ;;  %5681 = vperm.xlu1 %6808, %v4520_v4   ;;  %v4523_v25 = vmul.f32 %v11659_v38, %v11658_v29  ;;  %v11665_v29 = vld [vmem:[#allocation44_spill] sm:$0xff] }
 0x35c   :  { %v10539_v40 = vpop.permute.xlu0 %5096 }
 0x35d   :  { %5672 = vperm.xlu0 %6809, %v4517_v55   ;;  %v11656_v55 = vld [vmem:[#allocation201_spill] sm:$0xff] }
 0x35e   :  { %v4526_v31 = vmul.f32 %v11656_v55, %v10200_v43  ;;  %v11662_v43 = vld [vmem:[#allocation202_spill] sm:$0xff] }
 0x35f   :  { %v10541_v63 = vpop.permute.xlu1 %5633  ;;  %5687 = vperm.xlu1 %6808, %v4522_v45   ;;  %v4525_v18 = vmul.f32 %v11662_v43, %v11661_v13  ;;  %v11668_v13 = vld [vmem:[#allocation45_spill] sm:$0xff] }
 0x360   :  { %11650 = vst [vmem:[#allocation58_spill] sm:$0xff] %v10541_v63  ;;  %v10547_v42 = vpop.permute.xlu0 %5102 }
 0x361   :  { %5678 = vperm.xlu0 %6809, %v4519_v22   ;;  %v11660_v22 = vld [vmem:[#allocation203_spill] sm:$0xff] }
 0x362   :  { %v4528_v62 = vmul.f32 %v11660_v22, %v10206_v32  ;;  %v11666_v32 = vld [vmem:[#allocation204_spill] sm:$0xff] }
 0x363   :  { %v10549_v4 = vpop.permute.xlu1 %5063  ;;  %5693 = vperm.xlu1 %6808, %v4524_v9   ;;  %v4527_v38 = vmul.f32 %v11666_v32, %v11665_v29  ;;  %v11672_v29 = vld [vmem:[#allocation46_spill] sm:$0xff] }
 0x364   :  { %v10555_v59 = vpop.permute.xlu0 %5108 }
 0x365   :  { %5684 = vperm.xlu0 %6809, %v4521_v19   ;;  %v11663_v19 = vld [vmem:[#allocation205_spill] sm:$0xff] }
 0x366   :  { %v4530_v55 = vmul.f32 %v11663_v19, %v10216_v11  ;;  %v11669_v11 = vld [vmem:[#allocation206_spill] sm:$0xff] }
 0x367   :  { %v10557_v45 = vpop.permute.xlu1 %5639  ;;  %5699 = vperm.xlu1 %6808, %v4526_v31   ;;  %v4529_v43 = vmul.f32 %v11669_v11, %v11668_v13  ;;  %v11675_v13 = vld [vmem:[#allocation47_spill] sm:$0xff] }
 0x368   :  { %11657 = vst [vmem:[#allocation118_spill] sm:$0xff] %v10557_v45  ;;  %v10563_v49 = vpop.permute.xlu0 %5114 }
 0x369   :  { %5690 = vperm.xlu0 %6809, %v4523_v25   ;;  %v11667_v25 = vld [vmem:[#allocation207_spill] sm:$0xff] }
 0x36a   :  { %v4532_v22 = vmul.f32 %v11667_v25, %v10224_v46  ;;  %v11673_v46 = vld [vmem:[#allocation208_spill] sm:$0xff] }
 0x36b   :  { %v10565_v9 = vpop.permute.xlu1 %5069  ;;  %5705 = vperm.xlu1 %6808, %v4528_v62   ;;  %v4531_v32 = vmul.f32 %v11673_v46, %v11672_v29  ;;  %v11679_v29 = vld [vmem:[#allocation48_spill] sm:$0xff] }
 0x36c   :  { %v10571_v27 = vpop.permute.xlu0 %5120 }
 0x36d   :  { %5696 = vperm.xlu0 %6809, %v4525_v18   ;;  %v11670_v18 = vld [vmem:[#allocation209_spill] sm:$0xff] }
 0x36e   :  { %v4534_v19 = vmul.f32 %v11670_v18, %v10232_v20  ;;  %v11676_v20 = vld [vmem:[#allocation210_spill] sm:$0xff] }
 0x36f   :  { %v10573_v31 = vpop.permute.xlu1 %5645  ;;  %5711 = vperm.xlu1 %6808, %v4530_v55   ;;  %v4533_v11 = vmul.f32 %v11676_v20, %v11675_v13  ;;  %v11683_v13 = vld [vmem:[#allocation41_spill] sm:$0xff] }
 0x370   :  { %11664 = vst [vmem:[#allocation59_spill] sm:$0xff] %v10573_v31  ;;  %v10579_v45 = vpop.permute.xlu0 %5126 }
 0x371   :  { %5702 = vperm.xlu0 %6809, %v4527_v38   ;;  %v11674_v38 = vld [vmem:[#allocation211_spill] sm:$0xff] }
 0x372   :  { %v4536_v25 = vmul.f32 %v11674_v38, %v10240_v33  ;;  %v11680_v33 = vld [vmem:[#allocation29_spill] sm:$0xff] }
 0x373   :  { %v10581_v62 = vpop.permute.xlu1 %5075  ;;  %5717 = vperm.xlu1 %6808, %v4532_v22   ;;  %v4535_v46 = vmul.f32 %v11680_v33, %v11679_v29  ;;  %v5226_v29 = vrot.slane %v10443_v53, %v11683_v13  ;;  %v11690_v53 = vld [vmem:[#allocation51_spill] sm:$0xff] }
 0x374   :  { %v10587_v31 = vpop.permute.xlu0 %5132 }
 0x375   :  { %5708 = vperm.xlu0 %6809, %v4529_v43   ;;  %v11677_v43 = vld [vmem:[#allocation26_spill] sm:$0xff] }
 0x376   :  { %v4538_v18 = vmul.f32 %v11677_v43, %v10248_v24  ;;  %v5207_v24 = vrot.slane %v10400_v36, %v11683_v13  ;;  %v11685_v43 = vld [vmem:[#allocation28_spill] sm:$0xff]  ;;  %v11688_v36 = vld [vmem:[#allocation50_spill] sm:$0xff] }
 0x377   :  { %v10589_v55 = vpop.permute.xlu1 %5651  ;;  %5723 = vperm.xlu1 %6808, %v4534_v19  }
 0x378   :  { %11671 = vst [vmem:[#allocation60_spill] sm:$0xff] %v10589_v55  ;;  %v10595_v63 = vpop.permute.xlu0 %5138 }
 0x379   :  { %5714 = vperm.xlu0 %6809, %v4531_v32   ;;  %v11681_v32 = vld [vmem:[#allocation27_spill] sm:$0xff] }
 0x37a   :  { %v4540_v38 = vmul.f32 %v11681_v32, %v10256_v17  ;;  %v11686_v17 = vld [vmem:[#allocation32_spill] sm:$0xff] }
 0x37b   :  { %v10597_v22 = vpop.permute.xlu1 %5081  ;;  %5729 = vperm.xlu1 %6808, %v4536_v25   ;;  %v5203_v25 = vrot.slane %v10427_v8, %v10015_v57  ;;  %v4542_v33 = vmul.f32 %v11686_v17, %v10270_v14  ;;  %v11692_v17 = vld [vmem:[#allocation52_spill] sm:$0xff] }
 0x37c   :  { %v10603_v55 = vpop.permute.xlu0 %5144 }
 0x37d   :  { %5720 = vperm.xlu0 %6809, %v4533_v11   ;;  %v11684_v11 = vld [vmem:[#allocation49_spill] sm:$0xff]  ;;  %v5208_v8 = vsel %vm4627_vm9, %v5207_v24, %v5203_v25  ;;  %v11693_v25 = vld [vmem:[#allocation35_spill] sm:$0xff] }
 0x37e   :  { %v4543_v24 = vmul.f32 %v11693_v25, %v11692_v17 }
 0x37f   :  { %v10605_v19 = vpop.permute.xlu1 %5657  ;;  %5735 = vperm.xlu1 %6808, %v4538_v18   ;;  %v4537_v18 = vmul.f32 %v11685_v43, %v11684_v11  ;;  %v5222_v11 = vrot.slane %v10437_v56, %v10015_v57  ;;  %v11691_v43 = vld [vmem:[#allocation33_spill] sm:$0xff] }
 0x380   :  { %11678 = vst [vmem:[#allocation123_spill] sm:$0xff] %v10605_v19  ;;  %v10613_v60 = vpop.permute.xlu0 %5150  ;;  %v11689_v19 = vld [vmem:[#allocation31_spill] sm:$0xff]  ;;  %v4541_v14 = vmul.f32 %v11691_v43, %v11690_v53  ;;  %v5241_v53 = vrot.slane %v10469_v58, %v10015_v57  ;;  %v11696_v43 = vld [vmem:[#allocation38_spill] sm:$0xff]  ;;  %v5269_v58 = vrot.slane %v10517_v1, %v10020_v47  ;;  %v5283_v1 = vrot.slane %v10491_v16, %v11683_v13 }
 0x381   :  { %11682 = vst [vmem:[#allocation121_spill] sm:$0xff] %v10613_v60  ;;  %5726 = vperm.xlu0 %6809, %v4535_v46   ;;  %v5217_v46 = vrot.slane %v10435_v30, %v10043_v35  ;;  %v4539_v54 = vmul.f32 %v11689_v19, %v11688_v36  ;;  %v11694_v30 = vld [vmem:[#allocation37_spill] sm:$0xff]  ;;  %v4548_v17 = vmul.f32 %v11696_v43, %v10356_v34 }
 0x382   :  { %v4545_v60 = vmul.f32 %v11694_v30, %v10284_v15  ;;  %v5279_v34 = vrot.slane %v10533_v37, %v10015_v57  ;;  %v5317_v37 = vrot.slane %v10597_v22, %v10015_v57  ;;  %v5255_v16 = vrot.slane %v10467_v3, %v10043_v35 }
 0x383   :  { %v10617_v20 = vpop.permute.xlu1 %5087  ;;  %5741 = vperm.xlu1 %6808, %v4540_v38   ;;  %v5212_v38 = vrot.slane %v10421_v23, %v10020_v47  ;;  %v11695_v23 = vld [vmem:[#allocation34_spill] sm:$0xff]  ;;  %v5321_v22 = vrot.slane %v10523_v21, %v11683_v13  ;;  %v5293_v21 = vrot.slane %v10499_v6, %v10043_v35  ;;  %v5331_v6 = vrot.slane %v10531_v7, %v10043_v35 }
 0x384   :  { %v10628_v32 = vpop.permute.xlu0 %5156  ;;  %v4544_v36 = vmul.f32 %v11695_v23, %v10299_v12  ;;  %v5236_v12 = vrot.slane %v10451_v41, %v10043_v35  ;;  %v5298_v41 = vrot.slane %v10565_v9, %v10015_v57  ;;  %v5302_v9 = vrot.slane %v10507_v51, %v11683_v13 }
 0x385   :  { %11687 = vst [vmem:[#allocation61_spill] sm:$0xff] %v10628_v32  ;;  %5732 = vperm.xlu0 %6809, %v4537_v18   ;;  %v5231_v32 = vrot.slane %v10453_v2, %v10020_v47  ;;  %v5213_v56 = vsel %vm4634_vm10, %v5212_v38, %v5208_v8  ;;  %v5227_v18 = vsel %vm4627_vm9, %v5226_v29, %v5222_v11 }
 0x386   :  { %v5218_v15 = vsel %vm4641_vm11, %v5217_v46, %v5213_v56  ;;  %v5250_v2 = vrot.slane %v10485_v5, %v10020_v47  ;;  %v5245_v29 = vrot.slane %v10459_v50, %v11683_v13  ;;  %v5288_v8 = vrot.slane %v10549_v4, %v10020_v47 }
 0x387   :  { %v10644_v19 = vpop.permute.xlu1 %5663  ;;  %5747 = vperm.xlu1 %6808, %v4542_v33   ;;  %v5260_v33 = vrot.slane %v10501_v52, %v10015_v57  ;;  %v5232_v5 = vsel %vm4634_vm10, %v5231_v32, %v5227_v18  ;;  %v5264_v52 = vrot.slane %v10475_v26, %v11683_v13  ;;  %v5284_v38 = vsel %vm4627_vm9, %v5283_v1, %v5279_v34  ;;  %v11697_v34 = vld [vmem:[#allocation36_spill] sm:$0xff] }
 0x388   :  { %v10659_v25 = vpop.permute.xlu0 %5162  ;;  %v5246_v50 = vsel %vm4627_vm9, %v5245_v29, %v5241_v53  ;;  %v5237_v11 = vsel %vm4641_vm11, %v5236_v12, %v5232_v5  ;;  %v5274_v51 = vrot.slane %v10483_v0, %v10043_v35  ;;  %v5303_v30 = vsel %vm4627_vm9, %v5302_v9, %v5298_v41 }
 0x389   :  { %5738 = vperm.xlu0 %6809, %v4539_v54   ;;  %v5307_v54 = vrot.slane %v10581_v62, %v10020_v47  ;;  %v5251_v26 = vsel %vm4634_vm10, %v5250_v2, %v5246_v50  ;;  %v5265_v4 = vsel %vm4627_vm9, %v5264_v52, %v5260_v33  ;;  %v5312_v0 = vrot.slane %v10515_v48, %v10043_v35 }
 0x38a   :  { %v5270_v62 = vsel %vm4634_vm10, %v5269_v58, %v5265_v4  ;;  %v5256_v3 = vsel %vm4641_vm11, %v5255_v16, %v5251_v26  ;;  %v5340_v29 = vrot.slane %v10539_v40, %v11683_v13  ;;  %v4546_v5 = vmul.f32 %v11697_v34, %v10325_v28  ;;  %v11700_v4 = vld [vmem:[#allocation90_spill] sm:$0xff] }
 0x38b   :  { %v5094_v46 = vpop.permute.xlu1 %5093  ;;  %5756 = vperm.xlu1 %6808, %v4545_v60   ;;  %v5326_v60 = vrot.slane %v10617_v20, %v10020_v47  ;;  %v5289_v20 = vsel %vm4634_vm10, %v5288_v8, %v5284_v38  ;;  %v5308_v56 = vsel %vm4634_vm10, %v5307_v54, %v5303_v30  ;;  %v5275_v18 = vsel %vm4641_vm11, %v5274_v51, %v5270_v62 }
 0x38c   :  { %v10689_v32 = vpop.permute.xlu0 %5168  ;;  %v5336_v43 = vrot.slane %v5094_v46, %v10015_v57  ;;  %v5294_v33 = vsel %vm4641_vm11, %v5293_v21, %v5289_v20  ;;  %v5313_v48 = vsel %vm4641_vm11, %v5312_v0, %v5308_v56  ;;  %v5350_v40 = vrot.slane %v10547_v42, %v10043_v35 }
 0x38d   :  { %5744 = vperm.xlu0 %6809, %v4541_v14   ;;  %v5322_v14 = vsel %vm4627_vm9, %v5321_v22, %v5317_v37  ;;  %v4550_v9 = vmul.f32 %v11700_v4, %v10379_v39  ;;  %v5359_v62 = vrot.slane %v10555_v59, %v11683_v13 }
 0x38e   :  { %v5327_v53 = vsel %vm4634_vm10, %v5326_v60, %v5322_v14  ;;  %v5341_v46 = vsel %vm4627_vm9, %v5340_v29, %v5336_v43  ;;  %v5397_v29 = vrot.slane %v10587_v31, %v11683_v13  ;;  %v5416_v31 = vrot.slane %v10603_v55, %v11683_v13  ;;  %v11703_v55 = vld [vmem:[#allocation61_spill] sm:$0xff] }
 0x38f   :  { %v10702_v23 = vpop.permute.xlu1 %5669  ;;  %5750 = vperm.xlu1 %6808, %v4543_v24   ;;  %v5504_v24 = vsel %vm3655_vm1, %v5237_v11, %v5218_v15  ;;  %v5332_v52 = vsel %vm4641_vm11, %v5331_v6, %v5327_v53  ;;  %v5369_v11 = vrot.slane %v10563_v49, %v10043_v35 }
 0x390   :  { %v10714_v2 = vpop.permute.xlu0 %5174  ;;  %v5505_v12 = vsel %vm3657_vm2, %v5256_v3, %v5504_v24 }
 0x391   :  { %5753 = vperm.xlu0 %6809, %v4544_v36   ;;  %v5506_v15 = vsel %vm3659_vm3, %v5275_v18, %v5505_v12  ;;  %v11698_v36 = vld [vmem:[#allocation94_spill] sm:$0xff]  ;;  %v5388_v18 = vrot.slane %v10579_v45, %v10043_v35 }
 0x392   :  { %v4549_v8 = vmul.f32 %v11698_v36, %v10342_v44  ;;  %v5507_v41 = vsel %vm3661_vm4, %v5294_v33, %v5506_v15  ;;  %v11699_v44 = vld [vmem:[#allocation39_spill] sm:$0xff] }
 0x393   :  { %v5100_v58 = vpop.permute.xlu1 %5099  ;;  %5765 = vperm.xlu1 %6808, %v4548_v17   ;;  %v5508_v28 = vsel %vm3663_vm5, %v5313_v48, %v5507_v41  ;;  %v4547_v26 = vmul.f32 %v11699_v44, %v10312_v61  ;;  %v11701_v61 = vld [vmem:[#allocation40_spill] sm:$0xff] }
 0x394   :  { %v5345_v7 = vrot.slane %v5100_v58, %v10020_v47  ;;  %v10735_v17 = vpop.permute.xlu0 %5180  ;;  %v5509_v1 = vsel %vm3665_vm6, %v5332_v52, %v5508_v28  ;;  %v4551_v38 = vmul.f32 %v11701_v61, %v10371_v10  ;;  %v5378_v10 = vrot.slane %v10571_v27, %v11683_v13 }
 0x395   :  { %5759 = vperm.xlu0 %6809, %v4546_v5   ;;  %v5407_v58 = vrot.slane %v10595_v63, %v10043_v35 }
 0x396   :  { %v5346_v50 = vsel %vm4634_vm10, %v5345_v7, %v5341_v46  ;;  %v11702_v46 = vld [vmem:[#allocation121_spill] sm:$0xff] }
 0x397   :  { %v5351_v54 = vsel %vm4641_vm11, %v5350_v40, %v5346_v50  ;;  %v5106_v37 = vpop.permute.xlu1 %5105  ;;  %5768 = vperm.xlu1 %6808, %v4549_v8   ;;  %v5426_v28 = vrot.slane %v11702_v46, %v10043_v35 }
 0x398   :  { %v5510_v42 = vsel %vm3667_vm7, %v5351_v54, %v5509_v1  ;;  %v5355_v60 = vrot.slane %v5106_v37, %v10015_v57  ;;  %v10751_v16 = vpop.permute.xlu0 %5186 }
 0x399   :  { %6102 = vst.msk [vmem:[%s11006_s4 + $0x30] sm:$0xff] %vm108_vm0, %v5510_v42  ;;  %5762 = vperm.xlu0 %6809, %v4547_v26  }
 0x39a   :  { %v5360_v51 = vsel %vm4627_vm9, %v5359_v62, %v5355_v60 }
 0x39b   :  { %v5112_v22 = vpop.permute.xlu1 %5111  ;;  %5771 = vperm.xlu1 %6808, %v4550_v9   ;;  %v5435_v9 = vrot.slane %v11703_v55, %v11683_v13  ;;  %v11713_v55 = vld [vmem:[#allocation57_spill] sm:$0xff] }
 0x39c   :  { %v5364_v39 = vrot.slane %v5112_v22, %v10020_v47  ;;  %v10761_v20 = vpop.permute.xlu0 %5192  ;;  %v5445_v22 = vrot.slane %v10659_v25, %v10043_v35  ;;  %v11704_v25 = vld [vmem:[#allocation54_spill] sm:$0xff] }
 0x39d   :  { %5774 = vperm.xlu0 %6809, %v4551_v38  }
 0x39e   :  { %v5365_v30 = vsel %vm4634_vm10, %v5364_v39, %v5360_v51 }
 0x39f   :  { %v5370_v3 = vsel %vm4641_vm11, %v5369_v11, %v5365_v30  ;;  %v5118_v59 = vpop.permute.xlu1 %5117 }
 0x3a0   :  { %v5374_v21 = vrot.slane %v5118_v59, %v10015_v57  ;;  %v10766_v56 = vpop.permute.xlu0 %5198 }
 0x3a2   :  { %v5379_v0 = vsel %vm4627_vm9, %v5378_v10, %v5374_v21  ;;  %v5454_v21 = vrot.slane %v10689_v32, %v11683_v13 }
 0x3a3   :  { %v5124_v14 = vpop.permute.xlu1 %5123 }
 0x3a4   :  { %v5383_v49 = vrot.slane %v5124_v14, %v10020_v47  ;;  %v10774_v53 = vpop.permute.xlu0 %5588 }
 0x3a6   :  { %v5384_v43 = vsel %vm4634_vm10, %v5383_v49, %v5379_v0  ;;  %v5779_v49 = vrot.slane %v11704_v25, %v10015_v57 }
 0x3a7   :  { %v5389_v24 = vsel %vm4641_vm11, %v5388_v18, %v5384_v43  ;;  %v5130_v6 = vpop.permute.xlu1 %5129  ;;  %v5464_v18 = vrot.slane %v10714_v2, %v10043_v35  ;;  %v5783_v2 = vrot.slane %v10774_v53, %v11683_v13 }
 0x3a8   :  { %v5511_v33 = vsel %vm3655_vm1, %v5389_v24, %v5370_v3  ;;  %v5393_v12 = vrot.slane %v5130_v6, %v10015_v57  ;;  %v10780_v27 = vpop.permute.xlu0 %5594  ;;  %v11705_v6 = vld [vmem:[#allocation113_spill] sm:$0xff] }
 0x3aa   :  { %v5398_v34 = vsel %vm4627_vm9, %v5397_v29, %v5393_v12  ;;  %v11706_v12 = vld [vmem:[#allocation58_spill] sm:$0xff] }
 0x3ab   :  { %v5136_v48 = vpop.permute.xlu1 %5135  ;;  %v5855_v32 = vrot.slane %v11706_v12, %v10015_v57 }
 0x3ac   :  { %v5402_v45 = vrot.slane %v5136_v48, %v10020_v47  ;;  %v5601_v5 = vpop.permute.xlu0 %5600 }
 0x3ad   :  { %v5802_v0 = vrot.slane %v5601_v5, %v11683_v13 }
 0x3ae   :  { %v5403_v15 = vsel %vm4634_vm10, %v5402_v45, %v5398_v34  ;;  %v11707_v45 = vld [vmem:[#allocation118_spill] sm:$0xff] }
 0x3af   :  { %v5408_v52 = vsel %vm4641_vm11, %v5407_v58, %v5403_v15  ;;  %v5142_v7 = vpop.permute.xlu1 %5141  ;;  %v5864_v58 = vrot.slane %v11707_v45, %v10020_v47 }
 0x3b0   :  { %v5512_v36 = vsel %vm3657_vm2, %v5408_v52, %v5511_v33  ;;  %v5412_v8 = vrot.slane %v5142_v7, %v10015_v57  ;;  %v10792_v41 = vpop.permute.xlu0 %5606  ;;  %v5798_v33 = vrot.slane %v11705_v6, %v10015_v57  ;;  %v11708_v52 = vld [vmem:[#allocation53_spill] sm:$0xff] }
 0x3b1   :  { %v5788_v7 = vrot.slane %v11708_v52, %v10020_v47  ;;  %v5812_v53 = vrot.slane %v10792_v41, %v10043_v35  ;;  %v5793_v41 = vrot.slane %v10780_v27, %v10043_v35 }
 0x3b2   :  { %v5417_v50 = vsel %vm4627_vm9, %v5416_v31, %v5412_v8  ;;  %v5803_v46 = vsel %vm4627_vm9, %v5802_v0, %v5798_v33 }
 0x3b3   :  { %v5148_v40 = vpop.permute.xlu1 %5147 }
 0x3b4   :  { %v5421_v63 = vrot.slane %v5148_v40, %v10020_v47  ;;  %v5613_v1 = vpop.permute.xlu0 %5612  ;;  %v11709_v40 = vld [vmem:[#allocation56_spill] sm:$0xff] }
 0x3b5   :  { %v5821_v34 = vrot.slane %v5613_v1, %v11683_v13  ;;  %v11710_v1 = vld [vmem:[#allocation111_spill] sm:$0xff] }
 0x3b6   :  { %v5422_v54 = vsel %vm4634_vm10, %v5421_v63, %v5417_v50  ;;  %v5817_v63 = vrot.slane %v11709_v40, %v10015_v57 }
 0x3b7   :  { %v5427_v37 = vsel %vm4641_vm11, %v5426_v28, %v5422_v54  ;;  %v5154_v44 = vpop.permute.xlu1 %5153  ;;  %v5807_v54 = vrot.slane %v11710_v1, %v10020_v47 }
 0x3b8   :  { %v5513_v26 = vsel %vm3659_vm3, %v5427_v37, %v5512_v36  ;;  %v5431_v42 = vrot.slane %v5154_v44, %v10015_v57  ;;  %v10804_v4 = vpop.permute.xlu0 %5618  ;;  %v11711_v37 = vld [vmem:[#allocation55_spill] sm:$0xff] }
 0x3b9   :  { %v5826_v44 = vrot.slane %v11711_v37, %v10020_v47 }
 0x3ba   :  { %v5436_v61 = vsel %vm4627_vm9, %v5435_v9, %v5431_v42  ;;  %v5845_v9 = vrot.slane %v11713_v55, %v10020_v47 }
 0x3bb   :  { %v5160_v60 = vpop.permute.xlu1 %5159 }
 0x3bc   :  { %v5440_v62 = vrot.slane %v5160_v60, %v10020_v47  ;;  %v5625_v38 = vpop.permute.xlu0 %5624  ;;  %v5784_v60 = vsel %vm4627_vm9, %v5783_v2, %v5779_v49 }
 0x3bd   :  { %v5840_v36 = vrot.slane %v5625_v38, %v11683_v13  ;;  %v5808_v38 = vsel %vm4634_vm10, %v5807_v54, %v5803_v46  ;;  %v5789_v25 = vsel %vm4634_vm10, %v5788_v7, %v5784_v60  ;;  %v5492_v7 = vrot.slane %v10761_v20, %v11683_v13  ;;  %v11716_v20 = vld [vmem:[#allocation123_spill] sm:$0xff] }
 0x3be   :  { %v5441_v39 = vsel %vm4634_vm10, %v5440_v62, %v5436_v61  ;;  %v5822_v62 = vsel %vm4627_vm9, %v5821_v34, %v5817_v63  ;;  %v5893_v54 = vrot.slane %v11716_v20, %v10015_v57 }
 0x3bf   :  { %v5446_v11 = vsel %vm4641_vm11, %v5445_v22, %v5441_v39  ;;  %v5166_v51 = vpop.permute.xlu1 %5165  ;;  %v5831_v22 = vrot.slane %v10804_v4, %v10043_v35  ;;  %v5473_v4 = vrot.slane %v10735_v17, %v11683_v13  ;;  %v5827_v49 = vsel %vm4634_vm10, %v5826_v44, %v5822_v62 }
 0x3c0   :  { %v5514_v30 = vsel %vm3661_vm4, %v5446_v11, %v5513_v26  ;;  %v5450_v3 = vrot.slane %v5166_v51, %v10015_v57  ;;  %v5631_v59 = vpop.permute.xlu0 %5630  ;;  %v11712_v26 = vld [vmem:[#allocation117_spill] sm:$0xff] }
 0x3c1   :  { %v5836_v42 = vrot.slane %v11712_v26, %v10015_v57  ;;  %v5850_v11 = vrot.slane %v5631_v59, %v10043_v35  ;;  %v5902_v26 = vrot.slane %v10644_v19, %v10020_v47 }
 0x3c2   :  { %v5455_v43 = vsel %vm4627_vm9, %v5454_v21, %v5450_v3  ;;  %v5813_v21 = vsel %vm4641_vm11, %v5812_v53, %v5808_v38 }
 0x3c3   :  { %v5172_v10 = vpop.permute.xlu1 %5171  ;;  %v5841_v39 = vsel %vm4627_vm9, %v5840_v36, %v5836_v42 }
 0x3c4   :  { %v5459_v14 = vrot.slane %v5172_v10, %v10020_v47  ;;  %v5637_v24 = vpop.permute.xlu0 %5636  ;;  %v5846_v6 = vsel %vm4634_vm10, %v5845_v9, %v5841_v39  ;;  %v5912_v39 = vrot.slane %v10702_v23, %v10015_v57 }
 0x3c5   :  { %v5859_v48 = vrot.slane %v5637_v24, %v11683_v13  ;;  %v5832_v24 = vsel %vm4641_vm11, %v5831_v22, %v5827_v49  ;;  %v5851_v17 = vsel %vm4641_vm11, %v5850_v11, %v5846_v6 }
 0x3c6   :  { %v5460_v29 = vsel %vm4634_vm10, %v5459_v14, %v5455_v43  ;;  %v5794_v43 = vsel %vm4641_vm11, %v5793_v41, %v5789_v25 }
 0x3c7   :  { %v5465_v5 = vsel %vm4641_vm11, %v5464_v18, %v5460_v29  ;;  %v5178_v15 = vpop.permute.xlu1 %5177  ;;  %v5860_v31 = vsel %vm4627_vm9, %v5859_v48, %v5855_v32  ;;  %v11715_v18 = vld [vmem:[#allocation60_spill] sm:$0xff]  ;;  %v6080_v12 = vsel %vm3655_vm1, %v5813_v21, %v5794_v43 }
 0x3c8   :  { %v5515_v8 = vsel %vm3663_vm5, %v5465_v5, %v5514_v30  ;;  %v5643_v28 = vpop.permute.xlu0 %5642  ;;  %v5865_v50 = vsel %vm4634_vm10, %v5864_v58, %v5860_v31  ;;  %v5469_v51 = vrot.slane %v5178_v15, %v10015_v57  ;;  %v11714_v30 = vld [vmem:[#allocation59_spill] sm:$0xff]  ;;  %v5883_v0 = vrot.slane %v11715_v18, %v10020_v47 }
 0x3c9   :  { %v5874_v3 = vrot.slane %v11714_v30, %v10015_v57  ;;  %v5869_v10 = vrot.slane %v5643_v28, %v10043_v35  ;;  %v5483_v5 = vrot.slane %v10751_v16, %v10043_v35  ;;  %v6081_v15 = vsel %vm3657_vm2, %v5832_v24, %v6080_v12 }
 0x3ca   :  { %v5474_v32 = vsel %vm4627_vm9, %v5473_v4, %v5469_v51  ;;  %v6082_v36 = vsel %vm3659_vm3, %v5851_v17, %v6081_v15  ;;  %v5502_v16 = vrot.slane %v10766_v56, %v10043_v35 }
 0x3cb   :  { %v5184_v61 = vpop.permute.xlu1 %5183  ;;  %v5870_v45 = vsel %vm4641_vm11, %v5869_v10, %v5865_v50 }
 0x3cc   :  { %v5478_v27 = vrot.slane %v5184_v61, %v10020_v47  ;;  %v5649_v14 = vpop.permute.xlu0 %5648  ;;  %v6083_v63 = vsel %vm3661_vm4, %v5870_v45, %v6082_v36 }
 0x3cd   :  { %v5878_v59 = vrot.slane %v5649_v14, %v11683_v13 }
 0x3ce   :  { %v5479_v48 = vsel %vm4634_vm10, %v5478_v27, %v5474_v32 }
 0x3cf   :  { %v5190_v33 = vpop.permute.xlu1 %5189  ;;  %v5879_v29 = vsel %vm4627_vm9, %v5878_v59, %v5874_v3  ;;  %v5484_v40 = vsel %vm4641_vm11, %v5483_v5, %v5479_v48 }
 0x3d0   :  { %v5488_v58 = vrot.slane %v5190_v33, %v10015_v57  ;;  %v5655_v2 = vpop.permute.xlu0 %5654  ;;  %v5884_v34 = vsel %vm4634_vm10, %v5883_v0, %v5879_v29  ;;  %v5516_v42 = vsel %vm3665_vm6, %v5484_v40, %v5515_v8 }
 0x3d1   :  { %v5888_v52 = vrot.slane %v5655_v2, %v10043_v35 }
 0x3d2   :  { %v5493_v28 = vsel %vm4627_vm9, %v5492_v7, %v5488_v58 }
 0x3d3   :  { %v5196_v31 = vpop.permute.xlu1 %5195  ;;  %v5889_v53 = vsel %vm4641_vm11, %v5888_v52, %v5884_v34 }
 0x3d4   :  { %v5497_v46 = vrot.slane %v5196_v31, %v10020_v47  ;;  %v6084_v50 = vsel %vm3663_vm5, %v5889_v53, %v6083_v63  ;;  %v5661_v1 = vpop.permute.xlu0 %5660 }
 0x3d5   :  { %v5897_v44 = vrot.slane %v5661_v1, %v11683_v13 }
 0x3d6   :  { %v5498_v37 = vsel %vm4634_vm10, %v5497_v46, %v5493_v28 }
 0x3d7   :  { %v5503_v55 = vsel %vm4641_vm11, %v5502_v16, %v5498_v37  ;;  %v5676_v56 = vpop.permute.xlu1 %5675  ;;  %v5898_v60 = vsel %vm4627_vm9, %v5897_v44, %v5893_v54 }
 0x3d8   :  { %v5517_v9 = vsel %vm3667_vm7, %v5503_v55, %v5516_v42  ;;  %v5667_v41 = vpop.permute.xlu0 %5666  ;;  %v5903_v62 = vsel %vm4634_vm10, %v5902_v26, %v5898_v60  ;;  %v5921_v3 = vrot.slane %v5676_v56, %v10020_v47 }
 0x3d9   :  { %6103 = vst.msk [vmem:[%s11006_s4 + $0x38] sm:$0xff] %vm108_vm0, %v5517_v9  ;;  %v5907_v22 = vrot.slane %v5667_v41, %v10043_v35 }
 0x3db   :  { %v5682_v19 = vpop.permute.xlu1 %5681  ;;  %v5908_v8 = vsel %vm4641_vm11, %v5907_v22, %v5903_v62 }
 0x3dc   :  { %v6085_v61 = vsel %vm3665_vm6, %v5908_v8, %v6084_v50  ;;  %v5673_v38 = vpop.permute.xlu0 %5672  ;;  %v5931_v36 = vrot.slane %v5682_v19, %v10015_v57 }
 0x3dd   :  { %v5916_v11 = vrot.slane %v5673_v38, %v11683_v13 }
 0x3df   :  { %v5688_v51 = vpop.permute.xlu1 %5687  ;;  %v5917_v30 = vsel %vm4627_vm9, %v5916_v11, %v5912_v39 }
 0x3e0   :  { %v5679_v21 = vpop.permute.xlu0 %5678  ;;  %v5922_v14 = vsel %vm4634_vm10, %v5921_v3, %v5917_v30  ;;  %v5940_v28 = vrot.slane %v5688_v51, %v10020_v47 }
 0x3e1   :  { %v5926_v27 = vrot.slane %v5679_v21, %v10043_v35 }
 0x3e3   :  { %v5694_v10 = vpop.permute.xlu1 %5693  ;;  %v5927_v4 = vsel %vm4641_vm11, %v5926_v27, %v5922_v14 }
 0x3e4   :  { %v6086_v25 = vsel %vm3667_vm7, %v5927_v4, %v6085_v61  ;;  %v5685_v49 = vpop.permute.xlu0 %5684  ;;  %v5950_v46 = vrot.slane %v5694_v10, %v10015_v57 }
 0x3e5   :  { %6104 = vst.msk [vmem:[%s11006_s4 + $0x40] sm:$0xff] %vm108_vm0, %v6086_v25  ;;  %v5935_v52 = vrot.slane %v5685_v49, %v11683_v13 }
 0x3e7   :  { %v5700_v23 = vpop.permute.xlu1 %5699  ;;  %v5936_v53 = vsel %vm4627_vm9, %v5935_v52, %v5931_v36 }
 0x3e8   :  { %v5691_v59 = vpop.permute.xlu0 %5690  ;;  %v5959_v54 = vrot.slane %v5700_v23, %v10020_v47  ;;  %v5941_v42 = vsel %vm4634_vm10, %v5940_v28, %v5936_v53 }
 0x3e9   :  { %v5945_v16 = vrot.slane %v5691_v59, %v10043_v35 }
 0x3eb   :  { %v5706_v18 = vpop.permute.xlu1 %5705  ;;  %v5946_v41 = vsel %vm4641_vm11, %v5945_v16, %v5941_v42 }
 0x3ec   :  { %v5697_v0 = vpop.permute.xlu0 %5696  ;;  %v5969_v50 = vrot.slane %v5706_v18, %v10015_v57 }
 0x3ed   :  { %v5954_v31 = vrot.slane %v5697_v0, %v11683_v13 }
 0x3ef   :  { %v5712_v43 = vpop.permute.xlu1 %5711  ;;  %v5955_v37 = vsel %vm4627_vm9, %v5954_v31, %v5950_v46 }
 0x3f0   :  { %v5703_v24 = vpop.permute.xlu0 %5702  ;;  %v5978_v62 = vrot.slane %v5712_v43, %v10020_v47  ;;  %v5960_v8 = vsel %vm4634_vm10, %v5959_v54, %v5955_v37 }
 0x3f1   :  { %v5964_v44 = vrot.slane %v5703_v24, %v10043_v35 }
 0x3f3   :  { %v5718_v6 = vpop.permute.xlu1 %5717  ;;  %v5965_v51 = vsel %vm4641_vm11, %v5964_v44, %v5960_v8 }
 0x3f4   :  { %v5709_v33 = vpop.permute.xlu0 %5708  ;;  %v5988_v55 = vrot.slane %v5718_v6, %v10015_v57  ;;  %v6087_v0 = vsel %vm3655_vm1, %v5965_v51, %v5946_v41 }
 0x3f5   :  { %v5973_v40 = vrot.slane %v5709_v33, %v11683_v13 }
 0x3f7   :  { %v5724_v12 = vpop.permute.xlu1 %5723  ;;  %v5974_v56 = vsel %vm4627_vm9, %v5973_v40, %v5969_v50 }
 0x3f8   :  { %v5715_v17 = vpop.permute.xlu0 %5714  ;;  %v5997_v30 = vrot.slane %v5724_v12, %v10020_v47  ;;  %v5979_v3 = vsel %vm4634_vm10, %v5978_v62, %v5974_v56 }
 0x3f9   :  { %v5983_v22 = vrot.slane %v5715_v17, %v10043_v35 }
 0x3fb   :  { %v5730_v32 = vpop.permute.xlu1 %5729  ;;  %v5984_v49 = vsel %vm4641_vm11, %v5983_v22, %v5979_v3 }
 0x3fc   :  { %v5721_v29 = vpop.permute.xlu0 %5720  ;;  %v6007_v61 = vrot.slane %v5730_v32, %v10015_v57 }
 0x3fd   :  { %v5992_v1 = vrot.slane %v5721_v29, %v11683_v13 }
 0x3ff   :  { %v5736_v48 = vpop.permute.xlu1 %5735  ;;  %v5993_v38 = vsel %vm4627_vm9, %v5992_v1, %v5988_v55 }
 0x400   :  { %v5727_v45 = vpop.permute.xlu0 %5726  ;;  %v6016_v23 = vrot.slane %v5736_v48, %v10020_v47  ;;  %v5998_v59 = vsel %vm4634_vm10, %v5997_v30, %v5993_v38  ;;  %v6088_v48 = vsel %vm3657_vm2, %v5984_v49, %v6087_v0 }
 0x401   :  { %v6002_v39 = vrot.slane %v5727_v45, %v10043_v35 }
 0x403   :  { %v5742_v58 = vpop.permute.xlu1 %5741  ;;  %v6003_v43 = vsel %vm4641_vm11, %v6002_v39, %v5998_v59 }
 0x404   :  { %v5733_v2 = vpop.permute.xlu0 %5732  ;;  %v6026_v19 = vrot.slane %v5742_v58, %v10015_v57 }
 0x405   :  { %v6011_v9 = vrot.slane %v5733_v2, %v11683_v13 }
 0x407   :  { %v5748_v34 = vpop.permute.xlu1 %5747  ;;  %v6012_v10 = vsel %vm4627_vm9, %v6011_v9, %v6007_v61 }
 0x408   :  { %v5739_v5 = vpop.permute.xlu0 %5738  ;;  %v6035_v27 = vrot.slane %v5748_v34, %v10020_v47  ;;  %v6017_v12 = vsel %vm4634_vm10, %v6016_v23, %v6012_v10 }
 0x409   :  { %v6021_v14 = vrot.slane %v5739_v5, %v10043_v35 }
 0x40b   :  { %v5757_v15 = vpop.permute.xlu1 %5756  ;;  %v6022_v45 = vsel %vm4641_vm11, %v6021_v14, %v6017_v12 }
 0x40c   :  { %v5745_v7 = vpop.permute.xlu0 %5744  ;;  %v6049_v24 = vrot.slane %v5757_v15, %v11683_v13 }
 0x40d   :  { %v6030_v26 = vrot.slane %v5745_v7, %v11683_v13  ;;  %v6089_v7 = vsel %vm3659_vm3, %v6003_v43, %v6088_v48 }
 0x40e   :  { %v6090_v31 = vsel %vm3661_vm4, %v6022_v45, %v6089_v7 }
 0x40f   :  { %v5751_v63 = vpop.permute.xlu1 %5750  ;;  %v6031_v21 = vsel %vm4627_vm9, %v6030_v26, %v6026_v19 }
 0x410   :  { %v5754_v20 = vpop.permute.xlu0 %5753  ;;  %v6036_v6 = vsel %vm4634_vm10, %v6035_v27, %v6031_v21  ;;  %v6040_v17 = vrot.slane %v5751_v63, %v10043_v35 }
 0x411   :  { %v6045_v4 = vrot.slane %v5754_v20, %v10015_v57 }
 0x412   :  { %v6041_v34 = vsel %vm4641_vm11, %v6040_v17, %v6036_v6 }
 0x413   :  { %v5766_v60 = vpop.permute.xlu1 %5765  ;;  %v6050_v58 = vsel %vm4627_vm9, %v6049_v24, %v6045_v4  ;;  %v6091_v53 = vsel %vm3663_vm5, %v6041_v34, %v6090_v31 }
 0x414   :  { %v5760_v11 = vpop.permute.xlu0 %5759  ;;  %v6064_v5 = vrot.slane %v5766_v60, %v10015_v57 }
 0x415   :  { %v6054_v18 = vrot.slane %v5760_v11, %v10020_v47 }
 0x417   :  { %v5769_v25 = vpop.permute.xlu1 %5768  ;;  %v6055_v15 = vsel %vm4634_vm10, %v6054_v18, %v6050_v58 }
 0x418   :  { %v5763_v33 = vpop.permute.xlu0 %5762  ;;  %v6068_v32 = vrot.slane %v5769_v25, %v11683_v13 }
 0x419   :  { %v6059_v29 = vrot.slane %v5763_v33, %v10043_v35 }
 0x41a   :  { %v6069_v40 = vsel %vm4627_vm9, %v6068_v32, %v6064_v5 }
 0x41b   :  { %v5772_v2 = vpop.permute.xlu1 %5771  ;;  %v6060_v13 = vsel %vm4641_vm11, %v6059_v29, %v6055_v15 }
 0x41c   :  { %v6073_v52 = vrot.slane %v5772_v2, %v10020_v47  ;;  %v5775_v36 = vpop.permute.xlu0 %5774  ;;  %v6092_v57 = vsel %vm3665_vm6, %v6060_v13, %v6091_v53 }
 0x41d   :  { %v6078_v63 = vrot.slane %v5775_v36, %v10043_v35 }
 0x41e   :  { %v6074_v46 = vsel %vm4634_vm10, %v6073_v52, %v6069_v40 }
 0x41f   :  { %v6079_v16 = vsel %vm4641_vm11, %v6078_v63, %v6074_v46 }
 0x420   :  { %v6093_v47 = vsel %vm3667_vm7, %v6079_v16, %v6092_v57 }
 0x421   :  { %6105 = vst.msk [vmem:[%s11006_s4 + $0x48] sm:$0xff] %vm108_vm0, %v6093_v47 }

</bundles_post_ra>
